<compile_context>
chip_gen: v6e
topology: v6e:2x2x1
jax: 0.10.0
libtpu: 0.0.40
codegen_flags: <defaults>
</compile_context>

<pallas_src>
import functools
import math

import jax
import jax.numpy as jnp
from jax import lax
from jax.experimental import pallas as pl
from jax.experimental.pallas import tpu as pltpu


_TILE = 512                           # feature-dim padding unit (K and N)
_MAX_WBLOCK_BYTES = 8 * 1024 * 1024   # per weight block; x2 buffers = 16 MiB (v7x safe)
_VMEM_LIMIT_BYTES = 32 * 1024 * 1024


def _round_up(n, m):
    return ((n + m - 1) // m) * m


# ----------------------------- fused kernel ----------------------------------
def _fused_mlp_kernel(x_ref, w_hbm, b_ref, o_ref,
                      act_a, act_b, wbuf, sem,
                      *, layers, tk, tn, n_classes, total_blocks):
    """Single-call fused MLP.

    x_ref : (M, Kp0) f32 in VMEM (input, zero-padded features)
    w_hbm : (TOTAL_BLOCKS, tk, tn) bf16 in HBM — all layers' weights, pre-blocked,
            ordered layer-major, then output strip j, then K chunk k.
    b_ref : (1, sum Np) f32 in VMEM — all (padded) biases concatenated.
    o_ref : (M, n_classes) f32 output.
    act_a/act_b : (M, max_dim) f32 VMEM ping-pong activation buffers.
    wbuf  : (2, tk, tn) bf16 VMEM weight double buffer.
    sem   : DMA semaphores, one per buffer slot.
    """
    m = x_ref.shape[0]

    def start(g):    # issue DMA of flat weight block g into slot g % 2
        pltpu.make_async_copy(w_hbm.at[g], wbuf.at[g % 2], sem.at[g % 2]).start()

    def wait(g):
        pltpu.make_async_copy(w_hbm.at[g], wbuf.at[g % 2], sem.at[g % 2]).wait()

    def matmul_strip(src, meta, j):
        """f32 (m, tn) = src @ W[:, strip j] + bias[strip j] for one layer."""
        acc = jnp.zeros((m, tn), jnp.float32)
        for k in range(meta["nk"]):                 # nk is a small Python int
            g = meta["block_off"] + j * meta["nk"] + k
            wait(g)
            if g + 1 < total_blocks:
                start(g + 1)                        # prefetch next block (maybe next layer)
            xk = src[:, k * tk:(k + 1) * tk].astype(jnp.bfloat16)
            acc = acc + jnp.dot(xk, wbuf[g % 2],
                                preferred_element_type=jnp.float32)
        boff = meta["bias_off"]
        return acc + b_ref[:, boff + j * tn: boff + (j + 1) * tn]

    # Prime the weight stream.
    start(0)

    src = x_ref
    bufs = (act_a, act_b)
    # Hidden layers: Linear + bias + ReLU; activations stay resident in VMEM.
    for li, meta in enumerate(layers[:-1]):
        dst = bufs[li % 2]
        for j in range(meta["nj"]):
            out = matmul_strip(src, meta, j)
            dst[:, j * tn:(j + 1) * tn] = jnp.maximum(out, 0.0)
        src = dst

    # Final layer: Linear + bias, then the fused DOUBLE softmax over real classes.
    meta = layers[-1]
    logits = matmul_strip(src, meta, 0)             # nj == 1 (padded classes <= tn)
    col = lax.broadcasted_iota(jnp.int32, (m, tn), 1)
    pad_mask = col >= n_classes
    neg = jnp.float32(-1e30)

    def _softmax(v):
        v = jnp.where(pad_mask, neg, v)             # mask padded columns BEFORE each softmax
        mx = jnp.max(v, axis=1, keepdims=True)
        e = jnp.exp(v - mx)
        return e / jnp.sum(e, axis=1, keepdims=True)   # exact reciprocal (tolerance-critical)

    probs = _softmax(_softmax(logits))
    o_ref[...] = probs[:, :n_classes]


# ----------------------------- parameter packing -----------------------------
def prepare_fused_params(params):
    """params: list of (w (K, N) f32, b (N,) f32) in layer order.

    Pads every feature dim to a multiple of 512 (exact — see header), casts the
    weights once to bf16 and pre-blocks them into one contiguous HBM array of
    (tk, tn) tiles so every in-kernel DMA is a single contiguous transfer.
    """
    tile = _TILE
    kps = [_round_up(w.shape[0], tile) for w, _ in params]
    nps = [_round_up(w.shape[1], tile) for w, _ in params]

    tn = tile
    g = 0
    for kp in kps:
        g = math.gcd(g, kp)
    # Largest multiple-of-tile divisor of gcd(Kp) whose bf16 block fits the cap.
    units = g // tile
    tk = tile
    for d in range(1, units + 1):
        if units % d == 0 and tile * d * tn * 2 <= _MAX_WBLOCK_BYTES:
            tk = max(tk, tile * d)

    w_blocks, b_parts, metas = [], [], []
    block_off = 0
    bias_off = 0
    for (w, b), kp, npad in zip(params, kps, nps):
        K, N = w.shape
        nk, nj = kp // tk, npad // tn
        wp = jnp.pad(w.astype(jnp.bfloat16), ((0, kp - K), (0, npad - N)))
        # (kp, npad) -> (nj*nk, tk, tn), contiguous per block, ordered j-major then k.
        wb = wp.reshape(nk, tk, nj, tn).transpose(2, 0, 1, 3).reshape(nj * nk, tk, tn)
        w_blocks.append(wb)
        b_parts.append(jnp.pad(b.astype(jnp.float32), (0, npad - N)))
        metas.append(dict(kp=kp, npad=npad, nk=nk, nj=nj,
                          block_off=block_off, bias_off=bias_off))
        block_off += nj * nk
        bias_off += npad

    assert metas[-1]["nj"] == 1, "padded num_classes must fit a single tn strip"

    return dict(
        w_all=jnp.concatenate(w_blocks, axis=0),
        b_all=jnp.concatenate(b_parts, axis=0).reshape(1, -1),
        metas=tuple(metas), tk=tk, tn=tn, total_blocks=block_off,
        max_dim=max(kps + nps),
        in_features=params[0][0].shape[0],
        n_classes=params[-1][0].shape[1],
    )


# ----------------------------- model forward ---------------------------------
def mlp_forward(x, fused):
    M = x.shape[0]
    kp0 = fused["metas"][0]["kp"]
    x_pad = jnp.pad(x, ((0, 0), (0, kp0 - x.shape[1])))   # zero-pad input features (exact)

    metas = fused["metas"]
    n_classes = fused["n_classes"]
    w_all, b_all = fused["w_all"], fused["b_all"]

    kernel = functools.partial(
        _fused_mlp_kernel,
        layers=metas, tk=fused["tk"], tn=fused["tn"],
        n_classes=n_classes, total_blocks=fused["total_blocks"])

    cost = pl.CostEstimate(
        flops=2 * M * sum(mt["kp"] * mt["npad"] for mt in metas),
        transcendentals=2 * M * metas[-1]["npad"],
        bytes_accessed=int(w_all.size) * 2 + int(b_all.size) * 4
                       + int(x_pad.size) * 4 + M * n_classes * 4)

    return pl.pallas_call(
        kernel,
        out_shape=jax.ShapeDtypeStruct((M, n_classes), jnp.float32),
        in_specs=[
            pl.BlockSpec(memory_space=pltpu.MemorySpace.VMEM),   # x (resident)
            pl.BlockSpec(memory_space=pl.ANY),                   # pre-blocked weights (HBM)
            pl.BlockSpec(memory_space=pltpu.MemorySpace.VMEM),   # biases (resident)
        ],
        out_specs=pl.BlockSpec(memory_space=pltpu.MemorySpace.VMEM),
        scratch_shapes=[
            pltpu.VMEM((M, fused["max_dim"]), jnp.float32),      # activation ping
            pltpu.VMEM((M, fused["max_dim"]), jnp.float32),      # activation pong
            pltpu.VMEM((2, fused["tk"], fused["tn"]), jnp.bfloat16),  # weight double buffer
            pltpu.SemaphoreType.DMA((2,)),
        ],
        compiler_params=pltpu.CompilerParams(vmem_limit_bytes=_VMEM_LIMIT_BYTES),
        cost_estimate=cost,
    )(x_pad, w_all, b_all)


# ----------------------------- reference (same bf16 weight storage) ----------
def reference(x, params):
    h = x
    for i, (w, b) in enumerate(params):
        h = jnp.dot(h.astype(jnp.bfloat16), w.astype(jnp.bfloat16),
                    preferred_element_type=jnp.float32) + b
        if i < len(params) - 1:
            h = jax.nn.relu(h)
    h = jax.nn.softmax(h, axis=1)       # nn.Softmax(dim=1) in fc_layers
    return jax.nn.softmax(h, axis=1)    # F.softmax(..., dim=1) in forward


def init_linear(kw, kb, fan_in, fan_out):
    # PyTorch nn.Linear default: U(-1/sqrt(fan_in), 1/sqrt(fan_in)) for W and b.
    bound = 1.0 / (fan_in ** 0.5)
    w = jax.random.uniform(kw, (fan_in, fan_out), jnp.float32, -bound, bound)
    b = jax.random.uniform(kb, (fan_out,), jnp.float32, -bound, bound)
    return w, b


if __name__ == "__main__":
    # Small-scale stand-ins for the real dims (3501 -> 7000 -> 7000 -> 3500 -> 230),
    # deliberately NOT multiples of 128/512 so padding, masking and the split-K
    # (nk=2) accumulation paths are all exercised.
    BATCH, D_IN, H, FC, NUM_CLASSES = 4, 351, 700, 350, 230

    key = jax.random.PRNGKey(0)
    ks = jax.random.split(key, 9)

    params = [
        init_linear(ks[1], ks[2], D_IN, H),
        init_linear(ks[3], ks[4], H, H),
        init_linear(ks[5], ks[6], H, FC),
        init_linear(ks[7], ks[8], FC, NUM_CLASSES),
    ]
    x = jax.random.normal(ks[0], (BATCH, D_IN), jnp.float32)

    fused = prepare_fused_params(params)
    out = jax.block_until_ready(mlp_forward(x, fused))
    ref = jax.block_until_ready(reference(x, params))

    assert out.shape == (BATCH, NUM_CLASSES)
    assert bool(jnp.all(jnp.isfinite(out)))
    assert jnp.allclose(jnp.sum(out, axis=1), 1.0, atol=1e-4)   # softmax rows sum to 1
    assert float(jnp.max(jnp.abs(out - ref))) < 1e-4

    print("KERNEL_OK")
</pallas_src>

<mosaic_0001>
module attributes {stable_mosaic.version = 11 : i64} {
  func.func @_fused_mlp_kernel(%arg0: memref<4x512xf32, #tpu.memory_space<vmem>>, %arg1: memref<9x512x512xbf16, #tpu.memory_space<any>>, %arg2: memref<1x3072xf32, #tpu.memory_space<vmem>>, %arg3: memref<4x230xf32, #tpu.memory_space<vmem>>, %arg4: memref<4x1024xf32, #tpu.memory_space<vmem>>, %arg5: memref<4x1024xf32, #tpu.memory_space<vmem>>, %arg6: memref<2x512x512xbf16, #tpu.memory_space<vmem>>, %arg7: memref<2x!tpu.dma_semaphore, #tpu.memory_space<semaphore_mem>>) attributes {dimension_semantics = [], scalar_prefetch = 0 : i64, scratch_operands = 4 : i64, tpu.core_type = #tpu.core_type<tc>} {
    %c0_i32 = arith.constant 0 : i32
    %c0_i32_0 = arith.constant 0 : i32
    %c0_i32_1 = arith.constant 0 : i32
    %c0_i32_2 = arith.constant 0 : i32
    %c0_i32_3 = arith.constant 0 : i32
    %0 = tpu.memref_slice %arg1[%c0_i32, %c0_i32_2, %c0_i32_3] : memref<9x512x512xbf16, #tpu.memory_space<any>> -> memref<1x512x512xbf16, #tpu.memory_space<any>>
    %1 = tpu.memref_squeeze %0 : memref<1x512x512xbf16, #tpu.memory_space<any>> -> memref<512x512xbf16, #tpu.memory_space<any>>
    %c0_i32_4 = arith.constant 0 : i32
    %c0_i32_5 = arith.constant 0 : i32
    %2 = tpu.memref_slice %arg6[%c0_i32_0, %c0_i32_4, %c0_i32_5] : memref<2x512x512xbf16, #tpu.memory_space<vmem>> -> memref<1x512x512xbf16, #tpu.memory_space<vmem>>
    %3 = tpu.memref_squeeze %2 : memref<1x512x512xbf16, #tpu.memory_space<vmem>> -> memref<512x512xbf16, #tpu.memory_space<vmem>>
    %4 = tpu.memref_slice %arg7[%c0_i32_1] : memref<2x!tpu.dma_semaphore, #tpu.memory_space<semaphore_mem>> -> memref<1x!tpu.dma_semaphore, #tpu.memory_space<semaphore_mem>>
    %5 = tpu.memref_squeeze %4 : memref<1x!tpu.dma_semaphore, #tpu.memory_space<semaphore_mem>> -> memref<!tpu.dma_semaphore, #tpu.memory_space<semaphore_mem>>
    tpu.enqueue_dma source(%1 : memref<512x512xbf16, #tpu.memory_space<any>>) target(%3 : memref<512x512xbf16, #tpu.memory_space<vmem>>) target_semaphore(%5 : memref<!tpu.dma_semaphore, #tpu.memory_space<semaphore_mem>>)
    %cst = arith.constant 0.000000e+00 : f32
    %6 = vector.broadcast %cst : f32 to vector<4x512xf32>
    %c0_i32_6 = arith.constant 0 : i32
    %c0_i32_7 = arith.constant 0 : i32
    %c0_i32_8 = arith.constant 0 : i32
    %c0_i32_9 = arith.constant 0 : i32
    %c0_i32_10 = arith.constant 0 : i32
    %7 = tpu.memref_slice %arg1[%c0_i32_6, %c0_i32_9, %c0_i32_10] : memref<9x512x512xbf16, #tpu.memory_space<any>> -> memref<1x512x512xbf16, #tpu.memory_space<any>>
    %8 = tpu.memref_squeeze %7 : memref<1x512x512xbf16, #tpu.memory_space<any>> -> memref<512x512xbf16, #tpu.memory_space<any>>
    %c0_i32_11 = arith.constant 0 : i32
    %c0_i32_12 = arith.constant 0 : i32
    %9 = tpu.memref_slice %arg6[%c0_i32_7, %c0_i32_11, %c0_i32_12] : memref<2x512x512xbf16, #tpu.memory_space<vmem>> -> memref<1x512x512xbf16, #tpu.memory_space<vmem>>
    %10 = tpu.memref_squeeze %9 : memref<1x512x512xbf16, #tpu.memory_space<vmem>> -> memref<512x512xbf16, #tpu.memory_space<vmem>>
    %11 = tpu.memref_slice %arg7[%c0_i32_8] : memref<2x!tpu.dma_semaphore, #tpu.memory_space<semaphore_mem>> -> memref<1x!tpu.dma_semaphore, #tpu.memory_space<semaphore_mem>>
    %12 = tpu.memref_squeeze %11 : memref<1x!tpu.dma_semaphore, #tpu.memory_space<semaphore_mem>> -> memref<!tpu.dma_semaphore, #tpu.memory_space<semaphore_mem>>
    tpu.wait_dma2 semaphore(%12 : memref<!tpu.dma_semaphore, #tpu.memory_space<semaphore_mem>>) src(%8 : memref<512x512xbf16, #tpu.memory_space<any>>) dst(%10 : memref<512x512xbf16, #tpu.memory_space<vmem>>)
    %c1_i32 = arith.constant 1 : i32
    %c1_i32_13 = arith.constant 1 : i32
    %c1_i32_14 = arith.constant 1 : i32
    %c0_i32_15 = arith.constant 0 : i32
    %c0_i32_16 = arith.constant 0 : i32
    %13 = tpu.memref_slice %arg1[%c1_i32, %c0_i32_15, %c0_i32_16] : memref<9x512x512xbf16, #tpu.memory_space<any>> -> memref<1x512x512xbf16, #tpu.memory_space<any>>
    %14 = tpu.memref_squeeze %13 : memref<1x512x512xbf16, #tpu.memory_space<any>> -> memref<512x512xbf16, #tpu.memory_space<any>>
    %c0_i32_17 = arith.constant 0 : i32
    %c0_i32_18 = arith.constant 0 : i32
    %15 = tpu.memref_slice %arg6[%c1_i32_13, %c0_i32_17, %c0_i32_18] : memref<2x512x512xbf16, #tpu.memory_space<vmem>> -> memref<1x512x512xbf16, #tpu.memory_space<vmem>>
    %16 = tpu.memref_squeeze %15 : memref<1x512x512xbf16, #tpu.memory_space<vmem>> -> memref<512x512xbf16, #tpu.memory_space<vmem>>
    %17 = tpu.memref_slice %arg7[%c1_i32_14] : memref<2x!tpu.dma_semaphore, #tpu.memory_space<semaphore_mem>> -> memref<1x!tpu.dma_semaphore, #tpu.memory_space<semaphore_mem>>
    %18 = tpu.memref_squeeze %17 : memref<1x!tpu.dma_semaphore, #tpu.memory_space<semaphore_mem>> -> memref<!tpu.dma_semaphore, #tpu.memory_space<semaphore_mem>>
    tpu.enqueue_dma source(%14 : memref<512x512xbf16, #tpu.memory_space<any>>) target(%16 : memref<512x512xbf16, #tpu.memory_space<vmem>>) target_semaphore(%18 : memref<!tpu.dma_semaphore, #tpu.memory_space<semaphore_mem>>)
    %c0 = arith.constant 0 : index
    %c0_19 = arith.constant 0 : index
    %19 = vector.load %arg0[%c0, %c0_19] : memref<4x512xf32, #tpu.memory_space<vmem>>, vector<4x512xf32>
    %20 = arith.truncf %19 : vector<4x512xf32> to vector<4x512xbf16>
    %c0_20 = arith.constant 0 : index
    %c0_21 = arith.constant 0 : index
    %c0_22 = arith.constant 0 : index
    %21 = vector.load %arg6[%c0_20, %c0_21, %c0_22] : memref<2x512x512xbf16, #tpu.memory_space<vmem>>, vector<1x512x512xbf16>
    %22 = vector.shape_cast %21 : vector<1x512x512xbf16> to vector<512x512xbf16>
    %cst_23 = arith.constant dense<0.000000e+00> : vector<4x512xf32>
    %23 = tpu.matmul %20, %22, %cst_23 {dimension_numbers = #tpu.dot_dimension_numbers<[1], [0], [0], [1], [0, 0, 1, 1], [], []>} : vector<4x512xbf16>, vector<512x512xbf16>, vector<4x512xf32> -> vector<4x512xf32>
    %24 = arith.addf %6, %23 : vector<4x512xf32>
    %c0_24 = arith.constant 0 : index
    %c0_25 = arith.constant 0 : index
    %25 = vector.load %arg2[%c0_24, %c0_25] : memref<1x3072xf32, #tpu.memory_space<vmem>>, vector<1x512xf32>
    %26 = vector.broadcast %25 : vector<1x512xf32> to vector<4x512xf32>
    %27 = arith.addf %24, %26 : vector<4x512xf32>
    %cst_26 = arith.constant 0.000000e+00 : f32
    %28 = vector.broadcast %cst_26 : f32 to vector<4x512xf32>
    %29 = arith.maximumf %27, %28 : vector<4x512xf32>
    %c0_27 = arith.constant 0 : index
    %c0_28 = arith.constant 0 : index
    %30 = vector.load %arg4[%c0_27, %c0_28] : memref<4x1024xf32, #tpu.memory_space<vmem>>, vector<4x512xf32>
    tpu.vector_store %arg4[%c0_27, %c0_28], %29 {strides = array<i32>} : memref<4x1024xf32, #tpu.memory_space<vmem>>, vector<4x512xf32>,
    %cst_29 = arith.constant 0.000000e+00 : f32
    %31 = vector.broadcast %cst_29 : f32 to vector<4x512xf32>
    %c1_i32_30 = arith.constant 1 : i32
    %c1_i32_31 = arith.constant 1 : i32
    %c1_i32_32 = arith.constant 1 : i32
    %c0_i32_33 = arith.constant 0 : i32
    %c0_i32_34 = arith.constant 0 : i32
    %32 = tpu.memref_slice %arg1[%c1_i32_30, %c0_i32_33, %c0_i32_34] : memref<9x512x512xbf16, #tpu.memory_space<any>> -> memref<1x512x512xbf16, #tpu.memory_space<any>>
    %33 = tpu.memref_squeeze %32 : memref<1x512x512xbf16, #tpu.memory_space<any>> -> memref<512x512xbf16, #tpu.memory_space<any>>
    %c0_i32_35 = arith.constant 0 : i32
    %c0_i32_36 = arith.constant 0 : i32
    %34 = tpu.memref_slice %arg6[%c1_i32_31, %c0_i32_35, %c0_i32_36] : memref<2x512x512xbf16, #tpu.memory_space<vmem>> -> memref<1x512x512xbf16, #tpu.memory_space<vmem>>
    %35 = tpu.memref_squeeze %34 : memref<1x512x512xbf16, #tpu.memory_space<vmem>> -> memref<512x512xbf16, #tpu.memory_space<vmem>>
    %36 = tpu.memref_slice %arg7[%c1_i32_32] : memref<2x!tpu.dma_semaphore, #tpu.memory_space<semaphore_mem>> -> memref<1x!tpu.dma_semaphore, #tpu.memory_space<semaphore_mem>>
    %37 = tpu.memref_squeeze %36 : memref<1x!tpu.dma_semaphore, #tpu.memory_space<semaphore_mem>> -> memref<!tpu.dma_semaphore, #tpu.memory_space<semaphore_mem>>
    tpu.wait_dma2 semaphore(%37 : memref<!tpu.dma_semaphore, #tpu.memory_space<semaphore_mem>>) src(%33 : memref<512x512xbf16, #tpu.memory_space<any>>) dst(%35 : memref<512x512xbf16, #tpu.memory_space<vmem>>)
    %c2_i32 = arith.constant 2 : i32
    %c0_i32_37 = arith.constant 0 : i32
    %c0_i32_38 = arith.constant 0 : i32
    %c0_i32_39 = arith.constant 0 : i32
    %c0_i32_40 = arith.constant 0 : i32
    %38 = tpu.memref_slice %arg1[%c2_i32, %c0_i32_39, %c0_i32_40] : memref<9x512x512xbf16, #tpu.memory_space<any>> -> memref<1x512x512xbf16, #tpu.memory_space<any>>
    %39 = tpu.memref_squeeze %38 : memref<1x512x512xbf16, #tpu.memory_space<any>> -> memref<512x512xbf16, #tpu.memory_space<any>>
    %c0_i32_41 = arith.constant 0 : i32
    %c0_i32_42 = arith.constant 0 : i32
    %40 = tpu.memref_slice %arg6[%c0_i32_37, %c0_i32_41, %c0_i32_42] : memref<2x512x512xbf16, #tpu.memory_space<vmem>> -> memref<1x512x512xbf16, #tpu.memory_space<vmem>>
    %41 = tpu.memref_squeeze %40 : memref<1x512x512xbf16, #tpu.memory_space<vmem>> -> memref<512x512xbf16, #tpu.memory_space<vmem>>
    %42 = tpu.memref_slice %arg7[%c0_i32_38] : memref<2x!tpu.dma_semaphore, #tpu.memory_space<semaphore_mem>> -> memref<1x!tpu.dma_semaphore, #tpu.memory_space<semaphore_mem>>
    %43 = tpu.memref_squeeze %42 : memref<1x!tpu.dma_semaphore, #tpu.memory_space<semaphore_mem>> -> memref<!tpu.dma_semaphore, #tpu.memory_space<semaphore_mem>>
    tpu.enqueue_dma source(%39 : memref<512x512xbf16, #tpu.memory_space<any>>) target(%41 : memref<512x512xbf16, #tpu.memory_space<vmem>>) target_semaphore(%43 : memref<!tpu.dma_semaphore, #tpu.memory_space<semaphore_mem>>)
    %c0_43 = arith.constant 0 : index
    %c0_44 = arith.constant 0 : index
    %44 = vector.load %arg0[%c0_43, %c0_44] : memref<4x512xf32, #tpu.memory_space<vmem>>, vector<4x512xf32>
    %45 = arith.truncf %44 : vector<4x512xf32> to vector<4x512xbf16>
    %c1 = arith.constant 1 : index
    %c0_45 = arith.constant 0 : index
    %c0_46 = arith.constant 0 : index
    %46 = vector.load %arg6[%c1, %c0_45, %c0_46] : memref<2x512x512xbf16, #tpu.memory_space<vmem>>, vector<1x512x512xbf16>
    %47 = vector.shape_cast %46 : vector<1x512x512xbf16> to vector<512x512xbf16>
    %cst_47 = arith.constant dense<0.000000e+00> : vector<4x512xf32>
    %48 = tpu.matmul %45, %47, %cst_47 {dimension_numbers = #tpu.dot_dimension_numbers<[1], [0], [0], [1], [0, 0, 1, 1], [], []>} : vector<4x512xbf16>, vector<512x512xbf16>, vector<4x512xf32> -> vector<4x512xf32>
    %49 = arith.addf %31, %48 : vector<4x512xf32>
    %c0_48 = arith.constant 0 : index
    %c512 = arith.constant 512 : index
    %50 = vector.load %arg2[%c0_48, %c512] : memref<1x3072xf32, #tpu.memory_space<vmem>>, vector<1x512xf32>
    %51 = vector.broadcast %50 : vector<1x512xf32> to vector<4x512xf32>
    %52 = arith.addf %49, %51 : vector<4x512xf32>
    %cst_49 = arith.constant 0.000000e+00 : f32
    %53 = vector.broadcast %cst_49 : f32 to vector<4x512xf32>
    %54 = arith.maximumf %52, %53 : vector<4x512xf32>
    %c0_50 = arith.constant 0 : index
    %c512_51 = arith.constant 512 : index
    %55 = vector.load %arg4[%c0_50, %c512_51] : memref<4x1024xf32, #tpu.memory_space<vmem>>, vector<4x512xf32>
    tpu.vector_store %arg4[%c0_50, %c512_51], %54 {strides = array<i32>} : memref<4x1024xf32, #tpu.memory_space<vmem>>, vector<4x512xf32>,
    %cst_52 = arith.constant 0.000000e+00 : f32
    %56 = vector.broadcast %cst_52 : f32 to vector<4x512xf32>
    %c2_i32_53 = arith.constant 2 : i32
    %c0_i32_54 = arith.constant 0 : i32
    %c0_i32_55 = arith.constant 0 : i32
    %c0_i32_56 = arith.constant 0 : i32
    %c0_i32_57 = arith.constant 0 : i32
    %57 = tpu.memref_slice %arg1[%c2_i32_53, %c0_i32_56, %c0_i32_57] : memref<9x512x512xbf16, #tpu.memory_space<any>> -> memref<1x512x512xbf16, #tpu.memory_space<any>>
    %58 = tpu.memref_squeeze %57 : memref<1x512x512xbf16, #tpu.memory_space<any>> -> memref<512x512xbf16, #tpu.memory_space<any>>
    %c0_i32_58 = arith.constant 0 : i32
    %c0_i32_59 = arith.constant 0 : i32
    %59 = tpu.memref_slice %arg6[%c0_i32_54, %c0_i32_58, %c0_i32_59] : memref<2x512x512xbf16, #tpu.memory_space<vmem>> -> memref<1x512x512xbf16, #tpu.memory_space<vmem>>
    %60 = tpu.memref_squeeze %59 : memref<1x512x512xbf16, #tpu.memory_space<vmem>> -> memref<512x512xbf16, #tpu.memory_space<vmem>>
    %61 = tpu.memref_slice %arg7[%c0_i32_55] : memref<2x!tpu.dma_semaphore, #tpu.memory_space<semaphore_mem>> -> memref<1x!tpu.dma_semaphore, #tpu.memory_space<semaphore_mem>>
    %62 = tpu.memref_squeeze %61 : memref<1x!tpu.dma_semaphore, #tpu.memory_space<semaphore_mem>> -> memref<!tpu.dma_semaphore, #tpu.memory_space<semaphore_mem>>
    tpu.wait_dma2 semaphore(%62 : memref<!tpu.dma_semaphore, #tpu.memory_space<semaphore_mem>>) src(%58 : memref<512x512xbf16, #tpu.memory_space<any>>) dst(%60 : memref<512x512xbf16, #tpu.memory_space<vmem>>)
    %c3_i32 = arith.constant 3 : i32
    %c1_i32_60 = arith.constant 1 : i32
    %c1_i32_61 = arith.constant 1 : i32
    %c0_i32_62 = arith.constant 0 : i32
    %c0_i32_63 = arith.constant 0 : i32
    %63 = tpu.memref_slice %arg1[%c3_i32, %c0_i32_62, %c0_i32_63] : memref<9x512x512xbf16, #tpu.memory_space<any>> -> memref<1x512x512xbf16, #tpu.memory_space<any>>
    %64 = tpu.memref_squeeze %63 : memref<1x512x512xbf16, #tpu.memory_space<any>> -> memref<512x512xbf16, #tpu.memory_space<any>>
    %c0_i32_64 = arith.constant 0 : i32
    %c0_i32_65 = arith.constant 0 : i32
    %65 = tpu.memref_slice %arg6[%c1_i32_60, %c0_i32_64, %c0_i32_65] : memref<2x512x512xbf16, #tpu.memory_space<vmem>> -> memref<1x512x512xbf16, #tpu.memory_space<vmem>>
    %66 = tpu.memref_squeeze %65 : memref<1x512x512xbf16, #tpu.memory_space<vmem>> -> memref<512x512xbf16, #tpu.memory_space<vmem>>
    %67 = tpu.memref_slice %arg7[%c1_i32_61] : memref<2x!tpu.dma_semaphore, #tpu.memory_space<semaphore_mem>> -> memref<1x!tpu.dma_semaphore, #tpu.memory_space<semaphore_mem>>
    %68 = tpu.memref_squeeze %67 : memref<1x!tpu.dma_semaphore, #tpu.memory_space<semaphore_mem>> -> memref<!tpu.dma_semaphore, #tpu.memory_space<semaphore_mem>>
    tpu.enqueue_dma source(%64 : memref<512x512xbf16, #tpu.memory_space<any>>) target(%66 : memref<512x512xbf16, #tpu.memory_space<vmem>>) target_semaphore(%68 : memref<!tpu.dma_semaphore, #tpu.memory_space<semaphore_mem>>)
    %c0_66 = arith.constant 0 : index
    %c0_67 = arith.constant 0 : index
    %69 = vector.load %arg4[%c0_66, %c0_67] : memref<4x1024xf32, #tpu.memory_space<vmem>>, vector<4x512xf32>
    %70 = arith.truncf %69 : vector<4x512xf32> to vector<4x512xbf16>
    %c0_68 = arith.constant 0 : index
    %c0_69 = arith.constant 0 : index
    %c0_70 = arith.constant 0 : index
    %71 = vector.load %arg6[%c0_68, %c0_69, %c0_70] : memref<2x512x512xbf16, #tpu.memory_space<vmem>>, vector<1x512x512xbf16>
    %72 = vector.shape_cast %71 : vector<1x512x512xbf16> to vector<512x512xbf16>
    %cst_71 = arith.constant dense<0.000000e+00> : vector<4x512xf32>
    %73 = tpu.matmul %70, %72, %cst_71 {dimension_numbers = #tpu.dot_dimension_numbers<[1], [0], [0], [1], [0, 0, 1, 1], [], []>} : vector<4x512xbf16>, vector<512x512xbf16>, vector<4x512xf32> -> vector<4x512xf32>
    %74 = arith.addf %56, %73 : vector<4x512xf32>
    %c3_i32_72 = arith.constant 3 : i32
    %c1_i32_73 = arith.constant 1 : i32
    %c1_i32_74 = arith.constant 1 : i32
    %c0_i32_75 = arith.constant 0 : i32
    %c0_i32_76 = arith.constant 0 : i32
    %75 = tpu.memref_slice %arg1[%c3_i32_72, %c0_i32_75, %c0_i32_76] : memref<9x512x512xbf16, #tpu.memory_space<any>> -> memref<1x512x512xbf16, #tpu.memory_space<any>>
    %76 = tpu.memref_squeeze %75 : memref<1x512x512xbf16, #tpu.memory_space<any>> -> memref<512x512xbf16, #tpu.memory_space<any>>
    %c0_i32_77 = arith.constant 0 : i32
    %c0_i32_78 = arith.constant 0 : i32
    %77 = tpu.memref_slice %arg6[%c1_i32_73, %c0_i32_77, %c0_i32_78] : memref<2x512x512xbf16, #tpu.memory_space<vmem>> -> memref<1x512x512xbf16, #tpu.memory_space<vmem>>
    %78 = tpu.memref_squeeze %77 : memref<1x512x512xbf16, #tpu.memory_space<vmem>> -> memref<512x512xbf16, #tpu.memory_space<vmem>>
    %79 = tpu.memref_slice %arg7[%c1_i32_74] : memref<2x!tpu.dma_semaphore, #tpu.memory_space<semaphore_mem>> -> memref<1x!tpu.dma_semaphore, #tpu.memory_space<semaphore_mem>>
    %80 = tpu.memref_squeeze %79 : memref<1x!tpu.dma_semaphore, #tpu.memory_space<semaphore_mem>> -> memref<!tpu.dma_semaphore, #tpu.memory_space<semaphore_mem>>
    tpu.wait_dma2 semaphore(%80 : memref<!tpu.dma_semaphore, #tpu.memory_space<semaphore_mem>>) src(%76 : memref<512x512xbf16, #tpu.memory_space<any>>) dst(%78 : memref<512x512xbf16, #tpu.memory_space<vmem>>)
    %c4_i32 = arith.constant 4 : i32
    %c0_i32_79 = arith.constant 0 : i32
    %c0_i32_80 = arith.constant 0 : i32
    %c0_i32_81 = arith.constant 0 : i32
    %c0_i32_82 = arith.constant 0 : i32
    %81 = tpu.memref_slice %arg1[%c4_i32, %c0_i32_81, %c0_i32_82] : memref<9x512x512xbf16, #tpu.memory_space<any>> -> memref<1x512x512xbf16, #tpu.memory_space<any>>
    %82 = tpu.memref_squeeze %81 : memref<1x512x512xbf16, #tpu.memory_space<any>> -> memref<512x512xbf16, #tpu.memory_space<any>>
    %c0_i32_83 = arith.constant 0 : i32
    %c0_i32_84 = arith.constant 0 : i32
    %83 = tpu.memref_slice %arg6[%c0_i32_79, %c0_i32_83, %c0_i32_84] : memref<2x512x512xbf16, #tpu.memory_space<vmem>> -> memref<1x512x512xbf16, #tpu.memory_space<vmem>>
    %84 = tpu.memref_squeeze %83 : memref<1x512x512xbf16, #tpu.memory_space<vmem>> -> memref<512x512xbf16, #tpu.memory_space<vmem>>
    %85 = tpu.memref_slice %arg7[%c0_i32_80] : memref<2x!tpu.dma_semaphore, #tpu.memory_space<semaphore_mem>> -> memref<1x!tpu.dma_semaphore, #tpu.memory_space<semaphore_mem>>
    %86 = tpu.memref_squeeze %85 : memref<1x!tpu.dma_semaphore, #tpu.memory_space<semaphore_mem>> -> memref<!tpu.dma_semaphore, #tpu.memory_space<semaphore_mem>>
    tpu.enqueue_dma source(%82 : memref<512x512xbf16, #tpu.memory_space<any>>) target(%84 : memref<512x512xbf16, #tpu.memory_space<vmem>>) target_semaphore(%86 : memref<!tpu.dma_semaphore, #tpu.memory_space<semaphore_mem>>)
    %c0_85 = arith.constant 0 : index
    %c512_86 = arith.constant 512 : index
    %87 = vector.load %arg4[%c0_85, %c512_86] : memref<4x1024xf32, #tpu.memory_space<vmem>>, vector<4x512xf32>
    %88 = arith.truncf %87 : vector<4x512xf32> to vector<4x512xbf16>
    %c1_87 = arith.constant 1 : index
    %c0_88 = arith.constant 0 : index
    %c0_89 = arith.constant 0 : index
    %89 = vector.load %arg6[%c1_87, %c0_88, %c0_89] : memref<2x512x512xbf16, #tpu.memory_space<vmem>>, vector<1x512x512xbf16>
    %90 = vector.shape_cast %89 : vector<1x512x512xbf16> to vector<512x512xbf16>
    %cst_90 = arith.constant dense<0.000000e+00> : vector<4x512xf32>
    %91 = tpu.matmul %88, %90, %cst_90 {dimension_numbers = #tpu.dot_dimension_numbers<[1], [0], [0], [1], [0, 0, 1, 1], [], []>} : vector<4x512xbf16>, vector<512x512xbf16>, vector<4x512xf32> -> vector<4x512xf32>
    %92 = arith.addf %74, %91 : vector<4x512xf32>
    %c0_91 = arith.constant 0 : index
    %c1024 = arith.constant 1024 : index
    %93 = vector.load %arg2[%c0_91, %c1024] : memref<1x3072xf32, #tpu.memory_space<vmem>>, vector<1x512xf32>
    %94 = vector.broadcast %93 : vector<1x512xf32> to vector<4x512xf32>
    %95 = arith.addf %92, %94 : vector<4x512xf32>
    %cst_92 = arith.constant 0.000000e+00 : f32
    %96 = vector.broadcast %cst_92 : f32 to vector<4x512xf32>
    %97 = arith.maximumf %95, %96 : vector<4x512xf32>
    %c0_93 = arith.constant 0 : index
    %c0_94 = arith.constant 0 : index
    %98 = vector.load %arg5[%c0_93, %c0_94] : memref<4x1024xf32, #tpu.memory_space<vmem>>, vector<4x512xf32>
    tpu.vector_store %arg5[%c0_93, %c0_94], %97 {strides = array<i32>} : memref<4x1024xf32, #tpu.memory_space<vmem>>, vector<4x512xf32>,
    %cst_95 = arith.constant 0.000000e+00 : f32
    %99 = vector.broadcast %cst_95 : f32 to vector<4x512xf32>
    %c4_i32_96 = arith.constant 4 : i32
    %c0_i32_97 = arith.constant 0 : i32
    %c0_i32_98 = arith.constant 0 : i32
    %c0_i32_99 = arith.constant 0 : i32
    %c0_i32_100 = arith.constant 0 : i32
    %100 = tpu.memref_slice %arg1[%c4_i32_96, %c0_i32_99, %c0_i32_100] : memref<9x512x512xbf16, #tpu.memory_space<any>> -> memref<1x512x512xbf16, #tpu.memory_space<any>>
    %101 = tpu.memref_squeeze %100 : memref<1x512x512xbf16, #tpu.memory_space<any>> -> memref<512x512xbf16, #tpu.memory_space<any>>
    %c0_i32_101 = arith.constant 0 : i32
    %c0_i32_102 = arith.constant 0 : i32
    %102 = tpu.memref_slice %arg6[%c0_i32_97, %c0_i32_101, %c0_i32_102] : memref<2x512x512xbf16, #tpu.memory_space<vmem>> -> memref<1x512x512xbf16, #tpu.memory_space<vmem>>
    %103 = tpu.memref_squeeze %102 : memref<1x512x512xbf16, #tpu.memory_space<vmem>> -> memref<512x512xbf16, #tpu.memory_space<vmem>>
    %104 = tpu.memref_slice %arg7[%c0_i32_98] : memref<2x!tpu.dma_semaphore, #tpu.memory_space<semaphore_mem>> -> memref<1x!tpu.dma_semaphore, #tpu.memory_space<semaphore_mem>>
    %105 = tpu.memref_squeeze %104 : memref<1x!tpu.dma_semaphore, #tpu.memory_space<semaphore_mem>> -> memref<!tpu.dma_semaphore, #tpu.memory_space<semaphore_mem>>
    tpu.wait_dma2 semaphore(%105 : memref<!tpu.dma_semaphore, #tpu.memory_space<semaphore_mem>>) src(%101 : memref<512x512xbf16, #tpu.memory_space<any>>) dst(%103 : memref<512x512xbf16, #tpu.memory_space<vmem>>)
    %c5_i32 = arith.constant 5 : i32
    %c1_i32_103 = arith.constant 1 : i32
    %c1_i32_104 = arith.constant 1 : i32
    %c0_i32_105 = arith.constant 0 : i32
    %c0_i32_106 = arith.constant 0 : i32
    %106 = tpu.memref_slice %arg1[%c5_i32, %c0_i32_105, %c0_i32_106] : memref<9x512x512xbf16, #tpu.memory_space<any>> -> memref<1x512x512xbf16, #tpu.memory_space<any>>
    %107 = tpu.memref_squeeze %106 : memref<1x512x512xbf16, #tpu.memory_space<any>> -> memref<512x512xbf16, #tpu.memory_space<any>>
    %c0_i32_107 = arith.constant 0 : i32
    %c0_i32_108 = arith.constant 0 : i32
    %108 = tpu.memref_slice %arg6[%c1_i32_103, %c0_i32_107, %c0_i32_108] : memref<2x512x512xbf16, #tpu.memory_space<vmem>> -> memref<1x512x512xbf16, #tpu.memory_space<vmem>>
    %109 = tpu.memref_squeeze %108 : memref<1x512x512xbf16, #tpu.memory_space<vmem>> -> memref<512x512xbf16, #tpu.memory_space<vmem>>
    %110 = tpu.memref_slice %arg7[%c1_i32_104] : memref<2x!tpu.dma_semaphore, #tpu.memory_space<semaphore_mem>> -> memref<1x!tpu.dma_semaphore, #tpu.memory_space<semaphore_mem>>
    %111 = tpu.memref_squeeze %110 : memref<1x!tpu.dma_semaphore, #tpu.memory_space<semaphore_mem>> -> memref<!tpu.dma_semaphore, #tpu.memory_space<semaphore_mem>>
    tpu.enqueue_dma source(%107 : memref<512x512xbf16, #tpu.memory_space<any>>) target(%109 : memref<512x512xbf16, #tpu.memory_space<vmem>>) target_semaphore(%111 : memref<!tpu.dma_semaphore, #tpu.memory_space<semaphore_mem>>)
    %c0_109 = arith.constant 0 : index
    %c0_110 = arith.constant 0 : index
    %112 = vector.load %arg4[%c0_109, %c0_110] : memref<4x1024xf32, #tpu.memory_space<vmem>>, vector<4x512xf32>
    %113 = arith.truncf %112 : vector<4x512xf32> to vector<4x512xbf16>
    %c0_111 = arith.constant 0 : index
    %c0_112 = arith.constant 0 : index
    %c0_113 = arith.constant 0 : index
    %114 = vector.load %arg6[%c0_111, %c0_112, %c0_113] : memref<2x512x512xbf16, #tpu.memory_space<vmem>>, vector<1x512x512xbf16>
    %115 = vector.shape_cast %114 : vector<1x512x512xbf16> to vector<512x512xbf16>
    %cst_114 = arith.constant dense<0.000000e+00> : vector<4x512xf32>
    %116 = tpu.matmul %113, %115, %cst_114 {dimension_numbers = #tpu.dot_dimension_numbers<[1], [0], [0], [1], [0, 0, 1, 1], [], []>} : vector<4x512xbf16>, vector<512x512xbf16>, vector<4x512xf32> -> vector<4x512xf32>
    %117 = arith.addf %99, %116 : vector<4x512xf32>
    %c5_i32_115 = arith.constant 5 : i32
    %c1_i32_116 = arith.constant 1 : i32
    %c1_i32_117 = arith.constant 1 : i32
    %c0_i32_118 = arith.constant 0 : i32
    %c0_i32_119 = arith.constant 0 : i32
    %118 = tpu.memref_slice %arg1[%c5_i32_115, %c0_i32_118, %c0_i32_119] : memref<9x512x512xbf16, #tpu.memory_space<any>> -> memref<1x512x512xbf16, #tpu.memory_space<any>>
    %119 = tpu.memref_squeeze %118 : memref<1x512x512xbf16, #tpu.memory_space<any>> -> memref<512x512xbf16, #tpu.memory_space<any>>
    %c0_i32_120 = arith.constant 0 : i32
    %c0_i32_121 = arith.constant 0 : i32
    %120 = tpu.memref_slice %arg6[%c1_i32_116, %c0_i32_120, %c0_i32_121] : memref<2x512x512xbf16, #tpu.memory_space<vmem>> -> memref<1x512x512xbf16, #tpu.memory_space<vmem>>
    %121 = tpu.memref_squeeze %120 : memref<1x512x512xbf16, #tpu.memory_space<vmem>> -> memref<512x512xbf16, #tpu.memory_space<vmem>>
    %122 = tpu.memref_slice %arg7[%c1_i32_117] : memref<2x!tpu.dma_semaphore, #tpu.memory_space<semaphore_mem>> -> memref<1x!tpu.dma_semaphore, #tpu.memory_space<semaphore_mem>>
    %123 = tpu.memref_squeeze %122 : memref<1x!tpu.dma_semaphore, #tpu.memory_space<semaphore_mem>> -> memref<!tpu.dma_semaphore, #tpu.memory_space<semaphore_mem>>
    tpu.wait_dma2 semaphore(%123 : memref<!tpu.dma_semaphore, #tpu.memory_space<semaphore_mem>>) src(%119 : memref<512x512xbf16, #tpu.memory_space<any>>) dst(%121 : memref<512x512xbf16, #tpu.memory_space<vmem>>)
    %c6_i32 = arith.constant 6 : i32
    %c0_i32_122 = arith.constant 0 : i32
    %c0_i32_123 = arith.constant 0 : i32
    %c0_i32_124 = arith.constant 0 : i32
    %c0_i32_125 = arith.constant 0 : i32
    %124 = tpu.memref_slice %arg1[%c6_i32, %c0_i32_124, %c0_i32_125] : memref<9x512x512xbf16, #tpu.memory_space<any>> -> memref<1x512x512xbf16, #tpu.memory_space<any>>
    %125 = tpu.memref_squeeze %124 : memref<1x512x512xbf16, #tpu.memory_space<any>> -> memref<512x512xbf16, #tpu.memory_space<any>>
    %c0_i32_126 = arith.constant 0 : i32
    %c0_i32_127 = arith.constant 0 : i32
    %126 = tpu.memref_slice %arg6[%c0_i32_122, %c0_i32_126, %c0_i32_127] : memref<2x512x512xbf16, #tpu.memory_space<vmem>> -> memref<1x512x512xbf16, #tpu.memory_space<vmem>>
    %127 = tpu.memref_squeeze %126 : memref<1x512x512xbf16, #tpu.memory_space<vmem>> -> memref<512x512xbf16, #tpu.memory_space<vmem>>
    %128 = tpu.memref_slice %arg7[%c0_i32_123] : memref<2x!tpu.dma_semaphore, #tpu.memory_space<semaphore_mem>> -> memref<1x!tpu.dma_semaphore, #tpu.memory_space<semaphore_mem>>
    %129 = tpu.memref_squeeze %128 : memref<1x!tpu.dma_semaphore, #tpu.memory_space<semaphore_mem>> -> memref<!tpu.dma_semaphore, #tpu.memory_space<semaphore_mem>>
    tpu.enqueue_dma source(%125 : memref<512x512xbf16, #tpu.memory_space<any>>) target(%127 : memref<512x512xbf16, #tpu.memory_space<vmem>>) target_semaphore(%129 : memref<!tpu.dma_semaphore, #tpu.memory_space<semaphore_mem>>)
    %c0_128 = arith.constant 0 : index
    %c512_129 = arith.constant 512 : index
    %130 = vector.load %arg4[%c0_128, %c512_129] : memref<4x1024xf32, #tpu.memory_space<vmem>>, vector<4x512xf32>
    %131 = arith.truncf %130 : vector<4x512xf32> to vector<4x512xbf16>
    %c1_130 = arith.constant 1 : index
    %c0_131 = arith.constant 0 : index
    %c0_132 = arith.constant 0 : index
    %132 = vector.load %arg6[%c1_130, %c0_131, %c0_132] : memref<2x512x512xbf16, #tpu.memory_space<vmem>>, vector<1x512x512xbf16>
    %133 = vector.shape_cast %132 : vector<1x512x512xbf16> to vector<512x512xbf16>
    %cst_133 = arith.constant dense<0.000000e+00> : vector<4x512xf32>
    %134 = tpu.matmul %131, %133, %cst_133 {dimension_numbers = #tpu.dot_dimension_numbers<[1], [0], [0], [1], [0, 0, 1, 1], [], []>} : vector<4x512xbf16>, vector<512x512xbf16>, vector<4x512xf32> -> vector<4x512xf32>
    %135 = arith.addf %117, %134 : vector<4x512xf32>
    %c0_134 = arith.constant 0 : index
    %c1536 = arith.constant 1536 : index
    %136 = vector.load %arg2[%c0_134, %c1536] : memref<1x3072xf32, #tpu.memory_space<vmem>>, vector<1x512xf32>
    %137 = vector.broadcast %136 : vector<1x512xf32> to vector<4x512xf32>
    %138 = arith.addf %135, %137 : vector<4x512xf32>
    %cst_135 = arith.constant 0.000000e+00 : f32
    %139 = vector.broadcast %cst_135 : f32 to vector<4x512xf32>
    %140 = arith.maximumf %138, %139 : vector<4x512xf32>
    %c0_136 = arith.constant 0 : index
    %c512_137 = arith.constant 512 : index
    %141 = vector.load %arg5[%c0_136, %c512_137] : memref<4x1024xf32, #tpu.memory_space<vmem>>, vector<4x512xf32>
    tpu.vector_store %arg5[%c0_136, %c512_137], %140 {strides = array<i32>} : memref<4x1024xf32, #tpu.memory_space<vmem>>, vector<4x512xf32>,
    %cst_138 = arith.constant 0.000000e+00 : f32
    %142 = vector.broadcast %cst_138 : f32 to vector<4x512xf32>
    %c6_i32_139 = arith.constant 6 : i32
    %c0_i32_140 = arith.constant 0 : i32
    %c0_i32_141 = arith.constant 0 : i32
    %c0_i32_142 = arith.constant 0 : i32
    %c0_i32_143 = arith.constant 0 : i32
    %143 = tpu.memref_slice %arg1[%c6_i32_139, %c0_i32_142, %c0_i32_143] : memref<9x512x512xbf16, #tpu.memory_space<any>> -> memref<1x512x512xbf16, #tpu.memory_space<any>>
    %144 = tpu.memref_squeeze %143 : memref<1x512x512xbf16, #tpu.memory_space<any>> -> memref<512x512xbf16, #tpu.memory_space<any>>
    %c0_i32_144 = arith.constant 0 : i32
    %c0_i32_145 = arith.constant 0 : i32
    %145 = tpu.memref_slice %arg6[%c0_i32_140, %c0_i32_144, %c0_i32_145] : memref<2x512x512xbf16, #tpu.memory_space<vmem>> -> memref<1x512x512xbf16, #tpu.memory_space<vmem>>
    %146 = tpu.memref_squeeze %145 : memref<1x512x512xbf16, #tpu.memory_space<vmem>> -> memref<512x512xbf16, #tpu.memory_space<vmem>>
    %147 = tpu.memref_slice %arg7[%c0_i32_141] : memref<2x!tpu.dma_semaphore, #tpu.memory_space<semaphore_mem>> -> memref<1x!tpu.dma_semaphore, #tpu.memory_space<semaphore_mem>>
    %148 = tpu.memref_squeeze %147 : memref<1x!tpu.dma_semaphore, #tpu.memory_space<semaphore_mem>> -> memref<!tpu.dma_semaphore, #tpu.memory_space<semaphore_mem>>
    tpu.wait_dma2 semaphore(%148 : memref<!tpu.dma_semaphore, #tpu.memory_space<semaphore_mem>>) src(%144 : memref<512x512xbf16, #tpu.memory_space<any>>) dst(%146 : memref<512x512xbf16, #tpu.memory_space<vmem>>)
    %c7_i32 = arith.constant 7 : i32
    %c1_i32_146 = arith.constant 1 : i32
    %c1_i32_147 = arith.constant 1 : i32
    %c0_i32_148 = arith.constant 0 : i32
    %c0_i32_149 = arith.constant 0 : i32
    %149 = tpu.memref_slice %arg1[%c7_i32, %c0_i32_148, %c0_i32_149] : memref<9x512x512xbf16, #tpu.memory_space<any>> -> memref<1x512x512xbf16, #tpu.memory_space<any>>
    %150 = tpu.memref_squeeze %149 : memref<1x512x512xbf16, #tpu.memory_space<any>> -> memref<512x512xbf16, #tpu.memory_space<any>>
    %c0_i32_150 = arith.constant 0 : i32
    %c0_i32_151 = arith.constant 0 : i32
    %151 = tpu.memref_slice %arg6[%c1_i32_146, %c0_i32_150, %c0_i32_151] : memref<2x512x512xbf16, #tpu.memory_space<vmem>> -> memref<1x512x512xbf16, #tpu.memory_space<vmem>>
    %152 = tpu.memref_squeeze %151 : memref<1x512x512xbf16, #tpu.memory_space<vmem>> -> memref<512x512xbf16, #tpu.memory_space<vmem>>
    %153 = tpu.memref_slice %arg7[%c1_i32_147] : memref<2x!tpu.dma_semaphore, #tpu.memory_space<semaphore_mem>> -> memref<1x!tpu.dma_semaphore, #tpu.memory_space<semaphore_mem>>
    %154 = tpu.memref_squeeze %153 : memref<1x!tpu.dma_semaphore, #tpu.memory_space<semaphore_mem>> -> memref<!tpu.dma_semaphore, #tpu.memory_space<semaphore_mem>>
    tpu.enqueue_dma source(%150 : memref<512x512xbf16, #tpu.memory_space<any>>) target(%152 : memref<512x512xbf16, #tpu.memory_space<vmem>>) target_semaphore(%154 : memref<!tpu.dma_semaphore, #tpu.memory_space<semaphore_mem>>)
    %c0_152 = arith.constant 0 : index
    %c0_153 = arith.constant 0 : index
    %155 = vector.load %arg5[%c0_152, %c0_153] : memref<4x1024xf32, #tpu.memory_space<vmem>>, vector<4x512xf32>
    %156 = arith.truncf %155 : vector<4x512xf32> to vector<4x512xbf16>
    %c0_154 = arith.constant 0 : index
    %c0_155 = arith.constant 0 : index
    %c0_156 = arith.constant 0 : index
    %157 = vector.load %arg6[%c0_154, %c0_155, %c0_156] : memref<2x512x512xbf16, #tpu.memory_space<vmem>>, vector<1x512x512xbf16>
    %158 = vector.shape_cast %157 : vector<1x512x512xbf16> to vector<512x512xbf16>
    %cst_157 = arith.constant dense<0.000000e+00> : vector<4x512xf32>
    %159 = tpu.matmul %156, %158, %cst_157 {dimension_numbers = #tpu.dot_dimension_numbers<[1], [0], [0], [1], [0, 0, 1, 1], [], []>} : vector<4x512xbf16>, vector<512x512xbf16>, vector<4x512xf32> -> vector<4x512xf32>
    %160 = arith.addf %142, %159 : vector<4x512xf32>
    %c7_i32_158 = arith.constant 7 : i32
    %c1_i32_159 = arith.constant 1 : i32
    %c1_i32_160 = arith.constant 1 : i32
    %c0_i32_161 = arith.constant 0 : i32
    %c0_i32_162 = arith.constant 0 : i32
    %161 = tpu.memref_slice %arg1[%c7_i32_158, %c0_i32_161, %c0_i32_162] : memref<9x512x512xbf16, #tpu.memory_space<any>> -> memref<1x512x512xbf16, #tpu.memory_space<any>>
    %162 = tpu.memref_squeeze %161 : memref<1x512x512xbf16, #tpu.memory_space<any>> -> memref<512x512xbf16, #tpu.memory_space<any>>
    %c0_i32_163 = arith.constant 0 : i32
    %c0_i32_164 = arith.constant 0 : i32
    %163 = tpu.memref_slice %arg6[%c1_i32_159, %c0_i32_163, %c0_i32_164] : memref<2x512x512xbf16, #tpu.memory_space<vmem>> -> memref<1x512x512xbf16, #tpu.memory_space<vmem>>
    %164 = tpu.memref_squeeze %163 : memref<1x512x512xbf16, #tpu.memory_space<vmem>> -> memref<512x512xbf16, #tpu.memory_space<vmem>>
    %165 = tpu.memref_slice %arg7[%c1_i32_160] : memref<2x!tpu.dma_semaphore, #tpu.memory_space<semaphore_mem>> -> memref<1x!tpu.dma_semaphore, #tpu.memory_space<semaphore_mem>>
    %166 = tpu.memref_squeeze %165 : memref<1x!tpu.dma_semaphore, #tpu.memory_space<semaphore_mem>> -> memref<!tpu.dma_semaphore, #tpu.memory_space<semaphore_mem>>
    tpu.wait_dma2 semaphore(%166 : memref<!tpu.dma_semaphore, #tpu.memory_space<semaphore_mem>>) src(%162 : memref<512x512xbf16, #tpu.memory_space<any>>) dst(%164 : memref<512x512xbf16, #tpu.memory_space<vmem>>)
    %c8_i32 = arith.constant 8 : i32
    %c0_i32_165 = arith.constant 0 : i32
    %c0_i32_166 = arith.constant 0 : i32
    %c0_i32_167 = arith.constant 0 : i32
    %c0_i32_168 = arith.constant 0 : i32
    %167 = tpu.memref_slice %arg1[%c8_i32, %c0_i32_167, %c0_i32_168] : memref<9x512x512xbf16, #tpu.memory_space<any>> -> memref<1x512x512xbf16, #tpu.memory_space<any>>
    %168 = tpu.memref_squeeze %167 : memref<1x512x512xbf16, #tpu.memory_space<any>> -> memref<512x512xbf16, #tpu.memory_space<any>>
    %c0_i32_169 = arith.constant 0 : i32
    %c0_i32_170 = arith.constant 0 : i32
    %169 = tpu.memref_slice %arg6[%c0_i32_165, %c0_i32_169, %c0_i32_170] : memref<2x512x512xbf16, #tpu.memory_space<vmem>> -> memref<1x512x512xbf16, #tpu.memory_space<vmem>>
    %170 = tpu.memref_squeeze %169 : memref<1x512x512xbf16, #tpu.memory_space<vmem>> -> memref<512x512xbf16, #tpu.memory_space<vmem>>
    %171 = tpu.memref_slice %arg7[%c0_i32_166] : memref<2x!tpu.dma_semaphore, #tpu.memory_space<semaphore_mem>> -> memref<1x!tpu.dma_semaphore, #tpu.memory_space<semaphore_mem>>
    %172 = tpu.memref_squeeze %171 : memref<1x!tpu.dma_semaphore, #tpu.memory_space<semaphore_mem>> -> memref<!tpu.dma_semaphore, #tpu.memory_space<semaphore_mem>>
    tpu.enqueue_dma source(%168 : memref<512x512xbf16, #tpu.memory_space<any>>) target(%170 : memref<512x512xbf16, #tpu.memory_space<vmem>>) target_semaphore(%172 : memref<!tpu.dma_semaphore, #tpu.memory_space<semaphore_mem>>)
    %c0_171 = arith.constant 0 : index
    %c512_172 = arith.constant 512 : index
    %173 = vector.load %arg5[%c0_171, %c512_172] : memref<4x1024xf32, #tpu.memory_space<vmem>>, vector<4x512xf32>
    %174 = arith.truncf %173 : vector<4x512xf32> to vector<4x512xbf16>
    %c1_173 = arith.constant 1 : index
    %c0_174 = arith.constant 0 : index
    %c0_175 = arith.constant 0 : index
    %175 = vector.load %arg6[%c1_173, %c0_174, %c0_175] : memref<2x512x512xbf16, #tpu.memory_space<vmem>>, vector<1x512x512xbf16>
    %176 = vector.shape_cast %175 : vector<1x512x512xbf16> to vector<512x512xbf16>
    %cst_176 = arith.constant dense<0.000000e+00> : vector<4x512xf32>
    %177 = tpu.matmul %174, %176, %cst_176 {dimension_numbers = #tpu.dot_dimension_numbers<[1], [0], [0], [1], [0, 0, 1, 1], [], []>} : vector<4x512xbf16>, vector<512x512xbf16>, vector<4x512xf32> -> vector<4x512xf32>
    %178 = arith.addf %160, %177 : vector<4x512xf32>
    %c0_177 = arith.constant 0 : index
    %c2048 = arith.constant 2048 : index
    %179 = vector.load %arg2[%c0_177, %c2048] : memref<1x3072xf32, #tpu.memory_space<vmem>>, vector<1x512xf32>
    %180 = vector.broadcast %179 : vector<1x512xf32> to vector<4x512xf32>
    %181 = arith.addf %178, %180 : vector<4x512xf32>
    %cst_178 = arith.constant 0.000000e+00 : f32
    %182 = vector.broadcast %cst_178 : f32 to vector<4x512xf32>
    %183 = arith.maximumf %181, %182 : vector<4x512xf32>
    %c0_179 = arith.constant 0 : index
    %c0_180 = arith.constant 0 : index
    %184 = vector.load %arg4[%c0_179, %c0_180] : memref<4x1024xf32, #tpu.memory_space<vmem>>, vector<4x512xf32>
    tpu.vector_store %arg4[%c0_179, %c0_180], %183 {strides = array<i32>} : memref<4x1024xf32, #tpu.memory_space<vmem>>, vector<4x512xf32>,
    %cst_181 = arith.constant 0.000000e+00 : f32
    %185 = vector.broadcast %cst_181 : f32 to vector<4x512xf32>
    %c8_i32_182 = arith.constant 8 : i32
    %c0_i32_183 = arith.constant 0 : i32
    %c0_i32_184 = arith.constant 0 : i32
    %c0_i32_185 = arith.constant 0 : i32
    %c0_i32_186 = arith.constant 0 : i32
    %186 = tpu.memref_slice %arg1[%c8_i32_182, %c0_i32_185, %c0_i32_186] : memref<9x512x512xbf16, #tpu.memory_space<any>> -> memref<1x512x512xbf16, #tpu.memory_space<any>>
    %187 = tpu.memref_squeeze %186 : memref<1x512x512xbf16, #tpu.memory_space<any>> -> memref<512x512xbf16, #tpu.memory_space<any>>
    %c0_i32_187 = arith.constant 0 : i32
    %c0_i32_188 = arith.constant 0 : i32
    %188 = tpu.memref_slice %arg6[%c0_i32_183, %c0_i32_187, %c0_i32_188] : memref<2x512x512xbf16, #tpu.memory_space<vmem>> -> memref<1x512x512xbf16, #tpu.memory_space<vmem>>
    %189 = tpu.memref_squeeze %188 : memref<1x512x512xbf16, #tpu.memory_space<vmem>> -> memref<512x512xbf16, #tpu.memory_space<vmem>>
    %190 = tpu.memref_slice %arg7[%c0_i32_184] : memref<2x!tpu.dma_semaphore, #tpu.memory_space<semaphore_mem>> -> memref<1x!tpu.dma_semaphore, #tpu.memory_space<semaphore_mem>>
    %191 = tpu.memref_squeeze %190 : memref<1x!tpu.dma_semaphore, #tpu.memory_space<semaphore_mem>> -> memref<!tpu.dma_semaphore, #tpu.memory_space<semaphore_mem>>
    tpu.wait_dma2 semaphore(%191 : memref<!tpu.dma_semaphore, #tpu.memory_space<semaphore_mem>>) src(%187 : memref<512x512xbf16, #tpu.memory_space<any>>) dst(%189 : memref<512x512xbf16, #tpu.memory_space<vmem>>)
    %c0_189 = arith.constant 0 : index
    %c0_190 = arith.constant 0 : index
    %192 = vector.load %arg4[%c0_189, %c0_190] : memref<4x1024xf32, #tpu.memory_space<vmem>>, vector<4x512xf32>
    %193 = arith.truncf %192 : vector<4x512xf32> to vector<4x512xbf16>
    %c0_191 = arith.constant 0 : index
    %c0_192 = arith.constant 0 : index
    %c0_193 = arith.constant 0 : index
    %194 = vector.load %arg6[%c0_191, %c0_192, %c0_193] : memref<2x512x512xbf16, #tpu.memory_space<vmem>>, vector<1x512x512xbf16>
    %195 = vector.shape_cast %194 : vector<1x512x512xbf16> to vector<512x512xbf16>
    %cst_194 = arith.constant dense<0.000000e+00> : vector<4x512xf32>
    %196 = tpu.matmul %193, %195, %cst_194 {dimension_numbers = #tpu.dot_dimension_numbers<[1], [0], [0], [1], [0, 0, 1, 1], [], []>} : vector<4x512xbf16>, vector<512x512xbf16>, vector<4x512xf32> -> vector<4x512xf32>
    %197 = arith.addf %185, %196 : vector<4x512xf32>
    %c0_195 = arith.constant 0 : index
    %c2560 = arith.constant 2560 : index
    %198 = vector.load %arg2[%c0_195, %c2560] : memref<1x3072xf32, #tpu.memory_space<vmem>>, vector<1x512xf32>
    %199 = vector.broadcast %198 : vector<1x512xf32> to vector<4x512xf32>
    %200 = arith.addf %197, %199 : vector<4x512xf32>
    %201 = tpu.iota {dimensions = array<i32: 1>} : vector<4x512xi32>
    %c230_i32 = arith.constant 230 : i32
    %202 = vector.broadcast %c230_i32 : i32 to vector<4x512xi32>
    %203 = arith.cmpi sge, %201, %202 : vector<4x512xi32>
    %cst_196 = arith.constant -1.000000e+30 : f32
    %204 = vector.broadcast %cst_196 : f32 to vector<4x512xf32>
    %205 = arith.select %203, %204, %200 : vector<4x512xi1>, vector<4x512xf32>
    %cst_197 = arith.constant dense<0xFF800000> : vector<4xf32>
    %206 = vector.multi_reduction <maximumf>, %205, %cst_197 [1] : vector<4x512xf32> to vector<4xf32>
    %207 = vector.shape_cast %206 : vector<4xf32> to vector<4x1xf32>
    %208 = vector.broadcast %207 : vector<4x1xf32> to vector<4x512xf32>
    %209 = arith.subf %205, %208 : vector<4x512xf32>
    %210 = math.exp %209 : vector<4x512xf32>
    %cst_198 = arith.constant dense<0.000000e+00> : vector<4xf32>
    %211 = vector.multi_reduction <add>, %210, %cst_198 [1] : vector<4x512xf32> to vector<4xf32>
    %212 = vector.shape_cast %211 : vector<4xf32> to vector<4x1xf32>
    %213 = vector.broadcast %212 : vector<4x1xf32> to vector<4x512xf32>
    %214 = arith.divf %210, %213 : vector<4x512xf32>
    %cst_199 = arith.constant -1.000000e+30 : f32
    %215 = vector.broadcast %cst_199 : f32 to vector<4x512xf32>
    %216 = arith.select %203, %215, %214 : vector<4x512xi1>, vector<4x512xf32>
    %cst_200 = arith.constant dense<0xFF800000> : vector<4xf32>
    %217 = vector.multi_reduction <maximumf>, %216, %cst_200 [1] : vector<4x512xf32> to vector<4xf32>
    %218 = vector.shape_cast %217 : vector<4xf32> to vector<4x1xf32>
    %219 = vector.broadcast %218 : vector<4x1xf32> to vector<4x512xf32>
    %220 = arith.subf %216, %219 : vector<4x512xf32>
    %221 = math.exp %220 : vector<4x512xf32>
    %cst_201 = arith.constant dense<0.000000e+00> : vector<4xf32>
    %222 = vector.multi_reduction <add>, %221, %cst_201 [1] : vector<4x512xf32> to vector<4xf32>
    %223 = vector.shape_cast %222 : vector<4xf32> to vector<4x1xf32>
    %224 = vector.broadcast %223 : vector<4x1xf32> to vector<4x512xf32>
    %225 = arith.divf %221, %224 : vector<4x512xf32>
    %226 = vector.extract_strided_slice %225 {offsets = [0, 0], sizes = [4, 230], strides = [1, 1]} : vector<4x512xf32> to vector<4x230xf32>
    %c0_202 = arith.constant 0 : index
    %c0_203 = arith.constant 0 : index
    %227 = vector.load %arg3[%c0_202, %c0_203] : memref<4x230xf32, #tpu.memory_space<vmem>>, vector<4x230xf32>
    tpu.vector_store %arg3[%c0_202, %c0_203], %226 {strides = array<i32>} : memref<4x230xf32, #tpu.memory_space<vmem>>, vector<4x230xf32>,
    return
  }
}

</mosaic_0001>

<bundles_post_ra>
// kernel: tpu_custom_call.1
= control target key start
LH: loop header
LB: loop body
LE: loop exit
PB: predicated region body
PF: predicated region fallthrough
CT: control target
= control target key end

     0   :  { %8 = vsyncpa [#allocation7], 0  ;;  %s13569_s0 = inlined_call_operand.hbm [shape: f32[4,512], index: 0, kind: input, shape index: {}]   ;;  %s13570_s1 = inlined_call_operand.hbm [shape: bf16[9,512,512], index: 1, kind: input, shape index: {}]   ;;  %s13571_s2 = inlined_call_operand.hbm [shape: f32[1,3072], index: 2, kind: input, shape index: {}]   ;;  %s13572_s3 = inlined_call_operand.hbm [shape: f32[4,230], index: 3, kind: output, shape index: {}]  }
   0x1   :  { %9 = vsyncpa [#allocation10], 0 }
   0x2   :  { %10 = vsyncpa [#allocation8], 0  ;;  %s11628_s12 = smov [#allocation6]   ;;  %s11629_s14 = smov [#allocation9]  }
   0x3   :  { %s17_s13 = sshll.u32 %s11628_s12, 4  ;;  %s27_s15 = sshll.u32 %s11629_s14, 4  ;;  %s18_s13 = int_to_ptr.vmem [resolvable:$true] %s17_s13  ;;  %s28_s15 = int_to_ptr.vmem [resolvable:$true] %s27_s15 }
   0x4   :  { %s11348_s16 = scalar_lea.vmem %s18_s13, 256  ;;  %p11353_p1 = scmp.lt.s32.totalorder %s18_s13, %s18_s13 }
   0x5   :  { %p11349_p0 = scmp.ne.s32.totalorder %s18_s13, %s11348_s16  ;;  %p11354_p2 = scmp.lt.s32.totalorder %s11348_s16, %s11348_s16 }
   0x7   :  { %p11355_p3 = por %p11354_p2, %p11353_p1 }
   0x9   :  { %p11356_p4 = pnand %p11355_p3, %p11349_p0 }
   0xb   :  { %11359 = shalt.err (!%p11356_p4)
}
   0xc   :  { %20 = dma.hbm_to_vmem [thread:$0]  %s13569_s0, 256, %s18_s13, [#allocation7]  }
   0xd   :  { %s11368_s19 = scalar_lea.vmem %s28_s15, 384  ;;  %p11373_p6 = scmp.lt.s32.totalorder %s28_s15, %s28_s15 }
   0xe   :  { %p11369_p5 = scmp.ne.s32.totalorder %s28_s15, %s11368_s19  ;;  %p11374_p7 = scmp.lt.s32.totalorder %s11368_s19, %s11368_s19 }
  0x10   :  { %p11375_p8 = por %p11374_p7, %p11373_p6 }
  0x12   :  { %p11376_p9 = pnand %p11375_p8, %p11369_p5 }
  0x14   :  { %11379 = shalt.err (!%p11376_p9)
}
  0x15   :  { %30 = dma.hbm_to_vmem [thread:$0]  %s13571_s2, 384, %s28_s15, [#allocation10]  }
  0x16   :  { %11604 = dma.done.wait [#allocation7], 256  }
  0x17   :  { %11605 = vsyncadd [#allocation7], 4294967040 }
  0x18   :  { %11606 = dma.done.wait [#allocation10], 384  }
  0x19   :  { %11607 = vsyncadd [#allocation10], 4294966912  ;;  %s11630_s22 = smov [#allocation4]  }
  0x1a   :  { %s44_s23 = sshll.u32 %s11630_s22, 4  ;;  %s11660_s23 = int_to_ptr.vmem [resolvable:$true] %s44_s23 }
  0x1b   :  { %s11388_s0 = scalar_lea.vmem %s11660_s23, 16384  ;;  %s11392_s24 = scalar_lea.vmem %s11660_s23, 32768 }
  0x1c   :  { %p11389_p10 = scmp.ne.s32.totalorder %s11660_s23, %s11388_s0  ;;  %p11393_p11 = scmp.lt.s32.totalorder %s11660_s23, %s11660_s23 }
  0x1d   :  { %p11394_p12 = scmp.lt.s32.totalorder %s11392_s24, %s11388_s0 }
  0x1f   :  { %p11395_p13 = por %p11394_p12, %p11393_p11 }
  0x21   :  { %p11667_p0 = pnand %p11395_p13, %p11389_p10 }
  0x23   :  { %11399 = shalt.err (!%p11667_p0)  }
  0x24   :  { %47 = dma.hbm_to_vmem [thread:$0]  %s13570_s1, 16384, %s11660_s23, [#allocation5] }
  0x25   :  { %11608 = dma.done.wait [#allocation5], 16384 }
  0x26   :  { %11609 = vsyncadd [#allocation5], 4294950912  ;;  %s52_s29 = scalar_lea.hbm %s13570_s1, 16384  ;;  %s11631_s30 = smov [#allocation4 + $0x400]  }
  0x27   :  { %s62_s4 = sshll.u32 %s11631_s30, 4  ;;  %s11680_s4 = int_to_ptr.vmem [resolvable:$true] %s62_s4 }
  0x28   :  { %s11410_s5 = scalar_lea.vmem %s11680_s4, 16384  ;;  %p11415_p2 = scmp.lt.s32.totalorder %s11680_s4, %s11660_s23 }
  0x29   :  { %p11411_p1 = scmp.ne.s32.totalorder %s11680_s4, %s11410_s5  ;;  %p11416_p3 = scmp.lt.s32.totalorder %s11392_s24, %s11410_s5 }
  0x2b   :  { %p11417_p4 = por %p11416_p3, %p11415_p2 }
  0x2d   :  { %p11686_p5 = pnand %p11417_p4, %p11411_p1 }
  0x2f   :  { %11421 = shalt.err (!%p11686_p5)  }
  0x30   :  { %65 = dma.hbm_to_vmem [thread:$0]  %s52_s29, 16384, %s11680_s4, [#allocation5 + $0x1]  ;;  %v11693_v0 = vld [vmem:[#allocation6] sm:$0xff]  ;;  %v11695_v1 = vld [vmem:[#allocation6 + $0x8] sm:$0xff] }
  0x31   :  { %v70_v2 = vcombine.high %v11693_v0, %v11693_v0  ;;  %v71_v3 = vcombine.high %v11695_v1, %v11695_v1  ;;  %v10168_v4 = vld [vmem:[#allocation4 + $0xe4] ss:$16 sps:$4 sm:$0xff]   ;;  %v10172_v8 = vld [vmem:[#allocation4 + $0xe0] ss:$16 sps:$4 sm:$0xff]  }
  0x32   :  { %v10170_v7 = vld [vmem:[#allocation4 + $0x2e4] ss:$16 sps:$4 sm:$0xff]   ;;  %868 = vmatprep.subr.bf16.mxu0 %v10168_v4  ;;  %v10173_v9 = vld [vmem:[#allocation4 + $0x2e0] ss:$16 sps:$4 sm:$0xff]  }
  0x33   :  { %v11701_v5 = vpack.c.bf16 %v70_v2, %v70_v2  ;;  %v11703_v6 = vpack.c.bf16 %v71_v3, %v71_v3  ;;  %909 = vmatprep.subr.bf16.mxu1 %v10170_v7  ;;  %v10174_v10 = vld [vmem:[#allocation4 + $0xc4] ss:$16 sps:$4 sm:$0xff]   ;;  %869 = vmatpush1.bf16.msra.mxu0 %v10172_v8  ;;  %v10178_v12 = vld [vmem:[#allocation4 + $0xc0] ss:$16 sps:$4 sm:$0xff]  }
  0x34   :  { %910 = vmatpush1.bf16.msra.mxu1 %v10173_v9  ;;  %v10176_v11 = vld [vmem:[#allocation4 + $0x2c4] ss:$16 sps:$4 sm:$0xff]   ;;  %870 = vmatprep.subr.bf16.mxu0 %v10174_v10  ;;  %v10179_v13 = vld [vmem:[#allocation4 + $0x2c0] ss:$16 sps:$4 sm:$0xff]   ;;  %v10268_v10 = vld [vmem:[#allocation4 + $0xec] ss:$16 sps:$4 sm:$0xff]  }
  0x35   :  { %900 = vmatprep.mubr.bf16.mxu0 %v11701_v5  ;;  %941 = vmatprep.mubr.bf16.mxu1 %v11703_v6  ;;  %v10180_v14 = vld [vmem:[#allocation4 + $0xa4] ss:$16 sps:$4 sm:$0xff]   ;;  %v10184_v16 = vld [vmem:[#allocation4 + $0xa0] ss:$16 sps:$4 sm:$0xff]  }
  0x36   :  { %911 = vmatprep.subr.bf16.mxu1 %v10176_v11  ;;  %v10182_v15 = vld [vmem:[#allocation4 + $0x2a4] ss:$16 sps:$4 sm:$0xff]   ;;  %v10185_v17 = vld [vmem:[#allocation4 + $0x2a0] ss:$16 sps:$4 sm:$0xff]   ;;  %v10271_v11 = vld [vmem:[#allocation4 + $0x2ec] ss:$16 sps:$4 sm:$0xff]  }
  0x37   :  { %871 = vmatpush1.bf16.msra.mxu0 %v10178_v12  ;;  %v10186_v18 = vld [vmem:[#allocation4 + $0x84] ss:$16 sps:$4 sm:$0xff]   ;;  %v10190_v20 = vld [vmem:[#allocation4 + $0x80] ss:$16 sps:$4 sm:$0xff]   ;;  %v11709_v12 = vpack.c.bf16 %v11693_v0, %v11693_v0  ;;  %v10280_v0 = vld [vmem:[#allocation4 + $0xac] ss:$16 sps:$4 sm:$0xff]  }
  0x38   :  { %912 = vmatpush1.bf16.msra.mxu1 %v10179_v13  ;;  %872 = vmatprep.subr.bf16.mxu0 %v10180_v14  ;;  %v10188_v19 = vld [vmem:[#allocation4 + $0x284] ss:$16 sps:$4 sm:$0xff]   ;;  %v10191_v21 = vld [vmem:[#allocation4 + $0x280] ss:$16 sps:$4 sm:$0xff]   ;;  %v11713_v13 = vpack.c.bf16 %v11695_v1, %v11695_v1  ;;  %v10266_v14 = vld [vmem:[#allocation4 + $0xe8] ss:$16 sps:$4 sm:$0xff]  }
  0x39   :  { %913 = vmatprep.subr.bf16.mxu1 %v10182_v15  ;;  %v10192_v22 = vld [vmem:[#allocation4 + $0x64] ss:$16 sps:$4 sm:$0xff]   ;;  %v10196_v24 = vld [vmem:[#allocation4 + $0x60] ss:$16 sps:$4 sm:$0xff]   ;;  %v10269_v15 = vld [vmem:[#allocation4 + $0x2e8] ss:$16 sps:$4 sm:$0xff]  }
  0x3a   :  { %v10194_v23 = vld [vmem:[#allocation4 + $0x264] ss:$16 sps:$4 sm:$0xff]   ;;  %v10197_v25 = vld [vmem:[#allocation4 + $0x260] ss:$16 sps:$4 sm:$0xff]   ;;  %v10283_v1 = vld [vmem:[#allocation4 + $0x2ac] ss:$16 sps:$4 sm:$0xff]  }
  0x3b   :  { %873 = vmatpush1.bf16.msra.mxu0 %v10184_v16  ;;  %v10198_v26 = vld [vmem:[#allocation4 + $0x44] ss:$16 sps:$4 sm:$0xff]   ;;  %v10202_v28 = vld [vmem:[#allocation4 + $0x40] ss:$16 sps:$4 sm:$0xff]   ;;  %v10274_v16 = vld [vmem:[#allocation4 + $0xcc] ss:$16 sps:$4 sm:$0xff]  }
  0x3c   :  { %914 = vmatpush1.bf16.msra.mxu1 %v10185_v17  ;;  %874 = vmatprep.subr.bf16.mxu0 %v10186_v18  ;;  %v10200_v27 = vld [vmem:[#allocation4 + $0x244] ss:$16 sps:$4 sm:$0xff]   ;;  %v10203_v29 = vld [vmem:[#allocation4 + $0x240] ss:$16 sps:$4 sm:$0xff]   ;;  %v10277_v17 = vld [vmem:[#allocation4 + $0x2cc] ss:$16 sps:$4 sm:$0xff]  }
  0x3d   :  { %915 = vmatprep.subr.bf16.mxu1 %v10188_v19  ;;  %v10204_v30 = vld [vmem:[#allocation4 + $0x24] ss:$16 sps:$4 sm:$0xff]   ;;  %v10208_v32 = vld [vmem:[#allocation4 + $0x20] ss:$16 sps:$4 sm:$0xff]   ;;  %v10272_v18 = vld [vmem:[#allocation4 + $0xc8] ss:$16 sps:$4 sm:$0xff]  }
  0x3e   :  { %v10206_v31 = vld [vmem:[#allocation4 + $0x224] ss:$16 sps:$4 sm:$0xff]   ;;  %v10209_v33 = vld [vmem:[#allocation4 + $0x220] ss:$16 sps:$4 sm:$0xff]   ;;  %v10275_v19 = vld [vmem:[#allocation4 + $0x2c8] ss:$16 sps:$4 sm:$0xff]  }
  0x3f   :  { %875 = vmatpush1.bf16.msra.mxu0 %v10190_v20  ;;  %v10210_v34 = vld [vmem:[#allocation4 + $0x4] ss:$16 sps:$4 sm:$0xff]   ;;  %v10214_v36 = vld [vmem:[#allocation4] ss:$16 sps:$4 sm:$0xff]   ;;  %v10278_v20 = vld [vmem:[#allocation4 + $0xa8] ss:$16 sps:$4 sm:$0xff]  }
  0x40   :  { %916 = vmatpush1.bf16.msra.mxu1 %v10191_v21  ;;  %876 = vmatprep.subr.bf16.mxu0 %v10192_v22  ;;  %v10212_v35 = vld [vmem:[#allocation4 + $0x204] ss:$16 sps:$4 sm:$0xff]   ;;  %v10215_v37 = vld [vmem:[#allocation4 + $0x200] ss:$16 sps:$4 sm:$0xff]   ;;  %v10281_v21 = vld [vmem:[#allocation4 + $0x2a8] ss:$16 sps:$4 sm:$0xff]  }
  0x41   :  { %917 = vmatprep.subr.bf16.mxu1 %v10194_v23  ;;  %v10216_v38 = vld [vmem:[#allocation4 + $0x1e4] ss:$16 sps:$4 sm:$0xff]   ;;  %v10220_v40 = vld [vmem:[#allocation4 + $0x1e0] ss:$16 sps:$4 sm:$0xff]   ;;  %v10286_v22 = vld [vmem:[#allocation4 + $0x8c] ss:$16 sps:$4 sm:$0xff]  }
  0x42   :  { %v10218_v39 = vld [vmem:[#allocation4 + $0x3e4] ss:$16 sps:$4 sm:$0xff]   ;;  %v10221_v41 = vld [vmem:[#allocation4 + $0x3e0] ss:$16 sps:$4 sm:$0xff]   ;;  %v10289_v23 = vld [vmem:[#allocation4 + $0x28c] ss:$16 sps:$4 sm:$0xff]  }
  0x43   :  { %877 = vmatpush1.bf16.msra.mxu0 %v10196_v24  ;;  %v10222_v42 = vld [vmem:[#allocation4 + $0x1c4] ss:$16 sps:$4 sm:$0xff]   ;;  %v10226_v44 = vld [vmem:[#allocation4 + $0x1c0] ss:$16 sps:$4 sm:$0xff]   ;;  %v10284_v24 = vld [vmem:[#allocation4 + $0x88] ss:$16 sps:$4 sm:$0xff]  }
  0x44   :  { %918 = vmatpush1.bf16.msra.mxu1 %v10197_v25  ;;  %878 = vmatprep.subr.bf16.mxu0 %v10198_v26  ;;  %v10224_v43 = vld [vmem:[#allocation4 + $0x3c4] ss:$16 sps:$4 sm:$0xff]   ;;  %v10227_v45 = vld [vmem:[#allocation4 + $0x3c0] ss:$16 sps:$4 sm:$0xff]   ;;  %v10287_v25 = vld [vmem:[#allocation4 + $0x288] ss:$16 sps:$4 sm:$0xff]  }
  0x45   :  { %919 = vmatprep.subr.bf16.mxu1 %v10200_v27  ;;  %v10228_v46 = vld [vmem:[#allocation4 + $0x1a4] ss:$16 sps:$4 sm:$0xff]   ;;  %v10232_v48 = vld [vmem:[#allocation4 + $0x1a0] ss:$16 sps:$4 sm:$0xff]   ;;  %v10292_v26 = vld [vmem:[#allocation4 + $0x6c] ss:$16 sps:$4 sm:$0xff]  }
  0x46   :  { %v10230_v47 = vld [vmem:[#allocation4 + $0x3a4] ss:$16 sps:$4 sm:$0xff]   ;;  %v10233_v49 = vld [vmem:[#allocation4 + $0x3a0] ss:$16 sps:$4 sm:$0xff]   ;;  %v10295_v27 = vld [vmem:[#allocation4 + $0x26c] ss:$16 sps:$4 sm:$0xff]  }
  0x47   :  { %879 = vmatpush1.bf16.msra.mxu0 %v10202_v28  ;;  %v10234_v50 = vld [vmem:[#allocation4 + $0x184] ss:$16 sps:$4 sm:$0xff]   ;;  %v10238_v52 = vld [vmem:[#allocation4 + $0x180] ss:$16 sps:$4 sm:$0xff]   ;;  %v10290_v28 = vld [vmem:[#allocation4 + $0x68] ss:$16 sps:$4 sm:$0xff]  }
  0x48   :  { %920 = vmatpush1.bf16.msra.mxu1 %v10203_v29  ;;  %880 = vmatprep.subr.bf16.mxu0 %v10204_v30  ;;  %v10236_v51 = vld [vmem:[#allocation4 + $0x384] ss:$16 sps:$4 sm:$0xff]   ;;  %v10239_v53 = vld [vmem:[#allocation4 + $0x380] ss:$16 sps:$4 sm:$0xff]   ;;  %v10301_v29 = vld [vmem:[#allocation4 + $0x24c] ss:$16 sps:$4 sm:$0xff]  }
  0x49   :  { %921 = vmatprep.subr.bf16.mxu1 %v10206_v31  ;;  %v10240_v54 = vld [vmem:[#allocation4 + $0x164] ss:$16 sps:$4 sm:$0xff]   ;;  %v10244_v56 = vld [vmem:[#allocation4 + $0x160] ss:$16 sps:$4 sm:$0xff]   ;;  %v10296_v30 = vld [vmem:[#allocation4 + $0x48] ss:$16 sps:$4 sm:$0xff]  }
  0x4a   :  { %v10242_v55 = vld [vmem:[#allocation4 + $0x364] ss:$16 sps:$4 sm:$0xff]   ;;  %v10245_v57 = vld [vmem:[#allocation4 + $0x360] ss:$16 sps:$4 sm:$0xff]   ;;  %v10299_v31 = vld [vmem:[#allocation4 + $0x248] ss:$16 sps:$4 sm:$0xff]  }
  0x4b   :  { %881 = vmatpush1.bf16.msra.mxu0 %v10208_v32  ;;  %v10246_v58 = vld [vmem:[#allocation4 + $0x144] ss:$16 sps:$4 sm:$0xff]   ;;  %v10250_v60 = vld [vmem:[#allocation4 + $0x140] ss:$16 sps:$4 sm:$0xff]   ;;  %v10304_v32 = vld [vmem:[#allocation4 + $0x2c] ss:$16 sps:$4 sm:$0xff]  }
  0x4c   :  { %922 = vmatpush1.bf16.msra.mxu1 %v10209_v33  ;;  %882 = vmatprep.subr.bf16.mxu0 %v10210_v34  ;;  %v10248_v59 = vld [vmem:[#allocation4 + $0x344] ss:$16 sps:$4 sm:$0xff]   ;;  %v10251_v61 = vld [vmem:[#allocation4 + $0x340] ss:$16 sps:$4 sm:$0xff]   ;;  %v10307_v33 = vld [vmem:[#allocation4 + $0x22c] ss:$16 sps:$4 sm:$0xff]  }
  0x4d   :  { %923 = vmatprep.subr.bf16.mxu1 %v10212_v35  ;;  %v10252_v62 = vld [vmem:[#allocation4 + $0x124] ss:$16 sps:$4 sm:$0xff]   ;;  %v10256_v2 = vld [vmem:[#allocation4 + $0x120] ss:$16 sps:$4 sm:$0xff]   ;;  %v10302_v34 = vld [vmem:[#allocation4 + $0x28] ss:$16 sps:$4 sm:$0xff]  }
  0x4e   :  { %v10254_v63 = vld [vmem:[#allocation4 + $0x324] ss:$16 sps:$4 sm:$0xff]   ;;  %v10257_v3 = vld [vmem:[#allocation4 + $0x320] ss:$16 sps:$4 sm:$0xff]   ;;  %v10305_v35 = vld [vmem:[#allocation4 + $0x228] ss:$16 sps:$4 sm:$0xff]  }
  0x4f   :  { %883 = vmatpush1.bf16.msra.mxu0 %v10214_v36  ;;  %v10258_v4 = vld [vmem:[#allocation4 + $0x104] ss:$16 sps:$4 sm:$0xff]   ;;  %v10262_v8 = vld [vmem:[#allocation4 + $0x100] ss:$16 sps:$4 sm:$0xff]   ;;  %v10310_v36 = vld [vmem:[#allocation4 + $0xc] ss:$16 sps:$4 sm:$0xff]  }
  0x50   :  { %924 = vmatpush1.bf16.msra.mxu1 %v10215_v37  ;;  %884 = vmatprep.subr.bf16.mxu0 %v10216_v38  ;;  %v10260_v7 = vld [vmem:[#allocation4 + $0x304] ss:$16 sps:$4 sm:$0xff]   ;;  %v10263_v9 = vld [vmem:[#allocation4 + $0x300] ss:$16 sps:$4 sm:$0xff]   ;;  %v10313_v37 = vld [vmem:[#allocation4 + $0x20c] ss:$16 sps:$4 sm:$0xff]  }
  0x51   :  { %925 = vmatprep.subr.bf16.mxu1 %v10218_v39  ;;  %v10308_v38 = vld [vmem:[#allocation4 + $0x8] ss:$16 sps:$4 sm:$0xff]  }
  0x52   :  { %v10311_v39 = vld [vmem:[#allocation4 + $0x208] ss:$16 sps:$4 sm:$0xff]  }
  0x53   :  { %885 = vmatpush2.bf16.msra.mxu0 %v10220_v40  ;;  %v10316_v40 = vld [vmem:[#allocation4 + $0x1ec] ss:$16 sps:$4 sm:$0xff]  }
  0x54   :  { %926 = vmatpush2.bf16.msra.mxu1 %v10221_v41  ;;  %886 = vmatprep.subr.bf16.mxu0 %v10222_v42  ;;  %v10319_v41 = vld [vmem:[#allocation4 + $0x3ec] ss:$16 sps:$4 sm:$0xff]   ;;  %v10314_v42 = vld [vmem:[#allocation4 + $0x1e8] ss:$16 sps:$4 sm:$0xff]  }
  0x55   :  { %927 = vmatprep.subr.bf16.mxu1 %v10224_v43  ;;  %v10317_v43 = vld [vmem:[#allocation4 + $0x3e8] ss:$16 sps:$4 sm:$0xff]  }
  0x57   :  { %887 = vmatpush2.bf16.msra.mxu0 %v10226_v44  ;;  %v10322_v44 = vld [vmem:[#allocation4 + $0x1cc] ss:$16 sps:$4 sm:$0xff]  }
  0x58   :  { %928 = vmatpush2.bf16.msra.mxu1 %v10227_v45  ;;  %888 = vmatprep.subr.bf16.mxu0 %v10228_v46  ;;  %v10325_v45 = vld [vmem:[#allocation4 + $0x3cc] ss:$16 sps:$4 sm:$0xff]   ;;  %v10320_v46 = vld [vmem:[#allocation4 + $0x1c8] ss:$16 sps:$4 sm:$0xff]  }
  0x59   :  { %929 = vmatprep.subr.bf16.mxu1 %v10230_v47  ;;  %v10323_v47 = vld [vmem:[#allocation4 + $0x3c8] ss:$16 sps:$4 sm:$0xff]  }
  0x5b   :  { %889 = vmatpush2.bf16.msra.mxu0 %v10232_v48  ;;  %v10328_v48 = vld [vmem:[#allocation4 + $0x1ac] ss:$16 sps:$4 sm:$0xff]  }
  0x5c   :  { %930 = vmatpush2.bf16.msra.mxu1 %v10233_v49  ;;  %890 = vmatprep.subr.bf16.mxu0 %v10234_v50  ;;  %v10331_v49 = vld [vmem:[#allocation4 + $0x3ac] ss:$16 sps:$4 sm:$0xff]   ;;  %v10326_v50 = vld [vmem:[#allocation4 + $0x1a8] ss:$16 sps:$4 sm:$0xff]  }
  0x5d   :  { %931 = vmatprep.subr.bf16.mxu1 %v10236_v51  ;;  %v10329_v51 = vld [vmem:[#allocation4 + $0x3a8] ss:$16 sps:$4 sm:$0xff]  }
  0x5f   :  { %891 = vmatpush2.bf16.msra.mxu0 %v10238_v52  ;;  %v10334_v52 = vld [vmem:[#allocation4 + $0x18c] ss:$16 sps:$4 sm:$0xff]  }
  0x60   :  { %932 = vmatpush2.bf16.msra.mxu1 %v10239_v53  ;;  %892 = vmatprep.subr.bf16.mxu0 %v10240_v54  ;;  %v10337_v53 = vld [vmem:[#allocation4 + $0x38c] ss:$16 sps:$4 sm:$0xff]   ;;  %v10332_v54 = vld [vmem:[#allocation4 + $0x188] ss:$16 sps:$4 sm:$0xff]  }
  0x61   :  { %933 = vmatprep.subr.bf16.mxu1 %v10242_v55  ;;  %v10335_v55 = vld [vmem:[#allocation4 + $0x388] ss:$16 sps:$4 sm:$0xff]  }
  0x63   :  { %893 = vmatpush2.bf16.msra.mxu0 %v10244_v56  ;;  %v10340_v56 = vld [vmem:[#allocation4 + $0x16c] ss:$16 sps:$4 sm:$0xff]  }
  0x64   :  { %934 = vmatpush2.bf16.msra.mxu1 %v10245_v57  ;;  %894 = vmatprep.subr.bf16.mxu0 %v10246_v58  ;;  %v10343_v57 = vld [vmem:[#allocation4 + $0x36c] ss:$16 sps:$4 sm:$0xff]   ;;  %v10338_v58 = vld [vmem:[#allocation4 + $0x168] ss:$16 sps:$4 sm:$0xff]  }
  0x65   :  { %935 = vmatprep.subr.bf16.mxu1 %v10248_v59  ;;  %v10341_v59 = vld [vmem:[#allocation4 + $0x368] ss:$16 sps:$4 sm:$0xff]  }
  0x67   :  { %895 = vmatpush2.bf16.msra.mxu0 %v10250_v60  ;;  %v10346_v60 = vld [vmem:[#allocation4 + $0x14c] ss:$16 sps:$4 sm:$0xff]  }
  0x68   :  { %936 = vmatpush2.bf16.msra.mxu1 %v10251_v61  ;;  %896 = vmatprep.subr.bf16.mxu0 %v10252_v62  ;;  %v10349_v61 = vld [vmem:[#allocation4 + $0x34c] ss:$16 sps:$4 sm:$0xff]   ;;  %v10344_v62 = vld [vmem:[#allocation4 + $0x148] ss:$16 sps:$4 sm:$0xff]  }
  0x69   :  { %937 = vmatprep.subr.bf16.mxu1 %v10254_v63  ;;  %v10347_v63 = vld [vmem:[#allocation4 + $0x348] ss:$16 sps:$4 sm:$0xff]  }
  0x6b   :  { %897 = vmatpush2.bf16.msra.mxu0 %v10256_v2  ;;  %v10352_v2 = vld [vmem:[#allocation4 + $0x12c] ss:$16 sps:$4 sm:$0xff]  }
  0x6c   :  { %938 = vmatpush2.bf16.msra.mxu1 %v10257_v3  ;;  %898 = vmatprep.subr.bf16.mxu0 %v10258_v4  ;;  %v10355_v3 = vld [vmem:[#allocation4 + $0x32c] ss:$16 sps:$4 sm:$0xff]   ;;  %v10350_v4 = vld [vmem:[#allocation4 + $0x128] ss:$16 sps:$4 sm:$0xff]  }
  0x6d   :  { %939 = vmatprep.subr.bf16.mxu1 %v10260_v7  ;;  %v10353_v7 = vld [vmem:[#allocation4 + $0x328] ss:$16 sps:$4 sm:$0xff]  }
  0x6f   :  { %899 = vmatpush2.bf16.msra.mxu0 %v10262_v8  ;;  %v10358_v8 = vld [vmem:[#allocation4 + $0x10c] ss:$16 sps:$4 sm:$0xff]  }
  0x70   :  { %940 = vmatpush2.bf16.msra.mxu1 %v10263_v9  ;;  %950 = vmatprep.subr.bf16.mxu0 %v10268_v10  ;;  %v10361_v9 = vld [vmem:[#allocation4 + $0x30c] ss:$16 sps:$4 sm:$0xff]   ;;  %v10356_v10 = vld [vmem:[#allocation4 + $0x108] ss:$16 sps:$4 sm:$0xff]  }
  0x71   :  { %991 = vmatprep.subr.bf16.mxu1 %v10271_v11  ;;  %v10359_v11 = vld [vmem:[#allocation4 + $0x308] ss:$16 sps:$4 sm:$0xff]  }
  0x72   :  { %901 = vmatmul.mubr.bf16.vlgmr.msra.gmra.mxu0 %v11709_v12 }
  0x73   :  { %942 = vmatmul.mubr.bf16.vlgmr.msra.gmra.mxu1 %v11713_v13  ;;  %951 = vmatpush1.bf16.msra.mxu0 %v10266_v14  ;;  %v13573_v14 = vlaneseq }
  0x74   :  { %992 = vmatpush1.bf16.msra.mxu1 %v10269_v15  ;;  %952 = vmatprep.subr.bf16.mxu0 %v10274_v16 }
  0x75   :  { %993 = vmatprep.subr.bf16.mxu1 %v10277_v17  ;;  %982 = vmatprep.mubr.bf16.mxu0 %v11701_v5  ;;  %v10293_v5 = vld [vmem:[#allocation4 + $0x268] ss:$16 sps:$4 sm:$0xff]   ;;  %v209_v15 = vshrl.u32 %v13573_v14, 7  ;;  %v206_v17 = vld [vmem:[#allocation9] sm:$0xf] }
  0x76   :  { %1023 = vmatprep.mubr.bf16.mxu1 %v11703_v6  ;;  %v10298_v6 = vld [vmem:[#allocation4 + $0x4c] ss:$16 sps:$4 sm:$0xff]  }
  0x77   :  { %953 = vmatpush1.bf16.msra.mxu0 %v10272_v18  ;;  %v11722_v16 = vsub.s32 0, %v209_v15  ;;  %v11724_v18 = vsub.s32 1, %v209_v15 }
  0x78   :  { %994 = vmatpush1.bf16.msra.mxu1 %v10275_v19  ;;  %954 = vmatprep.subr.bf16.mxu0 %v10280_v0 }
  0x79   :  { %995 = vmatprep.subr.bf16.mxu1 %v10283_v1  ;;  %13847 = vst [vmem:[#allocation44_spill] sm:$0xff] %v11722_v16  ;;  %13848 = vst [vmem:[#allocation45_spill] sm:$0xff] %v11724_v18  ;;  %v211_v19 = vrot.slane %v206_v17, %v11722_v16  ;;  %v215_v0 = vrot.slane %v206_v17, %v11724_v18 }
  0x7b   :  { %955 = vmatpush1.bf16.msra.mxu0 %v10278_v20 }
  0x7c   :  { %996 = vmatpush1.bf16.msra.mxu1 %v10281_v21  ;;  %956 = vmatprep.subr.bf16.mxu0 %v10286_v22 }
  0x7d   :  { %997 = vmatprep.subr.bf16.mxu1 %v10289_v23 }
  0x7f   :  { %957 = vmatpush1.bf16.msra.mxu0 %v10284_v24 }
  0x80   :  { %998 = vmatpush1.bf16.msra.mxu1 %v10287_v25  ;;  %958 = vmatprep.subr.bf16.mxu0 %v10292_v26 }
  0x81   :  { %999 = vmatprep.subr.bf16.mxu1 %v10295_v27 }
  0x83   :  { %959 = vmatpush1.bf16.msra.mxu0 %v10290_v28 }
  0x84   :  { %1000 = vmatpush1.bf16.msra.mxu1 %v10293_v5  ;;  %960 = vmatprep.subr.bf16.mxu0 %v10298_v6 }
  0x85   :  { %1001 = vmatprep.subr.bf16.mxu1 %v10301_v29 }
  0x87   :  { %961 = vmatpush1.bf16.msra.mxu0 %v10296_v30  ;;  %v11733_v30 = vsub.s32 2, %v209_v15 }
  0x88   :  { %1002 = vmatpush1.bf16.msra.mxu1 %v10299_v31  ;;  %962 = vmatprep.subr.bf16.mxu0 %v10304_v32  ;;  %v11735_v31 = vsub.s32 3, %v209_v15 }
  0x89   :  { %1003 = vmatprep.subr.bf16.mxu1 %v10307_v33  ;;  %13849 = vst [vmem:[#allocation46_spill] sm:$0xff] %v11733_v30  ;;  %v219_v32 = vrot.slane %v206_v17, %v11733_v30 }
  0x8a   :  { %13850 = vst [vmem:[#allocation47_spill] sm:$0xff] %v11735_v31  ;;  %v223_v33 = vrot.slane %v206_v17, %v11735_v31 }
  0x8b   :  { %963 = vmatpush1.bf16.msra.mxu0 %v10302_v34 }
  0x8c   :  { %1004 = vmatpush1.bf16.msra.mxu1 %v10305_v35  ;;  %964 = vmatprep.subr.bf16.mxu0 %v10310_v36 }
  0x8d   :  { %1005 = vmatprep.subr.bf16.mxu1 %v10313_v37 }
  0x8f   :  { %965 = vmatpush1.bf16.msra.mxu0 %v10308_v38 }
  0x90   :  { %1006 = vmatpush1.bf16.msra.mxu1 %v10311_v39  ;;  %966 = vmatprep.subr.bf16.mxu0 %v10316_v40 }
  0x91   :  { %1007 = vmatprep.subr.bf16.mxu1 %v10319_v41 }
  0x93   :  { %967 = vmatpush2.bf16.msra.mxu0 %v10314_v42 }
  0x94   :  { %1008 = vmatpush2.bf16.msra.mxu1 %v10317_v43  ;;  %968 = vmatprep.subr.bf16.mxu0 %v10322_v44 }
  0x95   :  { %1009 = vmatprep.subr.bf16.mxu1 %v10325_v45 }
  0x97   :  { %969 = vmatpush2.bf16.msra.mxu0 %v10320_v46 }
  0x98   :  { %1010 = vmatpush2.bf16.msra.mxu1 %v10323_v47  ;;  %970 = vmatprep.subr.bf16.mxu0 %v10328_v48 }
  0x99   :  { %1011 = vmatprep.subr.bf16.mxu1 %v10331_v49 }
  0x9b   :  { %971 = vmatpush2.bf16.msra.mxu0 %v10326_v50 }
  0x9c   :  { %1012 = vmatpush2.bf16.msra.mxu1 %v10329_v51  ;;  %972 = vmatprep.subr.bf16.mxu0 %v10334_v52 }
  0x9d   :  { %1013 = vmatprep.subr.bf16.mxu1 %v10337_v53 }
  0x9f   :  { %973 = vmatpush2.bf16.msra.mxu0 %v10332_v54 }
  0xa0   :  { %1014 = vmatpush2.bf16.msra.mxu1 %v10335_v55  ;;  %974 = vmatprep.subr.bf16.mxu0 %v10340_v56 }
  0xa1   :  { %1015 = vmatprep.subr.bf16.mxu1 %v10343_v57 }
  0xa3   :  { %975 = vmatpush2.bf16.msra.mxu0 %v10338_v58 }
  0xa4   :  { %1016 = vmatpush2.bf16.msra.mxu1 %v10341_v59  ;;  %976 = vmatprep.subr.bf16.mxu0 %v10346_v60 }
  0xa5   :  { %1017 = vmatprep.subr.bf16.mxu1 %v10349_v61 }
  0xa7   :  { %977 = vmatpush2.bf16.msra.mxu0 %v10344_v62 }
  0xa8   :  { %1018 = vmatpush2.bf16.msra.mxu1 %v10347_v63  ;;  %978 = vmatprep.subr.bf16.mxu0 %v10352_v2 }
  0xa9   :  { %1019 = vmatprep.subr.bf16.mxu1 %v10355_v3 }
  0xab   :  { %979 = vmatpush2.bf16.msra.mxu0 %v10350_v4 }
  0xac   :  { %1020 = vmatpush2.bf16.msra.mxu1 %v10353_v7  ;;  %980 = vmatprep.subr.bf16.mxu0 %v10358_v8 }
  0xad   :  { %1021 = vmatprep.subr.bf16.mxu1 %v10361_v9 }
  0xaf   :  { %981 = vmatpush2.bf16.msra.mxu0 %v10356_v10 }
  0xb0   :  { %1022 = vmatpush2.bf16.msra.mxu1 %v10359_v11 }
  0xb2   :  { %983 = vmatmul.mubr.bf16.vlgmr.msra.gmra.mxu0 %v11709_v12 }
  0xb3   :  { %1024 = vmatmul.mubr.bf16.vlgmr.msra.gmra.mxu1 %v11713_v13 }
 0x132   :  { %v902_v1 = vpop.f32.mrf.mxu0 }
 0x133   :  { %v943_v20 = vpop.f32.mrf.mxu1  ;;  %v903_v21 = vadd.f32 %v902_v1, %v211_v19 }
 0x134   :  { %v904_v22 = vpop.f32.mrf.mxu0 }
 0x135   :  { %v945_v23 = vpop.f32.mrf.mxu1  ;;  %v944_v12 = vadd.f32 %v943_v20, %v903_v21  ;;  %v905_v24 = vadd.f32 %v904_v22, %v215_v0 }
 0x136   :  { %v906_v13 = vpop.f32.mrf.mxu0 }
 0x137   :  { %v947_v25 = vpop.f32.mrf.mxu1  ;;  %v1032_v26 = vmax.f32 %v944_v12, 0.0  ;;  %v946_v27 = vadd.f32 %v945_v23, %v905_v24 }
 0x138   :  { %v907_v28 = vpop.f32.mrf.mxu0 }
 0x139   :  { %v948_v5 = vpop.f32.mrf.mxu1  ;;  %v11728_v6 = vmax.f32 %v946_v27, 0.0 }
 0x13b   :  { %v11731_v29 = vcombine.low %v1032_v26, %v11728_v6 }
 0x172   :  { %v984_v34 = vpop.f32.mrf.mxu0 }
 0x173   :  { %v1025_v35 = vpop.f32.mrf.mxu1  ;;  %v985_v36 = vadd.f32 %v984_v34, %v219_v32 }
 0x174   :  { %v986_v37 = vpop.f32.mrf.mxu0 }
 0x175   :  { %v1027_v38 = vpop.f32.mrf.mxu1  ;;  %v1026_v39 = vadd.f32 %v1025_v35, %v985_v36  ;;  %v987_v40 = vadd.f32 %v986_v37, %v223_v33 }
 0x176   :  { %v988_v41 = vpop.f32.mrf.mxu0 }
 0x177   :  { %v1029_v42 = vpop.f32.mrf.mxu1  ;;  %v1028_v43 = vadd.f32 %v1027_v38, %v987_v40  ;;  %v1034_v46 = vmax.f32 %v1026_v39, 0.0 }
 0x178   :  { %v989_v44 = vpop.f32.mrf.mxu0 }
 0x179   :  { %v1030_v45 = vpop.f32.mrf.mxu1  ;;  %v11739_v47 = vmax.f32 %v1028_v43, 0.0 }
 0x17b   :  { %v11742_v48 = vcombine.low %v1034_v46, %v11739_v47 }
 0x17c   :  { %11610 = dma.done.wait [#allocation5 + $0x1], 16384 }
 0x17d   :  { %11611 = vsyncadd [#allocation5 + $0x1], 4294950912  ;;  %s1048_s9 = scalar_lea.hbm %s13570_s1, 32768 }
 0x17e   :  { %11444 = shalt.err (!%p11667_p0)  }
 0x17f   :  { %1059 = dma.hbm_to_vmem [thread:$0]  %s1048_s9, 16384, %s11660_s23, [#allocation5]  ;;  %v11750_v49 = vld [vmem:[#allocation6] sm:$0xff]  ;;  %v11752_v50 = vld [vmem:[#allocation6 + $0x8] sm:$0xff] }
 0x180   :  { %v10362_v51 = vld [vmem:[#allocation4 + $0x4e4] ss:$16 sps:$4 sm:$0xff]   ;;  %v1064_v52 = vcombine.high %v11750_v49, %v11750_v49  ;;  %v1065_v53 = vcombine.high %v11752_v50, %v11752_v50  ;;  %v10366_v55 = vld [vmem:[#allocation4 + $0x4e0] ss:$16 sps:$4 sm:$0xff]  }
 0x181   :  { %v10364_v54 = vld [vmem:[#allocation4 + $0x6e4] ss:$16 sps:$4 sm:$0xff]   ;;  %1862 = vmatprep.subr.bf16.mxu0 %v10362_v51  ;;  %v10367_v56 = vld [vmem:[#allocation4 + $0x6e0] ss:$16 sps:$4 sm:$0xff]  }
 0x182   :  { %v11758_v57 = vpack.c.bf16 %v1064_v52, %v1064_v52  ;;  %v11760_v58 = vpack.c.bf16 %v1065_v53, %v1065_v53  ;;  %1903 = vmatprep.subr.bf16.mxu1 %v10364_v54  ;;  %v10368_v59 = vld [vmem:[#allocation4 + $0x4c4] ss:$16 sps:$4 sm:$0xff]   ;;  %1863 = vmatpush1.bf16.msra.mxu0 %v10366_v55  ;;  %v10372_v61 = vld [vmem:[#allocation4 + $0x4c0] ss:$16 sps:$4 sm:$0xff]  }
 0x183   :  { %1904 = vmatpush1.bf16.msra.mxu1 %v10367_v56  ;;  %v10370_v60 = vld [vmem:[#allocation4 + $0x6c4] ss:$16 sps:$4 sm:$0xff]   ;;  %1864 = vmatprep.subr.bf16.mxu0 %v10368_v59  ;;  %v10373_v62 = vld [vmem:[#allocation4 + $0x6c0] ss:$16 sps:$4 sm:$0xff]  }
 0x184   :  { %1894 = vmatprep.mubr.bf16.mxu0 %v11758_v57  ;;  %1905 = vmatprep.subr.bf16.mxu1 %v10370_v60  ;;  %v10374_v63 = vld [vmem:[#allocation4 + $0x4a4] ss:$16 sps:$4 sm:$0xff]   ;;  %v10378_v3 = vld [vmem:[#allocation4 + $0x4a0] ss:$16 sps:$4 sm:$0xff]  }
 0x185   :  { %1935 = vmatprep.mubr.bf16.mxu1 %v11760_v58  ;;  %v10376_v2 = vld [vmem:[#allocation4 + $0x6a4] ss:$16 sps:$4 sm:$0xff]   ;;  %v10379_v4 = vld [vmem:[#allocation4 + $0x6a0] ss:$16 sps:$4 sm:$0xff]  }
 0x186   :  { %1865 = vmatpush1.bf16.msra.mxu0 %v10372_v61  ;;  %v10380_v7 = vld [vmem:[#allocation4 + $0x484] ss:$16 sps:$4 sm:$0xff]   ;;  %v10384_v9 = vld [vmem:[#allocation4 + $0x480] ss:$16 sps:$4 sm:$0xff]  }
 0x187   :  { %1906 = vmatpush1.bf16.msra.mxu1 %v10373_v62  ;;  %1866 = vmatprep.subr.bf16.mxu0 %v10374_v63  ;;  %v10382_v8 = vld [vmem:[#allocation4 + $0x684] ss:$16 sps:$4 sm:$0xff]   ;;  %v10385_v10 = vld [vmem:[#allocation4 + $0x680] ss:$16 sps:$4 sm:$0xff]  }
 0x188   :  { %1907 = vmatprep.subr.bf16.mxu1 %v10376_v2  ;;  %v10386_v11 = vld [vmem:[#allocation4 + $0x464] ss:$16 sps:$4 sm:$0xff]   ;;  %v10390_v17 = vld [vmem:[#allocation4 + $0x460] ss:$16 sps:$4 sm:$0xff]  }
 0x189   :  { %v10388_v15 = vld [vmem:[#allocation4 + $0x664] ss:$16 sps:$4 sm:$0xff]   ;;  %v10391_v19 = vld [vmem:[#allocation4 + $0x660] ss:$16 sps:$4 sm:$0xff]  }
 0x18a   :  { %1867 = vmatpush1.bf16.msra.mxu0 %v10378_v3  ;;  %v10392_v0 = vld [vmem:[#allocation4 + $0x444] ss:$16 sps:$4 sm:$0xff]   ;;  %v10396_v20 = vld [vmem:[#allocation4 + $0x440] ss:$16 sps:$4 sm:$0xff]  }
 0x18b   :  { %1908 = vmatpush1.bf16.msra.mxu1 %v10379_v4  ;;  %1868 = vmatprep.subr.bf16.mxu0 %v10380_v7  ;;  %v10394_v1 = vld [vmem:[#allocation4 + $0x644] ss:$16 sps:$4 sm:$0xff]   ;;  %v10397_v21 = vld [vmem:[#allocation4 + $0x640] ss:$16 sps:$4 sm:$0xff]  }
 0x18c   :  { %1909 = vmatprep.subr.bf16.mxu1 %v10382_v8  ;;  %v10398_v22 = vld [vmem:[#allocation4 + $0x424] ss:$16 sps:$4 sm:$0xff]   ;;  %v10402_v12 = vld [vmem:[#allocation4 + $0x420] ss:$16 sps:$4 sm:$0xff]   ;;  %v10462_v8 = vld [vmem:[#allocation4 + $0x4ec] ss:$16 sps:$4 sm:$0xff]  }
 0x18d   :  { %v10400_v23 = vld [vmem:[#allocation4 + $0x624] ss:$16 sps:$4 sm:$0xff]   ;;  %v10403_v24 = vld [vmem:[#allocation4 + $0x620] ss:$16 sps:$4 sm:$0xff]  }
 0x18e   :  { %1869 = vmatpush1.bf16.msra.mxu0 %v10384_v9  ;;  %v10404_v13 = vld [vmem:[#allocation4 + $0x404] ss:$16 sps:$4 sm:$0xff]   ;;  %v10408_v26 = vld [vmem:[#allocation4 + $0x400] ss:$16 sps:$4 sm:$0xff]   ;;  %v10465_v9 = vld [vmem:[#allocation4 + $0x6ec] ss:$16 sps:$4 sm:$0xff]  }
 0x18f   :  { %1910 = vmatpush1.bf16.msra.mxu1 %v10385_v10  ;;  %1870 = vmatprep.subr.bf16.mxu0 %v10386_v11  ;;  %v10406_v25 = vld [vmem:[#allocation4 + $0x604] ss:$16 sps:$4 sm:$0xff]   ;;  %v10409_v27 = vld [vmem:[#allocation4 + $0x600] ss:$16 sps:$4 sm:$0xff]   ;;  %v11766_v10 = vpack.c.bf16 %v11750_v49, %v11750_v49  ;;  %v11770_v11 = vpack.c.bf16 %v11752_v50, %v11752_v50  ;;  %v10474_v49 = vld [vmem:[#allocation4 + $0x4ac] ss:$16 sps:$4 sm:$0xff]  }
 0x190   :  { %1911 = vmatprep.subr.bf16.mxu1 %v10388_v15  ;;  %v10410_v28 = vld [vmem:[#allocation4 + $0x5e4] ss:$16 sps:$4 sm:$0xff]   ;;  %v10414_v32 = vld [vmem:[#allocation4 + $0x5e0] ss:$16 sps:$4 sm:$0xff]   ;;  %v10460_v15 = vld [vmem:[#allocation4 + $0x4e8] ss:$16 sps:$4 sm:$0xff]  }
 0x191   :  { %v10412_v5 = vld [vmem:[#allocation4 + $0x7e4] ss:$16 sps:$4 sm:$0xff]   ;;  %v10415_v33 = vld [vmem:[#allocation4 + $0x7e0] ss:$16 sps:$4 sm:$0xff]   ;;  %v10477_v50 = vld [vmem:[#allocation4 + $0x6ac] ss:$16 sps:$4 sm:$0xff]  }
 0x192   :  { %1871 = vmatpush1.bf16.msra.mxu0 %v10390_v17  ;;  %v10416_v34 = vld [vmem:[#allocation4 + $0x5c4] ss:$16 sps:$4 sm:$0xff]   ;;  %v10420_v36 = vld [vmem:[#allocation4 + $0x5c0] ss:$16 sps:$4 sm:$0xff]   ;;  %v10463_v17 = vld [vmem:[#allocation4 + $0x6e8] ss:$16 sps:$4 sm:$0xff]  }
 0x193   :  { %1912 = vmatpush1.bf16.msra.mxu1 %v10391_v19  ;;  %1872 = vmatprep.subr.bf16.mxu0 %v10392_v0  ;;  %v10418_v35 = vld [vmem:[#allocation4 + $0x7c4] ss:$16 sps:$4 sm:$0xff]   ;;  %v10421_v37 = vld [vmem:[#allocation4 + $0x7c0] ss:$16 sps:$4 sm:$0xff]   ;;  %v10468_v19 = vld [vmem:[#allocation4 + $0x4cc] ss:$16 sps:$4 sm:$0xff]  }
 0x194   :  { %1913 = vmatprep.subr.bf16.mxu1 %v10394_v1  ;;  %v10422_v38 = vld [vmem:[#allocation4 + $0x5a4] ss:$16 sps:$4 sm:$0xff]   ;;  %v10426_v40 = vld [vmem:[#allocation4 + $0x5a0] ss:$16 sps:$4 sm:$0xff]   ;;  %v10471_v0 = vld [vmem:[#allocation4 + $0x6cc] ss:$16 sps:$4 sm:$0xff]  }
 0x195   :  { %v10424_v39 = vld [vmem:[#allocation4 + $0x7a4] ss:$16 sps:$4 sm:$0xff]   ;;  %v10427_v41 = vld [vmem:[#allocation4 + $0x7a0] ss:$16 sps:$4 sm:$0xff]   ;;  %v10466_v1 = vld [vmem:[#allocation4 + $0x4c8] ss:$16 sps:$4 sm:$0xff]  }
 0x196   :  { %1873 = vmatpush1.bf16.msra.mxu0 %v10396_v20  ;;  %v10428_v42 = vld [vmem:[#allocation4 + $0x584] ss:$16 sps:$4 sm:$0xff]   ;;  %v10432_v44 = vld [vmem:[#allocation4 + $0x580] ss:$16 sps:$4 sm:$0xff]   ;;  %v10469_v20 = vld [vmem:[#allocation4 + $0x6c8] ss:$16 sps:$4 sm:$0xff]  }
 0x197   :  { %1914 = vmatpush1.bf16.msra.mxu1 %v10397_v21  ;;  %1874 = vmatprep.subr.bf16.mxu0 %v10398_v22  ;;  %v10430_v43 = vld [vmem:[#allocation4 + $0x784] ss:$16 sps:$4 sm:$0xff]   ;;  %v10433_v45 = vld [vmem:[#allocation4 + $0x780] ss:$16 sps:$4 sm:$0xff]   ;;  %v10472_v21 = vld [vmem:[#allocation4 + $0x4a8] ss:$16 sps:$4 sm:$0xff]  }
 0x198   :  { %1915 = vmatprep.subr.bf16.mxu1 %v10400_v23  ;;  %v10434_v46 = vld [vmem:[#allocation4 + $0x564] ss:$16 sps:$4 sm:$0xff]   ;;  %v10438_v52 = vld [vmem:[#allocation4 + $0x560] ss:$16 sps:$4 sm:$0xff]   ;;  %v10475_v22 = vld [vmem:[#allocation4 + $0x6a8] ss:$16 sps:$4 sm:$0xff]  }
 0x199   :  { %v10436_v51 = vld [vmem:[#allocation4 + $0x764] ss:$16 sps:$4 sm:$0xff]   ;;  %v10439_v53 = vld [vmem:[#allocation4 + $0x760] ss:$16 sps:$4 sm:$0xff]   ;;  %v10480_v23 = vld [vmem:[#allocation4 + $0x48c] ss:$16 sps:$4 sm:$0xff]  }
 0x19a   :  { %1875 = vmatpush1.bf16.msra.mxu0 %v10402_v12  ;;  %v10440_v54 = vld [vmem:[#allocation4 + $0x544] ss:$16 sps:$4 sm:$0xff]   ;;  %v10444_v56 = vld [vmem:[#allocation4 + $0x540] ss:$16 sps:$4 sm:$0xff]   ;;  %v10483_v12 = vld [vmem:[#allocation4 + $0x68c] ss:$16 sps:$4 sm:$0xff]  }
 0x19b   :  { %1916 = vmatpush1.bf16.msra.mxu1 %v10403_v24  ;;  %1876 = vmatprep.subr.bf16.mxu0 %v10404_v13  ;;  %v10442_v55 = vld [vmem:[#allocation4 + $0x744] ss:$16 sps:$4 sm:$0xff]   ;;  %v10445_v59 = vld [vmem:[#allocation4 + $0x740] ss:$16 sps:$4 sm:$0xff]   ;;  %v10478_v24 = vld [vmem:[#allocation4 + $0x488] ss:$16 sps:$4 sm:$0xff]  }
 0x19c   :  { %1917 = vmatprep.subr.bf16.mxu1 %v10406_v25  ;;  %v10446_v60 = vld [vmem:[#allocation4 + $0x524] ss:$16 sps:$4 sm:$0xff]   ;;  %v10450_v62 = vld [vmem:[#allocation4 + $0x520] ss:$16 sps:$4 sm:$0xff]   ;;  %v10481_v13 = vld [vmem:[#allocation4 + $0x688] ss:$16 sps:$4 sm:$0xff]  }
 0x19d   :  { %v10448_v61 = vld [vmem:[#allocation4 + $0x724] ss:$16 sps:$4 sm:$0xff]   ;;  %v10451_v63 = vld [vmem:[#allocation4 + $0x720] ss:$16 sps:$4 sm:$0xff]   ;;  %v10486_v25 = vld [vmem:[#allocation4 + $0x46c] ss:$16 sps:$4 sm:$0xff]  }
 0x19e   :  { %1877 = vmatpush1.bf16.msra.mxu0 %v10408_v26  ;;  %v10452_v2 = vld [vmem:[#allocation4 + $0x504] ss:$16 sps:$4 sm:$0xff]   ;;  %v10456_v4 = vld [vmem:[#allocation4 + $0x500] ss:$16 sps:$4 sm:$0xff]   ;;  %v10489_v26 = vld [vmem:[#allocation4 + $0x66c] ss:$16 sps:$4 sm:$0xff]  }
 0x19f   :  { %1918 = vmatpush1.bf16.msra.mxu1 %v10409_v27  ;;  %1878 = vmatprep.subr.bf16.mxu0 %v10410_v28  ;;  %v10454_v3 = vld [vmem:[#allocation4 + $0x704] ss:$16 sps:$4 sm:$0xff]   ;;  %v10457_v7 = vld [vmem:[#allocation4 + $0x700] ss:$16 sps:$4 sm:$0xff]   ;;  %v10484_v27 = vld [vmem:[#allocation4 + $0x468] ss:$16 sps:$4 sm:$0xff]  }
 0x1a0   :  { %1919 = vmatprep.subr.bf16.mxu1 %v10412_v5  ;;  %v10495_v28 = vld [vmem:[#allocation4 + $0x64c] ss:$16 sps:$4 sm:$0xff]   ;;  %v10490_v5 = vld [vmem:[#allocation4 + $0x448] ss:$16 sps:$4 sm:$0xff]  }
 0x1a2   :  { %1879 = vmatpush2.bf16.msra.mxu0 %v10414_v32  ;;  %v10493_v32 = vld [vmem:[#allocation4 + $0x648] ss:$16 sps:$4 sm:$0xff]  }
 0x1a3   :  { %1920 = vmatpush2.bf16.msra.mxu1 %v10415_v33  ;;  %1880 = vmatprep.subr.bf16.mxu0 %v10416_v34  ;;  %v10498_v33 = vld [vmem:[#allocation4 + $0x42c] ss:$16 sps:$4 sm:$0xff]  }
 0x1a4   :  { %1921 = vmatprep.subr.bf16.mxu1 %v10418_v35  ;;  %v10501_v34 = vld [vmem:[#allocation4 + $0x62c] ss:$16 sps:$4 sm:$0xff]   ;;  %v10496_v35 = vld [vmem:[#allocation4 + $0x428] ss:$16 sps:$4 sm:$0xff]  }
 0x1a6   :  { %1881 = vmatpush2.bf16.msra.mxu0 %v10420_v36  ;;  %v10499_v36 = vld [vmem:[#allocation4 + $0x628] ss:$16 sps:$4 sm:$0xff]  }
 0x1a7   :  { %1922 = vmatpush2.bf16.msra.mxu1 %v10421_v37  ;;  %1882 = vmatprep.subr.bf16.mxu0 %v10422_v38  ;;  %v10504_v37 = vld [vmem:[#allocation4 + $0x40c] ss:$16 sps:$4 sm:$0xff]  }
 0x1a8   :  { %1923 = vmatprep.subr.bf16.mxu1 %v10424_v39  ;;  %v10507_v38 = vld [vmem:[#allocation4 + $0x60c] ss:$16 sps:$4 sm:$0xff]   ;;  %v10502_v39 = vld [vmem:[#allocation4 + $0x408] ss:$16 sps:$4 sm:$0xff]  }
 0x1aa   :  { %1883 = vmatpush2.bf16.msra.mxu0 %v10426_v40  ;;  %v10505_v40 = vld [vmem:[#allocation4 + $0x608] ss:$16 sps:$4 sm:$0xff]  }
 0x1ab   :  { %1924 = vmatpush2.bf16.msra.mxu1 %v10427_v41  ;;  %1884 = vmatprep.subr.bf16.mxu0 %v10428_v42  ;;  %v10510_v41 = vld [vmem:[#allocation4 + $0x5ec] ss:$16 sps:$4 sm:$0xff]  }
 0x1ac   :  { %1925 = vmatprep.subr.bf16.mxu1 %v10430_v43  ;;  %v10513_v42 = vld [vmem:[#allocation4 + $0x7ec] ss:$16 sps:$4 sm:$0xff]   ;;  %v10508_v43 = vld [vmem:[#allocation4 + $0x5e8] ss:$16 sps:$4 sm:$0xff]  }
 0x1ae   :  { %1885 = vmatpush2.bf16.msra.mxu0 %v10432_v44  ;;  %v10511_v44 = vld [vmem:[#allocation4 + $0x7e8] ss:$16 sps:$4 sm:$0xff]  }
 0x1af   :  { %1926 = vmatpush2.bf16.msra.mxu1 %v10433_v45  ;;  %1886 = vmatprep.subr.bf16.mxu0 %v10434_v46  ;;  %v10516_v45 = vld [vmem:[#allocation4 + $0x5cc] ss:$16 sps:$4 sm:$0xff]  }
 0x1b0   :  { %1927 = vmatprep.subr.bf16.mxu1 %v10436_v51  ;;  %v10519_v46 = vld [vmem:[#allocation4 + $0x7cc] ss:$16 sps:$4 sm:$0xff]   ;;  %v10514_v51 = vld [vmem:[#allocation4 + $0x5c8] ss:$16 sps:$4 sm:$0xff]  }
 0x1b2   :  { %1887 = vmatpush2.bf16.msra.mxu0 %v10438_v52  ;;  %v10517_v52 = vld [vmem:[#allocation4 + $0x7c8] ss:$16 sps:$4 sm:$0xff]  }
 0x1b3   :  { %1928 = vmatpush2.bf16.msra.mxu1 %v10439_v53  ;;  %1888 = vmatprep.subr.bf16.mxu0 %v10440_v54  ;;  %v10522_v53 = vld [vmem:[#allocation4 + $0x5ac] ss:$16 sps:$4 sm:$0xff]  }
 0x1b4   :  { %1929 = vmatprep.subr.bf16.mxu1 %v10442_v55  ;;  %v10525_v54 = vld [vmem:[#allocation4 + $0x7ac] ss:$16 sps:$4 sm:$0xff]   ;;  %v10520_v55 = vld [vmem:[#allocation4 + $0x5a8] ss:$16 sps:$4 sm:$0xff]  }
 0x1b6   :  { %1889 = vmatpush2.bf16.msra.mxu0 %v10444_v56  ;;  %v10523_v56 = vld [vmem:[#allocation4 + $0x7a8] ss:$16 sps:$4 sm:$0xff]  }
 0x1b7   :  { %1930 = vmatpush2.bf16.msra.mxu1 %v10445_v59  ;;  %1890 = vmatprep.subr.bf16.mxu0 %v10446_v60  ;;  %v10528_v59 = vld [vmem:[#allocation4 + $0x58c] ss:$16 sps:$4 sm:$0xff]  }
 0x1b8   :  { %1931 = vmatprep.subr.bf16.mxu1 %v10448_v61  ;;  %v10531_v60 = vld [vmem:[#allocation4 + $0x78c] ss:$16 sps:$4 sm:$0xff]   ;;  %v10526_v61 = vld [vmem:[#allocation4 + $0x588] ss:$16 sps:$4 sm:$0xff]  }
 0x1ba   :  { %1891 = vmatpush2.bf16.msra.mxu0 %v10450_v62  ;;  %v10529_v62 = vld [vmem:[#allocation4 + $0x788] ss:$16 sps:$4 sm:$0xff]  }
 0x1bb   :  { %1932 = vmatpush2.bf16.msra.mxu1 %v10451_v63  ;;  %1892 = vmatprep.subr.bf16.mxu0 %v10452_v2  ;;  %v10534_v63 = vld [vmem:[#allocation4 + $0x56c] ss:$16 sps:$4 sm:$0xff]  }
 0x1bc   :  { %1933 = vmatprep.subr.bf16.mxu1 %v10454_v3  ;;  %v10537_v2 = vld [vmem:[#allocation4 + $0x76c] ss:$16 sps:$4 sm:$0xff]   ;;  %v10532_v3 = vld [vmem:[#allocation4 + $0x568] ss:$16 sps:$4 sm:$0xff]  }
 0x1be   :  { %1893 = vmatpush2.bf16.msra.mxu0 %v10456_v4  ;;  %v10535_v4 = vld [vmem:[#allocation4 + $0x768] ss:$16 sps:$4 sm:$0xff]  }
 0x1bf   :  { %1934 = vmatpush2.bf16.msra.mxu1 %v10457_v7  ;;  %1944 = vmatprep.subr.bf16.mxu0 %v10462_v8  ;;  %v10540_v7 = vld [vmem:[#allocation4 + $0x54c] ss:$16 sps:$4 sm:$0xff]  }
 0x1c0   :  { %1985 = vmatprep.subr.bf16.mxu1 %v10465_v9  ;;  %v10543_v8 = vld [vmem:[#allocation4 + $0x74c] ss:$16 sps:$4 sm:$0xff]   ;;  %v10538_v9 = vld [vmem:[#allocation4 + $0x548] ss:$16 sps:$4 sm:$0xff]  }
 0x1c1   :  { %1895 = vmatmul.mubr.bf16.vlgmr.msra.gmra.mxu0 %v11766_v10 }
 0x1c2   :  { %1936 = vmatmul.mubr.bf16.vlgmr.msra.gmra.mxu1 %v11770_v11  ;;  %1945 = vmatpush1.bf16.msra.mxu0 %v10460_v15  ;;  %v10541_v15 = vld [vmem:[#allocation4 + $0x748] ss:$16 sps:$4 sm:$0xff]  }
 0x1c3   :  { %1986 = vmatpush1.bf16.msra.mxu1 %v10463_v17  ;;  %1946 = vmatprep.subr.bf16.mxu0 %v10468_v19  ;;  %v10546_v17 = vld [vmem:[#allocation4 + $0x52c] ss:$16 sps:$4 sm:$0xff]  }
 0x1c4   :  { %1987 = vmatprep.subr.bf16.mxu1 %v10471_v0  ;;  %1976 = vmatprep.mubr.bf16.mxu0 %v11758_v57  ;;  %v10487_v57 = vld [vmem:[#allocation4 + $0x668] ss:$16 sps:$4 sm:$0xff]   ;;  %v10549_v19 = vld [vmem:[#allocation4 + $0x72c] ss:$16 sps:$4 sm:$0xff]  }
 0x1c5   :  { %2017 = vmatprep.mubr.bf16.mxu1 %v11760_v58  ;;  %v10492_v58 = vld [vmem:[#allocation4 + $0x44c] ss:$16 sps:$4 sm:$0xff]   ;;  %v10544_v0 = vld [vmem:[#allocation4 + $0x528] ss:$16 sps:$4 sm:$0xff]  }
 0x1c6   :  { %1947 = vmatpush1.bf16.msra.mxu0 %v10466_v1  ;;  %v10547_v1 = vld [vmem:[#allocation4 + $0x728] ss:$16 sps:$4 sm:$0xff]  }
 0x1c7   :  { %1988 = vmatpush1.bf16.msra.mxu1 %v10469_v20  ;;  %1948 = vmatprep.subr.bf16.mxu0 %v10474_v49  ;;  %v10552_v20 = vld [vmem:[#allocation4 + $0x50c] ss:$16 sps:$4 sm:$0xff]  }
 0x1c8   :  { %1989 = vmatprep.subr.bf16.mxu1 %v10477_v50  ;;  %v10555_v49 = vld [vmem:[#allocation4 + $0x70c] ss:$16 sps:$4 sm:$0xff]   ;;  %v10550_v50 = vld [vmem:[#allocation4 + $0x508] ss:$16 sps:$4 sm:$0xff]  }
 0x1ca   :  { %1949 = vmatpush1.bf16.msra.mxu0 %v10472_v21  ;;  %v10553_v21 = vld [vmem:[#allocation4 + $0x708] ss:$16 sps:$4 sm:$0xff]  }
 0x1cb   :  { %1990 = vmatpush1.bf16.msra.mxu1 %v10475_v22  ;;  %1950 = vmatprep.subr.bf16.mxu0 %v10480_v23  ;;  %v1200_v22 = vld [vmem:[#allocation9 + $0x4] sm:$0xf] }
 0x1cc   :  { %1991 = vmatprep.subr.bf16.mxu1 %v10483_v12  ;;  %v1205_v23 = vrot.slane %v1200_v22, %v11722_v16  ;;  %v1209_v12 = vrot.slane %v1200_v22, %v11724_v18 }
 0x1ce   :  { %1951 = vmatpush1.bf16.msra.mxu0 %v10478_v24 }
 0x1cf   :  { %1992 = vmatpush1.bf16.msra.mxu1 %v10481_v13  ;;  %1952 = vmatprep.subr.bf16.mxu0 %v10486_v25 }
 0x1d0   :  { %1993 = vmatprep.subr.bf16.mxu1 %v10489_v26 }
 0x1d2   :  { %1953 = vmatpush1.bf16.msra.mxu0 %v10484_v27 }
 0x1d3   :  { %1994 = vmatpush1.bf16.msra.mxu1 %v10487_v57  ;;  %1954 = vmatprep.subr.bf16.mxu0 %v10492_v58 }
 0x1d4   :  { %1995 = vmatprep.subr.bf16.mxu1 %v10495_v28 }
 0x1d6   :  { %1955 = vmatpush1.bf16.msra.mxu0 %v10490_v5 }
 0x1d7   :  { %1996 = vmatpush1.bf16.msra.mxu1 %v10493_v32  ;;  %1956 = vmatprep.subr.bf16.mxu0 %v10498_v33 }
 0x1d8   :  { %1997 = vmatprep.subr.bf16.mxu1 %v10501_v34 }
 0x1da   :  { %1957 = vmatpush1.bf16.msra.mxu0 %v10496_v35 }
 0x1db   :  { %1998 = vmatpush1.bf16.msra.mxu1 %v10499_v36  ;;  %1958 = vmatprep.subr.bf16.mxu0 %v10504_v37  ;;  %v1213_v36 = vrot.slane %v1200_v22, %v11733_v30  ;;  %v1217_v37 = vrot.slane %v1200_v22, %v11735_v31 }
 0x1dc   :  { %1999 = vmatprep.subr.bf16.mxu1 %v10507_v38 }
 0x1de   :  { %1959 = vmatpush1.bf16.msra.mxu0 %v10502_v39 }
 0x1df   :  { %2000 = vmatpush1.bf16.msra.mxu1 %v10505_v40  ;;  %1960 = vmatprep.subr.bf16.mxu0 %v10510_v41 }
 0x1e0   :  { %2001 = vmatprep.subr.bf16.mxu1 %v10513_v42 }
 0x1e2   :  { %1961 = vmatpush2.bf16.msra.mxu0 %v10508_v43 }
 0x1e3   :  { %2002 = vmatpush2.bf16.msra.mxu1 %v10511_v44  ;;  %1962 = vmatprep.subr.bf16.mxu0 %v10516_v45 }
 0x1e4   :  { %2003 = vmatprep.subr.bf16.mxu1 %v10519_v46 }
 0x1e6   :  { %1963 = vmatpush2.bf16.msra.mxu0 %v10514_v51 }
 0x1e7   :  { %2004 = vmatpush2.bf16.msra.mxu1 %v10517_v52  ;;  %1964 = vmatprep.subr.bf16.mxu0 %v10522_v53 }
 0x1e8   :  { %2005 = vmatprep.subr.bf16.mxu1 %v10525_v54 }
 0x1ea   :  { %1965 = vmatpush2.bf16.msra.mxu0 %v10520_v55 }
 0x1eb   :  { %2006 = vmatpush2.bf16.msra.mxu1 %v10523_v56  ;;  %1966 = vmatprep.subr.bf16.mxu0 %v10528_v59 }
 0x1ec   :  { %2007 = vmatprep.subr.bf16.mxu1 %v10531_v60 }
 0x1ee   :  { %1967 = vmatpush2.bf16.msra.mxu0 %v10526_v61 }
 0x1ef   :  { %2008 = vmatpush2.bf16.msra.mxu1 %v10529_v62  ;;  %1968 = vmatprep.subr.bf16.mxu0 %v10534_v63 }
 0x1f0   :  { %2009 = vmatprep.subr.bf16.mxu1 %v10537_v2 }
 0x1f2   :  { %1969 = vmatpush2.bf16.msra.mxu0 %v10532_v3 }
 0x1f3   :  { %2010 = vmatpush2.bf16.msra.mxu1 %v10535_v4  ;;  %1970 = vmatprep.subr.bf16.mxu0 %v10540_v7 }
 0x1f4   :  { %2011 = vmatprep.subr.bf16.mxu1 %v10543_v8 }
 0x1f6   :  { %1971 = vmatpush2.bf16.msra.mxu0 %v10538_v9 }
 0x1f7   :  { %2012 = vmatpush2.bf16.msra.mxu1 %v10541_v15  ;;  %1972 = vmatprep.subr.bf16.mxu0 %v10546_v17 }
 0x1f8   :  { %2013 = vmatprep.subr.bf16.mxu1 %v10549_v19 }
 0x1fa   :  { %1973 = vmatpush2.bf16.msra.mxu0 %v10544_v0 }
 0x1fb   :  { %2014 = vmatpush2.bf16.msra.mxu1 %v10547_v1  ;;  %1974 = vmatprep.subr.bf16.mxu0 %v10552_v20 }
 0x1fc   :  { %2015 = vmatprep.subr.bf16.mxu1 %v10555_v49 }
 0x1fe   :  { %1975 = vmatpush2.bf16.msra.mxu0 %v10550_v50 }
 0x1ff   :  { %2016 = vmatpush2.bf16.msra.mxu1 %v10553_v21 }
 0x201   :  { %1977 = vmatmul.mubr.bf16.vlgmr.msra.gmra.mxu0 %v11766_v10 }
 0x202   :  { %2018 = vmatmul.mubr.bf16.vlgmr.msra.gmra.mxu1 %v11770_v11 }
 0x281   :  { %v1896_v24 = vpop.f32.mrf.mxu0 }
 0x282   :  { %v1937_v13 = vpop.f32.mrf.mxu1  ;;  %v1897_v25 = vadd.f32 %v1896_v24, %v1205_v23 }
 0x283   :  { %v1898_v26 = vpop.f32.mrf.mxu0 }
 0x284   :  { %v1939_v27 = vpop.f32.mrf.mxu1  ;;  %v1938_v57 = vadd.f32 %v1937_v13, %v1897_v25  ;;  %v1899_v58 = vadd.f32 %v1898_v26, %v1209_v12 }
 0x285   :  { %v1900_v28 = vpop.f32.mrf.mxu0 }
 0x286   :  { %v1941_v5 = vpop.f32.mrf.mxu1  ;;  %v2026_v32 = vmax.f32 %v1938_v57, 0.0  ;;  %v1940_v33 = vadd.f32 %v1939_v27, %v1899_v58 }
 0x287   :  { %v1901_v34 = vpop.f32.mrf.mxu0 }
 0x288   :  { %v1942_v10 = vpop.f32.mrf.mxu1  ;;  %v11780_v35 = vmax.f32 %v1940_v33, 0.0 }
 0x28a   :  { %v11783_v11 = vcombine.low %v2026_v32, %v11780_v35 }
 0x2c1   :  { %v1978_v38 = vpop.f32.mrf.mxu0 }
 0x2c2   :  { %v2019_v39 = vpop.f32.mrf.mxu1  ;;  %v1979_v40 = vadd.f32 %v1978_v38, %v1213_v36 }
 0x2c3   :  { %v1980_v41 = vpop.f32.mrf.mxu0 }
 0x2c4   :  { %v2021_v42 = vpop.f32.mrf.mxu1  ;;  %v2020_v43 = vadd.f32 %v2019_v39, %v1979_v40  ;;  %v1981_v44 = vadd.f32 %v1980_v41, %v1217_v37 }
 0x2c5   :  { %v1982_v45 = vpop.f32.mrf.mxu0 }
 0x2c6   :  { %v2023_v46 = vpop.f32.mrf.mxu1  ;;  %v2022_v51 = vadd.f32 %v2021_v42, %v1981_v44  ;;  %v2028_v54 = vmax.f32 %v2020_v43, 0.0 }
 0x2c7   :  { %v1983_v52 = vpop.f32.mrf.mxu0 }
 0x2c8   :  { %v2024_v53 = vpop.f32.mrf.mxu1  ;;  %v11787_v55 = vmax.f32 %v2022_v51, 0.0 }
 0x2ca   :  { %v11790_v56 = vcombine.low %v2028_v54, %v11787_v55 }
 0x2cb   :  { %11612 = dma.done.wait [#allocation5], 16384 }
 0x2cc   :  { %11613 = vsyncadd [#allocation5], 4294950912  ;;  %s2042_s12 = scalar_lea.hbm %s13570_s1, 49152  ;;  %v10152_v59 = vcombine.low %v11728_v6, %v11728_v6  ;;  %v10153_v60 = vcombine.low %v11739_v47, %v11739_v47  ;;  %v11801_v61 = vpack.c.bf16 %v11731_v29, %v11731_v29  ;;  %v11805_v62 = vpack.c.bf16 %v11742_v48, %v11742_v48 }
 0x2ce   :  { %13851 = vst [vmem:[#allocation48_spill] sm:$0xff] %v11801_v61  ;;  %13852 = vst [vmem:[#allocation49_spill] sm:$0xff] %v11805_v62 }
 0x2cf   :  { %11467 = shalt.err (!%p11686_p5)  }
 0x2d0   :  { %2053 = dma.hbm_to_vmem [thread:$0]  %s2042_s12, 16384, %s11680_s4, [#allocation5 + $0x1]  ;;  %v11810_v63 = vpack.c.bf16 %v10152_v59, %v10152_v59  ;;  %v11812_v2 = vpack.c.bf16 %v10153_v60, %v10153_v60 }
 0x2d1   :  { %v11814_v6 = vld [vmem:[#allocation4] sm:$0xff]  ;;  %v11816_v3 = vld [vmem:[#allocation4 + $0x8] sm:$0xff]  ;;  %v11818_v47 = vld [vmem:[#allocation4 + $0x10] sm:$0xff] }
 0x2d2   :  { %13853 = vst [vmem:[#allocation50_spill] sm:$0xff] %v11816_v3  ;;  %v11820_v29 = vld [vmem:[#allocation4 + $0x18] sm:$0xff]  ;;  %v11822_v4 = vld [vmem:[#allocation4 + $0x20] sm:$0xff]  ;;  %v11824_v48 = vld [vmem:[#allocation4 + $0x28] sm:$0xff] }
 0x2d3   :  { %13854 = vst [vmem:[#allocation51_spill] sm:$0xff] %v11820_v29  ;;  %13855 = vst [vmem:[#allocation52_spill] sm:$0xff] %v11824_v48  ;;  %v11826_v7 = vld [vmem:[#allocation4 + $0x30] sm:$0xff]  ;;  %v11828_v8 = vld [vmem:[#allocation4 + $0x38] sm:$0xff] }
 0x2d4   :  { %13856 = vst [vmem:[#allocation53_spill] sm:$0xff] %v11828_v8  ;;  %v11830_v9 = vld [vmem:[#allocation4 + $0x40] sm:$0xff]  ;;  %v11832_v15 = vld [vmem:[#allocation4 + $0x48] sm:$0xff]  ;;  %v11834_v17 = vld [vmem:[#allocation4 + $0x50] sm:$0xff] }
 0x2d5   :  { %13857 = vst [vmem:[#allocation54_spill] sm:$0xff] %v11832_v15  ;;  %v11836_v19 = vld [vmem:[#allocation4 + $0x58] sm:$0xff]  ;;  %v11838_v0 = vld [vmem:[#allocation4 + $0x60] sm:$0xff]  ;;  %v11840_v1 = vld [vmem:[#allocation4 + $0x68] sm:$0xff] }
 0x2d6   :  { %13858 = vst [vmem:[#allocation55_spill] sm:$0xff] %v11836_v19  ;;  %13859 = vst [vmem:[#allocation56_spill] sm:$0xff] %v11840_v1  ;;  %v11842_v20 = vld [vmem:[#allocation4 + $0x70] sm:$0xff]  ;;  %v11844_v49 = vld [vmem:[#allocation4 + $0x78] sm:$0xff] }
 0x2d7   :  { %13860 = vst [vmem:[#allocation57_spill] sm:$0xff] %v11844_v49  ;;  %v11846_v50 = vld [vmem:[#allocation4 + $0x80] sm:$0xff]  ;;  %v11848_v21 = vld [vmem:[#allocation4 + $0x88] sm:$0xff]  ;;  %v11850_v22 = vld [vmem:[#allocation4 + $0x90] sm:$0xff] }
 0x2d8   :  { %13861 = vst [vmem:[#allocation58_spill] sm:$0xff] %v11848_v21  ;;  %v11852_v23 = vld [vmem:[#allocation4 + $0x98] sm:$0xff]  ;;  %v11854_v12 = vld [vmem:[#allocation4 + $0xa0] sm:$0xff]  ;;  %v11856_v24 = vld [vmem:[#allocation4 + $0xa8] sm:$0xff] }
 0x2d9   :  { %13862 = vst [vmem:[#allocation59_spill] sm:$0xff] %v11852_v23  ;;  %13863 = vst [vmem:[#allocation60_spill] sm:$0xff] %v11856_v24  ;;  %v11858_v13 = vld [vmem:[#allocation4 + $0xb0] sm:$0xff]  ;;  %v11860_v25 = vld [vmem:[#allocation4 + $0xb8] sm:$0xff] }
 0x2da   :  { %13864 = vst [vmem:[#allocation61_spill] sm:$0xff] %v11860_v25  ;;  %v11862_v26 = vld [vmem:[#allocation4 + $0xc0] sm:$0xff]  ;;  %v11864_v27 = vld [vmem:[#allocation4 + $0xc8] sm:$0xff]  ;;  %v11866_v57 = vld [vmem:[#allocation4 + $0xd0] sm:$0xff] }
 0x2db   :  { %13865 = vst [vmem:[#allocation62_spill] sm:$0xff] %v11864_v27  ;;  %v11868_v58 = vld [vmem:[#allocation4 + $0xd8] sm:$0xff]  ;;  %v11870_v28 = vld [vmem:[#allocation4 + $0xe0] sm:$0xff]  ;;  %v11872_v5 = vld [vmem:[#allocation4 + $0xe8] sm:$0xff] }
 0x2dc   :  { %13866 = vst [vmem:[#allocation63_spill] sm:$0xff] %v11868_v58  ;;  %13867 = vst [vmem:[#allocation64_spill] sm:$0xff] %v11872_v5  ;;  %v11874_v32 = vld [vmem:[#allocation4 + $0xf0] sm:$0xff]  ;;  %v11876_v33 = vld [vmem:[#allocation4 + $0xf8] sm:$0xff] }
 0x2dd   :  { %13868 = vst [vmem:[#allocation65_spill] sm:$0xff] %v11876_v33  ;;  %v11878_v34 = vld [vmem:[#allocation4 + $0x100] sm:$0xff]  ;;  %v11880_v10 = vld [vmem:[#allocation4 + $0x108] sm:$0xff]  ;;  %v11882_v36 = vld [vmem:[#allocation4 + $0x110] sm:$0xff] }
 0x2de   :  { %13869 = vst [vmem:[#allocation66_spill] sm:$0xff] %v11878_v34  ;;  %13870 = vst [vmem:[#allocation67_spill] sm:$0xff] %v11880_v10  ;;  %v11884_v37 = vld [vmem:[#allocation4 + $0x118] sm:$0xff]  ;;  %v11886_v38 = vld [vmem:[#allocation4 + $0x120] sm:$0xff] }
 0x2df   :  { %13871 = vst [vmem:[#allocation68_spill] sm:$0xff] %v11882_v36  ;;  %13872 = vst [vmem:[#allocation69_spill] sm:$0xff] %v11884_v37  ;;  %v11888_v39 = vld [vmem:[#allocation4 + $0x128] sm:$0xff]  ;;  %v11890_v40 = vld [vmem:[#allocation4 + $0x130] sm:$0xff] }
 0x2e0   :  { %13873 = vst [vmem:[#allocation70_spill] sm:$0xff] %v11886_v38  ;;  %13874 = vst [vmem:[#allocation71_spill] sm:$0xff] %v11888_v39  ;;  %v11892_v41 = vld [vmem:[#allocation4 + $0x138] sm:$0xff]  ;;  %v11894_v42 = vld [vmem:[#allocation4 + $0x140] sm:$0xff] }
 0x2e1   :  { %13875 = vst [vmem:[#allocation72_spill] sm:$0xff] %v11890_v40  ;;  %13876 = vst [vmem:[#allocation73_spill] sm:$0xff] %v11892_v41  ;;  %v11896_v43 = vld [vmem:[#allocation4 + $0x148] sm:$0xff]  ;;  %v11898_v44 = vld [vmem:[#allocation4 + $0x150] sm:$0xff] }
 0x2e2   :  { %13877 = vst [vmem:[#allocation74_spill] sm:$0xff] %v11894_v42  ;;  %13878 = vst [vmem:[#allocation75_spill] sm:$0xff] %v11896_v43  ;;  %v11900_v45 = vld [vmem:[#allocation4 + $0x158] sm:$0xff]  ;;  %v11902_v46 = vld [vmem:[#allocation4 + $0x160] sm:$0xff] }
 0x2e3   :  { %13879 = vst [vmem:[#allocation76_spill] sm:$0xff] %v11898_v44  ;;  %13880 = vst [vmem:[#allocation77_spill] sm:$0xff] %v11900_v45  ;;  %v11904_v51 = vld [vmem:[#allocation4 + $0x168] sm:$0xff]  ;;  %v11906_v52 = vld [vmem:[#allocation4 + $0x170] sm:$0xff] }
 0x2e4   :  { %13881 = vst [vmem:[#allocation78_spill] sm:$0xff] %v11902_v46  ;;  %13882 = vst [vmem:[#allocation79_spill] sm:$0xff] %v11904_v51  ;;  %v11908_v53 = vld [vmem:[#allocation4 + $0x178] sm:$0xff]  ;;  %v11910_v54 = vld [vmem:[#allocation4 + $0x180] sm:$0xff] }
 0x2e5   :  { %13883 = vst [vmem:[#allocation80_spill] sm:$0xff] %v11906_v52  ;;  %13884 = vst [vmem:[#allocation81_spill] sm:$0xff] %v11908_v53  ;;  %v11912_v59 = vld [vmem:[#allocation4 + $0x188] sm:$0xff]  ;;  %v11914_v60 = vld [vmem:[#allocation4 + $0x190] sm:$0xff] }
 0x2e6   :  { %13885 = vst [vmem:[#allocation82_spill] sm:$0xff] %v11910_v54  ;;  %13886 = vst [vmem:[#allocation83_spill] sm:$0xff] %v11912_v59  ;;  %v11916_v14 = vld [vmem:[#allocation4 + $0x198] sm:$0xff]  ;;  %v11918_v31 = vld [vmem:[#allocation4 + $0x1a0] sm:$0xff] }
 0x2e7   :  { %13887 = vst [vmem:[#allocation84_spill] sm:$0xff] %v11914_v60  ;;  %13888 = vst [vmem:[#allocation85_spill] sm:$0xff] %v11916_v14  ;;  %v11920_v30 = vld [vmem:[#allocation4 + $0x1a8] sm:$0xff]  ;;  %v11922_v18 = vld [vmem:[#allocation4 + $0x1b0] sm:$0xff] }
 0x2e8   :  { %13889 = vst [vmem:[#allocation86_spill] sm:$0xff] %v11920_v30  ;;  %v11924_v16 = vld [vmem:[#allocation4 + $0x1b8] sm:$0xff]  ;;  %v11926_v10 = vld [vmem:[#allocation4 + $0x1c0] sm:$0xff]  ;;  %v11928_v37 = vld [vmem:[#allocation4 + $0x1c8] sm:$0xff] }
 0x2e9   :  { %13890 = vst [vmem:[#allocation87_spill] sm:$0xff] %v11924_v16  ;;  %13891 = vst [vmem:[#allocation88_spill] sm:$0xff] %v11928_v37  ;;  %v11930_v39 = vld [vmem:[#allocation4 + $0x1d0] sm:$0xff]  ;;  %v11932_v41 = vld [vmem:[#allocation4 + $0x1d8] sm:$0xff] }
 0x2ea   :  { %13892 = vst [vmem:[#allocation89_spill] sm:$0xff] %v11932_v41  ;;  %v11934_v43 = vld [vmem:[#allocation4 + $0x1e0] sm:$0xff]  ;;  %v11936_v45 = vld [vmem:[#allocation4 + $0x1e8] sm:$0xff]  ;;  %v11938_v51 = vld [vmem:[#allocation4 + $0x1f0] sm:$0xff] }
 0x2eb   :  { %13893 = vst [vmem:[#allocation90_spill] sm:$0xff] %v11936_v45  ;;  %v11940_v53 = vld [vmem:[#allocation4 + $0x1f8] sm:$0xff]  ;;  %v11942_v59 = vld [vmem:[#allocation4 + $0x200] sm:$0xff]  ;;  %v11944_v14 = vld [vmem:[#allocation4 + $0x208] sm:$0xff] }
 0x2ec   :  { %13894 = vst [vmem:[#allocation91_spill] sm:$0xff] %v11940_v53  ;;  %13895 = vst [vmem:[#allocation92_spill] sm:$0xff] %v11944_v14  ;;  %v11946_v30 = vld [vmem:[#allocation4 + $0x210] sm:$0xff]  ;;  %v11948_v16 = vld [vmem:[#allocation4 + $0x218] sm:$0xff] }
 0x2ed   :  { %13896 = vst [vmem:[#allocation93_spill] sm:$0xff] %v11948_v16  ;;  %v11950_v37 = vld [vmem:[#allocation4 + $0x220] sm:$0xff]  ;;  %v11952_v3 = vld [vmem:[#allocation4 + $0x228] sm:$0xff]  ;;  %v11954_v41 = vld [vmem:[#allocation4 + $0x230] sm:$0xff] }
 0x2ee   :  { %13897 = vst [vmem:[#allocation94_spill] sm:$0xff] %v11952_v3  ;;  %v11956_v29 = vld [vmem:[#allocation4 + $0x238] sm:$0xff]  ;;  %v11958_v45 = vld [vmem:[#allocation4 + $0x240] sm:$0xff]  ;;  %v11960_v48 = vld [vmem:[#allocation4 + $0x248] sm:$0xff] }
 0x2ef   :  { %13898 = vst [vmem:[#allocation95_spill] sm:$0xff] %v11956_v29  ;;  %13899 = vst [vmem:[#allocation96_spill] sm:$0xff] %v11960_v48  ;;  %v11962_v53 = vld [vmem:[#allocation4 + $0x250] sm:$0xff]  ;;  %v11964_v8 = vld [vmem:[#allocation4 + $0x258] sm:$0xff] }
 0x2f0   :  { %13900 = vst [vmem:[#allocation97_spill] sm:$0xff] %v11964_v8  ;;  %v11966_v14 = vld [vmem:[#allocation4 + $0x260] sm:$0xff]  ;;  %v11968_v15 = vld [vmem:[#allocation4 + $0x268] sm:$0xff]  ;;  %v11970_v16 = vld [vmem:[#allocation4 + $0x270] sm:$0xff] }
 0x2f1   :  { %13901 = vst [vmem:[#allocation98_spill] sm:$0xff] %v11968_v15  ;;  %v11972_v19 = vld [vmem:[#allocation4 + $0x278] sm:$0xff]  ;;  %v11974_v3 = vld [vmem:[#allocation4 + $0x280] sm:$0xff]  ;;  %v11976_v1 = vld [vmem:[#allocation4 + $0x288] sm:$0xff] }
 0x2f2   :  { %13902 = vst [vmem:[#allocation99_spill] sm:$0xff] %v11972_v19  ;;  %13903 = vst [vmem:[#allocation100_spill] sm:$0xff] %v11976_v1  ;;  %v11978_v29 = vld [vmem:[#allocation4 + $0x290] sm:$0xff]  ;;  %v11980_v49 = vld [vmem:[#allocation4 + $0x298] sm:$0xff] }
 0x2f3   :  { %13904 = vst [vmem:[#allocation101_spill] sm:$0xff] %v11980_v49  ;;  %v11982_v48 = vld [vmem:[#allocation4 + $0x2a0] sm:$0xff]  ;;  %v11984_v21 = vld [vmem:[#allocation4 + $0x2a8] sm:$0xff]  ;;  %v11986_v8 = vld [vmem:[#allocation4 + $0x2b0] sm:$0xff] }
 0x2f4   :  { %13905 = vst [vmem:[#allocation102_spill] sm:$0xff] %v11984_v21  ;;  %v11988_v23 = vld [vmem:[#allocation4 + $0x2b8] sm:$0xff]  ;;  %v11990_v15 = vld [vmem:[#allocation4 + $0x2c0] sm:$0xff]  ;;  %v11992_v24 = vld [vmem:[#allocation4 + $0x2c8] sm:$0xff] }
 0x2f5   :  { %13906 = vst [vmem:[#allocation103_spill] sm:$0xff] %v11988_v23  ;;  %13907 = vst [vmem:[#allocation104_spill] sm:$0xff] %v11992_v24  ;;  %v11994_v19 = vld [vmem:[#allocation4 + $0x2d0] sm:$0xff]  ;;  %v11996_v25 = vld [vmem:[#allocation4 + $0x2d8] sm:$0xff] }
 0x2f6   :  { %13908 = vst [vmem:[#allocation105_spill] sm:$0xff] %v11996_v25  ;;  %v11998_v1 = vld [vmem:[#allocation4 + $0x2e0] sm:$0xff]  ;;  %v12000_v62 = vld [vmem:[#allocation4 + $0x2e8] sm:$0xff]  ;;  %v12002_v49 = vld [vmem:[#allocation4 + $0x2f0] sm:$0xff] }
 0x2f7   :  { %13909 = vst [vmem:[#allocation106_spill] sm:$0xff] %v12000_v62  ;;  %v12004_v61 = vld [vmem:[#allocation4 + $0x2f8] sm:$0xff]  ;;  %v12006_v21 = vld [vmem:[#allocation4 + $0x300] sm:$0xff]  ;;  %v12008_v27 = vld [vmem:[#allocation4 + $0x308] sm:$0xff] }
 0x2f8   :  { %13910 = vst [vmem:[#allocation107_spill] sm:$0xff] %v12004_v61  ;;  %13911 = vst [vmem:[#allocation108_spill] sm:$0xff] %v12006_v21  ;;  %v12010_v23 = vld [vmem:[#allocation4 + $0x310] sm:$0xff]  ;;  %v12012_v58 = vld [vmem:[#allocation4 + $0x318] sm:$0xff] }
 0x2f9   :  { %13912 = vst [vmem:[#allocation109_spill] sm:$0xff] %v12008_v27  ;;  %13913 = vst [vmem:[#allocation110_spill] sm:$0xff] %v12010_v23  ;;  %v12014_v24 = vld [vmem:[#allocation4 + $0x320] sm:$0xff]  ;;  %v12016_v5 = vld [vmem:[#allocation4 + $0x328] sm:$0xff] }
 0x2fa   :  { %13914 = vst [vmem:[#allocation111_spill] sm:$0xff] %v12012_v58  ;;  %13915 = vst [vmem:[#allocation112_spill] sm:$0xff] %v12014_v24  ;;  %v12018_v25 = vld [vmem:[#allocation4 + $0x330] sm:$0xff]  ;;  %v12020_v33 = vld [vmem:[#allocation4 + $0x338] sm:$0xff] }
 0x2fb   :  { %13916 = vst [vmem:[#allocation113_spill] sm:$0xff] %v12016_v5  ;;  %13917 = vst [vmem:[#allocation114_spill] sm:$0xff] %v12018_v25  ;;  %v12022_v62 = vld [vmem:[#allocation4 + $0x340] sm:$0xff]  ;;  %v12024_v34 = vld [vmem:[#allocation4 + $0x348] sm:$0xff] }
 0x2fc   :  { %13918 = vst [vmem:[#allocation115_spill] sm:$0xff] %v12020_v33  ;;  %13919 = vst [vmem:[#allocation116_spill] sm:$0xff] %v12022_v62  ;;  %v12026_v61 = vld [vmem:[#allocation4 + $0x350] sm:$0xff]  ;;  %v12028_v21 = vld [vmem:[#allocation4 + $0x358] sm:$0xff] }
 0x2fd   :  { %13920 = vst [vmem:[#allocation117_spill] sm:$0xff] %v12024_v34  ;;  %13921 = vst [vmem:[#allocation118_spill] sm:$0xff] %v12026_v61  ;;  %v12030_v27 = vld [vmem:[#allocation4 + $0x360] sm:$0xff]  ;;  %v12032_v23 = vld [vmem:[#allocation4 + $0x368] sm:$0xff] }
 0x2fe   :  { %13922 = vst [vmem:[#allocation119_spill] sm:$0xff] %v12028_v21  ;;  %13923 = vst [vmem:[#allocation120_spill] sm:$0xff] %v12030_v27  ;;  %v12034_v58 = vld [vmem:[#allocation4 + $0x370] sm:$0xff]  ;;  %v12036_v36 = vld [vmem:[#allocation4 + $0x378] sm:$0xff] }
 0x2ff   :  { %13924 = vst [vmem:[#allocation121_spill] sm:$0xff] %v12032_v23  ;;  %13925 = vst [vmem:[#allocation122_spill] sm:$0xff] %v12034_v58  ;;  %v12038_v5 = vld [vmem:[#allocation4 + $0x380] sm:$0xff]  ;;  %v12040_v24 = vld [vmem:[#allocation4 + $0x388] sm:$0xff] }
 0x300   :  { %13926 = vst [vmem:[#allocation123_spill] sm:$0xff] %v12036_v36  ;;  %13927 = vst [vmem:[#allocation124_spill] sm:$0xff] %v12038_v5  ;;  %v12042_v33 = vld [vmem:[#allocation4 + $0x390] sm:$0xff]  ;;  %v12044_v25 = vld [vmem:[#allocation4 + $0x398] sm:$0xff] }
 0x301   :  { %13928 = vst [vmem:[#allocation125_spill] sm:$0xff] %v12040_v24  ;;  %13929 = vst [vmem:[#allocation126_spill] sm:$0xff] %v12042_v33  ;;  %v12046_v34 = vld [vmem:[#allocation4 + $0x3a0] sm:$0xff]  ;;  %v12048_v38 = vld [vmem:[#allocation4 + $0x3a8] sm:$0xff] }
 0x302   :  { %13930 = vst [vmem:[#allocation127_spill] sm:$0xff] %v12044_v25  ;;  %13931 = vst [vmem:[#allocation128_spill] sm:$0xff] %v12046_v34  ;;  %v12050_v21 = vld [vmem:[#allocation4 + $0x3b0] sm:$0xff]  ;;  %v12052_v40 = vld [vmem:[#allocation4 + $0x3b8] sm:$0xff] }
 0x303   :  { %13932 = vst [vmem:[#allocation129_spill] sm:$0xff] %v12048_v38  ;;  %13933 = vst [vmem:[#allocation130_spill] sm:$0xff] %v12052_v40  ;;  %v12054_v23 = vld [vmem:[#allocation4 + $0x3c0] sm:$0xff]  ;;  %v12056_v62 = vld [vmem:[#allocation4 + $0x3c8] sm:$0xff] }
 0x304   :  { %13934 = vst [vmem:[#allocation131_spill] sm:$0xff] %v12056_v62  ;;  %v12058_v36 = vld [vmem:[#allocation4 + $0x3d0] sm:$0xff]  ;;  %v12060_v61 = vld [vmem:[#allocation4 + $0x3d8] sm:$0xff]  ;;  %v12062_v24 = vld [vmem:[#allocation4 + $0x3e0] sm:$0xff] }
 0x305   :  { %13935 = vst [vmem:[#allocation132_spill] sm:$0xff] %v12060_v61  ;;  %v12064_v42 = vld [vmem:[#allocation4 + $0x3e8] sm:$0xff]  ;;  %v12066_v25 = vld [vmem:[#allocation4 + $0x3f0] sm:$0xff]  ;;  %v12068_v44 = vld [vmem:[#allocation4 + $0x3f8] sm:$0xff] }
 0x306   :  { %13936 = vst [vmem:[#allocation133_spill] sm:$0xff] %v12064_v42  ;;  %13937 = vst [vmem:[#allocation134_spill] sm:$0xff] %v12068_v44 }
 0x307   :  { %11614 = dma.done.wait [#allocation5 + $0x1], 16384 }
 0x308   :  { %11615 = vsyncadd [#allocation5 + $0x1], 4294950912  ;;  %s2196_s15 = scalar_lea.hbm %s13570_s1, 65536  ;;  %v10154_v38 = vcombine.low %v11780_v35, %v11780_v35  ;;  %v10155_v40 = vcombine.low %v11787_v55, %v11787_v55 }
 0x309   :  { %11490 = shalt.err (!%p11667_p0)  }
 0x30a   :  { %2207 = dma.hbm_to_vmem [thread:$0]  %s2196_s15, 16384, %s11660_s23, [#allocation5]  ;;  %v12080_v62 = vpack.c.bf16 %v10154_v38, %v10154_v38  ;;  %v12082_v61 = vpack.c.bf16 %v10155_v40, %v10155_v40 }
 0x30b   :  { %v10556_v42 = vld [vmem:[#allocation4 + $0x4e4] ss:$16 sps:$4 sm:$0xff]   ;;  %v10560_v27 = vld [vmem:[#allocation4 + $0x4e0] ss:$16 sps:$4 sm:$0xff]  }
 0x30c   :  { %3020 = vmatprep.mubr.bf16.mxu0 %v12080_v62  ;;  %3061 = vmatprep.mubr.bf16.mxu1 %v12082_v61  ;;  %v10558_v44 = vld [vmem:[#allocation4 + $0x6e4] ss:$16 sps:$4 sm:$0xff]   ;;  %v10561_v35 = vld [vmem:[#allocation4 + $0x6e0] ss:$16 sps:$4 sm:$0xff]  }
 0x30d   :  { %2988 = vmatprep.subr.bf16.mxu0 %v10556_v42  ;;  %3029 = vmatprep.subr.bf16.mxu1 %v10558_v44  ;;  %v10562_v58 = vld [vmem:[#allocation4 + $0x4c4] ss:$16 sps:$4 sm:$0xff]   ;;  %v10566_v46 = vld [vmem:[#allocation4 + $0x4c0] ss:$16 sps:$4 sm:$0xff]  }
 0x30e   :  { %2989 = vmatpush1.bf16.msra.mxu0 %v10560_v27  ;;  %3030 = vmatpush1.bf16.msra.mxu1 %v10561_v35  ;;  %v10564_v55 = vld [vmem:[#allocation4 + $0x6c4] ss:$16 sps:$4 sm:$0xff]   ;;  %v10567_v38 = vld [vmem:[#allocation4 + $0x6c0] ss:$16 sps:$4 sm:$0xff]  }
 0x30f   :  { %2990 = vmatprep.subr.bf16.mxu0 %v10562_v58  ;;  %3031 = vmatprep.subr.bf16.mxu1 %v10564_v55  ;;  %v10568_v40 = vld [vmem:[#allocation4 + $0x4a4] ss:$16 sps:$4 sm:$0xff]   ;;  %v10572_v5 = vld [vmem:[#allocation4 + $0x4a0] ss:$16 sps:$4 sm:$0xff]  }
 0x310   :  { %v10570_v52 = vld [vmem:[#allocation4 + $0x6a4] ss:$16 sps:$4 sm:$0xff]   ;;  %v10573_v33 = vld [vmem:[#allocation4 + $0x6a0] ss:$16 sps:$4 sm:$0xff]  }
 0x311   :  { %v10574_v54 = vld [vmem:[#allocation4 + $0x484] ss:$16 sps:$4 sm:$0xff]   ;;  %v10578_v60 = vld [vmem:[#allocation4 + $0x480] ss:$16 sps:$4 sm:$0xff]  }
 0x312   :  { %2991 = vmatpush1.bf16.msra.mxu0 %v10566_v46  ;;  %3032 = vmatpush1.bf16.msra.mxu1 %v10567_v38  ;;  %v10576_v42 = vld [vmem:[#allocation4 + $0x684] ss:$16 sps:$4 sm:$0xff]   ;;  %v10579_v27 = vld [vmem:[#allocation4 + $0x680] ss:$16 sps:$4 sm:$0xff]  }
 0x313   :  { %2992 = vmatprep.subr.bf16.mxu0 %v10568_v40  ;;  %3033 = vmatprep.subr.bf16.mxu1 %v10570_v52  ;;  %v10580_v44 = vld [vmem:[#allocation4 + $0x464] ss:$16 sps:$4 sm:$0xff]   ;;  %v10584_v35 = vld [vmem:[#allocation4 + $0x460] ss:$16 sps:$4 sm:$0xff]  }
 0x314   :  { %v10582_v58 = vld [vmem:[#allocation4 + $0x664] ss:$16 sps:$4 sm:$0xff]   ;;  %v10585_v55 = vld [vmem:[#allocation4 + $0x660] ss:$16 sps:$4 sm:$0xff]  }
 0x315   :  { %v10586_v34 = vld [vmem:[#allocation4 + $0x444] ss:$16 sps:$4 sm:$0xff]   ;;  %v10590_v38 = vld [vmem:[#allocation4 + $0x440] ss:$16 sps:$4 sm:$0xff]  }
 0x316   :  { %2993 = vmatpush1.bf16.msra.mxu0 %v10572_v5  ;;  %3034 = vmatpush1.bf16.msra.mxu1 %v10573_v33  ;;  %v10588_v46 = vld [vmem:[#allocation4 + $0x644] ss:$16 sps:$4 sm:$0xff]   ;;  %v10591_v52 = vld [vmem:[#allocation4 + $0x640] ss:$16 sps:$4 sm:$0xff]  }
 0x317   :  { %2994 = vmatprep.subr.bf16.mxu0 %v10574_v54  ;;  %3035 = vmatprep.subr.bf16.mxu1 %v10576_v42  ;;  %v10592_v40 = vld [vmem:[#allocation4 + $0x424] ss:$16 sps:$4 sm:$0xff]   ;;  %v10596_v33 = vld [vmem:[#allocation4 + $0x420] ss:$16 sps:$4 sm:$0xff]  }
 0x318   :  { %v10594_v5 = vld [vmem:[#allocation4 + $0x624] ss:$16 sps:$4 sm:$0xff]   ;;  %v10597_v54 = vld [vmem:[#allocation4 + $0x620] ss:$16 sps:$4 sm:$0xff]  }
 0x319   :  { %v10598_v42 = vld [vmem:[#allocation4 + $0x404] ss:$16 sps:$4 sm:$0xff]  }
 0x31a   :  { %2995 = vmatpush1.bf16.msra.mxu0 %v10578_v60  ;;  %3036 = vmatpush1.bf16.msra.mxu1 %v10579_v27  ;;  %v10600_v60 = vld [vmem:[#allocation4 + $0x604] ss:$16 sps:$4 sm:$0xff]   ;;  %v10602_v27 = vld [vmem:[#allocation4 + $0x400] ss:$16 sps:$4 sm:$0xff]  }
 0x31b   :  { %2996 = vmatprep.subr.bf16.mxu0 %v10580_v44  ;;  %3037 = vmatprep.subr.bf16.mxu1 %v10582_v58  ;;  %v10603_v44 = vld [vmem:[#allocation4 + $0x600] ss:$16 sps:$4 sm:$0xff]   ;;  %v10604_v58 = vld [vmem:[#allocation4 + $0x5e4] ss:$16 sps:$4 sm:$0xff]  }
 0x31e   :  { %2997 = vmatpush1.bf16.msra.mxu0 %v10584_v35  ;;  %3038 = vmatpush1.bf16.msra.mxu1 %v10585_v55  ;;  %v10606_v35 = vld [vmem:[#allocation4 + $0x7e4] ss:$16 sps:$4 sm:$0xff]   ;;  %v10608_v55 = vld [vmem:[#allocation4 + $0x5e0] ss:$16 sps:$4 sm:$0xff]  }
 0x31f   :  { %2998 = vmatprep.subr.bf16.mxu0 %v10586_v34  ;;  %3039 = vmatprep.subr.bf16.mxu1 %v10588_v46  ;;  %v10609_v34 = vld [vmem:[#allocation4 + $0x7e0] ss:$16 sps:$4 sm:$0xff]   ;;  %v10610_v46 = vld [vmem:[#allocation4 + $0x5c4] ss:$16 sps:$4 sm:$0xff]  }
 0x322   :  { %2999 = vmatpush1.bf16.msra.mxu0 %v10590_v38  ;;  %3040 = vmatpush1.bf16.msra.mxu1 %v10591_v52  ;;  %v10612_v38 = vld [vmem:[#allocation4 + $0x7c4] ss:$16 sps:$4 sm:$0xff]   ;;  %v10614_v52 = vld [vmem:[#allocation4 + $0x5c0] ss:$16 sps:$4 sm:$0xff]  }
 0x323   :  { %3000 = vmatprep.subr.bf16.mxu0 %v10592_v40  ;;  %3041 = vmatprep.subr.bf16.mxu1 %v10594_v5  ;;  %v10615_v40 = vld [vmem:[#allocation4 + $0x7c0] ss:$16 sps:$4 sm:$0xff]   ;;  %v10616_v5 = vld [vmem:[#allocation4 + $0x5a4] ss:$16 sps:$4 sm:$0xff]  }
 0x326   :  { %3001 = vmatpush1.bf16.msra.mxu0 %v10596_v33  ;;  %3042 = vmatpush1.bf16.msra.mxu1 %v10597_v54  ;;  %v10618_v33 = vld [vmem:[#allocation4 + $0x7a4] ss:$16 sps:$4 sm:$0xff]   ;;  %v10620_v54 = vld [vmem:[#allocation4 + $0x5a0] ss:$16 sps:$4 sm:$0xff]  }
 0x327   :  { %3002 = vmatprep.subr.bf16.mxu0 %v10598_v42  ;;  %3043 = vmatprep.subr.bf16.mxu1 %v10600_v60  ;;  %v10621_v42 = vld [vmem:[#allocation4 + $0x7a0] ss:$16 sps:$4 sm:$0xff]   ;;  %v10622_v60 = vld [vmem:[#allocation4 + $0x584] ss:$16 sps:$4 sm:$0xff]  }
 0x32a   :  { %3003 = vmatpush1.bf16.msra.mxu0 %v10602_v27  ;;  %3044 = vmatpush1.bf16.msra.mxu1 %v10603_v44  ;;  %v10624_v27 = vld [vmem:[#allocation4 + $0x784] ss:$16 sps:$4 sm:$0xff]   ;;  %v10626_v44 = vld [vmem:[#allocation4 + $0x580] ss:$16 sps:$4 sm:$0xff]  }
 0x32b   :  { %3004 = vmatprep.subr.bf16.mxu0 %v10604_v58  ;;  %3045 = vmatprep.subr.bf16.mxu1 %v10606_v35  ;;  %v10627_v58 = vld [vmem:[#allocation4 + $0x780] ss:$16 sps:$4 sm:$0xff]   ;;  %v10628_v35 = vld [vmem:[#allocation4 + $0x564] ss:$16 sps:$4 sm:$0xff]  }
 0x32e   :  { %3005 = vmatpush2.bf16.msra.mxu0 %v10608_v55  ;;  %3046 = vmatpush2.bf16.msra.mxu1 %v10609_v34  ;;  %v10630_v55 = vld [vmem:[#allocation4 + $0x764] ss:$16 sps:$4 sm:$0xff]   ;;  %v10632_v34 = vld [vmem:[#allocation4 + $0x560] ss:$16 sps:$4 sm:$0xff]  }
 0x32f   :  { %3006 = vmatprep.subr.bf16.mxu0 %v10610_v46  ;;  %3047 = vmatprep.subr.bf16.mxu1 %v10612_v38  ;;  %v10633_v46 = vld [vmem:[#allocation4 + $0x760] ss:$16 sps:$4 sm:$0xff]   ;;  %v10634_v38 = vld [vmem:[#allocation4 + $0x544] ss:$16 sps:$4 sm:$0xff]  }
 0x332   :  { %3007 = vmatpush2.bf16.msra.mxu0 %v10614_v52  ;;  %3048 = vmatpush2.bf16.msra.mxu1 %v10615_v40  ;;  %v10636_v52 = vld [vmem:[#allocation4 + $0x744] ss:$16 sps:$4 sm:$0xff]   ;;  %v10638_v40 = vld [vmem:[#allocation4 + $0x540] ss:$16 sps:$4 sm:$0xff]  }
 0x333   :  { %3008 = vmatprep.subr.bf16.mxu0 %v10616_v5  ;;  %3049 = vmatprep.subr.bf16.mxu1 %v10618_v33  ;;  %v10639_v5 = vld [vmem:[#allocation4 + $0x740] ss:$16 sps:$4 sm:$0xff]   ;;  %v10640_v33 = vld [vmem:[#allocation4 + $0x524] ss:$16 sps:$4 sm:$0xff]  }
 0x336   :  { %3009 = vmatpush2.bf16.msra.mxu0 %v10620_v54  ;;  %3050 = vmatpush2.bf16.msra.mxu1 %v10621_v42  ;;  %v10642_v54 = vld [vmem:[#allocation4 + $0x724] ss:$16 sps:$4 sm:$0xff]   ;;  %v10644_v42 = vld [vmem:[#allocation4 + $0x520] ss:$16 sps:$4 sm:$0xff]  }
 0x337   :  { %3010 = vmatprep.subr.bf16.mxu0 %v10622_v60  ;;  %3051 = vmatprep.subr.bf16.mxu1 %v10624_v27  ;;  %v10645_v60 = vld [vmem:[#allocation4 + $0x720] ss:$16 sps:$4 sm:$0xff]   ;;  %v10646_v27 = vld [vmem:[#allocation4 + $0x504] ss:$16 sps:$4 sm:$0xff]  }
 0x33a   :  { %3011 = vmatpush2.bf16.msra.mxu0 %v10626_v44  ;;  %3052 = vmatpush2.bf16.msra.mxu1 %v10627_v58  ;;  %v10648_v44 = vld [vmem:[#allocation4 + $0x704] ss:$16 sps:$4 sm:$0xff]   ;;  %v10650_v58 = vld [vmem:[#allocation4 + $0x500] ss:$16 sps:$4 sm:$0xff]  }
 0x33b   :  { %3012 = vmatprep.subr.bf16.mxu0 %v10628_v35  ;;  %3053 = vmatprep.subr.bf16.mxu1 %v10630_v55  ;;  %v10651_v35 = vld [vmem:[#allocation4 + $0x700] ss:$16 sps:$4 sm:$0xff]   ;;  %v10654_v55 = vld [vmem:[#allocation4 + $0x4ec] ss:$16 sps:$4 sm:$0xff]  }
 0x33e   :  { %3013 = vmatpush2.bf16.msra.mxu0 %v10632_v34  ;;  %3054 = vmatpush2.bf16.msra.mxu1 %v10633_v46  ;;  %v10657_v34 = vld [vmem:[#allocation4 + $0x6ec] ss:$16 sps:$4 sm:$0xff]   ;;  %v12088_v46 = vpack.c.bf16 %v11783_v11, %v11783_v11 }
 0x33f   :  { %3014 = vmatprep.subr.bf16.mxu0 %v10634_v38  ;;  %3055 = vmatprep.subr.bf16.mxu1 %v10636_v52  ;;  %v12092_v38 = vpack.c.bf16 %v11790_v56, %v11790_v56  ;;  %v10652_v52 = vld [vmem:[#allocation4 + $0x4e8] ss:$16 sps:$4 sm:$0xff]   ;;  %v10666_v11 = vld [vmem:[#allocation4 + $0x4ac] ss:$16 sps:$4 sm:$0xff]  }
 0x340   :  { %v10669_v56 = vld [vmem:[#allocation4 + $0x6ac] ss:$16 sps:$4 sm:$0xff]  }
 0x342   :  { %3015 = vmatpush2.bf16.msra.mxu0 %v10638_v40  ;;  %3056 = vmatpush2.bf16.msra.mxu1 %v10639_v5  ;;  %v10655_v40 = vld [vmem:[#allocation4 + $0x6e8] ss:$16 sps:$4 sm:$0xff]   ;;  %v10660_v5 = vld [vmem:[#allocation4 + $0x4cc] ss:$16 sps:$4 sm:$0xff]  }
 0x343   :  { %3016 = vmatprep.subr.bf16.mxu0 %v10640_v33  ;;  %3057 = vmatprep.subr.bf16.mxu1 %v10642_v54  ;;  %v10663_v33 = vld [vmem:[#allocation4 + $0x6cc] ss:$16 sps:$4 sm:$0xff]   ;;  %v10658_v54 = vld [vmem:[#allocation4 + $0x4c8] ss:$16 sps:$4 sm:$0xff]  }
 0x346   :  { %3017 = vmatpush2.bf16.msra.mxu0 %v10644_v42  ;;  %3058 = vmatpush2.bf16.msra.mxu1 %v10645_v60  ;;  %v10661_v42 = vld [vmem:[#allocation4 + $0x6c8] ss:$16 sps:$4 sm:$0xff]  }
 0x347   :  { %3018 = vmatprep.subr.bf16.mxu0 %v10646_v27  ;;  %3059 = vmatprep.subr.bf16.mxu1 %v10648_v44  ;;  %v10664_v60 = vld [vmem:[#allocation4 + $0x4a8] ss:$16 sps:$4 sm:$0xff]   ;;  %v10672_v44 = vld [vmem:[#allocation4 + $0x48c] ss:$16 sps:$4 sm:$0xff]  }
 0x348   :  { %v10667_v27 = vld [vmem:[#allocation4 + $0x6a8] ss:$16 sps:$4 sm:$0xff]  }
 0x34a   :  { %3019 = vmatpush2.bf16.msra.mxu0 %v10650_v58  ;;  %3060 = vmatpush2.bf16.msra.mxu1 %v10651_v35  ;;  %v10675_v58 = vld [vmem:[#allocation4 + $0x68c] ss:$16 sps:$4 sm:$0xff]   ;;  %v10670_v35 = vld [vmem:[#allocation4 + $0x488] ss:$16 sps:$4 sm:$0xff]  }
 0x34b   :  { %3070 = vmatprep.subr.bf16.mxu0 %v10654_v55  ;;  %3111 = vmatprep.subr.bf16.mxu1 %v10657_v34  ;;  %v10673_v55 = vld [vmem:[#allocation4 + $0x688] ss:$16 sps:$4 sm:$0xff]   ;;  %v10678_v34 = vld [vmem:[#allocation4 + $0x46c] ss:$16 sps:$4 sm:$0xff]  }
 0x34d   :  { %3021 = vmatmul.mubr.bf16.vlgmr.msra.gmra.mxu0 %v12088_v46  ;;  %3062 = vmatmul.mubr.bf16.vlgmr.msra.gmra.mxu1 %v12092_v38 }
 0x34e   :  { %3071 = vmatpush1.bf16.msra.mxu0 %v10652_v52  ;;  %3112 = vmatpush1.bf16.msra.mxu1 %v10655_v40  ;;  %v10681_v52 = vld [vmem:[#allocation4 + $0x66c] ss:$16 sps:$4 sm:$0xff]   ;;  %v10676_v40 = vld [vmem:[#allocation4 + $0x468] ss:$16 sps:$4 sm:$0xff]  }
 0x34f   :  { %3072 = vmatprep.subr.bf16.mxu0 %v10660_v5  ;;  %3113 = vmatprep.subr.bf16.mxu1 %v10663_v33  ;;  %v10679_v5 = vld [vmem:[#allocation4 + $0x668] ss:$16 sps:$4 sm:$0xff]   ;;  %v10684_v33 = vld [vmem:[#allocation4 + $0x44c] ss:$16 sps:$4 sm:$0xff]  }
 0x350   :  { %3102 = vmatprep.mubr.bf16.mxu0 %v12080_v62  ;;  %3143 = vmatprep.mubr.bf16.mxu1 %v12082_v61 }
 0x352   :  { %3073 = vmatpush1.bf16.msra.mxu0 %v10658_v54  ;;  %3114 = vmatpush1.bf16.msra.mxu1 %v10661_v42  ;;  %v10687_v54 = vld [vmem:[#allocation4 + $0x64c] ss:$16 sps:$4 sm:$0xff]   ;;  %v10682_v42 = vld [vmem:[#allocation4 + $0x448] ss:$16 sps:$4 sm:$0xff]  }
 0x353   :  { %3074 = vmatprep.subr.bf16.mxu0 %v10666_v11  ;;  %3115 = vmatprep.subr.bf16.mxu1 %v10669_v56  ;;  %v10685_v11 = vld [vmem:[#allocation4 + $0x648] ss:$16 sps:$4 sm:$0xff]   ;;  %v10690_v56 = vld [vmem:[#allocation4 + $0x42c] ss:$16 sps:$4 sm:$0xff]  }
 0x356   :  { %3075 = vmatpush1.bf16.msra.mxu0 %v10664_v60  ;;  %3116 = vmatpush1.bf16.msra.mxu1 %v10667_v27  ;;  %v10693_v60 = vld [vmem:[#allocation4 + $0x62c] ss:$16 sps:$4 sm:$0xff]   ;;  %v10688_v27 = vld [vmem:[#allocation4 + $0x428] ss:$16 sps:$4 sm:$0xff]  }
 0x357   :  { %3076 = vmatprep.subr.bf16.mxu0 %v10672_v44  ;;  %3117 = vmatprep.subr.bf16.mxu1 %v10675_v58  ;;  %v10691_v44 = vld [vmem:[#allocation4 + $0x628] ss:$16 sps:$4 sm:$0xff]   ;;  %v10696_v58 = vld [vmem:[#allocation4 + $0x40c] ss:$16 sps:$4 sm:$0xff]  }
 0x35a   :  { %3077 = vmatpush1.bf16.msra.mxu0 %v10670_v35  ;;  %3118 = vmatpush1.bf16.msra.mxu1 %v10673_v55  ;;  %v10699_v35 = vld [vmem:[#allocation4 + $0x60c] ss:$16 sps:$4 sm:$0xff]   ;;  %v10694_v55 = vld [vmem:[#allocation4 + $0x408] ss:$16 sps:$4 sm:$0xff]  }
 0x35b   :  { %3078 = vmatprep.subr.bf16.mxu0 %v10678_v34  ;;  %3119 = vmatprep.subr.bf16.mxu1 %v10681_v52  ;;  %v10697_v34 = vld [vmem:[#allocation4 + $0x608] ss:$16 sps:$4 sm:$0xff]   ;;  %v10702_v52 = vld [vmem:[#allocation4 + $0x5ec] ss:$16 sps:$4 sm:$0xff]  }
 0x35e   :  { %3079 = vmatpush1.bf16.msra.mxu0 %v10676_v40  ;;  %3120 = vmatpush1.bf16.msra.mxu1 %v10679_v5  ;;  %v10705_v40 = vld [vmem:[#allocation4 + $0x7ec] ss:$16 sps:$4 sm:$0xff]   ;;  %v10700_v5 = vld [vmem:[#allocation4 + $0x5e8] ss:$16 sps:$4 sm:$0xff]  }
 0x35f   :  { %3080 = vmatprep.subr.bf16.mxu0 %v10684_v33  ;;  %3121 = vmatprep.subr.bf16.mxu1 %v10687_v54  ;;  %v10703_v33 = vld [vmem:[#allocation4 + $0x7e8] ss:$16 sps:$4 sm:$0xff]   ;;  %v10708_v54 = vld [vmem:[#allocation4 + $0x5cc] ss:$16 sps:$4 sm:$0xff]  }
 0x362   :  { %3081 = vmatpush1.bf16.msra.mxu0 %v10682_v42  ;;  %3122 = vmatpush1.bf16.msra.mxu1 %v10685_v11  ;;  %v10711_v42 = vld [vmem:[#allocation4 + $0x7cc] ss:$16 sps:$4 sm:$0xff]   ;;  %v10706_v11 = vld [vmem:[#allocation4 + $0x5c8] ss:$16 sps:$4 sm:$0xff]  }
 0x363   :  { %3082 = vmatprep.subr.bf16.mxu0 %v10690_v56  ;;  %3123 = vmatprep.subr.bf16.mxu1 %v10693_v60  ;;  %v10709_v56 = vld [vmem:[#allocation4 + $0x7c8] ss:$16 sps:$4 sm:$0xff]   ;;  %v10714_v60 = vld [vmem:[#allocation4 + $0x5ac] ss:$16 sps:$4 sm:$0xff]  }
 0x366   :  { %3083 = vmatpush1.bf16.msra.mxu0 %v10688_v27  ;;  %3124 = vmatpush1.bf16.msra.mxu1 %v10691_v44  ;;  %v10717_v27 = vld [vmem:[#allocation4 + $0x7ac] ss:$16 sps:$4 sm:$0xff]   ;;  %v10712_v44 = vld [vmem:[#allocation4 + $0x5a8] ss:$16 sps:$4 sm:$0xff]  }
 0x367   :  { %3084 = vmatprep.subr.bf16.mxu0 %v10696_v58  ;;  %3125 = vmatprep.subr.bf16.mxu1 %v10699_v35  ;;  %v10715_v58 = vld [vmem:[#allocation4 + $0x7a8] ss:$16 sps:$4 sm:$0xff]   ;;  %v10720_v35 = vld [vmem:[#allocation4 + $0x58c] ss:$16 sps:$4 sm:$0xff]  }
 0x36a   :  { %3085 = vmatpush1.bf16.msra.mxu0 %v10694_v55  ;;  %3126 = vmatpush1.bf16.msra.mxu1 %v10697_v34  ;;  %v10723_v55 = vld [vmem:[#allocation4 + $0x78c] ss:$16 sps:$4 sm:$0xff]   ;;  %v10718_v34 = vld [vmem:[#allocation4 + $0x588] ss:$16 sps:$4 sm:$0xff]  }
 0x36b   :  { %3086 = vmatprep.subr.bf16.mxu0 %v10702_v52  ;;  %3127 = vmatprep.subr.bf16.mxu1 %v10705_v40  ;;  %v10721_v52 = vld [vmem:[#allocation4 + $0x788] ss:$16 sps:$4 sm:$0xff]   ;;  %v10726_v40 = vld [vmem:[#allocation4 + $0x56c] ss:$16 sps:$4 sm:$0xff]  }
 0x36e   :  { %3087 = vmatpush2.bf16.msra.mxu0 %v10700_v5  ;;  %3128 = vmatpush2.bf16.msra.mxu1 %v10703_v33  ;;  %v10729_v5 = vld [vmem:[#allocation4 + $0x76c] ss:$16 sps:$4 sm:$0xff]   ;;  %v10724_v33 = vld [vmem:[#allocation4 + $0x568] ss:$16 sps:$4 sm:$0xff]  }
 0x36f   :  { %3088 = vmatprep.subr.bf16.mxu0 %v10708_v54  ;;  %3129 = vmatprep.subr.bf16.mxu1 %v10711_v42  ;;  %v10727_v54 = vld [vmem:[#allocation4 + $0x768] ss:$16 sps:$4 sm:$0xff]   ;;  %v10732_v42 = vld [vmem:[#allocation4 + $0x54c] ss:$16 sps:$4 sm:$0xff]  }
 0x372   :  { %3089 = vmatpush2.bf16.msra.mxu0 %v10706_v11  ;;  %3130 = vmatpush2.bf16.msra.mxu1 %v10709_v56  ;;  %v10735_v11 = vld [vmem:[#allocation4 + $0x74c] ss:$16 sps:$4 sm:$0xff]   ;;  %v10730_v56 = vld [vmem:[#allocation4 + $0x548] ss:$16 sps:$4 sm:$0xff]  }
 0x373   :  { %3090 = vmatprep.subr.bf16.mxu0 %v10714_v60  ;;  %3131 = vmatprep.subr.bf16.mxu1 %v10717_v27  ;;  %v10733_v60 = vld [vmem:[#allocation4 + $0x748] ss:$16 sps:$4 sm:$0xff]   ;;  %v10738_v27 = vld [vmem:[#allocation4 + $0x52c] ss:$16 sps:$4 sm:$0xff]  }
 0x376   :  { %3091 = vmatpush2.bf16.msra.mxu0 %v10712_v44  ;;  %3132 = vmatpush2.bf16.msra.mxu1 %v10715_v58  ;;  %v10741_v44 = vld [vmem:[#allocation4 + $0x72c] ss:$16 sps:$4 sm:$0xff]   ;;  %v10736_v58 = vld [vmem:[#allocation4 + $0x528] ss:$16 sps:$4 sm:$0xff]  }
 0x377   :  { %3092 = vmatprep.subr.bf16.mxu0 %v10720_v35  ;;  %3133 = vmatprep.subr.bf16.mxu1 %v10723_v55  ;;  %v10739_v35 = vld [vmem:[#allocation4 + $0x728] ss:$16 sps:$4 sm:$0xff]   ;;  %v10744_v55 = vld [vmem:[#allocation4 + $0x50c] ss:$16 sps:$4 sm:$0xff]  }
 0x37a   :  { %3093 = vmatpush2.bf16.msra.mxu0 %v10718_v34  ;;  %3134 = vmatpush2.bf16.msra.mxu1 %v10721_v52  ;;  %v10747_v34 = vld [vmem:[#allocation4 + $0x70c] ss:$16 sps:$4 sm:$0xff]   ;;  %v10742_v52 = vld [vmem:[#allocation4 + $0x508] ss:$16 sps:$4 sm:$0xff]  }
 0x37b   :  { %3094 = vmatprep.subr.bf16.mxu0 %v10726_v40  ;;  %3135 = vmatprep.subr.bf16.mxu1 %v10729_v5  ;;  %v10745_v40 = vld [vmem:[#allocation4 + $0x708] ss:$16 sps:$4 sm:$0xff]   ;;  %v9411_v5 = vcombine.high %v11870_v28, %v11874_v32 }
 0x37e   :  { %3095 = vmatpush2.bf16.msra.mxu0 %v10724_v33  ;;  %3136 = vmatpush2.bf16.msra.mxu1 %v10727_v54  ;;  %v9475_v33 = vcombine.high %v11998_v1, %v12002_v49  ;;  %v9410_v54 = vcombine.low %v11870_v28, %v11874_v32  ;;  %v9406_v28 = vcombine.low %v11862_v26, %v11866_v57 }
 0x37f   :  { %3096 = vmatprep.subr.bf16.mxu0 %v10732_v42  ;;  %3137 = vmatprep.subr.bf16.mxu1 %v10735_v11  ;;  %v9474_v42 = vcombine.low %v11998_v1, %v12002_v49  ;;  %v9407_v11 = vcombine.high %v11862_v26, %v11866_v57  ;;  %v9470_v1 = vcombine.low %v11990_v15, %v11994_v19 }
 0x380   :  { %v9403_v49 = vcombine.high %v11854_v12, %v11858_v13  ;;  %v9467_v32 = vcombine.high %v11982_v48, %v11986_v8  ;;  %v9402_v26 = vcombine.low %v11854_v12, %v11858_v13  ;;  %v9463_v57 = vcombine.high %v11974_v3, %v11978_v29 }
 0x381   :  { %v9394_v12 = vcombine.low %v11838_v0, %v11842_v20  ;;  %v9458_v13 = vcombine.low %v11966_v14, %v11970_v16 }
 0x382   :  { %3097 = vmatpush2.bf16.msra.mxu0 %v10730_v56  ;;  %3138 = vmatpush2.bf16.msra.mxu1 %v10733_v60  ;;  %v9471_v56 = vcombine.high %v11990_v15, %v11994_v19  ;;  %v9466_v15 = vcombine.low %v11982_v48, %v11986_v8  ;;  %v9399_v19 = vcombine.high %v11846_v50, %v11850_v22 }
 0x383   :  { %3098 = vmatprep.subr.bf16.mxu0 %v10738_v27  ;;  %3139 = vmatprep.subr.bf16.mxu1 %v10741_v44  ;;  %v9398_v60 = vcombine.low %v11846_v50, %v11850_v22  ;;  %v9462_v27 = vcombine.low %v11974_v3, %v11978_v29  ;;  %v9395_v48 = vcombine.high %v11838_v0, %v11842_v20 }
 0x384   :  { %v9459_v8 = vcombine.high %v11966_v14, %v11970_v16  ;;  %v9391_v3 = vcombine.high %v11830_v9, %v11834_v17  ;;  %v9455_v29 = vcombine.high %v11958_v45, %v11962_v53  ;;  %v9390_v50 = vcombine.low %v11830_v9, %v11834_v17 }
 0x385   :  { %v9454_v22 = vcombine.low %v11958_v45, %v11962_v53  ;;  %v9387_v14 = vcombine.high %v11822_v4, %v11826_v7  ;;  %v9451_v16 = vcombine.high %v11950_v37, %v11954_v41  ;;  %v9386_v0 = vcombine.low %v11822_v4, %v11826_v7 }
 0x386   :  { %3099 = vmatpush2.bf16.msra.mxu0 %v10736_v58  ;;  %3140 = vmatpush2.bf16.msra.mxu1 %v10739_v35  ;;  %v9450_v20 = vcombine.low %v11950_v37, %v11954_v41  ;;  %v9383_v9 = vcombine.high %v11814_v6, %v11818_v47  ;;  %v9447_v17 = vcombine.high %v11942_v59, %v11946_v30  ;;  %v13942_v58 = vld [vmem:[#allocation124_spill] sm:$0xff] }
 0x387   :  { %3100 = vmatprep.subr.bf16.mxu0 %v10744_v55  ;;  %3141 = vmatprep.subr.bf16.mxu1 %v10747_v34  ;;  %v9382_v45 = vcombine.low %v11814_v6, %v11818_v47  ;;  %v9446_v53 = vcombine.low %v11942_v59, %v11946_v30  ;;  %v9443_v4 = vcombine.high %v11934_v43, %v11938_v51 }
 0x388   :  { %v9507_v7 = vcombine.high %v12062_v24, %v12066_v25  ;;  %v9442_v37 = vcombine.low %v11934_v43, %v11938_v51  ;;  %v9506_v41 = vcombine.low %v12062_v24, %v12066_v25  ;;  %v9439_v30 = vcombine.high %v11926_v10, %v11930_v39  ;;  %v13938_v25 = vld [vmem:[#allocation128_spill] sm:$0xff] }
 0x389   :  { %v9503_v6 = vcombine.high %v12054_v23, %v12058_v36  ;;  %v9438_v47 = vcombine.low %v11926_v10, %v11930_v39  ;;  %v9502_v59 = vcombine.low %v12054_v23, %v12058_v36  ;;  %v9435_v24 = vcombine.high %v11918_v31, %v11922_v18  ;;  %v13939_v10 = vld [vmem:[#allocation84_spill] sm:$0xff]  ;;  %v13940_v23 = vld [vmem:[#allocation82_spill] sm:$0xff] }
 0x38a   :  { %3101 = vmatpush2.bf16.msra.mxu0 %v10742_v52  ;;  %3142 = vmatpush2.bf16.msra.mxu1 %v10745_v40  ;;  %v9499_v43 = vcombine.high %v13938_v25, %v12050_v21  ;;  %v9434_v51 = vcombine.low %v11918_v31, %v11922_v18  ;;  %v9498_v44 = vcombine.low %v13938_v25, %v12050_v21  ;;  %v13941_v39 = vld [vmem:[#allocation126_spill] sm:$0xff]  ;;  %v13943_v18 = vld [vmem:[#allocation80_spill] sm:$0xff] }
 0x38b   :  { %3792 = vmatprep.subr.bf16.mxu0 %v9411_v5  ;;  %3833 = vmatprep.subr.bf16.mxu1 %v9475_v33  ;;  %v9431_v36 = vcombine.high %v13940_v23, %v13939_v10  ;;  %v9495_v35 = vcombine.high %v13942_v58, %v13941_v39  ;;  %v9430_v55 = vcombine.low %v13940_v23, %v13939_v10  ;;  %v13944_v31 = vld [vmem:[#allocation78_spill] sm:$0xff]  ;;  %v13946_v40 = vld [vmem:[#allocation120_spill] sm:$0xff]  ;;  %v13969_v10 = vld [vmem:[#allocation61_spill] sm:$0xff] }
 0x38c   :  { %v9494_v34 = vcombine.low %v13942_v58, %v13941_v39  ;;  %v9427_v21 = vcombine.high %v13944_v31, %v13943_v18  ;;  %v13945_v52 = vld [vmem:[#allocation122_spill] sm:$0xff]  ;;  %v9426_v33 = vcombine.low %v13944_v31, %v13943_v18  ;;  %v13967_v25 = vld [vmem:[#allocation48_spill] sm:$0xff]  ;;  %v13971_v39 = vld [vmem:[#allocation103_spill] sm:$0xff] }
 0x38d   :  { %3103 = vmatmul.mubr.bf16.vlgmr.msra.gmra.mxu0 %v12088_v46  ;;  %3144 = vmatmul.mubr.bf16.vlgmr.msra.gmra.mxu1 %v12092_v38  ;;  %v9491_v5 = vcombine.high %v13946_v40, %v13945_v52  ;;  %v13970_v23 = vld [vmem:[#allocation60_spill] sm:$0xff]  ;;  %v13972_v58 = vld [vmem:[#allocation102_spill] sm:$0xff]  ;;  %v13973_v18 = vld [vmem:[#allocation59_spill] sm:$0xff] }
 0x38e   :  { %3793 = vmatpush1.bf16.msra.mxu0 %v9410_v54  ;;  %3834 = vmatpush1.bf16.msra.mxu1 %v9474_v42  ;;  %v9490_v54 = vcombine.low %v13946_v40, %v13945_v52  ;;  %v13947_v42 = vld [vmem:[#allocation76_spill] sm:$0xff]  ;;  %v13974_v31 = vld [vmem:[#allocation58_spill] sm:$0xff]  ;;  %v13975_v52 = vld [vmem:[#allocation101_spill] sm:$0xff] }
 0x38f   :  { %3794 = vmatprep.subr.bf16.mxu0 %v9407_v11  ;;  %3835 = vmatprep.subr.bf16.mxu1 %v9471_v56  ;;  %v13948_v11 = vld [vmem:[#allocation74_spill] sm:$0xff]  ;;  %v13976_v40 = vld [vmem:[#allocation100_spill] sm:$0xff] }
 0x390   :  { %3824 = vmatprep.mubr.bf16.mxu0 %v11810_v63  ;;  %3865 = vmatprep.mubr.bf16.mxu1 %v11812_v2  ;;  %v9423_v56 = vcombine.high %v13948_v11, %v13947_v42 }
 0x392   :  { %3795 = vmatpush1.bf16.msra.mxu0 %v9406_v28  ;;  %3836 = vmatpush1.bf16.msra.mxu1 %v9470_v1  ;;  %v13949_v28 = vld [vmem:[#allocation118_spill] sm:$0xff]  ;;  %v13950_v1 = vld [vmem:[#allocation116_spill] sm:$0xff] }
 0x393   :  { %3796 = vmatprep.subr.bf16.mxu0 %v9403_v49  ;;  %3837 = vmatprep.subr.bf16.mxu1 %v9467_v32  ;;  %v9487_v49 = vcombine.high %v13950_v1, %v13949_v28  ;;  %v9422_v32 = vcombine.low %v13948_v11, %v13947_v42  ;;  %v13977_v42 = vld [vmem:[#allocation57_spill] sm:$0xff]  ;;  %v13978_v11 = vld [vmem:[#allocation56_spill] sm:$0xff] }
 0x396   :  { %3797 = vmatpush1.bf16.msra.mxu0 %v9402_v26  ;;  %3838 = vmatpush1.bf16.msra.mxu1 %v9466_v15  ;;  %v9486_v26 = vcombine.low %v13950_v1, %v13949_v28  ;;  %v13951_v15 = vld [vmem:[#allocation72_spill] sm:$0xff]  ;;  %v13979_v28 = vld [vmem:[#allocation99_spill] sm:$0xff]  ;;  %v13980_v1 = vld [vmem:[#allocation98_spill] sm:$0xff] }
 0x397   :  { %3798 = vmatprep.subr.bf16.mxu0 %v9399_v19  ;;  %3839 = vmatprep.subr.bf16.mxu1 %v9463_v57  ;;  %v13952_v19 = vld [vmem:[#allocation70_spill] sm:$0xff] }
 0x398   :  { %v9419_v57 = vcombine.high %v13952_v19, %v13951_v15 }
 0x39a   :  { %3799 = vmatpush1.bf16.msra.mxu0 %v9398_v60  ;;  %3840 = vmatpush1.bf16.msra.mxu1 %v9462_v27  ;;  %v13953_v60 = vld [vmem:[#allocation114_spill] sm:$0xff]  ;;  %v13954_v27 = vld [vmem:[#allocation112_spill] sm:$0xff] }
 0x39b   :  { %3800 = vmatprep.subr.bf16.mxu0 %v9395_v48  ;;  %3841 = vmatprep.subr.bf16.mxu1 %v9459_v8  ;;  %v9483_v48 = vcombine.high %v13954_v27, %v13953_v60  ;;  %v9418_v8 = vcombine.low %v13952_v19, %v13951_v15  ;;  %v13981_v15 = vld [vmem:[#allocation55_spill] sm:$0xff]  ;;  %v13982_v19 = vld [vmem:[#allocation54_spill] sm:$0xff] }
 0x39e   :  { %3801 = vmatpush1.bf16.msra.mxu0 %v9394_v12  ;;  %3842 = vmatpush1.bf16.msra.mxu1 %v9458_v13  ;;  %v9482_v12 = vcombine.low %v13954_v27, %v13953_v60  ;;  %v13955_v13 = vld [vmem:[#allocation68_spill] sm:$0xff]  ;;  %v13983_v60 = vld [vmem:[#allocation97_spill] sm:$0xff] }
 0x39f   :  { %3802 = vmatprep.subr.bf16.mxu0 %v9391_v3  ;;  %3843 = vmatprep.subr.bf16.mxu1 %v9455_v29  ;;  %v13956_v3 = vld [vmem:[#allocation66_spill] sm:$0xff]  ;;  %v13984_v27 = vld [vmem:[#allocation96_spill] sm:$0xff] }
 0x3a0   :  { %v9415_v29 = vcombine.high %v13956_v3, %v13955_v13 }
 0x3a2   :  { %3803 = vmatpush1.bf16.msra.mxu0 %v9390_v50  ;;  %3844 = vmatpush1.bf16.msra.mxu1 %v9454_v22  ;;  %v13957_v50 = vld [vmem:[#allocation110_spill] sm:$0xff]  ;;  %v13958_v22 = vld [vmem:[#allocation108_spill] sm:$0xff] }
 0x3a3   :  { %3804 = vmatprep.subr.bf16.mxu0 %v9387_v14  ;;  %3845 = vmatprep.subr.bf16.mxu1 %v9451_v16  ;;  %v9479_v14 = vcombine.high %v13958_v22, %v13957_v50  ;;  %v9414_v16 = vcombine.low %v13956_v3, %v13955_v13  ;;  %v13985_v13 = vld [vmem:[#allocation53_spill] sm:$0xff]  ;;  %v13986_v3 = vld [vmem:[#allocation52_spill] sm:$0xff] }
 0x3a6   :  { %3805 = vmatpush1.bf16.msra.mxu0 %v9386_v0  ;;  %3846 = vmatpush1.bf16.msra.mxu1 %v9450_v20  ;;  %v9478_v0 = vcombine.low %v13958_v22, %v13957_v50  ;;  %v13959_v20 = vld [vmem:[#allocation65_spill] sm:$0xff]  ;;  %v13987_v50 = vld [vmem:[#allocation95_spill] sm:$0xff]  ;;  %v13988_v22 = vld [vmem:[#allocation94_spill] sm:$0xff] }
 0x3a7   :  { %3806 = vmatprep.subr.bf16.mxu0 %v9383_v9  ;;  %3847 = vmatprep.subr.bf16.mxu1 %v9447_v17  ;;  %v13960_v9 = vld [vmem:[#allocation64_spill] sm:$0xff] }
 0x3a8   :  { %v9413_v17 = vcombine.high %v13960_v9, %v13959_v20 }
 0x3aa   :  { %3807 = vmatpush1.bf16.msra.mxu0 %v9382_v45  ;;  %3848 = vmatpush1.bf16.msra.mxu1 %v9446_v53  ;;  %v13961_v45 = vld [vmem:[#allocation107_spill] sm:$0xff]  ;;  %v13962_v53 = vld [vmem:[#allocation106_spill] sm:$0xff] }
 0x3ab   :  { %3808 = vmatprep.subr.bf16.mxu0 %v9443_v4  ;;  %3849 = vmatprep.subr.bf16.mxu1 %v9507_v7  ;;  %v9477_v4 = vcombine.high %v13962_v53, %v13961_v45  ;;  %v9412_v7 = vcombine.low %v13960_v9, %v13959_v20  ;;  %v13989_v20 = vld [vmem:[#allocation51_spill] sm:$0xff]  ;;  %v13990_v9 = vld [vmem:[#allocation50_spill] sm:$0xff] }
 0x3ae   :  { %3809 = vmatpush2.bf16.msra.mxu0 %v9442_v37  ;;  %3850 = vmatpush2.bf16.msra.mxu1 %v9506_v41  ;;  %v9476_v37 = vcombine.low %v13962_v53, %v13961_v45  ;;  %v13963_v41 = vld [vmem:[#allocation63_spill] sm:$0xff]  ;;  %v13991_v45 = vld [vmem:[#allocation93_spill] sm:$0xff]  ;;  %v13992_v53 = vld [vmem:[#allocation92_spill] sm:$0xff] }
 0x3af   :  { %3810 = vmatprep.subr.bf16.mxu0 %v9439_v30  ;;  %3851 = vmatprep.subr.bf16.mxu1 %v9503_v6  ;;  %v13964_v30 = vld [vmem:[#allocation62_spill] sm:$0xff] }
 0x3b0   :  { %v9409_v6 = vcombine.high %v13964_v30, %v13963_v41 }
 0x3b2   :  { %3811 = vmatpush2.bf16.msra.mxu0 %v9438_v47  ;;  %3852 = vmatpush2.bf16.msra.mxu1 %v9502_v59  ;;  %v13965_v47 = vld [vmem:[#allocation105_spill] sm:$0xff]  ;;  %v13966_v59 = vld [vmem:[#allocation104_spill] sm:$0xff] }
 0x3b3   :  { %3812 = vmatprep.subr.bf16.mxu0 %v9435_v24  ;;  %3853 = vmatprep.subr.bf16.mxu1 %v9499_v43  ;;  %v9473_v24 = vcombine.high %v13966_v59, %v13965_v47  ;;  %v13968_v43 = vld [vmem:[#allocation49_spill] sm:$0xff] }
 0x3b6   :  { %3813 = vmatpush2.bf16.msra.mxu0 %v9434_v51  ;;  %3854 = vmatpush2.bf16.msra.mxu1 %v9498_v44  ;;  %v9408_v51 = vcombine.low %v13964_v30, %v13963_v41  ;;  %v9472_v44 = vcombine.low %v13966_v59, %v13965_v47  ;;  %v13993_v41 = vld [vmem:[#allocation91_spill] sm:$0xff]  ;;  %v13994_v30 = vld [vmem:[#allocation90_spill] sm:$0xff]  ;;  %v13996_v59 = vld [vmem:[#allocation133_spill] sm:$0xff] }
 0x3b7   :  { %3814 = vmatprep.subr.bf16.mxu0 %v9431_v36  ;;  %3855 = vmatprep.subr.bf16.mxu1 %v9495_v35  ;;  %v9405_v36 = vcombine.high %v13970_v23, %v13969_v10  ;;  %v9469_v35 = vcombine.high %v13972_v58, %v13971_v39  ;;  %v13995_v47 = vld [vmem:[#allocation134_spill] sm:$0xff] }
 0x3ba   :  { %3815 = vmatpush2.bf16.msra.mxu0 %v9430_v55  ;;  %3856 = vmatpush2.bf16.msra.mxu1 %v9494_v34  ;;  %v9404_v55 = vcombine.low %v13970_v23, %v13969_v10  ;;  %v9468_v34 = vcombine.low %v13972_v58, %v13971_v39  ;;  %v13997_v10 = vld [vmem:[#allocation89_spill] sm:$0xff]  ;;  %v13998_v23 = vld [vmem:[#allocation88_spill] sm:$0xff]  ;;  %v14000_v58 = vld [vmem:[#allocation131_spill] sm:$0xff] }
 0x3bb   :  { %3816 = vmatprep.subr.bf16.mxu0 %v9427_v21  ;;  %3857 = vmatprep.subr.bf16.mxu1 %v9491_v5  ;;  %v9401_v21 = vcombine.high %v13974_v31, %v13973_v18  ;;  %v9465_v5 = vcombine.high %v13976_v40, %v13975_v52  ;;  %v13999_v39 = vld [vmem:[#allocation132_spill] sm:$0xff] }
 0x3be   :  { %3817 = vmatpush2.bf16.msra.mxu0 %v9426_v33  ;;  %3858 = vmatpush2.bf16.msra.mxu1 %v9490_v54  ;;  %v9400_v33 = vcombine.low %v13974_v31, %v13973_v18  ;;  %v9464_v54 = vcombine.low %v13976_v40, %v13975_v52  ;;  %v14001_v18 = vld [vmem:[#allocation87_spill] sm:$0xff]  ;;  %v14002_v31 = vld [vmem:[#allocation86_spill] sm:$0xff]  ;;  %v14004_v40 = vld [vmem:[#allocation129_spill] sm:$0xff] }
 0x3bf   :  { %3818 = vmatprep.subr.bf16.mxu0 %v9423_v56  ;;  %3859 = vmatprep.subr.bf16.mxu1 %v9487_v49  ;;  %v9397_v56 = vcombine.high %v13978_v11, %v13977_v42  ;;  %v9461_v49 = vcombine.high %v13980_v1, %v13979_v28  ;;  %v14003_v52 = vld [vmem:[#allocation130_spill] sm:$0xff] }
 0x3c2   :  { %3819 = vmatpush2.bf16.msra.mxu0 %v9422_v32  ;;  %3860 = vmatpush2.bf16.msra.mxu1 %v9486_v26  ;;  %v9396_v32 = vcombine.low %v13978_v11, %v13977_v42  ;;  %v9460_v26 = vcombine.low %v13980_v1, %v13979_v28  ;;  %v14005_v42 = vld [vmem:[#allocation85_spill] sm:$0xff]  ;;  %v14006_v11 = vld [vmem:[#allocation83_spill] sm:$0xff] }
 0x3c3   :  { %3820 = vmatprep.subr.bf16.mxu0 %v9419_v57  ;;  %3861 = vmatprep.subr.bf16.mxu1 %v9483_v48  ;;  %v9393_v57 = vcombine.high %v13982_v19, %v13981_v15  ;;  %v9457_v48 = vcombine.high %v13984_v27, %v13983_v60  ;;  %v14007_v28 = vld [vmem:[#allocation127_spill] sm:$0xff]  ;;  %v14008_v1 = vld [vmem:[#allocation125_spill] sm:$0xff] }
 0x3c6   :  { %3821 = vmatpush2.bf16.msra.mxu0 %v9418_v8  ;;  %3862 = vmatpush2.bf16.msra.mxu1 %v9482_v12  ;;  %v9392_v8 = vcombine.low %v13982_v19, %v13981_v15  ;;  %v9456_v12 = vcombine.low %v13984_v27, %v13983_v60  ;;  %v14009_v15 = vld [vmem:[#allocation81_spill] sm:$0xff]  ;;  %v14010_v19 = vld [vmem:[#allocation79_spill] sm:$0xff] }
 0x3c7   :  { %3822 = vmatprep.subr.bf16.mxu0 %v9415_v29  ;;  %3863 = vmatprep.subr.bf16.mxu1 %v9479_v14  ;;  %v9389_v29 = vcombine.high %v13986_v3, %v13985_v13  ;;  %v9453_v14 = vcombine.high %v13988_v22, %v13987_v50  ;;  %v14011_v60 = vld [vmem:[#allocation123_spill] sm:$0xff]  ;;  %v14012_v27 = vld [vmem:[#allocation121_spill] sm:$0xff] }
 0x3ca   :  { %3823 = vmatpush2.bf16.msra.mxu0 %v9414_v16  ;;  %3864 = vmatpush2.bf16.msra.mxu1 %v9478_v0  ;;  %v9388_v16 = vcombine.low %v13986_v3, %v13985_v13  ;;  %v9452_v0 = vcombine.low %v13988_v22, %v13987_v50  ;;  %v14013_v13 = vld [vmem:[#allocation77_spill] sm:$0xff]  ;;  %v14014_v3 = vld [vmem:[#allocation75_spill] sm:$0xff] }
 0x3cb   :  { %3874 = vmatprep.subr.bf16.mxu0 %v9413_v17  ;;  %3915 = vmatprep.subr.bf16.mxu1 %v9477_v4  ;;  %v9385_v17 = vcombine.high %v13990_v9, %v13989_v20  ;;  %v9449_v4 = vcombine.high %v13992_v53, %v13991_v45  ;;  %v14015_v50 = vld [vmem:[#allocation119_spill] sm:$0xff]  ;;  %v14016_v22 = vld [vmem:[#allocation117_spill] sm:$0xff] }
 0x3cd   :  { %3825 = vmatmul.mubr.bf16.vlgmr.msra.gmra.mxu0 %v13967_v25  ;;  %3866 = vmatmul.mubr.bf16.vlgmr.msra.gmra.mxu1 %v13968_v43 }
 0x3ce   :  { %3875 = vmatpush1.bf16.msra.mxu0 %v9412_v7  ;;  %3916 = vmatpush1.bf16.msra.mxu1 %v9476_v37  ;;  %v9384_v7 = vcombine.low %v13990_v9, %v13989_v20  ;;  %v9448_v37 = vcombine.low %v13992_v53, %v13991_v45  ;;  %v14017_v20 = vld [vmem:[#allocation73_spill] sm:$0xff]  ;;  %v14018_v9 = vld [vmem:[#allocation71_spill] sm:$0xff] }
 0x3cf   :  { %3876 = vmatprep.subr.bf16.mxu0 %v9409_v6  ;;  %3917 = vmatprep.subr.bf16.mxu1 %v9473_v24  ;;  %v9445_v6 = vcombine.high %v13994_v30, %v13993_v41  ;;  %v9509_v24 = vcombine.high %v13996_v59, %v13995_v47  ;;  %v14019_v45 = vld [vmem:[#allocation115_spill] sm:$0xff]  ;;  %v14020_v53 = vld [vmem:[#allocation113_spill] sm:$0xff] }
 0x3d0   :  { %3906 = vmatprep.mubr.bf16.mxu0 %v11810_v63  ;;  %3947 = vmatprep.mubr.bf16.mxu1 %v11812_v2 }
 0x3d2   :  { %3877 = vmatpush1.bf16.msra.mxu0 %v9408_v51  ;;  %3918 = vmatpush1.bf16.msra.mxu1 %v9472_v44  ;;  %v9444_v51 = vcombine.low %v13994_v30, %v13993_v41  ;;  %v9508_v44 = vcombine.low %v13996_v59, %v13995_v47  ;;  %v14021_v41 = vld [vmem:[#allocation69_spill] sm:$0xff]  ;;  %v14022_v30 = vld [vmem:[#allocation67_spill] sm:$0xff] }
 0x3d3   :  { %3878 = vmatprep.subr.bf16.mxu0 %v9405_v36  ;;  %3919 = vmatprep.subr.bf16.mxu1 %v9469_v35  ;;  %v9441_v36 = vcombine.high %v13998_v23, %v13997_v10  ;;  %v9505_v35 = vcombine.high %v14000_v58, %v13999_v39  ;;  %v14023_v47 = vld [vmem:[#allocation111_spill] sm:$0xff]  ;;  %v14024_v59 = vld [vmem:[#allocation109_spill] sm:$0xff] }
 0x3d6   :  { %3879 = vmatpush1.bf16.msra.mxu0 %v9404_v55  ;;  %3920 = vmatpush1.bf16.msra.mxu1 %v9468_v34  ;;  %v9440_v55 = vcombine.low %v13998_v23, %v13997_v10  ;;  %v9504_v34 = vcombine.low %v14000_v58, %v13999_v39 }
 0x3d7   :  { %3880 = vmatprep.subr.bf16.mxu0 %v9401_v21  ;;  %3921 = vmatprep.subr.bf16.mxu1 %v9465_v5  ;;  %v9437_v21 = vcombine.high %v14002_v31, %v14001_v18  ;;  %v9501_v5 = vcombine.high %v14004_v40, %v14003_v52 }
 0x3da   :  { %3881 = vmatpush1.bf16.msra.mxu0 %v9400_v33  ;;  %3922 = vmatpush1.bf16.msra.mxu1 %v9464_v54  ;;  %v9436_v33 = vcombine.low %v14002_v31, %v14001_v18  ;;  %v9500_v54 = vcombine.low %v14004_v40, %v14003_v52 }
 0x3db   :  { %3882 = vmatprep.subr.bf16.mxu0 %v9397_v56  ;;  %3923 = vmatprep.subr.bf16.mxu1 %v9461_v49  ;;  %v9433_v56 = vcombine.high %v14006_v11, %v14005_v42  ;;  %v9497_v49 = vcombine.high %v14008_v1, %v14007_v28 }
 0x3de   :  { %3883 = vmatpush1.bf16.msra.mxu0 %v9396_v32  ;;  %3924 = vmatpush1.bf16.msra.mxu1 %v9460_v26  ;;  %v9432_v32 = vcombine.low %v14006_v11, %v14005_v42  ;;  %v9496_v26 = vcombine.low %v14008_v1, %v14007_v28  ;;  %v3956_v1 = vld [vmem:[#allocation9 + $0x8] sm:$0xf] }
 0x3df   :  { %3884 = vmatprep.subr.bf16.mxu0 %v9393_v57  ;;  %3925 = vmatprep.subr.bf16.mxu1 %v9457_v48  ;;  %v9429_v57 = vcombine.high %v14010_v19, %v14009_v15  ;;  %v9493_v48 = vcombine.high %v14012_v27, %v14011_v60 }
 0x3e2   :  { %3885 = vmatpush1.bf16.msra.mxu0 %v9392_v8  ;;  %3926 = vmatpush1.bf16.msra.mxu1 %v9456_v12  ;;  %v9428_v8 = vcombine.low %v14010_v19, %v14009_v15  ;;  %v9492_v12 = vcombine.low %v14012_v27, %v14011_v60  ;;  %v14025_v15 = vld [vmem:[#allocation44_spill] sm:$0xff] }
 0x3e3   :  { %3886 = vmatprep.subr.bf16.mxu0 %v9389_v29  ;;  %3927 = vmatprep.subr.bf16.mxu1 %v9453_v14  ;;  %v9425_v29 = vcombine.high %v14014_v3, %v14013_v13  ;;  %v9489_v14 = vcombine.high %v14016_v22, %v14015_v50  ;;  %v3961_v19 = vrot.slane %v3956_v1, %v14025_v15 }
 0x3e6   :  { %3887 = vmatpush1.bf16.msra.mxu0 %v9388_v16  ;;  %3928 = vmatpush1.bf16.msra.mxu1 %v9452_v0  ;;  %v9424_v16 = vcombine.low %v14014_v3, %v14013_v13  ;;  %v9488_v0 = vcombine.low %v14016_v22, %v14015_v50 }
 0x3e7   :  { %3888 = vmatprep.subr.bf16.mxu0 %v9385_v17  ;;  %3929 = vmatprep.subr.bf16.mxu1 %v9449_v4  ;;  %v9421_v17 = vcombine.high %v14018_v9, %v14017_v20  ;;  %v9485_v4 = vcombine.high %v14020_v53, %v14019_v45 }
 0x3ea   :  { %3889 = vmatpush1.bf16.msra.mxu0 %v9384_v7  ;;  %3930 = vmatpush1.bf16.msra.mxu1 %v9448_v37  ;;  %v9420_v7 = vcombine.low %v14018_v9, %v14017_v20  ;;  %v9484_v37 = vcombine.low %v14020_v53, %v14019_v45 }
 0x3eb   :  { %3890 = vmatprep.subr.bf16.mxu0 %v9445_v6  ;;  %3931 = vmatprep.subr.bf16.mxu1 %v9509_v24  ;;  %v9417_v6 = vcombine.high %v14022_v30, %v14021_v41  ;;  %v9481_v24 = vcombine.high %v14024_v59, %v14023_v47 }
 0x3ee   :  { %3891 = vmatpush2.bf16.msra.mxu0 %v9444_v51  ;;  %3932 = vmatpush2.bf16.msra.mxu1 %v9508_v44  ;;  %v9416_v51 = vcombine.low %v14022_v30, %v14021_v41  ;;  %v9480_v44 = vcombine.low %v14024_v59, %v14023_v47  ;;  %v14030_v47 = vld [vmem:[#allocation47_spill] sm:$0xff] }
 0x3ef   :  { %3892 = vmatprep.subr.bf16.mxu0 %v9441_v36  ;;  %3933 = vmatprep.subr.bf16.mxu1 %v9505_v35  ;;  %v3973_v59 = vrot.slane %v3956_v1, %v14030_v47 }
 0x3f2   :  { %3893 = vmatpush2.bf16.msra.mxu0 %v9440_v55  ;;  %3934 = vmatpush2.bf16.msra.mxu1 %v9504_v34 }
 0x3f3   :  { %3894 = vmatprep.subr.bf16.mxu0 %v9437_v21  ;;  %3935 = vmatprep.subr.bf16.mxu1 %v9501_v5 }
 0x3f6   :  { %3895 = vmatpush2.bf16.msra.mxu0 %v9436_v33  ;;  %3936 = vmatpush2.bf16.msra.mxu1 %v9500_v54 }
 0x3f7   :  { %3896 = vmatprep.subr.bf16.mxu0 %v9433_v56  ;;  %3937 = vmatprep.subr.bf16.mxu1 %v9497_v49 }
 0x3fa   :  { %3897 = vmatpush2.bf16.msra.mxu0 %v9432_v32  ;;  %3938 = vmatpush2.bf16.msra.mxu1 %v9496_v26 }
 0x3fb   :  { %3898 = vmatprep.subr.bf16.mxu0 %v9429_v57  ;;  %3939 = vmatprep.subr.bf16.mxu1 %v9493_v48 }
 0x3fe   :  { %3899 = vmatpush2.bf16.msra.mxu0 %v9428_v8  ;;  %3940 = vmatpush2.bf16.msra.mxu1 %v9492_v12  ;;  %v14026_v8 = vld [vmem:[#allocation45_spill] sm:$0xff] }
 0x3ff   :  { %3900 = vmatprep.subr.bf16.mxu0 %v9425_v29  ;;  %3941 = vmatprep.subr.bf16.mxu1 %v9489_v14  ;;  %v3965_v12 = vrot.slane %v3956_v1, %v14026_v8 }
 0x402   :  { %3901 = vmatpush2.bf16.msra.mxu0 %v9424_v16  ;;  %3942 = vmatpush2.bf16.msra.mxu1 %v9488_v0 }
 0x403   :  { %3902 = vmatprep.subr.bf16.mxu0 %v9421_v17  ;;  %3943 = vmatprep.subr.bf16.mxu1 %v9485_v4  ;;  %v14029_v4 = vld [vmem:[#allocation46_spill] sm:$0xff] }
 0x406   :  { %3903 = vmatpush2.bf16.msra.mxu0 %v9420_v7  ;;  %3944 = vmatpush2.bf16.msra.mxu1 %v9484_v37  ;;  %v3969_v7 = vrot.slane %v3956_v1, %v14029_v4 }
 0x407   :  { %3904 = vmatprep.subr.bf16.mxu0 %v9417_v6  ;;  %3945 = vmatprep.subr.bf16.mxu1 %v9481_v24 }
 0x40a   :  { %3905 = vmatpush2.bf16.msra.mxu0 %v9416_v51  ;;  %3946 = vmatpush2.bf16.msra.mxu1 %v9480_v44 }
 0x40d   :  { %v3022_v10 = vpop.f32.mrf.mxu0  ;;  %v3063_v23 = vpop.f32.mrf.mxu1  ;;  %3907 = vmatmul.mubr.bf16.vlgmr.msra.gmra.mxu0 %v13967_v25  ;;  %3948 = vmatmul.mubr.bf16.vlgmr.msra.gmra.mxu1 %v13968_v43 }
 0x40e   :  { %v3064_v36 = vadd.f32 %v3063_v23, %v3022_v10 }
 0x40f   :  { %v3024_v39 = vpop.f32.mrf.mxu0  ;;  %v3065_v58 = vpop.f32.mrf.mxu1 }
 0x410   :  { %v3066_v35 = vadd.f32 %v3065_v58, %v3024_v39 }
 0x411   :  { %v3026_v55 = vpop.f32.mrf.mxu0  ;;  %v3067_v34 = vpop.f32.mrf.mxu1 }
 0x413   :  { %v3027_v18 = vpop.f32.mrf.mxu0  ;;  %v3068_v31 = vpop.f32.mrf.mxu1 }
 0x44d   :  { %v3104_v21 = vpop.f32.mrf.mxu0  ;;  %v3145_v52 = vpop.f32.mrf.mxu1 }
 0x44e   :  { %v3146_v40 = vadd.f32 %v3145_v52, %v3104_v21 }
 0x44f   :  { %v3106_v5 = vpop.f32.mrf.mxu0  ;;  %v3147_v33 = vpop.f32.mrf.mxu1 }
 0x450   :  { %v3148_v54 = vadd.f32 %v3147_v33, %v3106_v5 }
 0x451   :  { %v3108_v42 = vpop.f32.mrf.mxu0  ;;  %v3149_v11 = vpop.f32.mrf.mxu1 }
 0x453   :  { %v3109_v56 = vpop.f32.mrf.mxu0  ;;  %v3150_v28 = vpop.f32.mrf.mxu1 }
 0x48d   :  { %v3826_v49 = vpop.f32.mrf.mxu0  ;;  %v3867_v32 = vpop.f32.mrf.mxu1 }
 0x48e   :  { %v3827_v26 = vadd.f32 %v3826_v49, %v3064_v36 }
 0x48f   :  { %v3828_v57 = vpop.f32.mrf.mxu0  ;;  %v3869_v60 = vpop.f32.mrf.mxu1 }
 0x490   :  { %v3868_v27 = vadd.f32 %v3867_v32, %v3827_v26  ;;  %v3829_v48 = vadd.f32 %v3828_v57, %v3066_v35 }
 0x491   :  { %v3830_v13 = vpop.f32.mrf.mxu0  ;;  %v3871_v3 = vpop.f32.mrf.mxu1 }
 0x492   :  { %v3978_v29 = vadd.f32 %v3961_v19, %v3868_v27  ;;  %v3870_v50 = vadd.f32 %v3869_v60, %v3829_v48 }
 0x493   :  { %v3831_v22 = vpop.f32.mrf.mxu0  ;;  %v3872_v14 = vpop.f32.mrf.mxu1 }
 0x494   :  { %v3979_v16 = vadd.f32 %v3965_v12, %v3870_v50  ;;  %v3982_v0 = vmax.f32 %v3978_v29, 0.0 }
 0x496   :  { %v12366_v20 = vmax.f32 %v3979_v16, 0.0 }
 0x498   :  { %14027 = vst [vmem:[#allocation128_spill] sm:$0xff] %v12366_v20  ;;  %v12369_v9 = vcombine.low %v3982_v0, %v12366_v20 }
 0x49a   :  { %14028 = vst [vmem:[#allocation84_spill] sm:$0xff] %v12369_v9 }
 0x4cd   :  { %v3908_v17 = vpop.f32.mrf.mxu0  ;;  %v3949_v45 = vpop.f32.mrf.mxu1 }
 0x4ce   :  { %v3909_v53 = vadd.f32 %v3908_v17, %v3146_v40 }
 0x4cf   :  { %v3910_v37 = vpop.f32.mrf.mxu0  ;;  %v3951_v41 = vpop.f32.mrf.mxu1 }
 0x4d0   :  { %v3950_v30 = vadd.f32 %v3949_v45, %v3909_v53  ;;  %v3911_v6 = vadd.f32 %v3910_v37, %v3148_v54 }
 0x4d1   :  { %v3912_v24 = vpop.f32.mrf.mxu0  ;;  %v3953_v51 = vpop.f32.mrf.mxu1 }
 0x4d2   :  { %v3980_v44 = vadd.f32 %v3969_v7, %v3950_v30  ;;  %v3952_v10 = vadd.f32 %v3951_v41, %v3911_v6 }
 0x4d3   :  { %v3913_v23 = vpop.f32.mrf.mxu0  ;;  %v3954_v36 = vpop.f32.mrf.mxu1 }
 0x4d4   :  { %v3981_v39 = vadd.f32 %v3973_v59, %v3952_v10  ;;  %v3984_v58 = vmax.f32 %v3980_v44, 0.0 }
 0x4d6   :  { %v12373_v35 = vmax.f32 %v3981_v39, 0.0 }
 0x4d8   :  { %14031 = vst [vmem:[#allocation82_spill] sm:$0xff] %v12373_v35  ;;  %v12376_v55 = vcombine.low %v3984_v58, %v12373_v35 }
 0x4da   :  { %14032 = vst [vmem:[#allocation126_spill] sm:$0xff] %v12376_v55 }
 0x4db   :  { %11616 = dma.done.wait [#allocation5], 16384 }
 0x4dc   :  { %11617 = vsyncadd [#allocation5], 4294950912  ;;  %s3998_s18 = scalar_lea.hbm %s13570_s1, 81920 }
 0x4dd   :  { %11513 = shalt.err (!%p11686_p5)  }
 0x4de   :  { %4009 = dma.hbm_to_vmem [thread:$0]  %s3998_s18, 16384, %s11680_s4, [#allocation5 + $0x1] }
 0x4df   :  { %v12384_v34 = vld [vmem:[#allocation4] sm:$0xff]  ;;  %v12386_v18 = vld [vmem:[#allocation4 + $0x8] sm:$0xff]  ;;  %v12388_v31 = vld [vmem:[#allocation4 + $0x10] sm:$0xff] }
 0x4e0   :  { %14033 = vst [vmem:[#allocation124_spill] sm:$0xff] %v12386_v18  ;;  %v12390_v21 = vld [vmem:[#allocation4 + $0x18] sm:$0xff]  ;;  %v12392_v52 = vld [vmem:[#allocation4 + $0x20] sm:$0xff]  ;;  %v12394_v40 = vld [vmem:[#allocation4 + $0x28] sm:$0xff] }
 0x4e1   :  { %14034 = vst [vmem:[#allocation80_spill] sm:$0xff] %v12390_v21  ;;  %14035 = vst [vmem:[#allocation78_spill] sm:$0xff] %v12394_v40  ;;  %v12396_v5 = vld [vmem:[#allocation4 + $0x30] sm:$0xff]  ;;  %v12398_v33 = vld [vmem:[#allocation4 + $0x38] sm:$0xff] }
 0x4e2   :  { %14036 = vst [vmem:[#allocation122_spill] sm:$0xff] %v12398_v33  ;;  %v12400_v54 = vld [vmem:[#allocation4 + $0x40] sm:$0xff]  ;;  %v12402_v42 = vld [vmem:[#allocation4 + $0x48] sm:$0xff]  ;;  %v12404_v11 = vld [vmem:[#allocation4 + $0x50] sm:$0xff] }
 0x4e3   :  { %14037 = vst [vmem:[#allocation120_spill] sm:$0xff] %v12402_v42  ;;  %v12406_v56 = vld [vmem:[#allocation4 + $0x58] sm:$0xff]  ;;  %v12408_v28 = vld [vmem:[#allocation4 + $0x60] sm:$0xff]  ;;  %v12410_v1 = vld [vmem:[#allocation4 + $0x68] sm:$0xff] }
 0x4e4   :  { %14038 = vst [vmem:[#allocation76_spill] sm:$0xff] %v12406_v56  ;;  %14039 = vst [vmem:[#allocation74_spill] sm:$0xff] %v12410_v1  ;;  %v12412_v49 = vld [vmem:[#allocation4 + $0x70] sm:$0xff]  ;;  %v12414_v32 = vld [vmem:[#allocation4 + $0x78] sm:$0xff] }
 0x4e5   :  { %14040 = vst [vmem:[#allocation118_spill] sm:$0xff] %v12414_v32  ;;  %v12416_v26 = vld [vmem:[#allocation4 + $0x80] sm:$0xff]  ;;  %v12418_v19 = vld [vmem:[#allocation4 + $0x88] sm:$0xff]  ;;  %v12420_v57 = vld [vmem:[#allocation4 + $0x90] sm:$0xff] }
 0x4e6   :  { %14041 = vst [vmem:[#allocation116_spill] sm:$0xff] %v12418_v19  ;;  %v12422_v60 = vld [vmem:[#allocation4 + $0x98] sm:$0xff]  ;;  %v12424_v27 = vld [vmem:[#allocation4 + $0xa0] sm:$0xff]  ;;  %v12426_v48 = vld [vmem:[#allocation4 + $0xa8] sm:$0xff] }
 0x4e7   :  { %14042 = vst [vmem:[#allocation72_spill] sm:$0xff] %v12422_v60  ;;  %14043 = vst [vmem:[#allocation70_spill] sm:$0xff] %v12426_v48  ;;  %v12428_v12 = vld [vmem:[#allocation4 + $0xb0] sm:$0xff]  ;;  %v12430_v13 = vld [vmem:[#allocation4 + $0xb8] sm:$0xff] }
 0x4e8   :  { %14044 = vst [vmem:[#allocation114_spill] sm:$0xff] %v12430_v13  ;;  %v12432_v3 = vld [vmem:[#allocation4 + $0xc0] sm:$0xff]  ;;  %v12434_v29 = vld [vmem:[#allocation4 + $0xc8] sm:$0xff]  ;;  %v12436_v50 = vld [vmem:[#allocation4 + $0xd0] sm:$0xff] }
 0x4e9   :  { %14045 = vst [vmem:[#allocation112_spill] sm:$0xff] %v12434_v29  ;;  %v12438_v22 = vld [vmem:[#allocation4 + $0xd8] sm:$0xff]  ;;  %v12440_v14 = vld [vmem:[#allocation4 + $0xe0] sm:$0xff]  ;;  %v12442_v16 = vld [vmem:[#allocation4 + $0xe8] sm:$0xff] }
 0x4ea   :  { %14046 = vst [vmem:[#allocation68_spill] sm:$0xff] %v12438_v22  ;;  %14047 = vst [vmem:[#allocation66_spill] sm:$0xff] %v12442_v16  ;;  %v12444_v0 = vld [vmem:[#allocation4 + $0xf0] sm:$0xff]  ;;  %v12446_v17 = vld [vmem:[#allocation4 + $0xf8] sm:$0xff] }
 0x4eb   :  { %14048 = vst [vmem:[#allocation110_spill] sm:$0xff] %v12446_v17  ;;  %v12448_v45 = vld [vmem:[#allocation4 + $0x100] sm:$0xff]  ;;  %v12450_v53 = vld [vmem:[#allocation4 + $0x108] sm:$0xff]  ;;  %v12452_v7 = vld [vmem:[#allocation4 + $0x110] sm:$0xff] }
 0x4ec   :  { %14049 = vst [vmem:[#allocation108_spill] sm:$0xff] %v12448_v45  ;;  %14050 = vst [vmem:[#allocation65_spill] sm:$0xff] %v12450_v53  ;;  %v12454_v37 = vld [vmem:[#allocation4 + $0x118] sm:$0xff]  ;;  %v12456_v41 = vld [vmem:[#allocation4 + $0x120] sm:$0xff] }
 0x4ed   :  { %14051 = vst [vmem:[#allocation64_spill] sm:$0xff] %v12452_v7  ;;  %14052 = vst [vmem:[#allocation107_spill] sm:$0xff] %v12454_v37  ;;  %v12458_v30 = vld [vmem:[#allocation4 + $0x128] sm:$0xff]  ;;  %v12460_v6 = vld [vmem:[#allocation4 + $0x130] sm:$0xff] }
 0x4ee   :  { %14053 = vst [vmem:[#allocation106_spill] sm:$0xff] %v12456_v41  ;;  %14054 = vst [vmem:[#allocation63_spill] sm:$0xff] %v12458_v30  ;;  %v12462_v59 = vld [vmem:[#allocation4 + $0x138] sm:$0xff]  ;;  %v12464_v24 = vld [vmem:[#allocation4 + $0x140] sm:$0xff] }
 0x4ef   :  { %14055 = vst [vmem:[#allocation62_spill] sm:$0xff] %v12460_v6  ;;  %14056 = vst [vmem:[#allocation105_spill] sm:$0xff] %v12462_v59  ;;  %v12466_v51 = vld [vmem:[#allocation4 + $0x148] sm:$0xff]  ;;  %v12468_v44 = vld [vmem:[#allocation4 + $0x150] sm:$0xff] }
 0x4f0   :  { %14057 = vst [vmem:[#allocation104_spill] sm:$0xff] %v12464_v24  ;;  %14058 = vst [vmem:[#allocation61_spill] sm:$0xff] %v12466_v51  ;;  %v12470_v10 = vld [vmem:[#allocation4 + $0x158] sm:$0xff]  ;;  %v12472_v23 = vld [vmem:[#allocation4 + $0x160] sm:$0xff] }
 0x4f1   :  { %14059 = vst [vmem:[#allocation60_spill] sm:$0xff] %v12468_v44  ;;  %14060 = vst [vmem:[#allocation103_spill] sm:$0xff] %v12470_v10  ;;  %v12474_v36 = vld [vmem:[#allocation4 + $0x168] sm:$0xff]  ;;  %v12476_v39 = vld [vmem:[#allocation4 + $0x170] sm:$0xff] }
 0x4f2   :  { %14061 = vst [vmem:[#allocation102_spill] sm:$0xff] %v12472_v23  ;;  %14062 = vst [vmem:[#allocation59_spill] sm:$0xff] %v12474_v36  ;;  %v12478_v58 = vld [vmem:[#allocation4 + $0x178] sm:$0xff]  ;;  %v12480_v55 = vld [vmem:[#allocation4 + $0x180] sm:$0xff] }
 0x4f3   :  { %14063 = vst [vmem:[#allocation58_spill] sm:$0xff] %v12476_v39  ;;  %14064 = vst [vmem:[#allocation101_spill] sm:$0xff] %v12478_v58  ;;  %v12482_v9 = vld [vmem:[#allocation4 + $0x188] sm:$0xff]  ;;  %v12484_v35 = vld [vmem:[#allocation4 + $0x190] sm:$0xff] }
 0x4f4   :  { %14065 = vst [vmem:[#allocation100_spill] sm:$0xff] %v12480_v55  ;;  %14066 = vst [vmem:[#allocation57_spill] sm:$0xff] %v12482_v9  ;;  %v12486_v20 = vld [vmem:[#allocation4 + $0x198] sm:$0xff]  ;;  %v12488_v47 = vld [vmem:[#allocation4 + $0x1a0] sm:$0xff] }
 0x4f5   :  { %14067 = vst [vmem:[#allocation56_spill] sm:$0xff] %v12484_v35  ;;  %14068 = vst [vmem:[#allocation99_spill] sm:$0xff] %v12486_v20  ;;  %v12490_v4 = vld [vmem:[#allocation4 + $0x1a8] sm:$0xff]  ;;  %v12492_v8 = vld [vmem:[#allocation4 + $0x1b0] sm:$0xff] }
 0x4f6   :  { %14069 = vst [vmem:[#allocation98_spill] sm:$0xff] %v12490_v4  ;;  %v12494_v15 = vld [vmem:[#allocation4 + $0x1b8] sm:$0xff]  ;;  %v12496_v53 = vld [vmem:[#allocation4 + $0x1c0] sm:$0xff]  ;;  %v12498_v37 = vld [vmem:[#allocation4 + $0x1c8] sm:$0xff] }
 0x4f7   :  { %14070 = vst [vmem:[#allocation55_spill] sm:$0xff] %v12494_v15  ;;  %14071 = vst [vmem:[#allocation54_spill] sm:$0xff] %v12498_v37  ;;  %v12500_v30 = vld [vmem:[#allocation4 + $0x1d0] sm:$0xff]  ;;  %v12502_v59 = vld [vmem:[#allocation4 + $0x1d8] sm:$0xff] }
 0x4f8   :  { %14072 = vst [vmem:[#allocation97_spill] sm:$0xff] %v12502_v59  ;;  %v12504_v51 = vld [vmem:[#allocation4 + $0x1e0] sm:$0xff]  ;;  %v12506_v10 = vld [vmem:[#allocation4 + $0x1e8] sm:$0xff]  ;;  %v12508_v36 = vld [vmem:[#allocation4 + $0x1f0] sm:$0xff] }
 0x4f9   :  { %14073 = vst [vmem:[#allocation96_spill] sm:$0xff] %v12506_v10  ;;  %v12510_v58 = vld [vmem:[#allocation4 + $0x1f8] sm:$0xff]  ;;  %v12512_v9 = vld [vmem:[#allocation4 + $0x200] sm:$0xff]  ;;  %v12514_v20 = vld [vmem:[#allocation4 + $0x208] sm:$0xff] }
 0x4fa   :  { %14074 = vst [vmem:[#allocation53_spill] sm:$0xff] %v12510_v58  ;;  %14075 = vst [vmem:[#allocation52_spill] sm:$0xff] %v12514_v20  ;;  %v12516_v4 = vld [vmem:[#allocation4 + $0x210] sm:$0xff]  ;;  %v12518_v15 = vld [vmem:[#allocation4 + $0x218] sm:$0xff] }
 0x4fb   :  { %14076 = vst [vmem:[#allocation95_spill] sm:$0xff] %v12518_v15  ;;  %v12520_v37 = vld [vmem:[#allocation4 + $0x220] sm:$0xff]  ;;  %v12522_v18 = vld [vmem:[#allocation4 + $0x228] sm:$0xff]  ;;  %v12524_v59 = vld [vmem:[#allocation4 + $0x230] sm:$0xff] }
 0x4fc   :  { %14077 = vst [vmem:[#allocation94_spill] sm:$0xff] %v12522_v18  ;;  %v12526_v21 = vld [vmem:[#allocation4 + $0x238] sm:$0xff]  ;;  %v12528_v10 = vld [vmem:[#allocation4 + $0x240] sm:$0xff]  ;;  %v12530_v40 = vld [vmem:[#allocation4 + $0x248] sm:$0xff] }
 0x4fd   :  { %14078 = vst [vmem:[#allocation51_spill] sm:$0xff] %v12526_v21  ;;  %14079 = vst [vmem:[#allocation50_spill] sm:$0xff] %v12530_v40  ;;  %v12532_v58 = vld [vmem:[#allocation4 + $0x250] sm:$0xff]  ;;  %v12534_v33 = vld [vmem:[#allocation4 + $0x258] sm:$0xff] }
 0x4fe   :  { %14080 = vst [vmem:[#allocation93_spill] sm:$0xff] %v12534_v33  ;;  %v12536_v20 = vld [vmem:[#allocation4 + $0x260] sm:$0xff]  ;;  %v12538_v42 = vld [vmem:[#allocation4 + $0x268] sm:$0xff]  ;;  %v12540_v15 = vld [vmem:[#allocation4 + $0x270] sm:$0xff] }
 0x4ff   :  { %14081 = vst [vmem:[#allocation92_spill] sm:$0xff] %v12538_v42  ;;  %v12542_v56 = vld [vmem:[#allocation4 + $0x278] sm:$0xff]  ;;  %v12544_v18 = vld [vmem:[#allocation4 + $0x280] sm:$0xff]  ;;  %v12546_v1 = vld [vmem:[#allocation4 + $0x288] sm:$0xff] }
 0x500   :  { %14082 = vst [vmem:[#allocation91_spill] sm:$0xff] %v12542_v56  ;;  %14083 = vst [vmem:[#allocation90_spill] sm:$0xff] %v12546_v1  ;;  %v12548_v21 = vld [vmem:[#allocation4 + $0x290] sm:$0xff]  ;;  %v12550_v32 = vld [vmem:[#allocation4 + $0x298] sm:$0xff] }
 0x501   :  { %14084 = vst [vmem:[#allocation134_spill] sm:$0xff] %v12550_v32  ;;  %v12552_v40 = vld [vmem:[#allocation4 + $0x2a0] sm:$0xff]  ;;  %v12554_v19 = vld [vmem:[#allocation4 + $0x2a8] sm:$0xff]  ;;  %v12556_v33 = vld [vmem:[#allocation4 + $0x2b0] sm:$0xff] }
 0x502   :  { %14085 = vst [vmem:[#allocation133_spill] sm:$0xff] %v12554_v19  ;;  %v12558_v60 = vld [vmem:[#allocation4 + $0x2b8] sm:$0xff]  ;;  %v12560_v42 = vld [vmem:[#allocation4 + $0x2c0] sm:$0xff]  ;;  %v12562_v48 = vld [vmem:[#allocation4 + $0x2c8] sm:$0xff] }
 0x503   :  { %14086 = vst [vmem:[#allocation89_spill] sm:$0xff] %v12558_v60  ;;  %14087 = vst [vmem:[#allocation88_spill] sm:$0xff] %v12562_v48  ;;  %v12564_v56 = vld [vmem:[#allocation4 + $0x2d0] sm:$0xff]  ;;  %v12566_v13 = vld [vmem:[#allocation4 + $0x2d8] sm:$0xff] }
 0x504   :  { %14088 = vst [vmem:[#allocation132_spill] sm:$0xff] %v12566_v13  ;;  %v12568_v1 = vld [vmem:[#allocation4 + $0x2e0] sm:$0xff]  ;;  %v12570_v43 = vld [vmem:[#allocation4 + $0x2e8] sm:$0xff]  ;;  %v12572_v32 = vld [vmem:[#allocation4 + $0x2f0] sm:$0xff] }
 0x505   :  { %14089 = vst [vmem:[#allocation131_spill] sm:$0xff] %v12570_v43  ;;  %v12574_v25 = vld [vmem:[#allocation4 + $0x2f8] sm:$0xff]  ;;  %v12576_v19 = vld [vmem:[#allocation4 + $0x300] sm:$0xff]  ;;  %v12578_v29 = vld [vmem:[#allocation4 + $0x308] sm:$0xff] }
 0x506   :  { %14090 = vst [vmem:[#allocation87_spill] sm:$0xff] %v12574_v25  ;;  %14091 = vst [vmem:[#allocation86_spill] sm:$0xff] %v12576_v19  ;;  %v12580_v60 = vld [vmem:[#allocation4 + $0x310] sm:$0xff]  ;;  %v12582_v22 = vld [vmem:[#allocation4 + $0x318] sm:$0xff] }
 0x507   :  { %14092 = vst [vmem:[#allocation130_spill] sm:$0xff] %v12578_v29  ;;  %14093 = vst [vmem:[#allocation129_spill] sm:$0xff] %v12580_v60  ;;  %v12584_v48 = vld [vmem:[#allocation4 + $0x320] sm:$0xff]  ;;  %v12586_v16 = vld [vmem:[#allocation4 + $0x328] sm:$0xff] }
 0x508   :  { %14094 = vst [vmem:[#allocation85_spill] sm:$0xff] %v12582_v22  ;;  %14095 = vst [vmem:[#allocation83_spill] sm:$0xff] %v12584_v48  ;;  %v12588_v13 = vld [vmem:[#allocation4 + $0x330] sm:$0xff]  ;;  %v12590_v17 = vld [vmem:[#allocation4 + $0x338] sm:$0xff] }
 0x509   :  { %14096 = vst [vmem:[#allocation127_spill] sm:$0xff] %v12586_v16  ;;  %14097 = vst [vmem:[#allocation125_spill] sm:$0xff] %v12588_v13  ;;  %v12592_v43 = vld [vmem:[#allocation4 + $0x340] sm:$0xff]  ;;  %v12594_v45 = vld [vmem:[#allocation4 + $0x348] sm:$0xff] }
 0x50a   :  { %14098 = vst [vmem:[#allocation81_spill] sm:$0xff] %v12590_v17  ;;  %14099 = vst [vmem:[#allocation79_spill] sm:$0xff] %v12592_v43  ;;  %v12596_v25 = vld [vmem:[#allocation4 + $0x350] sm:$0xff]  ;;  %v12598_v19 = vld [vmem:[#allocation4 + $0x358] sm:$0xff] }
 0x50b   :  { %14100 = vst [vmem:[#allocation123_spill] sm:$0xff] %v12594_v45  ;;  %14101 = vst [vmem:[#allocation121_spill] sm:$0xff] %v12596_v25  ;;  %v12600_v29 = vld [vmem:[#allocation4 + $0x360] sm:$0xff]  ;;  %v12602_v60 = vld [vmem:[#allocation4 + $0x368] sm:$0xff] }
 0x50c   :  { %14102 = vst [vmem:[#allocation77_spill] sm:$0xff] %v12598_v19  ;;  %14103 = vst [vmem:[#allocation75_spill] sm:$0xff] %v12600_v29  ;;  %v12604_v22 = vld [vmem:[#allocation4 + $0x370] sm:$0xff]  ;;  %v12606_v7 = vld [vmem:[#allocation4 + $0x378] sm:$0xff] }
 0x50d   :  { %14104 = vst [vmem:[#allocation119_spill] sm:$0xff] %v12602_v60  ;;  %14105 = vst [vmem:[#allocation117_spill] sm:$0xff] %v12604_v22  ;;  %v12608_v16 = vld [vmem:[#allocation4 + $0x380] sm:$0xff]  ;;  %v12610_v48 = vld [vmem:[#allocation4 + $0x388] sm:$0xff] }
 0x50e   :  { %14106 = vst [vmem:[#allocation73_spill] sm:$0xff] %v12606_v7  ;;  %14107 = vst [vmem:[#allocation71_spill] sm:$0xff] %v12608_v16  ;;  %v12612_v17 = vld [vmem:[#allocation4 + $0x390] sm:$0xff]  ;;  %v12614_v13 = vld [vmem:[#allocation4 + $0x398] sm:$0xff] }
 0x50f   :  { %14108 = vst [vmem:[#allocation115_spill] sm:$0xff] %v12610_v48  ;;  %14109 = vst [vmem:[#allocation113_spill] sm:$0xff] %v12612_v17  ;;  %v12616_v45 = vld [vmem:[#allocation4 + $0x3a0] sm:$0xff]  ;;  %v12618_v41 = vld [vmem:[#allocation4 + $0x3a8] sm:$0xff] }
 0x510   :  { %14110 = vst [vmem:[#allocation69_spill] sm:$0xff] %v12614_v13  ;;  %14111 = vst [vmem:[#allocation67_spill] sm:$0xff] %v12616_v45  ;;  %v12620_v19 = vld [vmem:[#allocation4 + $0x3b0] sm:$0xff]  ;;  %v12622_v6 = vld [vmem:[#allocation4 + $0x3b8] sm:$0xff] }
 0x511   :  { %14112 = vst [vmem:[#allocation111_spill] sm:$0xff] %v12618_v41  ;;  %14113 = vst [vmem:[#allocation109_spill] sm:$0xff] %v12622_v6  ;;  %v12624_v60 = vld [vmem:[#allocation4 + $0x3c0] sm:$0xff]  ;;  %v12626_v43 = vld [vmem:[#allocation4 + $0x3c8] sm:$0xff] }
 0x512   :  { %14114 = vst [vmem:[#allocation135_spill] sm:$0xff] %v12626_v43  ;;  %v12628_v7 = vld [vmem:[#allocation4 + $0x3d0] sm:$0xff]  ;;  %v12630_v25 = vld [vmem:[#allocation4 + $0x3d8] sm:$0xff]  ;;  %v12632_v48 = vld [vmem:[#allocation4 + $0x3e0] sm:$0xff] }
 0x513   :  { %14115 = vst [vmem:[#allocation136_spill] sm:$0xff] %v12630_v25  ;;  %v12634_v24 = vld [vmem:[#allocation4 + $0x3e8] sm:$0xff]  ;;  %v12636_v13 = vld [vmem:[#allocation4 + $0x3f0] sm:$0xff]  ;;  %v12638_v44 = vld [vmem:[#allocation4 + $0x3f8] sm:$0xff] }
 0x514   :  { %14116 = vst [vmem:[#allocation137_spill] sm:$0xff] %v12634_v24  ;;  %14117 = vst [vmem:[#allocation138_spill] sm:$0xff] %v12638_v44 }
 0x515   :  { %11618 = dma.done.wait [#allocation5 + $0x1], 16384 }
 0x516   :  { %11619 = vsyncadd [#allocation5 + $0x1], 4294950912  ;;  %s4152_s21 = scalar_lea.hbm %s13570_s1, 98304  ;;  %4976 = vmatprep.mubr.bf16.mxu0 %v12080_v62  ;;  %5017 = vmatprep.mubr.bf16.mxu1 %v12082_v61 }
 0x517   :  { %11536 = shalt.err (!%p11667_p0)  }
 0x518   :  { %4163 = dma.hbm_to_vmem [thread:$0]  %s4152_s21, 16384, %s11660_s23, [#allocation5] }
 0x519   :  { %v10748_v41 = vld [vmem:[#allocation4 + $0x4e4] ss:$16 sps:$4 sm:$0xff]   ;;  %v10752_v43 = vld [vmem:[#allocation4 + $0x4e0] ss:$16 sps:$4 sm:$0xff]  }
 0x51a   :  { %v10750_v6 = vld [vmem:[#allocation4 + $0x6e4] ss:$16 sps:$4 sm:$0xff]   ;;  %4944 = vmatprep.subr.bf16.mxu0 %v10748_v41  ;;  %v10753_v25 = vld [vmem:[#allocation4 + $0x6e0] ss:$16 sps:$4 sm:$0xff]  }
 0x51b   :  { %4985 = vmatprep.subr.bf16.mxu1 %v10750_v6  ;;  %v10754_v24 = vld [vmem:[#allocation4 + $0x4c4] ss:$16 sps:$4 sm:$0xff]   ;;  %4945 = vmatpush1.bf16.msra.mxu0 %v10752_v43  ;;  %v10758_v29 = vld [vmem:[#allocation4 + $0x4c0] ss:$16 sps:$4 sm:$0xff]  }
 0x51c   :  { %4986 = vmatpush1.bf16.msra.mxu1 %v10753_v25  ;;  %v10756_v44 = vld [vmem:[#allocation4 + $0x6c4] ss:$16 sps:$4 sm:$0xff]   ;;  %4946 = vmatprep.subr.bf16.mxu0 %v10754_v24  ;;  %v10759_v22 = vld [vmem:[#allocation4 + $0x6c0] ss:$16 sps:$4 sm:$0xff]  }
 0x51d   :  { %4987 = vmatprep.subr.bf16.mxu1 %v10756_v44  ;;  %v10760_v23 = vld [vmem:[#allocation4 + $0x4a4] ss:$16 sps:$4 sm:$0xff]   ;;  %v10764_v16 = vld [vmem:[#allocation4 + $0x4a0] ss:$16 sps:$4 sm:$0xff]  }
 0x51e   :  { %v10762_v39 = vld [vmem:[#allocation4 + $0x6a4] ss:$16 sps:$4 sm:$0xff]   ;;  %v10765_v17 = vld [vmem:[#allocation4 + $0x6a0] ss:$16 sps:$4 sm:$0xff]  }
 0x51f   :  { %4947 = vmatpush1.bf16.msra.mxu0 %v10758_v29  ;;  %v10766_v55 = vld [vmem:[#allocation4 + $0x484] ss:$16 sps:$4 sm:$0xff]   ;;  %v10770_v35 = vld [vmem:[#allocation4 + $0x480] ss:$16 sps:$4 sm:$0xff]  }
 0x520   :  { %4988 = vmatpush1.bf16.msra.mxu1 %v10759_v22  ;;  %4948 = vmatprep.subr.bf16.mxu0 %v10760_v23  ;;  %v10768_v41 = vld [vmem:[#allocation4 + $0x684] ss:$16 sps:$4 sm:$0xff]   ;;  %v10771_v43 = vld [vmem:[#allocation4 + $0x680] ss:$16 sps:$4 sm:$0xff]  }
 0x521   :  { %4989 = vmatprep.subr.bf16.mxu1 %v10762_v39  ;;  %v10772_v25 = vld [vmem:[#allocation4 + $0x464] ss:$16 sps:$4 sm:$0xff]   ;;  %v10776_v24 = vld [vmem:[#allocation4 + $0x460] ss:$16 sps:$4 sm:$0xff]  }
 0x522   :  { %v10774_v6 = vld [vmem:[#allocation4 + $0x664] ss:$16 sps:$4 sm:$0xff]   ;;  %v10777_v44 = vld [vmem:[#allocation4 + $0x660] ss:$16 sps:$4 sm:$0xff]  }
 0x523   :  { %4949 = vmatpush1.bf16.msra.mxu0 %v10764_v16  ;;  %v10778_v45 = vld [vmem:[#allocation4 + $0x444] ss:$16 sps:$4 sm:$0xff]   ;;  %v10782_v22 = vld [vmem:[#allocation4 + $0x440] ss:$16 sps:$4 sm:$0xff]  }
 0x524   :  { %4990 = vmatpush1.bf16.msra.mxu1 %v10765_v17  ;;  %4950 = vmatprep.subr.bf16.mxu0 %v10766_v55  ;;  %v10780_v29 = vld [vmem:[#allocation4 + $0x644] ss:$16 sps:$4 sm:$0xff]   ;;  %v10783_v23 = vld [vmem:[#allocation4 + $0x640] ss:$16 sps:$4 sm:$0xff]  }
 0x525   :  { %4991 = vmatprep.subr.bf16.mxu1 %v10768_v41  ;;  %v10784_v39 = vld [vmem:[#allocation4 + $0x424] ss:$16 sps:$4 sm:$0xff]   ;;  %v10788_v17 = vld [vmem:[#allocation4 + $0x420] ss:$16 sps:$4 sm:$0xff]  }
 0x526   :  { %v10786_v16 = vld [vmem:[#allocation4 + $0x624] ss:$16 sps:$4 sm:$0xff]   ;;  %v10789_v55 = vld [vmem:[#allocation4 + $0x620] ss:$16 sps:$4 sm:$0xff]  }
 0x527   :  { %4951 = vmatpush1.bf16.msra.mxu0 %v10770_v35  ;;  %v10790_v41 = vld [vmem:[#allocation4 + $0x404] ss:$16 sps:$4 sm:$0xff]  }
 0x528   :  { %4992 = vmatpush1.bf16.msra.mxu1 %v10771_v43  ;;  %4952 = vmatprep.subr.bf16.mxu0 %v10772_v25  ;;  %v10792_v35 = vld [vmem:[#allocation4 + $0x604] ss:$16 sps:$4 sm:$0xff]   ;;  %v10794_v43 = vld [vmem:[#allocation4 + $0x400] ss:$16 sps:$4 sm:$0xff]  }
 0x529   :  { %4993 = vmatprep.subr.bf16.mxu1 %v10774_v6  ;;  %v10795_v25 = vld [vmem:[#allocation4 + $0x600] ss:$16 sps:$4 sm:$0xff]   ;;  %v10796_v6 = vld [vmem:[#allocation4 + $0x5e4] ss:$16 sps:$4 sm:$0xff]  }
 0x52b   :  { %4953 = vmatpush1.bf16.msra.mxu0 %v10776_v24  ;;  %v10798_v24 = vld [vmem:[#allocation4 + $0x7e4] ss:$16 sps:$4 sm:$0xff]  }
 0x52c   :  { %4994 = vmatpush1.bf16.msra.mxu1 %v10777_v44  ;;  %4954 = vmatprep.subr.bf16.mxu0 %v10778_v45  ;;  %v10800_v44 = vld [vmem:[#allocation4 + $0x5e0] ss:$16 sps:$4 sm:$0xff]  }
 0x52d   :  { %4995 = vmatprep.subr.bf16.mxu1 %v10780_v29  ;;  %v10801_v45 = vld [vmem:[#allocation4 + $0x7e0] ss:$16 sps:$4 sm:$0xff]   ;;  %v10802_v29 = vld [vmem:[#allocation4 + $0x5c4] ss:$16 sps:$4 sm:$0xff]  }
 0x52f   :  { %4955 = vmatpush1.bf16.msra.mxu0 %v10782_v22  ;;  %v10804_v22 = vld [vmem:[#allocation4 + $0x7c4] ss:$16 sps:$4 sm:$0xff]  }
 0x530   :  { %4996 = vmatpush1.bf16.msra.mxu1 %v10783_v23  ;;  %4956 = vmatprep.subr.bf16.mxu0 %v10784_v39  ;;  %v10806_v23 = vld [vmem:[#allocation4 + $0x5c0] ss:$16 sps:$4 sm:$0xff]  }
 0x531   :  { %4997 = vmatprep.subr.bf16.mxu1 %v10786_v16  ;;  %v10807_v39 = vld [vmem:[#allocation4 + $0x7c0] ss:$16 sps:$4 sm:$0xff]   ;;  %v10808_v16 = vld [vmem:[#allocation4 + $0x5a4] ss:$16 sps:$4 sm:$0xff]  }
 0x533   :  { %4957 = vmatpush1.bf16.msra.mxu0 %v10788_v17  ;;  %v10810_v17 = vld [vmem:[#allocation4 + $0x7a4] ss:$16 sps:$4 sm:$0xff]  }
 0x534   :  { %4998 = vmatpush1.bf16.msra.mxu1 %v10789_v55  ;;  %4958 = vmatprep.subr.bf16.mxu0 %v10790_v41  ;;  %v10812_v55 = vld [vmem:[#allocation4 + $0x5a0] ss:$16 sps:$4 sm:$0xff]  }
 0x535   :  { %4999 = vmatprep.subr.bf16.mxu1 %v10792_v35  ;;  %v10813_v41 = vld [vmem:[#allocation4 + $0x7a0] ss:$16 sps:$4 sm:$0xff]   ;;  %v10814_v35 = vld [vmem:[#allocation4 + $0x584] ss:$16 sps:$4 sm:$0xff]  }
 0x537   :  { %4959 = vmatpush1.bf16.msra.mxu0 %v10794_v43  ;;  %v10816_v43 = vld [vmem:[#allocation4 + $0x784] ss:$16 sps:$4 sm:$0xff]  }
 0x538   :  { %5000 = vmatpush1.bf16.msra.mxu1 %v10795_v25  ;;  %4960 = vmatprep.subr.bf16.mxu0 %v10796_v6  ;;  %v10818_v25 = vld [vmem:[#allocation4 + $0x580] ss:$16 sps:$4 sm:$0xff]  }
 0x539   :  { %5001 = vmatprep.subr.bf16.mxu1 %v10798_v24  ;;  %v10819_v6 = vld [vmem:[#allocation4 + $0x780] ss:$16 sps:$4 sm:$0xff]   ;;  %v10820_v24 = vld [vmem:[#allocation4 + $0x564] ss:$16 sps:$4 sm:$0xff]  }
 0x53b   :  { %4961 = vmatpush2.bf16.msra.mxu0 %v10800_v44  ;;  %v10822_v44 = vld [vmem:[#allocation4 + $0x764] ss:$16 sps:$4 sm:$0xff]  }
 0x53c   :  { %5002 = vmatpush2.bf16.msra.mxu1 %v10801_v45  ;;  %4962 = vmatprep.subr.bf16.mxu0 %v10802_v29  ;;  %v10824_v45 = vld [vmem:[#allocation4 + $0x560] ss:$16 sps:$4 sm:$0xff]  }
 0x53d   :  { %5003 = vmatprep.subr.bf16.mxu1 %v10804_v22  ;;  %v10825_v29 = vld [vmem:[#allocation4 + $0x760] ss:$16 sps:$4 sm:$0xff]   ;;  %v10826_v22 = vld [vmem:[#allocation4 + $0x544] ss:$16 sps:$4 sm:$0xff]  }
 0x53f   :  { %4963 = vmatpush2.bf16.msra.mxu0 %v10806_v23  ;;  %v10828_v23 = vld [vmem:[#allocation4 + $0x744] ss:$16 sps:$4 sm:$0xff]  }
 0x540   :  { %5004 = vmatpush2.bf16.msra.mxu1 %v10807_v39  ;;  %4964 = vmatprep.subr.bf16.mxu0 %v10808_v16  ;;  %v10830_v39 = vld [vmem:[#allocation4 + $0x540] ss:$16 sps:$4 sm:$0xff]  }
 0x541   :  { %5005 = vmatprep.subr.bf16.mxu1 %v10810_v17  ;;  %v10831_v16 = vld [vmem:[#allocation4 + $0x740] ss:$16 sps:$4 sm:$0xff]   ;;  %v10832_v17 = vld [vmem:[#allocation4 + $0x524] ss:$16 sps:$4 sm:$0xff]  }
 0x543   :  { %4965 = vmatpush2.bf16.msra.mxu0 %v10812_v55  ;;  %v10834_v55 = vld [vmem:[#allocation4 + $0x724] ss:$16 sps:$4 sm:$0xff]  }
 0x544   :  { %5006 = vmatpush2.bf16.msra.mxu1 %v10813_v41  ;;  %4966 = vmatprep.subr.bf16.mxu0 %v10814_v35  ;;  %v10836_v41 = vld [vmem:[#allocation4 + $0x520] ss:$16 sps:$4 sm:$0xff]  }
 0x545   :  { %5007 = vmatprep.subr.bf16.mxu1 %v10816_v43  ;;  %v10837_v35 = vld [vmem:[#allocation4 + $0x720] ss:$16 sps:$4 sm:$0xff]   ;;  %v10838_v43 = vld [vmem:[#allocation4 + $0x504] ss:$16 sps:$4 sm:$0xff]  }
 0x547   :  { %4967 = vmatpush2.bf16.msra.mxu0 %v10818_v25  ;;  %v10840_v25 = vld [vmem:[#allocation4 + $0x704] ss:$16 sps:$4 sm:$0xff]  }
 0x548   :  { %5008 = vmatpush2.bf16.msra.mxu1 %v10819_v6  ;;  %4968 = vmatprep.subr.bf16.mxu0 %v10820_v24  ;;  %v10842_v6 = vld [vmem:[#allocation4 + $0x500] ss:$16 sps:$4 sm:$0xff]  }
 0x549   :  { %5009 = vmatprep.subr.bf16.mxu1 %v10822_v44  ;;  %v10843_v24 = vld [vmem:[#allocation4 + $0x700] ss:$16 sps:$4 sm:$0xff]   ;;  %v10846_v44 = vld [vmem:[#allocation4 + $0x4ec] ss:$16 sps:$4 sm:$0xff]  }
 0x54b   :  { %4969 = vmatpush2.bf16.msra.mxu0 %v10824_v45  ;;  %v10849_v45 = vld [vmem:[#allocation4 + $0x6ec] ss:$16 sps:$4 sm:$0xff]  }
 0x54c   :  { %5010 = vmatpush2.bf16.msra.mxu1 %v10825_v29  ;;  %4970 = vmatprep.subr.bf16.mxu0 %v10826_v22  ;;  %v10844_v29 = vld [vmem:[#allocation4 + $0x4e8] ss:$16 sps:$4 sm:$0xff]  }
 0x54d   :  { %5011 = vmatprep.subr.bf16.mxu1 %v10828_v23  ;;  %v10847_v22 = vld [vmem:[#allocation4 + $0x6e8] ss:$16 sps:$4 sm:$0xff]   ;;  %v10852_v23 = vld [vmem:[#allocation4 + $0x4cc] ss:$16 sps:$4 sm:$0xff]  }
 0x54f   :  { %4971 = vmatpush2.bf16.msra.mxu0 %v10830_v39  ;;  %v10855_v39 = vld [vmem:[#allocation4 + $0x6cc] ss:$16 sps:$4 sm:$0xff]  }
 0x550   :  { %5012 = vmatpush2.bf16.msra.mxu1 %v10831_v16  ;;  %4972 = vmatprep.subr.bf16.mxu0 %v10832_v17  ;;  %v10850_v16 = vld [vmem:[#allocation4 + $0x4c8] ss:$16 sps:$4 sm:$0xff]  }
 0x551   :  { %5013 = vmatprep.subr.bf16.mxu1 %v10834_v55  ;;  %v10853_v17 = vld [vmem:[#allocation4 + $0x6c8] ss:$16 sps:$4 sm:$0xff]   ;;  %v10858_v55 = vld [vmem:[#allocation4 + $0x4ac] ss:$16 sps:$4 sm:$0xff]  }
 0x553   :  { %4973 = vmatpush2.bf16.msra.mxu0 %v10836_v41  ;;  %v10861_v41 = vld [vmem:[#allocation4 + $0x6ac] ss:$16 sps:$4 sm:$0xff]  }
 0x554   :  { %5014 = vmatpush2.bf16.msra.mxu1 %v10837_v35  ;;  %4974 = vmatprep.subr.bf16.mxu0 %v10838_v43  ;;  %v10856_v35 = vld [vmem:[#allocation4 + $0x4a8] ss:$16 sps:$4 sm:$0xff]  }
 0x555   :  { %5015 = vmatprep.subr.bf16.mxu1 %v10840_v25  ;;  %v10859_v43 = vld [vmem:[#allocation4 + $0x6a8] ss:$16 sps:$4 sm:$0xff]   ;;  %v10864_v25 = vld [vmem:[#allocation4 + $0x48c] ss:$16 sps:$4 sm:$0xff]  }
 0x557   :  { %4975 = vmatpush2.bf16.msra.mxu0 %v10842_v6  ;;  %v10867_v6 = vld [vmem:[#allocation4 + $0x68c] ss:$16 sps:$4 sm:$0xff]  }
 0x558   :  { %5016 = vmatpush2.bf16.msra.mxu1 %v10843_v24  ;;  %5026 = vmatprep.subr.bf16.mxu0 %v10846_v44  ;;  %v10862_v24 = vld [vmem:[#allocation4 + $0x488] ss:$16 sps:$4 sm:$0xff]  }
 0x559   :  { %5067 = vmatprep.subr.bf16.mxu1 %v10849_v45  ;;  %v10865_v44 = vld [vmem:[#allocation4 + $0x688] ss:$16 sps:$4 sm:$0xff]   ;;  %v10870_v45 = vld [vmem:[#allocation4 + $0x46c] ss:$16 sps:$4 sm:$0xff]  }
 0x55a   :  { %4977 = vmatmul.mubr.bf16.vlgmr.msra.gmra.mxu0 %v12088_v46 }
 0x55b   :  { %5018 = vmatmul.mubr.bf16.vlgmr.msra.gmra.mxu1 %v12092_v38  ;;  %5027 = vmatpush1.bf16.msra.mxu0 %v10844_v29  ;;  %v10873_v29 = vld [vmem:[#allocation4 + $0x66c] ss:$16 sps:$4 sm:$0xff]  }
 0x55c   :  { %5068 = vmatpush1.bf16.msra.mxu1 %v10847_v22  ;;  %5028 = vmatprep.subr.bf16.mxu0 %v10852_v23  ;;  %v10868_v22 = vld [vmem:[#allocation4 + $0x468] ss:$16 sps:$4 sm:$0xff]   ;;  %v10879_v23 = vld [vmem:[#allocation4 + $0x64c] ss:$16 sps:$4 sm:$0xff]  }
 0x55d   :  { %5069 = vmatprep.subr.bf16.mxu1 %v10855_v39  ;;  %5058 = vmatprep.mubr.bf16.mxu0 %v12080_v62  ;;  %v10871_v62 = vld [vmem:[#allocation4 + $0x668] ss:$16 sps:$4 sm:$0xff]  }
 0x55e   :  { %5099 = vmatprep.mubr.bf16.mxu1 %v12082_v61  ;;  %v10876_v61 = vld [vmem:[#allocation4 + $0x44c] ss:$16 sps:$4 sm:$0xff]   ;;  %v10874_v39 = vld [vmem:[#allocation4 + $0x448] ss:$16 sps:$4 sm:$0xff]  }
 0x55f   :  { %5029 = vmatpush1.bf16.msra.mxu0 %v10850_v16  ;;  %v10877_v16 = vld [vmem:[#allocation4 + $0x648] ss:$16 sps:$4 sm:$0xff]  }
 0x560   :  { %5070 = vmatpush1.bf16.msra.mxu1 %v10853_v17  ;;  %5030 = vmatprep.subr.bf16.mxu0 %v10858_v55  ;;  %v10882_v17 = vld [vmem:[#allocation4 + $0x42c] ss:$16 sps:$4 sm:$0xff]  }
 0x561   :  { %5071 = vmatprep.subr.bf16.mxu1 %v10861_v41  ;;  %v10885_v55 = vld [vmem:[#allocation4 + $0x62c] ss:$16 sps:$4 sm:$0xff]   ;;  %v10880_v41 = vld [vmem:[#allocation4 + $0x428] ss:$16 sps:$4 sm:$0xff]  }
 0x563   :  { %5031 = vmatpush1.bf16.msra.mxu0 %v10856_v35  ;;  %v10883_v35 = vld [vmem:[#allocation4 + $0x628] ss:$16 sps:$4 sm:$0xff]  }
 0x564   :  { %5072 = vmatpush1.bf16.msra.mxu1 %v10859_v43  ;;  %5032 = vmatprep.subr.bf16.mxu0 %v10864_v25  ;;  %v10888_v43 = vld [vmem:[#allocation4 + $0x40c] ss:$16 sps:$4 sm:$0xff]  }
 0x565   :  { %5073 = vmatprep.subr.bf16.mxu1 %v10867_v6  ;;  %v10891_v25 = vld [vmem:[#allocation4 + $0x60c] ss:$16 sps:$4 sm:$0xff]   ;;  %v10886_v6 = vld [vmem:[#allocation4 + $0x408] ss:$16 sps:$4 sm:$0xff]  }
 0x567   :  { %5033 = vmatpush1.bf16.msra.mxu0 %v10862_v24  ;;  %v10889_v24 = vld [vmem:[#allocation4 + $0x608] ss:$16 sps:$4 sm:$0xff]  }
 0x568   :  { %5074 = vmatpush1.bf16.msra.mxu1 %v10865_v44  ;;  %5034 = vmatprep.subr.bf16.mxu0 %v10870_v45  ;;  %v10894_v44 = vld [vmem:[#allocation4 + $0x5ec] ss:$16 sps:$4 sm:$0xff]  }
 0x569   :  { %5075 = vmatprep.subr.bf16.mxu1 %v10873_v29  ;;  %v10897_v45 = vld [vmem:[#allocation4 + $0x7ec] ss:$16 sps:$4 sm:$0xff]   ;;  %v10892_v29 = vld [vmem:[#allocation4 + $0x5e8] ss:$16 sps:$4 sm:$0xff]  }
 0x56b   :  { %5035 = vmatpush1.bf16.msra.mxu0 %v10868_v22  ;;  %v10895_v22 = vld [vmem:[#allocation4 + $0x7e8] ss:$16 sps:$4 sm:$0xff]  }
 0x56c   :  { %5076 = vmatpush1.bf16.msra.mxu1 %v10871_v62  ;;  %5036 = vmatprep.subr.bf16.mxu0 %v10876_v61  ;;  %v10900_v62 = vld [vmem:[#allocation4 + $0x5cc] ss:$16 sps:$4 sm:$0xff]  }
 0x56d   :  { %5077 = vmatprep.subr.bf16.mxu1 %v10879_v23  ;;  %v10903_v61 = vld [vmem:[#allocation4 + $0x7cc] ss:$16 sps:$4 sm:$0xff]   ;;  %v10898_v23 = vld [vmem:[#allocation4 + $0x5c8] ss:$16 sps:$4 sm:$0xff]  }
 0x56f   :  { %5037 = vmatpush1.bf16.msra.mxu0 %v10874_v39  ;;  %v10901_v39 = vld [vmem:[#allocation4 + $0x7c8] ss:$16 sps:$4 sm:$0xff]  }
 0x570   :  { %5078 = vmatpush1.bf16.msra.mxu1 %v10877_v16  ;;  %5038 = vmatprep.subr.bf16.mxu0 %v10882_v17  ;;  %v10906_v16 = vld [vmem:[#allocation4 + $0x5ac] ss:$16 sps:$4 sm:$0xff]  }
 0x571   :  { %5079 = vmatprep.subr.bf16.mxu1 %v10885_v55  ;;  %v10909_v17 = vld [vmem:[#allocation4 + $0x7ac] ss:$16 sps:$4 sm:$0xff]   ;;  %v10904_v55 = vld [vmem:[#allocation4 + $0x5a8] ss:$16 sps:$4 sm:$0xff]  }
 0x573   :  { %5039 = vmatpush1.bf16.msra.mxu0 %v10880_v41  ;;  %v10907_v41 = vld [vmem:[#allocation4 + $0x7a8] ss:$16 sps:$4 sm:$0xff]  }
 0x574   :  { %5080 = vmatpush1.bf16.msra.mxu1 %v10883_v35  ;;  %5040 = vmatprep.subr.bf16.mxu0 %v10888_v43  ;;  %v10912_v35 = vld [vmem:[#allocation4 + $0x58c] ss:$16 sps:$4 sm:$0xff]  }
 0x575   :  { %5081 = vmatprep.subr.bf16.mxu1 %v10891_v25  ;;  %v10915_v43 = vld [vmem:[#allocation4 + $0x78c] ss:$16 sps:$4 sm:$0xff]   ;;  %v10910_v25 = vld [vmem:[#allocation4 + $0x588] ss:$16 sps:$4 sm:$0xff]  }
 0x577   :  { %5041 = vmatpush1.bf16.msra.mxu0 %v10886_v6  ;;  %v10913_v6 = vld [vmem:[#allocation4 + $0x788] ss:$16 sps:$4 sm:$0xff]  }
 0x578   :  { %5082 = vmatpush1.bf16.msra.mxu1 %v10889_v24  ;;  %5042 = vmatprep.subr.bf16.mxu0 %v10894_v44  ;;  %v10918_v24 = vld [vmem:[#allocation4 + $0x56c] ss:$16 sps:$4 sm:$0xff]  }
 0x579   :  { %5083 = vmatprep.subr.bf16.mxu1 %v10897_v45  ;;  %v10921_v44 = vld [vmem:[#allocation4 + $0x76c] ss:$16 sps:$4 sm:$0xff]   ;;  %v10916_v45 = vld [vmem:[#allocation4 + $0x568] ss:$16 sps:$4 sm:$0xff]  }
 0x57b   :  { %5043 = vmatpush2.bf16.msra.mxu0 %v10892_v29  ;;  %v10919_v29 = vld [vmem:[#allocation4 + $0x768] ss:$16 sps:$4 sm:$0xff]  }
 0x57c   :  { %5084 = vmatpush2.bf16.msra.mxu1 %v10895_v22  ;;  %5044 = vmatprep.subr.bf16.mxu0 %v10900_v62  ;;  %v10924_v22 = vld [vmem:[#allocation4 + $0x54c] ss:$16 sps:$4 sm:$0xff]  }
 0x57d   :  { %5085 = vmatprep.subr.bf16.mxu1 %v10903_v61  ;;  %v10927_v62 = vld [vmem:[#allocation4 + $0x74c] ss:$16 sps:$4 sm:$0xff]   ;;  %v10922_v61 = vld [vmem:[#allocation4 + $0x548] ss:$16 sps:$4 sm:$0xff]  }
 0x57f   :  { %5045 = vmatpush2.bf16.msra.mxu0 %v10898_v23  ;;  %v10925_v23 = vld [vmem:[#allocation4 + $0x748] ss:$16 sps:$4 sm:$0xff]  }
 0x580   :  { %5086 = vmatpush2.bf16.msra.mxu1 %v10901_v39  ;;  %5046 = vmatprep.subr.bf16.mxu0 %v10906_v16  ;;  %v10930_v39 = vld [vmem:[#allocation4 + $0x52c] ss:$16 sps:$4 sm:$0xff]  }
 0x581   :  { %5087 = vmatprep.subr.bf16.mxu1 %v10909_v17  ;;  %v10933_v16 = vld [vmem:[#allocation4 + $0x72c] ss:$16 sps:$4 sm:$0xff]   ;;  %v10928_v17 = vld [vmem:[#allocation4 + $0x528] ss:$16 sps:$4 sm:$0xff]  }
 0x583   :  { %5047 = vmatpush2.bf16.msra.mxu0 %v10904_v55  ;;  %v10931_v55 = vld [vmem:[#allocation4 + $0x728] ss:$16 sps:$4 sm:$0xff]  }
 0x584   :  { %5088 = vmatpush2.bf16.msra.mxu1 %v10907_v41  ;;  %5048 = vmatprep.subr.bf16.mxu0 %v10912_v35  ;;  %v10936_v41 = vld [vmem:[#allocation4 + $0x50c] ss:$16 sps:$4 sm:$0xff]  }
 0x585   :  { %5089 = vmatprep.subr.bf16.mxu1 %v10915_v43  ;;  %v10939_v35 = vld [vmem:[#allocation4 + $0x70c] ss:$16 sps:$4 sm:$0xff]   ;;  %v10934_v43 = vld [vmem:[#allocation4 + $0x508] ss:$16 sps:$4 sm:$0xff]  }
 0x587   :  { %5049 = vmatpush2.bf16.msra.mxu0 %v10910_v25  ;;  %v10937_v25 = vld [vmem:[#allocation4 + $0x708] ss:$16 sps:$4 sm:$0xff]  }
 0x588   :  { %5090 = vmatpush2.bf16.msra.mxu1 %v10913_v6  ;;  %5050 = vmatprep.subr.bf16.mxu0 %v10918_v24  ;;  %v9667_v6 = vcombine.high %v12440_v14, %v12444_v0  ;;  %v9731_v24 = vcombine.high %v12568_v1, %v12572_v32 }
 0x589   :  { %5091 = vmatprep.subr.bf16.mxu1 %v10921_v44  ;;  %v9666_v44 = vcombine.low %v12440_v14, %v12444_v0  ;;  %v9662_v14 = vcombine.low %v12432_v3, %v12436_v50  ;;  %v9723_v0 = vcombine.high %v12552_v40, %v12556_v33 }
 0x58b   :  { %5051 = vmatpush2.bf16.msra.mxu0 %v10916_v45  ;;  %v9730_v45 = vcombine.low %v12568_v1, %v12572_v32  ;;  %v9726_v1 = vcombine.low %v12560_v42, %v12564_v56  ;;  %v9659_v32 = vcombine.high %v12424_v27, %v12428_v12 }
 0x58c   :  { %5092 = vmatpush2.bf16.msra.mxu1 %v10919_v29  ;;  %5052 = vmatprep.subr.bf16.mxu0 %v10924_v22  ;;  %v9663_v29 = vcombine.high %v12432_v3, %v12436_v50  ;;  %v9727_v22 = vcombine.high %v12560_v42, %v12564_v56  ;;  %v9655_v42 = vcombine.high %v12416_v26, %v12420_v57 }
 0x58d   :  { %5093 = vmatprep.subr.bf16.mxu1 %v10927_v62  ;;  %v9719_v56 = vcombine.high %v12544_v18, %v12548_v21  ;;  %v9654_v3 = vcombine.low %v12416_v26, %v12420_v57  ;;  %v9718_v50 = vcombine.low %v12544_v18, %v12548_v21  ;;  %v9647_v18 = vcombine.high %v12400_v54, %v12404_v11 }
 0x58e   :  { %v9711_v21 = vcombine.high %v12528_v10, %v12532_v58  ;;  %v9646_v26 = vcombine.low %v12400_v54, %v12404_v11  ;;  %v9710_v57 = vcombine.low %v12528_v10, %v12532_v58  ;;  %v9639_v54 = vcombine.high %v12384_v34, %v12388_v31 }
 0x58f   :  { %5053 = vmatpush2.bf16.msra.mxu0 %v10922_v61  ;;  %v9703_v11 = vcombine.high %v12512_v9, %v12516_v4  ;;  %v9638_v10 = vcombine.low %v12384_v34, %v12388_v31  ;;  %v9702_v58 = vcombine.low %v12512_v9, %v12516_v4  ;;  %v9695_v9 = vcombine.high %v12496_v53, %v12500_v30  ;;  %v14122_v61 = vld [vmem:[#allocation71_spill] sm:$0xff] }
 0x590   :  { %5094 = vmatpush2.bf16.msra.mxu1 %v10925_v23  ;;  %5054 = vmatprep.subr.bf16.mxu0 %v10930_v39  ;;  %v9759_v4 = vcombine.high %v12624_v60, %v12628_v7  ;;  %v9694_v34 = vcombine.low %v12496_v53, %v12500_v30  ;;  %v9758_v31 = vcombine.low %v12624_v60, %v12628_v7  ;;  %v14119_v53 = vld [vmem:[#allocation56_spill] sm:$0xff]  ;;  %v14121_v30 = vld [vmem:[#allocation113_spill] sm:$0xff] }
 0x591   :  { %5095 = vmatprep.subr.bf16.mxu1 %v10933_v16  ;;  %v14120_v60 = vld [vmem:[#allocation100_spill] sm:$0xff]  ;;  %v9751_v23 = vcombine.high %v14122_v61, %v14121_v30  ;;  %v9750_v16 = vcombine.low %v14122_v61, %v14121_v30 }
 0x592   :  { %v9687_v7 = vcombine.high %v14120_v60, %v14119_v53  ;;  %v9686_v39 = vcombine.low %v14120_v60, %v14119_v53  ;;  %v14152_v53 = vld [vmem:[#allocation133_spill] sm:$0xff]  ;;  %v14153_v61 = vld [vmem:[#allocation72_spill] sm:$0xff] }
 0x593   :  { %5055 = vmatpush2.bf16.msra.mxu0 %v10928_v17  ;;  %v14125_v17 = vld [vmem:[#allocation117_spill] sm:$0xff] }
 0x594   :  { %5096 = vmatpush2.bf16.msra.mxu1 %v10931_v55  ;;  %5056 = vmatprep.subr.bf16.mxu0 %v10936_v41  ;;  %v14126_v55 = vld [vmem:[#allocation75_spill] sm:$0xff] }
 0x595   :  { %5097 = vmatprep.subr.bf16.mxu1 %v10939_v35  ;;  %v9747_v41 = vcombine.high %v14126_v55, %v14125_v17 }
 0x597   :  { %5057 = vmatpush2.bf16.msra.mxu0 %v10934_v43  ;;  %v9746_v43 = vcombine.low %v14126_v55, %v14125_v17  ;;  %v14158_v17 = vld [vmem:[#allocation74_spill] sm:$0xff] }
 0x598   :  { %5098 = vmatpush2.bf16.msra.mxu1 %v10937_v25  ;;  %5748 = vmatprep.subr.bf16.mxu0 %v9667_v6  ;;  %v14127_v25 = vld [vmem:[#allocation60_spill] sm:$0xff] }
 0x599   :  { %5789 = vmatprep.subr.bf16.mxu1 %v9731_v24  ;;  %v14128_v6 = vld [vmem:[#allocation104_spill] sm:$0xff] }
 0x59a   :  { %5059 = vmatmul.mubr.bf16.vlgmr.msra.gmra.mxu0 %v12088_v46  ;;  %v9658_v46 = vcombine.low %v12424_v27, %v12428_v12  ;;  %v9650_v27 = vcombine.low %v12408_v28, %v12412_v49  ;;  %v9714_v12 = vcombine.low %v12536_v20, %v12540_v15  ;;  %v9679_v24 = vcombine.high %v14128_v6, %v14127_v25 }
 0x59b   :  { %5100 = vmatmul.mubr.bf16.vlgmr.msra.gmra.mxu1 %v12092_v38  ;;  %5749 = vmatpush1.bf16.msra.mxu0 %v9666_v44  ;;  %v9722_v38 = vcombine.low %v12552_v40, %v12556_v33  ;;  %v9651_v40 = vcombine.high %v12408_v28, %v12412_v49  ;;  %v9715_v33 = vcombine.high %v12536_v20, %v12540_v15  ;;  %v14129_v44 = vld [vmem:[#allocation121_spill] sm:$0xff] }
 0x59c   :  { %5790 = vmatpush1.bf16.msra.mxu1 %v9730_v45  ;;  %5750 = vmatprep.subr.bf16.mxu0 %v9663_v29  ;;  %v9643_v15 = vcombine.high %v12392_v52, %v12396_v5  ;;  %v9707_v20 = vcombine.high %v12520_v37, %v12524_v59  ;;  %v9642_v28 = vcombine.low %v12392_v52, %v12396_v5  ;;  %v14130_v45 = vld [vmem:[#allocation79_spill] sm:$0xff] }
 0x59d   :  { %5791 = vmatprep.subr.bf16.mxu1 %v9727_v22  ;;  %5780 = vmatprep.mubr.bf16.mxu0 %v11810_v63  ;;  %v9706_v49 = vcombine.low %v12520_v37, %v12524_v59  ;;  %v9699_v52 = vcombine.high %v12504_v51, %v12508_v36  ;;  %v9763_v5 = vcombine.high %v12632_v48, %v12636_v13 }
 0x59e   :  { %5821 = vmatprep.mubr.bf16.mxu1 %v11812_v2  ;;  %v9698_v37 = vcombine.low %v12504_v51, %v12508_v36  ;;  %v9762_v59 = vcombine.low %v12632_v48, %v12636_v13  ;;  %v9691_v48 = vcombine.high %v12488_v47, %v12492_v8  ;;  %v14118_v13 = vld [vmem:[#allocation67_spill] sm:$0xff]  ;;  %v9690_v36 = vcombine.low %v12488_v47, %v12492_v8  ;;  %v14123_v8 = vld [vmem:[#allocation58_spill] sm:$0xff] }
 0x59f   :  { %5751 = vmatpush1.bf16.msra.mxu0 %v9662_v14  ;;  %v9755_v51 = vcombine.high %v14118_v13, %v12620_v19  ;;  %v9754_v62 = vcombine.low %v14118_v13, %v12620_v19  ;;  %v14124_v47 = vld [vmem:[#allocation102_spill] sm:$0xff]  ;;  %v9743_v29 = vcombine.high %v14130_v45, %v14129_v44  ;;  %v9678_v22 = vcombine.low %v14128_v6, %v14127_v25 }
 0x5a0   :  { %5792 = vmatpush1.bf16.msra.mxu1 %v9726_v1  ;;  %5752 = vmatprep.subr.bf16.mxu0 %v9659_v32  ;;  %v9683_v19 = vcombine.high %v14124_v47, %v14123_v8  ;;  %v9682_v35 = vcombine.low %v14124_v47, %v14123_v8  ;;  %v9742_v14 = vcombine.low %v14130_v45, %v14129_v44  ;;  %v14131_v1 = vld [vmem:[#allocation62_spill] sm:$0xff]  ;;  %v14162_v44 = vld [vmem:[#allocation120_spill] sm:$0xff] }
 0x5a1   :  { %5793 = vmatprep.subr.bf16.mxu1 %v9723_v0  ;;  %v14132_v32 = vld [vmem:[#allocation106_spill] sm:$0xff] }
 0x5a2   :  { %v9675_v0 = vcombine.high %v14132_v32, %v14131_v1  ;;  %v14149_v13 = vld [vmem:[#allocation114_spill] sm:$0xff] }
 0x5a3   :  { %5753 = vmatpush1.bf16.msra.mxu0 %v9658_v46  ;;  %v14133_v46 = vld [vmem:[#allocation125_spill] sm:$0xff]  ;;  %v14156_v8 = vld [vmem:[#allocation90_spill] sm:$0xff] }
 0x5a4   :  { %5794 = vmatpush1.bf16.msra.mxu1 %v9722_v38  ;;  %5754 = vmatprep.subr.bf16.mxu0 %v9655_v42  ;;  %v14134_v38 = vld [vmem:[#allocation83_spill] sm:$0xff] }
 0x5a5   :  { %5795 = vmatprep.subr.bf16.mxu1 %v9719_v56  ;;  %v9739_v42 = vcombine.high %v14134_v38, %v14133_v46  ;;  %v9674_v56 = vcombine.low %v14132_v32, %v14131_v1 }
 0x5a7   :  { %5755 = vmatpush1.bf16.msra.mxu0 %v9654_v3  ;;  %v9738_v3 = vcombine.low %v14134_v38, %v14133_v46  ;;  %v14166_v46 = vld [vmem:[#allocation78_spill] sm:$0xff] }
 0x5a8   :  { %5796 = vmatpush1.bf16.msra.mxu1 %v9718_v50  ;;  %5756 = vmatprep.subr.bf16.mxu0 %v9651_v40  ;;  %v14135_v50 = vld [vmem:[#allocation64_spill] sm:$0xff] }
 0x5a9   :  { %5797 = vmatprep.subr.bf16.mxu1 %v9715_v33  ;;  %v14136_v40 = vld [vmem:[#allocation108_spill] sm:$0xff] }
 0x5aa   :  { %v9671_v33 = vcombine.high %v14136_v40, %v14135_v50 }
 0x5ab   :  { %5757 = vmatpush1.bf16.msra.mxu0 %v9650_v27  ;;  %v14137_v27 = vld [vmem:[#allocation129_spill] sm:$0xff] }
 0x5ac   :  { %5798 = vmatpush1.bf16.msra.mxu1 %v9714_v12  ;;  %5758 = vmatprep.subr.bf16.mxu0 %v9647_v18  ;;  %v14138_v12 = vld [vmem:[#allocation86_spill] sm:$0xff] }
 0x5ad   :  { %5799 = vmatprep.subr.bf16.mxu1 %v9711_v21  ;;  %v9735_v18 = vcombine.high %v14138_v12, %v14137_v27  ;;  %v9670_v21 = vcombine.low %v14136_v40, %v14135_v50 }
 0x5af   :  { %5759 = vmatpush1.bf16.msra.mxu0 %v9646_v26  ;;  %v9734_v26 = vcombine.low %v14138_v12, %v14137_v27  ;;  %v14170_v27 = vld [vmem:[#allocation124_spill] sm:$0xff] }
 0x5b0   :  { %5800 = vmatpush1.bf16.msra.mxu1 %v9710_v57  ;;  %5760 = vmatprep.subr.bf16.mxu0 %v9643_v15  ;;  %v14139_v57 = vld [vmem:[#allocation110_spill] sm:$0xff] }
 0x5b1   :  { %5801 = vmatprep.subr.bf16.mxu1 %v9707_v20  ;;  %v14140_v15 = vld [vmem:[#allocation66_spill] sm:$0xff] }
 0x5b2   :  { %v9669_v20 = vcombine.high %v14140_v15, %v14139_v57 }
 0x5b3   :  { %5761 = vmatpush1.bf16.msra.mxu0 %v9642_v28  ;;  %v14141_v28 = vld [vmem:[#allocation87_spill] sm:$0xff] }
 0x5b4   :  { %5802 = vmatpush1.bf16.msra.mxu1 %v9706_v49  ;;  %5762 = vmatprep.subr.bf16.mxu0 %v9639_v54  ;;  %v14142_v49 = vld [vmem:[#allocation131_spill] sm:$0xff] }
 0x5b5   :  { %5803 = vmatprep.subr.bf16.mxu1 %v9703_v11  ;;  %v9733_v54 = vcombine.high %v14142_v49, %v14141_v28  ;;  %v9668_v11 = vcombine.low %v14140_v15, %v14139_v57 }
 0x5b7   :  { %5763 = vmatpush1.bf16.msra.mxu0 %v9638_v10  ;;  %v9732_v10 = vcombine.low %v14142_v49, %v14141_v28  ;;  %v14174_v28 = vld [vmem:[#allocation96_spill] sm:$0xff] }
 0x5b8   :  { %5804 = vmatpush1.bf16.msra.mxu1 %v9702_v58  ;;  %5764 = vmatprep.subr.bf16.mxu0 %v9699_v52  ;;  %v14143_v58 = vld [vmem:[#allocation68_spill] sm:$0xff] }
 0x5b9   :  { %5805 = vmatprep.subr.bf16.mxu1 %v9763_v5  ;;  %v14144_v52 = vld [vmem:[#allocation112_spill] sm:$0xff] }
 0x5ba   :  { %v9665_v5 = vcombine.high %v14144_v52, %v14143_v58 }
 0x5bb   :  { %5765 = vmatpush2.bf16.msra.mxu0 %v9698_v37  ;;  %v14145_v37 = vld [vmem:[#allocation132_spill] sm:$0xff] }
 0x5bc   :  { %5806 = vmatpush2.bf16.msra.mxu1 %v9762_v59  ;;  %5766 = vmatprep.subr.bf16.mxu0 %v9695_v9  ;;  %v14146_v59 = vld [vmem:[#allocation88_spill] sm:$0xff] }
 0x5bd   :  { %5807 = vmatprep.subr.bf16.mxu1 %v9759_v4  ;;  %v9729_v9 = vcombine.high %v14146_v59, %v14145_v37  ;;  %v14147_v4 = vld [vmem:[#allocation48_spill] sm:$0xff] }
 0x5bf   :  { %5767 = vmatpush2.bf16.msra.mxu0 %v9694_v34  ;;  %v14148_v34 = vld [vmem:[#allocation49_spill] sm:$0xff] }
 0x5c0   :  { %5808 = vmatpush2.bf16.msra.mxu1 %v9758_v31  ;;  %5768 = vmatprep.subr.bf16.mxu0 %v9691_v48  ;;  %v9664_v31 = vcombine.low %v14144_v52, %v14143_v58  ;;  %v9728_v48 = vcombine.low %v14146_v59, %v14145_v37  ;;  %v14178_v37 = vld [vmem:[#allocation54_spill] sm:$0xff] }
 0x5c1   :  { %5809 = vmatprep.subr.bf16.mxu1 %v9755_v51  ;;  %v14150_v51 = vld [vmem:[#allocation70_spill] sm:$0xff] }
 0x5c3   :  { %5769 = vmatpush2.bf16.msra.mxu0 %v9690_v36  ;;  %v9661_v36 = vcombine.high %v14150_v51, %v14149_v13 }
 0x5c4   :  { %5810 = vmatpush2.bf16.msra.mxu1 %v9754_v62  ;;  %5770 = vmatprep.subr.bf16.mxu0 %v9687_v7  ;;  %v14151_v62 = vld [vmem:[#allocation89_spill] sm:$0xff]  ;;  %v9660_v7 = vcombine.low %v14150_v51, %v14149_v13 }
 0x5c5   :  { %5811 = vmatprep.subr.bf16.mxu1 %v9751_v23  ;;  %v9725_v60 = vcombine.high %v14152_v53, %v14151_v62  ;;  %v9724_v30 = vcombine.low %v14152_v53, %v14151_v62  ;;  %v14154_v23 = vld [vmem:[#allocation116_spill] sm:$0xff]  ;;  %v14182_v62 = vld [vmem:[#allocation98_spill] sm:$0xff] }
 0x5c7   :  { %5771 = vmatpush2.bf16.msra.mxu0 %v9686_v39  ;;  %v9657_v39 = vcombine.high %v14154_v23, %v14153_v61 }
 0x5c8   :  { %5812 = vmatpush2.bf16.msra.mxu1 %v9750_v16  ;;  %5772 = vmatprep.subr.bf16.mxu0 %v9683_v19  ;;  %v14155_v16 = vld [vmem:[#allocation134_spill] sm:$0xff] }
 0x5c9   :  { %5813 = vmatprep.subr.bf16.mxu1 %v9747_v41  ;;  %v9721_v47 = vcombine.high %v14156_v8, %v14155_v16  ;;  %v14157_v19 = vld [vmem:[#allocation118_spill] sm:$0xff]  ;;  %v14159_v41 = vld [vmem:[#allocation91_spill] sm:$0xff] }
 0x5ca   :  { %v9653_v55 = vcombine.high %v14158_v17, %v14157_v19  ;;  %v9652_v25 = vcombine.low %v14158_v17, %v14157_v19 }
 0x5cb   :  { %5773 = vmatpush2.bf16.msra.mxu0 %v9682_v35  ;;  %v14160_v35 = vld [vmem:[#allocation92_spill] sm:$0xff] }
 0x5cc   :  { %5814 = vmatpush2.bf16.msra.mxu1 %v9746_v43  ;;  %5774 = vmatprep.subr.bf16.mxu0 %v9679_v24  ;;  %v9717_v43 = vcombine.high %v14160_v35, %v14159_v41  ;;  %v9716_v6 = vcombine.low %v14160_v35, %v14159_v41  ;;  %v14161_v24 = vld [vmem:[#allocation76_spill] sm:$0xff]  ;;  %v14190_v41 = vld [vmem:[#allocation59_spill] sm:$0xff] }
 0x5cd   :  { %5815 = vmatprep.subr.bf16.mxu1 %v9743_v29  ;;  %v9649_v45 = vcombine.high %v14162_v44, %v14161_v24  ;;  %v14163_v29 = vld [vmem:[#allocation93_spill] sm:$0xff]  ;;  %v9648_v1 = vcombine.low %v14162_v44, %v14161_v24 }
 0x5cf   :  { %5775 = vmatpush2.bf16.msra.mxu0 %v9678_v22  ;;  %v14164_v22 = vld [vmem:[#allocation50_spill] sm:$0xff] }
 0x5d0   :  { %5816 = vmatpush2.bf16.msra.mxu1 %v9742_v14  ;;  %5776 = vmatprep.subr.bf16.mxu0 %v9675_v0  ;;  %v9713_v14 = vcombine.high %v14164_v22, %v14163_v29  ;;  %v9712_v32 = vcombine.low %v14164_v22, %v14163_v29  ;;  %v14165_v0 = vld [vmem:[#allocation122_spill] sm:$0xff]  ;;  %v14194_v29 = vld [vmem:[#allocation61_spill] sm:$0xff] }
 0x5d1   :  { %5817 = vmatprep.subr.bf16.mxu1 %v9739_v42  ;;  %v9645_v38 = vcombine.high %v14166_v46, %v14165_v0  ;;  %v14167_v42 = vld [vmem:[#allocation51_spill] sm:$0xff]  ;;  %v9644_v50 = vcombine.low %v14166_v46, %v14165_v0 }
 0x5d3   :  { %5777 = vmatpush2.bf16.msra.mxu0 %v9674_v56  ;;  %v14168_v56 = vld [vmem:[#allocation94_spill] sm:$0xff] }
 0x5d4   :  { %5818 = vmatpush2.bf16.msra.mxu1 %v9738_v3  ;;  %5778 = vmatprep.subr.bf16.mxu0 %v9671_v33  ;;  %v9709_v3 = vcombine.high %v14168_v56, %v14167_v42  ;;  %v9708_v40 = vcombine.low %v14168_v56, %v14167_v42  ;;  %v14169_v33 = vld [vmem:[#allocation80_spill] sm:$0xff]  ;;  %v14198_v42 = vld [vmem:[#allocation63_spill] sm:$0xff] }
 0x5d5   :  { %5819 = vmatprep.subr.bf16.mxu1 %v9735_v18  ;;  %v9641_v12 = vcombine.high %v14170_v27, %v14169_v33  ;;  %v14171_v18 = vld [vmem:[#allocation95_spill] sm:$0xff]  ;;  %v9640_v57 = vcombine.low %v14170_v27, %v14169_v33 }
 0x5d7   :  { %5779 = vmatpush2.bf16.msra.mxu0 %v9670_v21  ;;  %v14172_v21 = vld [vmem:[#allocation52_spill] sm:$0xff] }
 0x5d8   :  { %5820 = vmatpush2.bf16.msra.mxu1 %v9734_v26  ;;  %5830 = vmatprep.subr.bf16.mxu0 %v9669_v20  ;;  %v9705_v26 = vcombine.high %v14172_v21, %v14171_v18  ;;  %v9704_v15 = vcombine.low %v14172_v21, %v14171_v18  ;;  %v14173_v20 = vld [vmem:[#allocation53_spill] sm:$0xff] }
 0x5d9   :  { %5871 = vmatprep.subr.bf16.mxu1 %v9733_v54  ;;  %v9701_v49 = vcombine.high %v14174_v28, %v14173_v20  ;;  %v14175_v54 = vld [vmem:[#allocation138_spill] sm:$0xff]  ;;  %v9700_v58 = vcombine.low %v14174_v28, %v14173_v20  ;;  %v14202_v18 = vld [vmem:[#allocation65_spill] sm:$0xff] }
 0x5da   :  { %5781 = vmatmul.mubr.bf16.vlgmr.msra.gmra.mxu0 %v14147_v4 }
 0x5db   :  { %5822 = vmatmul.mubr.bf16.vlgmr.msra.gmra.mxu1 %v14148_v34  ;;  %5831 = vmatpush1.bf16.msra.mxu0 %v9668_v11  ;;  %v14176_v11 = vld [vmem:[#allocation137_spill] sm:$0xff] }
 0x5dc   :  { %5872 = vmatpush1.bf16.msra.mxu1 %v9732_v10  ;;  %5832 = vmatprep.subr.bf16.mxu0 %v9665_v5  ;;  %v9765_v10 = vcombine.high %v14176_v11, %v14175_v54  ;;  %v9764_v52 = vcombine.low %v14176_v11, %v14175_v54  ;;  %v14177_v5 = vld [vmem:[#allocation97_spill] sm:$0xff] }
 0x5dd   :  { %5873 = vmatprep.subr.bf16.mxu1 %v9729_v9  ;;  %5862 = vmatprep.mubr.bf16.mxu0 %v11810_v63  ;;  %v9656_v63 = vcombine.low %v14154_v23, %v14153_v61  ;;  %v9697_v59 = vcombine.high %v14178_v37, %v14177_v5  ;;  %v14179_v9 = vld [vmem:[#allocation136_spill] sm:$0xff]  ;;  %v9696_v13 = vcombine.low %v14178_v37, %v14177_v5 }
 0x5de   :  { %5903 = vmatprep.mubr.bf16.mxu1 %v11812_v2  ;;  %v9720_v2 = vcombine.low %v14156_v8, %v14155_v16  ;;  %v14186_v16 = vld [vmem:[#allocation57_spill] sm:$0xff] }
 0x5df   :  { %5833 = vmatpush1.bf16.msra.mxu0 %v9664_v31  ;;  %v14180_v31 = vld [vmem:[#allocation135_spill] sm:$0xff] }
 0x5e0   :  { %5874 = vmatpush1.bf16.msra.mxu1 %v9728_v48  ;;  %5834 = vmatprep.subr.bf16.mxu0 %v9661_v36  ;;  %v9761_v48 = vcombine.high %v14180_v31, %v14179_v9  ;;  %v9760_v51 = vcombine.low %v14180_v31, %v14179_v9  ;;  %v14181_v36 = vld [vmem:[#allocation55_spill] sm:$0xff] }
 0x5e1   :  { %5875 = vmatprep.subr.bf16.mxu1 %v9725_v60  ;;  %v9693_v53 = vcombine.high %v14182_v62, %v14181_v36  ;;  %v14183_v60 = vld [vmem:[#allocation109_spill] sm:$0xff]  ;;  %v9692_v61 = vcombine.low %v14182_v62, %v14181_v36 }
 0x5e3   :  { %5835 = vmatpush1.bf16.msra.mxu0 %v9660_v7  ;;  %v14184_v7 = vld [vmem:[#allocation111_spill] sm:$0xff] }
 0x5e4   :  { %5876 = vmatpush1.bf16.msra.mxu1 %v9724_v30  ;;  %5836 = vmatprep.subr.bf16.mxu0 %v9657_v39  ;;  %v9757_v30 = vcombine.high %v14184_v7, %v14183_v60  ;;  %v9756_v23 = vcombine.low %v14184_v7, %v14183_v60  ;;  %v14185_v39 = vld [vmem:[#allocation99_spill] sm:$0xff] }
 0x5e5   :  { %5877 = vmatprep.subr.bf16.mxu1 %v9721_v47  ;;  %v9689_v8 = vcombine.high %v14186_v16, %v14185_v39  ;;  %v14187_v47 = vld [vmem:[#allocation69_spill] sm:$0xff]  ;;  %v9688_v19 = vcombine.low %v14186_v16, %v14185_v39  ;;  %v14205_v39 = vld [vmem:[#allocation44_spill] sm:$0xff] }
 0x5e7   :  { %5837 = vmatpush1.bf16.msra.mxu0 %v9656_v63  ;;  %v14188_v63 = vld [vmem:[#allocation115_spill] sm:$0xff] }
 0x5e8   :  { %5878 = vmatpush1.bf16.msra.mxu1 %v9720_v2  ;;  %5838 = vmatprep.subr.bf16.mxu0 %v9653_v55  ;;  %v9753_v2 = vcombine.high %v14188_v63, %v14187_v47  ;;  %v9752_v17 = vcombine.low %v14188_v63, %v14187_v47  ;;  %v14189_v55 = vld [vmem:[#allocation101_spill] sm:$0xff] }
 0x5e9   :  { %5879 = vmatprep.subr.bf16.mxu1 %v9717_v43  ;;  %v9685_v35 = vcombine.high %v14190_v41, %v14189_v55  ;;  %v14191_v43 = vld [vmem:[#allocation73_spill] sm:$0xff]  ;;  %v9684_v24 = vcombine.low %v14190_v41, %v14189_v55 }
 0x5eb   :  { %5839 = vmatpush1.bf16.msra.mxu0 %v9652_v25  ;;  %v14192_v25 = vld [vmem:[#allocation119_spill] sm:$0xff] }
 0x5ec   :  { %5880 = vmatpush1.bf16.msra.mxu1 %v9716_v6  ;;  %5840 = vmatprep.subr.bf16.mxu0 %v9649_v45  ;;  %v9749_v6 = vcombine.high %v14192_v25, %v14191_v43  ;;  %v9748_v44 = vcombine.low %v14192_v25, %v14191_v43  ;;  %v14193_v45 = vld [vmem:[#allocation103_spill] sm:$0xff] }
 0x5ed   :  { %5881 = vmatprep.subr.bf16.mxu1 %v9713_v14  ;;  %v9681_v22 = vcombine.high %v14194_v29, %v14193_v45  ;;  %v14195_v14 = vld [vmem:[#allocation77_spill] sm:$0xff]  ;;  %v9680_v0 = vcombine.low %v14194_v29, %v14193_v45 }
 0x5ef   :  { %5841 = vmatpush1.bf16.msra.mxu0 %v9648_v1  ;;  %v14196_v1 = vld [vmem:[#allocation123_spill] sm:$0xff] }
 0x5f0   :  { %5882 = vmatpush1.bf16.msra.mxu1 %v9712_v32  ;;  %5842 = vmatprep.subr.bf16.mxu0 %v9645_v38  ;;  %v9745_v32 = vcombine.high %v14196_v1, %v14195_v14  ;;  %v9744_v46 = vcombine.low %v14196_v1, %v14195_v14  ;;  %v14197_v38 = vld [vmem:[#allocation105_spill] sm:$0xff] }
 0x5f1   :  { %5883 = vmatprep.subr.bf16.mxu1 %v9709_v3  ;;  %v9677_v56 = vcombine.high %v14198_v42, %v14197_v38  ;;  %v14199_v3 = vld [vmem:[#allocation81_spill] sm:$0xff]  ;;  %v9676_v33 = vcombine.low %v14198_v42, %v14197_v38 }
 0x5f3   :  { %5843 = vmatpush1.bf16.msra.mxu0 %v9644_v50  ;;  %v14200_v50 = vld [vmem:[#allocation127_spill] sm:$0xff] }
 0x5f4   :  { %5884 = vmatpush1.bf16.msra.mxu1 %v9708_v40  ;;  %5844 = vmatprep.subr.bf16.mxu0 %v9641_v12  ;;  %v9741_v40 = vcombine.high %v14200_v50, %v14199_v3  ;;  %v9740_v27 = vcombine.low %v14200_v50, %v14199_v3  ;;  %v14201_v12 = vld [vmem:[#allocation107_spill] sm:$0xff] }
 0x5f5   :  { %5885 = vmatprep.subr.bf16.mxu1 %v9705_v26  ;;  %v9673_v21 = vcombine.high %v14202_v18, %v14201_v12  ;;  %v14203_v26 = vld [vmem:[#allocation85_spill] sm:$0xff]  ;;  %v9672_v20 = vcombine.low %v14202_v18, %v14201_v12  ;;  %v14208_v3 = vld [vmem:[#allocation47_spill] sm:$0xff] }
 0x5f7   :  { %5845 = vmatpush1.bf16.msra.mxu0 %v9640_v57  ;;  %v14204_v57 = vld [vmem:[#allocation130_spill] sm:$0xff] }
 0x5f8   :  { %5886 = vmatpush1.bf16.msra.mxu1 %v9704_v15  ;;  %5846 = vmatprep.subr.bf16.mxu0 %v9701_v49  ;;  %v9737_v15 = vcombine.high %v14204_v57, %v14203_v26  ;;  %v9736_v28 = vcombine.low %v14204_v57, %v14203_v26 }
 0x5f9   :  { %5887 = vmatprep.subr.bf16.mxu1 %v9765_v10 }
 0x5fb   :  { %5847 = vmatpush2.bf16.msra.mxu0 %v9700_v58 }
 0x5fc   :  { %5888 = vmatpush2.bf16.msra.mxu1 %v9764_v52  ;;  %5848 = vmatprep.subr.bf16.mxu0 %v9697_v59 }
 0x5fd   :  { %5889 = vmatprep.subr.bf16.mxu1 %v9761_v48 }
 0x5ff   :  { %5849 = vmatpush2.bf16.msra.mxu0 %v9696_v13 }
 0x600   :  { %5890 = vmatpush2.bf16.msra.mxu1 %v9760_v51  ;;  %5850 = vmatprep.subr.bf16.mxu0 %v9693_v53 }
 0x601   :  { %5891 = vmatprep.subr.bf16.mxu1 %v9757_v30  ;;  %v5912_v30 = vld [vmem:[#allocation9 + $0xc] sm:$0xf] }
 0x602   :  { %v5917_v16 = vrot.slane %v5912_v30, %v14205_v39  ;;  %v5929_v50 = vrot.slane %v5912_v30, %v14208_v3 }
 0x603   :  { %5851 = vmatpush2.bf16.msra.mxu0 %v9692_v61 }
 0x604   :  { %5892 = vmatpush2.bf16.msra.mxu1 %v9756_v23  ;;  %5852 = vmatprep.subr.bf16.mxu0 %v9689_v8 }
 0x605   :  { %5893 = vmatprep.subr.bf16.mxu1 %v9753_v2 }
 0x607   :  { %5853 = vmatpush2.bf16.msra.mxu0 %v9688_v19  ;;  %v14206_v19 = vld [vmem:[#allocation45_spill] sm:$0xff] }
 0x608   :  { %5894 = vmatpush2.bf16.msra.mxu1 %v9752_v17  ;;  %5854 = vmatprep.subr.bf16.mxu0 %v9685_v35  ;;  %v5921_v17 = vrot.slane %v5912_v30, %v14206_v19 }
 0x609   :  { %5895 = vmatprep.subr.bf16.mxu1 %v9749_v6 }
 0x60b   :  { %5855 = vmatpush2.bf16.msra.mxu0 %v9684_v24 }
 0x60c   :  { %5896 = vmatpush2.bf16.msra.mxu1 %v9748_v44  ;;  %5856 = vmatprep.subr.bf16.mxu0 %v9681_v22 }
 0x60d   :  { %5897 = vmatprep.subr.bf16.mxu1 %v9745_v32  ;;  %v14207_v32 = vld [vmem:[#allocation46_spill] sm:$0xff] }
 0x60f   :  { %5857 = vmatpush2.bf16.msra.mxu0 %v9680_v0  ;;  %v5925_v0 = vrot.slane %v5912_v30, %v14207_v32 }
 0x610   :  { %5898 = vmatpush2.bf16.msra.mxu1 %v9744_v46  ;;  %5858 = vmatprep.subr.bf16.mxu0 %v9677_v56 }
 0x611   :  { %5899 = vmatprep.subr.bf16.mxu1 %v9741_v40 }
 0x613   :  { %5859 = vmatpush2.bf16.msra.mxu0 %v9676_v33 }
 0x614   :  { %5900 = vmatpush2.bf16.msra.mxu1 %v9740_v27  ;;  %5860 = vmatprep.subr.bf16.mxu0 %v9673_v21 }
 0x615   :  { %5901 = vmatprep.subr.bf16.mxu1 %v9737_v15 }
 0x617   :  { %5861 = vmatpush2.bf16.msra.mxu0 %v9672_v20 }
 0x618   :  { %5902 = vmatpush2.bf16.msra.mxu1 %v9736_v28 }
 0x61a   :  { %v4978_v49 = vpop.f32.mrf.mxu0  ;;  %5863 = vmatmul.mubr.bf16.vlgmr.msra.gmra.mxu0 %v14147_v4 }
 0x61b   :  { %v5019_v54 = vpop.f32.mrf.mxu1  ;;  %5904 = vmatmul.mubr.bf16.vlgmr.msra.gmra.mxu1 %v14148_v34 }
 0x61c   :  { %v5020_v11 = vadd.f32 %v5019_v54, %v4978_v49  ;;  %v4980_v10 = vpop.f32.mrf.mxu0 }
 0x61d   :  { %v5021_v58 = vpop.f32.mrf.mxu1 }
 0x61e   :  { %v5022_v52 = vadd.f32 %v5021_v58, %v4980_v10  ;;  %v4982_v5 = vpop.f32.mrf.mxu0 }
 0x61f   :  { %v5023_v37 = vpop.f32.mrf.mxu1 }
 0x620   :  { %v4983_v59 = vpop.f32.mrf.mxu0 }
 0x621   :  { %v5024_v9 = vpop.f32.mrf.mxu1 }
 0x65a   :  { %v5060_v31 = vpop.f32.mrf.mxu0 }
 0x65b   :  { %v5101_v48 = vpop.f32.mrf.mxu1 }
 0x65c   :  { %v5102_v13 = vadd.f32 %v5101_v48, %v5060_v31  ;;  %v5062_v51 = vpop.f32.mrf.mxu0 }
 0x65d   :  { %v5103_v36 = vpop.f32.mrf.mxu1 }
 0x65e   :  { %v5104_v62 = vadd.f32 %v5103_v36, %v5062_v51  ;;  %v5064_v53 = vpop.f32.mrf.mxu0 }
 0x65f   :  { %v5105_v60 = vpop.f32.mrf.mxu1 }
 0x660   :  { %v5065_v7 = vpop.f32.mrf.mxu0 }
 0x661   :  { %v5106_v4 = vpop.f32.mrf.mxu1 }
 0x69a   :  { %v5782_v34 = vpop.f32.mrf.mxu0 }
 0x69b   :  { %v5823_v61 = vpop.f32.mrf.mxu1  ;;  %v5783_v23 = vadd.f32 %v5782_v34, %v5020_v11 }
 0x69c   :  { %v5784_v8 = vpop.f32.mrf.mxu0 }
 0x69d   :  { %v5825_v47 = vpop.f32.mrf.mxu1  ;;  %v5824_v63 = vadd.f32 %v5823_v61, %v5783_v23  ;;  %v5785_v2 = vadd.f32 %v5784_v8, %v5022_v52 }
 0x69e   :  { %v5786_v55 = vpop.f32.mrf.mxu0 }
 0x69f   :  { %v5827_v41 = vpop.f32.mrf.mxu1  ;;  %v5934_v35 = vadd.f32 %v5917_v16, %v5824_v63  ;;  %v5826_v43 = vadd.f32 %v5825_v47, %v5785_v2 }
 0x6a0   :  { %v5787_v25 = vpop.f32.mrf.mxu0 }
 0x6a1   :  { %v5828_v6 = vpop.f32.mrf.mxu1  ;;  %v5935_v24 = vadd.f32 %v5921_v17, %v5826_v43  ;;  %v5938_v44 = vmax.f32 %v5934_v35, 0.0 }
 0x6a3   :  { %v12920_v45 = vmax.f32 %v5935_v24, 0.0 }
 0x6a5   :  { %v12923_v29 = vcombine.low %v5938_v44, %v12920_v45 }
 0x6da   :  { %v5864_v22 = vpop.f32.mrf.mxu0 }
 0x6db   :  { %v5905_v14 = vpop.f32.mrf.mxu1  ;;  %v5865_v1 = vadd.f32 %v5864_v22, %v5102_v13 }
 0x6dc   :  { %v5866_v46 = vpop.f32.mrf.mxu0 }
 0x6dd   :  { %v5907_v38 = vpop.f32.mrf.mxu1  ;;  %v5906_v42 = vadd.f32 %v5905_v14, %v5865_v1  ;;  %v5867_v56 = vadd.f32 %v5866_v46, %v5104_v62 }
 0x6de   :  { %v5868_v40 = vpop.f32.mrf.mxu0 }
 0x6df   :  { %v5909_v33 = vpop.f32.mrf.mxu1  ;;  %v5936_v27 = vadd.f32 %v5925_v0, %v5906_v42  ;;  %v5908_v12 = vadd.f32 %v5907_v38, %v5867_v56 }
 0x6e0   :  { %v5869_v18 = vpop.f32.mrf.mxu0 }
 0x6e1   :  { %v5910_v21 = vpop.f32.mrf.mxu1  ;;  %v5937_v26 = vadd.f32 %v5929_v50, %v5908_v12  ;;  %v5940_v57 = vmax.f32 %v5936_v27, 0.0 }
 0x6e3   :  { %v12927_v15 = vmax.f32 %v5937_v26, 0.0 }
 0x6e5   :  { %v12930_v20 = vcombine.low %v5940_v57, %v12927_v15 }
 0x6e6   :  { %11620 = dma.done.wait [#allocation5], 16384 }
 0x6e7   :  { %11621 = vsyncadd [#allocation5], 4294950912  ;;  %s5954_s24 = scalar_lea.hbm %s13570_s1, 114688  ;;  %v14209_v28 = vld [vmem:[#allocation128_spill] sm:$0xff]  ;;  %v14210_v54 = vld [vmem:[#allocation82_spill] sm:$0xff] }
 0x6e8   :  { %v10156_v49 = vcombine.low %v14209_v28, %v14209_v28  ;;  %v10157_v11 = vcombine.low %v14210_v54, %v14210_v54  ;;  %v14211_v10 = vld [vmem:[#allocation84_spill] sm:$0xff]  ;;  %v14213_v52 = vld [vmem:[#allocation126_spill] sm:$0xff] }
 0x6e9   :  { %v12941_v58 = vpack.c.bf16 %v14211_v10, %v14211_v10  ;;  %v12945_v5 = vpack.c.bf16 %v14213_v52, %v14213_v52 }
 0x6eb   :  { %14212 = vst [vmem:[#allocation67_spill] sm:$0xff] %v12941_v58  ;;  %14214 = vst [vmem:[#allocation56_spill] sm:$0xff] %v12945_v5 }
 0x6ec   :  { %11559 = shalt.err (!%p11686_p5)  }
 0x6ed   :  { %5965 = dma.hbm_to_vmem [thread:$0]  %s5954_s24, 16384, %s11680_s4, [#allocation5 + $0x1]  ;;  %v12950_v37 = vpack.c.bf16 %v10156_v49, %v10156_v49  ;;  %v12952_v59 = vpack.c.bf16 %v10157_v11, %v10157_v11 }
 0x6ee   :  { %v12954_v9 = vld [vmem:[#allocation4] sm:$0xff]  ;;  %v12956_v31 = vld [vmem:[#allocation4 + $0x8] sm:$0xff]  ;;  %v12958_v48 = vld [vmem:[#allocation4 + $0x10] sm:$0xff] }
 0x6ef   :  { %14215 = vst [vmem:[#allocation100_spill] sm:$0xff] %v12956_v31  ;;  %v12960_v13 = vld [vmem:[#allocation4 + $0x18] sm:$0xff]  ;;  %v12962_v51 = vld [vmem:[#allocation4 + $0x20] sm:$0xff]  ;;  %v12964_v36 = vld [vmem:[#allocation4 + $0x28] sm:$0xff] }
 0x6f0   :  { %14216 = vst [vmem:[#allocation113_spill] sm:$0xff] %v12960_v13  ;;  %14217 = vst [vmem:[#allocation71_spill] sm:$0xff] %v12964_v36  ;;  %v12966_v62 = vld [vmem:[#allocation4 + $0x30] sm:$0xff]  ;;  %v12968_v53 = vld [vmem:[#allocation4 + $0x38] sm:$0xff] }
 0x6f1   :  { %14218 = vst [vmem:[#allocation58_spill] sm:$0xff] %v12968_v53  ;;  %v12970_v60 = vld [vmem:[#allocation4 + $0x40] sm:$0xff]  ;;  %v12972_v7 = vld [vmem:[#allocation4 + $0x48] sm:$0xff]  ;;  %v12974_v4 = vld [vmem:[#allocation4 + $0x50] sm:$0xff] }
 0x6f2   :  { %14219 = vst [vmem:[#allocation102_spill] sm:$0xff] %v12972_v7  ;;  %v12976_v30 = vld [vmem:[#allocation4 + $0x58] sm:$0xff]  ;;  %v12978_v34 = vld [vmem:[#allocation4 + $0x60] sm:$0xff]  ;;  %v12980_v61 = vld [vmem:[#allocation4 + $0x68] sm:$0xff] }
 0x6f3   :  { %14220 = vst [vmem:[#allocation117_spill] sm:$0xff] %v12976_v30  ;;  %14221 = vst [vmem:[#allocation75_spill] sm:$0xff] %v12980_v61  ;;  %v12982_v23 = vld [vmem:[#allocation4 + $0x70] sm:$0xff]  ;;  %v12984_v16 = vld [vmem:[#allocation4 + $0x78] sm:$0xff] }
 0x6f4   :  { %14222 = vst [vmem:[#allocation60_spill] sm:$0xff] %v12984_v16  ;;  %v12986_v8 = vld [vmem:[#allocation4 + $0x80] sm:$0xff]  ;;  %v12988_v47 = vld [vmem:[#allocation4 + $0x88] sm:$0xff]  ;;  %v12990_v63 = vld [vmem:[#allocation4 + $0x90] sm:$0xff] }
 0x6f5   :  { %14223 = vst [vmem:[#allocation104_spill] sm:$0xff] %v12988_v47  ;;  %v12992_v2 = vld [vmem:[#allocation4 + $0x98] sm:$0xff]  ;;  %v12994_v17 = vld [vmem:[#allocation4 + $0xa0] sm:$0xff]  ;;  %v12996_v55 = vld [vmem:[#allocation4 + $0xa8] sm:$0xff] }
 0x6f6   :  { %14224 = vst [vmem:[#allocation121_spill] sm:$0xff] %v12992_v2  ;;  %14225 = vst [vmem:[#allocation79_spill] sm:$0xff] %v12996_v55  ;;  %v12998_v41 = vld [vmem:[#allocation4 + $0xb0] sm:$0xff]  ;;  %v13000_v35 = vld [vmem:[#allocation4 + $0xb8] sm:$0xff] }
 0x6f7   :  { %14226 = vst [vmem:[#allocation62_spill] sm:$0xff] %v13000_v35  ;;  %v13002_v43 = vld [vmem:[#allocation4 + $0xc0] sm:$0xff]  ;;  %v13004_v25 = vld [vmem:[#allocation4 + $0xc8] sm:$0xff]  ;;  %v13006_v6 = vld [vmem:[#allocation4 + $0xd0] sm:$0xff] }
 0x6f8   :  { %14227 = vst [vmem:[#allocation106_spill] sm:$0xff] %v13004_v25  ;;  %v13008_v24 = vld [vmem:[#allocation4 + $0xd8] sm:$0xff]  ;;  %v13010_v44 = vld [vmem:[#allocation4 + $0xe0] sm:$0xff]  ;;  %v13012_v22 = vld [vmem:[#allocation4 + $0xe8] sm:$0xff] }
 0x6f9   :  { %14228 = vst [vmem:[#allocation125_spill] sm:$0xff] %v13008_v24  ;;  %14229 = vst [vmem:[#allocation83_spill] sm:$0xff] %v13012_v22  ;;  %v13014_v14 = vld [vmem:[#allocation4 + $0xf0] sm:$0xff]  ;;  %v13016_v1 = vld [vmem:[#allocation4 + $0xf8] sm:$0xff] }
 0x6fa   :  { %14230 = vst [vmem:[#allocation64_spill] sm:$0xff] %v13016_v1  ;;  %v13018_v0 = vld [vmem:[#allocation4 + $0x100] sm:$0xff]  ;;  %v13020_v46 = vld [vmem:[#allocation4 + $0x108] sm:$0xff]  ;;  %v13022_v38 = vld [vmem:[#allocation4 + $0x110] sm:$0xff] }
 0x6fb   :  { %14231 = vst [vmem:[#allocation108_spill] sm:$0xff] %v13018_v0  ;;  %14232 = vst [vmem:[#allocation129_spill] sm:$0xff] %v13020_v46  ;;  %v13024_v42 = vld [vmem:[#allocation4 + $0x118] sm:$0xff]  ;;  %v13026_v56 = vld [vmem:[#allocation4 + $0x120] sm:$0xff] }
 0x6fc   :  { %14233 = vst [vmem:[#allocation86_spill] sm:$0xff] %v13022_v38  ;;  %14234 = vst [vmem:[#allocation110_spill] sm:$0xff] %v13024_v42  ;;  %v13028_v50 = vld [vmem:[#allocation4 + $0x128] sm:$0xff]  ;;  %v13030_v40 = vld [vmem:[#allocation4 + $0x130] sm:$0xff] }
 0x6fd   :  { %14235 = vst [vmem:[#allocation66_spill] sm:$0xff] %v13026_v56  ;;  %14236 = vst [vmem:[#allocation87_spill] sm:$0xff] %v13028_v50  ;;  %v13032_v33 = vld [vmem:[#allocation4 + $0x138] sm:$0xff]  ;;  %v13034_v27 = vld [vmem:[#allocation4 + $0x140] sm:$0xff] }
 0x6fe   :  { %14237 = vst [vmem:[#allocation131_spill] sm:$0xff] %v13030_v40  ;;  %14238 = vst [vmem:[#allocation68_spill] sm:$0xff] %v13032_v33  ;;  %v13036_v12 = vld [vmem:[#allocation4 + $0x148] sm:$0xff]  ;;  %v13038_v18 = vld [vmem:[#allocation4 + $0x150] sm:$0xff] }
 0x6ff   :  { %14239 = vst [vmem:[#allocation112_spill] sm:$0xff] %v13034_v27  ;;  %14240 = vst [vmem:[#allocation132_spill] sm:$0xff] %v13036_v12  ;;  %v13040_v21 = vld [vmem:[#allocation4 + $0x158] sm:$0xff]  ;;  %v13042_v26 = vld [vmem:[#allocation4 + $0x160] sm:$0xff] }
 0x700   :  { %14241 = vst [vmem:[#allocation88_spill] sm:$0xff] %v13038_v18  ;;  %14242 = vst [vmem:[#allocation48_spill] sm:$0xff] %v13040_v21  ;;  %v13044_v57 = vld [vmem:[#allocation4 + $0x168] sm:$0xff]  ;;  %v13046_v28 = vld [vmem:[#allocation4 + $0x170] sm:$0xff] }
 0x701   :  { %14243 = vst [vmem:[#allocation49_spill] sm:$0xff] %v13042_v26  ;;  %14244 = vst [vmem:[#allocation114_spill] sm:$0xff] %v13044_v57  ;;  %v13048_v49 = vld [vmem:[#allocation4 + $0x178] sm:$0xff]  ;;  %v13050_v54 = vld [vmem:[#allocation4 + $0x180] sm:$0xff] }
 0x702   :  { %14245 = vst [vmem:[#allocation70_spill] sm:$0xff] %v13046_v28  ;;  %14246 = vst [vmem:[#allocation89_spill] sm:$0xff] %v13048_v49  ;;  %v13052_v11 = vld [vmem:[#allocation4 + $0x188] sm:$0xff]  ;;  %v13054_v10 = vld [vmem:[#allocation4 + $0x190] sm:$0xff] }
 0x703   :  { %14247 = vst [vmem:[#allocation133_spill] sm:$0xff] %v13050_v54  ;;  %14248 = vst [vmem:[#allocation72_spill] sm:$0xff] %v13052_v11  ;;  %v13056_v52 = vld [vmem:[#allocation4 + $0x198] sm:$0xff]  ;;  %v13058_v3 = vld [vmem:[#allocation4 + $0x1a0] sm:$0xff] }
 0x704   :  { %14249 = vst [vmem:[#allocation116_spill] sm:$0xff] %v13054_v10  ;;  %14250 = vst [vmem:[#allocation134_spill] sm:$0xff] %v13056_v52  ;;  %v13060_v32 = vld [vmem:[#allocation4 + $0x1a8] sm:$0xff]  ;;  %v13062_v19 = vld [vmem:[#allocation4 + $0x1b0] sm:$0xff] }
 0x705   :  { %14251 = vst [vmem:[#allocation90_spill] sm:$0xff] %v13060_v32  ;;  %v13064_v39 = vld [vmem:[#allocation4 + $0x1b8] sm:$0xff]  ;;  %v13066_v46 = vld [vmem:[#allocation4 + $0x1c0] sm:$0xff]  ;;  %v13068_v42 = vld [vmem:[#allocation4 + $0x1c8] sm:$0xff] }
 0x706   :  { %14252 = vst [vmem:[#allocation118_spill] sm:$0xff] %v13064_v39  ;;  %14253 = vst [vmem:[#allocation74_spill] sm:$0xff] %v13068_v42  ;;  %v13070_v50 = vld [vmem:[#allocation4 + $0x1d0] sm:$0xff]  ;;  %v13072_v33 = vld [vmem:[#allocation4 + $0x1d8] sm:$0xff] }
 0x707   :  { %14254 = vst [vmem:[#allocation91_spill] sm:$0xff] %v13072_v33  ;;  %v13074_v12 = vld [vmem:[#allocation4 + $0x1e0] sm:$0xff]  ;;  %v13076_v21 = vld [vmem:[#allocation4 + $0x1e8] sm:$0xff]  ;;  %v13078_v57 = vld [vmem:[#allocation4 + $0x1f0] sm:$0xff] }
 0x708   :  { %14255 = vst [vmem:[#allocation92_spill] sm:$0xff] %v13076_v21  ;;  %v13080_v49 = vld [vmem:[#allocation4 + $0x1f8] sm:$0xff]  ;;  %v13082_v11 = vld [vmem:[#allocation4 + $0x200] sm:$0xff]  ;;  %v13084_v52 = vld [vmem:[#allocation4 + $0x208] sm:$0xff] }
 0x709   :  { %14256 = vst [vmem:[#allocation76_spill] sm:$0xff] %v13080_v49  ;;  %14257 = vst [vmem:[#allocation120_spill] sm:$0xff] %v13084_v52  ;;  %v13086_v32 = vld [vmem:[#allocation4 + $0x210] sm:$0xff]  ;;  %v13088_v39 = vld [vmem:[#allocation4 + $0x218] sm:$0xff] }
 0x70a   :  { %14258 = vst [vmem:[#allocation93_spill] sm:$0xff] %v13088_v39  ;;  %v13090_v42 = vld [vmem:[#allocation4 + $0x220] sm:$0xff]  ;;  %v13092_v31 = vld [vmem:[#allocation4 + $0x228] sm:$0xff]  ;;  %v13094_v33 = vld [vmem:[#allocation4 + $0x230] sm:$0xff] }
 0x70b   :  { %14259 = vst [vmem:[#allocation50_spill] sm:$0xff] %v13092_v31  ;;  %v13096_v13 = vld [vmem:[#allocation4 + $0x238] sm:$0xff]  ;;  %v13098_v21 = vld [vmem:[#allocation4 + $0x240] sm:$0xff]  ;;  %v13100_v36 = vld [vmem:[#allocation4 + $0x248] sm:$0xff] }
 0x70c   :  { %14260 = vst [vmem:[#allocation122_spill] sm:$0xff] %v13096_v13  ;;  %14261 = vst [vmem:[#allocation78_spill] sm:$0xff] %v13100_v36  ;;  %v13102_v49 = vld [vmem:[#allocation4 + $0x250] sm:$0xff]  ;;  %v13104_v53 = vld [vmem:[#allocation4 + $0x258] sm:$0xff] }
 0x70d   :  { %14262 = vst [vmem:[#allocation51_spill] sm:$0xff] %v13104_v53  ;;  %v13106_v52 = vld [vmem:[#allocation4 + $0x260] sm:$0xff]  ;;  %v13108_v7 = vld [vmem:[#allocation4 + $0x268] sm:$0xff]  ;;  %v13110_v39 = vld [vmem:[#allocation4 + $0x270] sm:$0xff] }
 0x70e   :  { %14263 = vst [vmem:[#allocation94_spill] sm:$0xff] %v13108_v7  ;;  %v13112_v30 = vld [vmem:[#allocation4 + $0x278] sm:$0xff]  ;;  %v13114_v31 = vld [vmem:[#allocation4 + $0x280] sm:$0xff]  ;;  %v13116_v61 = vld [vmem:[#allocation4 + $0x288] sm:$0xff] }
 0x70f   :  { %14264 = vst [vmem:[#allocation80_spill] sm:$0xff] %v13112_v30  ;;  %14265 = vst [vmem:[#allocation124_spill] sm:$0xff] %v13116_v61  ;;  %v13118_v13 = vld [vmem:[#allocation4 + $0x290] sm:$0xff]  ;;  %v13120_v16 = vld [vmem:[#allocation4 + $0x298] sm:$0xff] }
 0x710   :  { %14266 = vst [vmem:[#allocation95_spill] sm:$0xff] %v13120_v16  ;;  %v13122_v36 = vld [vmem:[#allocation4 + $0x2a0] sm:$0xff]  ;;  %v13124_v47 = vld [vmem:[#allocation4 + $0x2a8] sm:$0xff]  ;;  %v13126_v53 = vld [vmem:[#allocation4 + $0x2b0] sm:$0xff] }
 0x711   :  { %14267 = vst [vmem:[#allocation52_spill] sm:$0xff] %v13124_v47  ;;  %v13128_v2 = vld [vmem:[#allocation4 + $0x2b8] sm:$0xff]  ;;  %v13130_v7 = vld [vmem:[#allocation4 + $0x2c0] sm:$0xff]  ;;  %v13132_v55 = vld [vmem:[#allocation4 + $0x2c8] sm:$0xff] }
 0x712   :  { %14268 = vst [vmem:[#allocation53_spill] sm:$0xff] %v13128_v2  ;;  %14269 = vst [vmem:[#allocation96_spill] sm:$0xff] %v13132_v55  ;;  %v13134_v30 = vld [vmem:[#allocation4 + $0x2d0] sm:$0xff]  ;;  %v13136_v35 = vld [vmem:[#allocation4 + $0x2d8] sm:$0xff] }
 0x713   :  { %14270 = vst [vmem:[#allocation138_spill] sm:$0xff] %v13136_v35  ;;  %v13138_v61 = vld [vmem:[#allocation4 + $0x2e0] sm:$0xff]  ;;  %v13140_v5 = vld [vmem:[#allocation4 + $0x2e8] sm:$0xff]  ;;  %v13142_v16 = vld [vmem:[#allocation4 + $0x2f0] sm:$0xff] }
 0x714   :  { %14271 = vst [vmem:[#allocation137_spill] sm:$0xff] %v13140_v5  ;;  %v13144_v58 = vld [vmem:[#allocation4 + $0x2f8] sm:$0xff]  ;;  %v13146_v47 = vld [vmem:[#allocation4 + $0x300] sm:$0xff]  ;;  %v13148_v25 = vld [vmem:[#allocation4 + $0x308] sm:$0xff] }
 0x715   :  { %14272 = vst [vmem:[#allocation97_spill] sm:$0xff] %v13144_v58  ;;  %14273 = vst [vmem:[#allocation54_spill] sm:$0xff] %v13146_v47  ;;  %v13150_v2 = vld [vmem:[#allocation4 + $0x310] sm:$0xff]  ;;  %v13152_v24 = vld [vmem:[#allocation4 + $0x318] sm:$0xff] }
 0x716   :  { %14274 = vst [vmem:[#allocation136_spill] sm:$0xff] %v13148_v25  ;;  %14275 = vst [vmem:[#allocation135_spill] sm:$0xff] %v13150_v2  ;;  %v13154_v55 = vld [vmem:[#allocation4 + $0x320] sm:$0xff]  ;;  %v13156_v22 = vld [vmem:[#allocation4 + $0x328] sm:$0xff] }
 0x717   :  { %14276 = vst [vmem:[#allocation55_spill] sm:$0xff] %v13152_v24  ;;  %14277 = vst [vmem:[#allocation98_spill] sm:$0xff] %v13154_v55  ;;  %v13158_v35 = vld [vmem:[#allocation4 + $0x330] sm:$0xff]  ;;  %v13160_v1 = vld [vmem:[#allocation4 + $0x338] sm:$0xff] }
 0x718   :  { %14278 = vst [vmem:[#allocation109_spill] sm:$0xff] %v13156_v22  ;;  %14279 = vst [vmem:[#allocation111_spill] sm:$0xff] %v13158_v35  ;;  %v13162_v5 = vld [vmem:[#allocation4 + $0x340] sm:$0xff]  ;;  %v13164_v0 = vld [vmem:[#allocation4 + $0x348] sm:$0xff] }
 0x719   :  { %14280 = vst [vmem:[#allocation99_spill] sm:$0xff] %v13160_v1  ;;  %14281 = vst [vmem:[#allocation57_spill] sm:$0xff] %v13162_v5  ;;  %v13166_v58 = vld [vmem:[#allocation4 + $0x350] sm:$0xff]  ;;  %v13168_v47 = vld [vmem:[#allocation4 + $0x358] sm:$0xff] }
 0x71a   :  { %14282 = vst [vmem:[#allocation69_spill] sm:$0xff] %v13164_v0  ;;  %14283 = vst [vmem:[#allocation115_spill] sm:$0xff] %v13166_v58  ;;  %v13170_v25 = vld [vmem:[#allocation4 + $0x360] sm:$0xff]  ;;  %v13172_v2 = vld [vmem:[#allocation4 + $0x368] sm:$0xff] }
 0x71b   :  { %14284 = vst [vmem:[#allocation101_spill] sm:$0xff] %v13168_v47  ;;  %14285 = vst [vmem:[#allocation59_spill] sm:$0xff] %v13170_v25  ;;  %v13174_v24 = vld [vmem:[#allocation4 + $0x370] sm:$0xff]  ;;  %v13176_v38 = vld [vmem:[#allocation4 + $0x378] sm:$0xff] }
 0x71c   :  { %14286 = vst [vmem:[#allocation73_spill] sm:$0xff] %v13172_v2  ;;  %14287 = vst [vmem:[#allocation119_spill] sm:$0xff] %v13174_v24  ;;  %v13178_v22 = vld [vmem:[#allocation4 + $0x380] sm:$0xff]  ;;  %v13180_v55 = vld [vmem:[#allocation4 + $0x388] sm:$0xff] }
 0x71d   :  { %14288 = vst [vmem:[#allocation103_spill] sm:$0xff] %v13176_v38  ;;  %14289 = vst [vmem:[#allocation61_spill] sm:$0xff] %v13178_v22  ;;  %v13182_v1 = vld [vmem:[#allocation4 + $0x390] sm:$0xff]  ;;  %v13184_v35 = vld [vmem:[#allocation4 + $0x398] sm:$0xff] }
 0x71e   :  { %14290 = vst [vmem:[#allocation77_spill] sm:$0xff] %v13180_v55  ;;  %14291 = vst [vmem:[#allocation123_spill] sm:$0xff] %v13182_v1  ;;  %v13186_v0 = vld [vmem:[#allocation4 + $0x3a0] sm:$0xff]  ;;  %v13188_v56 = vld [vmem:[#allocation4 + $0x3a8] sm:$0xff] }
 0x71f   :  { %14292 = vst [vmem:[#allocation105_spill] sm:$0xff] %v13184_v35  ;;  %14293 = vst [vmem:[#allocation63_spill] sm:$0xff] %v13186_v0  ;;  %v13190_v47 = vld [vmem:[#allocation4 + $0x3b0] sm:$0xff]  ;;  %v13192_v40 = vld [vmem:[#allocation4 + $0x3b8] sm:$0xff] }
 0x720   :  { %14294 = vst [vmem:[#allocation81_spill] sm:$0xff] %v13188_v56  ;;  %14295 = vst [vmem:[#allocation127_spill] sm:$0xff] %v13192_v40  ;;  %v13194_v2 = vld [vmem:[#allocation4 + $0x3c0] sm:$0xff]  ;;  %v13196_v5 = vld [vmem:[#allocation4 + $0x3c8] sm:$0xff] }
 0x721   :  { %14296 = vst [vmem:[#allocation107_spill] sm:$0xff] %v13196_v5  ;;  %v13198_v38 = vld [vmem:[#allocation4 + $0x3d0] sm:$0xff]  ;;  %v13200_v58 = vld [vmem:[#allocation4 + $0x3d8] sm:$0xff]  ;;  %v13202_v55 = vld [vmem:[#allocation4 + $0x3e0] sm:$0xff] }
 0x722   :  { %14297 = vst [vmem:[#allocation65_spill] sm:$0xff] %v13200_v58  ;;  %v13204_v27 = vld [vmem:[#allocation4 + $0x3e8] sm:$0xff]  ;;  %v13206_v35 = vld [vmem:[#allocation4 + $0x3f0] sm:$0xff]  ;;  %v13208_v18 = vld [vmem:[#allocation4 + $0x3f8] sm:$0xff] }
 0x723   :  { %14298 = vst [vmem:[#allocation85_spill] sm:$0xff] %v13204_v27  ;;  %14299 = vst [vmem:[#allocation130_spill] sm:$0xff] %v13208_v18 }
 0x724   :  { %11622 = dma.done.wait [#allocation5 + $0x1], 16384 }
 0x725   :  { %11623 = vsyncadd [#allocation5 + $0x1], 4294950912  ;;  %s6108_s27 = scalar_lea.hbm %s13570_s1, 131072  ;;  %v10158_v56 = vcombine.low %v12920_v45, %v12920_v45  ;;  %v10159_v40 = vcombine.low %v12927_v15, %v12927_v15 }
 0x726   :  { %11582 = shalt.err (!%p11667_p0)  }
 0x727   :  { %6119 = dma.hbm_to_vmem [thread:$0]  %s6108_s27, 16384, %s11660_s23, [#allocation5]  ;;  %v13220_v5 = vpack.c.bf16 %v10158_v56, %v10158_v56  ;;  %v13222_v58 = vpack.c.bf16 %v10159_v40, %v10159_v40 }
 0x728   :  { %v10940_v27 = vld [vmem:[#allocation4 + $0x4e4] ss:$16 sps:$4 sm:$0xff]   ;;  %v10944_v25 = vld [vmem:[#allocation4 + $0x4e0] ss:$16 sps:$4 sm:$0xff]  }
 0x729   :  { %6932 = vmatprep.mubr.bf16.mxu0 %v13220_v5  ;;  %6973 = vmatprep.mubr.bf16.mxu1 %v13222_v58  ;;  %v10942_v18 = vld [vmem:[#allocation4 + $0x6e4] ss:$16 sps:$4 sm:$0xff]   ;;  %v10945_v45 = vld [vmem:[#allocation4 + $0x6e0] ss:$16 sps:$4 sm:$0xff]  }
 0x72a   :  { %6900 = vmatprep.subr.bf16.mxu0 %v10940_v27  ;;  %6941 = vmatprep.subr.bf16.mxu1 %v10942_v18  ;;  %v10946_v24 = vld [vmem:[#allocation4 + $0x4c4] ss:$16 sps:$4 sm:$0xff]   ;;  %v10950_v26 = vld [vmem:[#allocation4 + $0x4c0] ss:$16 sps:$4 sm:$0xff]  }
 0x72b   :  { %6901 = vmatpush1.bf16.msra.mxu0 %v10944_v25  ;;  %6942 = vmatpush1.bf16.msra.mxu1 %v10945_v45  ;;  %v10948_v15 = vld [vmem:[#allocation4 + $0x6c4] ss:$16 sps:$4 sm:$0xff]   ;;  %v10951_v56 = vld [vmem:[#allocation4 + $0x6c0] ss:$16 sps:$4 sm:$0xff]  }
 0x72c   :  { %6902 = vmatprep.subr.bf16.mxu0 %v10946_v24  ;;  %6943 = vmatprep.subr.bf16.mxu1 %v10948_v15  ;;  %v10952_v40 = vld [vmem:[#allocation4 + $0x4a4] ss:$16 sps:$4 sm:$0xff]   ;;  %v10956_v22 = vld [vmem:[#allocation4 + $0x4a0] ss:$16 sps:$4 sm:$0xff]  }
 0x72d   :  { %v10954_v28 = vld [vmem:[#allocation4 + $0x6a4] ss:$16 sps:$4 sm:$0xff]   ;;  %v10957_v1 = vld [vmem:[#allocation4 + $0x6a0] ss:$16 sps:$4 sm:$0xff]  }
 0x72e   :  { %v10958_v54 = vld [vmem:[#allocation4 + $0x484] ss:$16 sps:$4 sm:$0xff]   ;;  %v10962_v10 = vld [vmem:[#allocation4 + $0x480] ss:$16 sps:$4 sm:$0xff]  }
 0x72f   :  { %6903 = vmatpush1.bf16.msra.mxu0 %v10950_v26  ;;  %6944 = vmatpush1.bf16.msra.mxu1 %v10951_v56  ;;  %v10960_v27 = vld [vmem:[#allocation4 + $0x684] ss:$16 sps:$4 sm:$0xff]   ;;  %v10963_v25 = vld [vmem:[#allocation4 + $0x680] ss:$16 sps:$4 sm:$0xff]  }
 0x730   :  { %6904 = vmatprep.subr.bf16.mxu0 %v10952_v40  ;;  %6945 = vmatprep.subr.bf16.mxu1 %v10954_v28  ;;  %v10964_v18 = vld [vmem:[#allocation4 + $0x464] ss:$16 sps:$4 sm:$0xff]   ;;  %v10968_v45 = vld [vmem:[#allocation4 + $0x460] ss:$16 sps:$4 sm:$0xff]  }
 0x731   :  { %v10966_v24 = vld [vmem:[#allocation4 + $0x664] ss:$16 sps:$4 sm:$0xff]   ;;  %v10969_v15 = vld [vmem:[#allocation4 + $0x660] ss:$16 sps:$4 sm:$0xff]  }
 0x732   :  { %v10970_v0 = vld [vmem:[#allocation4 + $0x444] ss:$16 sps:$4 sm:$0xff]   ;;  %v10974_v56 = vld [vmem:[#allocation4 + $0x440] ss:$16 sps:$4 sm:$0xff]  }
 0x733   :  { %6905 = vmatpush1.bf16.msra.mxu0 %v10956_v22  ;;  %6946 = vmatpush1.bf16.msra.mxu1 %v10957_v1  ;;  %v10972_v26 = vld [vmem:[#allocation4 + $0x644] ss:$16 sps:$4 sm:$0xff]   ;;  %v10975_v28 = vld [vmem:[#allocation4 + $0x640] ss:$16 sps:$4 sm:$0xff]  }
 0x734   :  { %6906 = vmatprep.subr.bf16.mxu0 %v10958_v54  ;;  %6947 = vmatprep.subr.bf16.mxu1 %v10960_v27  ;;  %v10976_v40 = vld [vmem:[#allocation4 + $0x424] ss:$16 sps:$4 sm:$0xff]   ;;  %v10980_v1 = vld [vmem:[#allocation4 + $0x420] ss:$16 sps:$4 sm:$0xff]  }
 0x735   :  { %v10978_v22 = vld [vmem:[#allocation4 + $0x624] ss:$16 sps:$4 sm:$0xff]   ;;  %v10981_v54 = vld [vmem:[#allocation4 + $0x620] ss:$16 sps:$4 sm:$0xff]  }
 0x736   :  { %v10982_v27 = vld [vmem:[#allocation4 + $0x404] ss:$16 sps:$4 sm:$0xff]  }
 0x737   :  { %6907 = vmatpush1.bf16.msra.mxu0 %v10962_v10  ;;  %6948 = vmatpush1.bf16.msra.mxu1 %v10963_v25  ;;  %v10984_v10 = vld [vmem:[#allocation4 + $0x604] ss:$16 sps:$4 sm:$0xff]   ;;  %v10986_v25 = vld [vmem:[#allocation4 + $0x400] ss:$16 sps:$4 sm:$0xff]  }
 0x738   :  { %6908 = vmatprep.subr.bf16.mxu0 %v10964_v18  ;;  %6949 = vmatprep.subr.bf16.mxu1 %v10966_v24  ;;  %v10987_v18 = vld [vmem:[#allocation4 + $0x600] ss:$16 sps:$4 sm:$0xff]   ;;  %v10988_v24 = vld [vmem:[#allocation4 + $0x5e4] ss:$16 sps:$4 sm:$0xff]  }
 0x73b   :  { %6909 = vmatpush1.bf16.msra.mxu0 %v10968_v45  ;;  %6950 = vmatpush1.bf16.msra.mxu1 %v10969_v15  ;;  %v10990_v45 = vld [vmem:[#allocation4 + $0x7e4] ss:$16 sps:$4 sm:$0xff]   ;;  %v10992_v15 = vld [vmem:[#allocation4 + $0x5e0] ss:$16 sps:$4 sm:$0xff]  }
 0x73c   :  { %6910 = vmatprep.subr.bf16.mxu0 %v10970_v0  ;;  %6951 = vmatprep.subr.bf16.mxu1 %v10972_v26  ;;  %v10993_v0 = vld [vmem:[#allocation4 + $0x7e0] ss:$16 sps:$4 sm:$0xff]   ;;  %v10994_v26 = vld [vmem:[#allocation4 + $0x5c4] ss:$16 sps:$4 sm:$0xff]  }
 0x73f   :  { %6911 = vmatpush1.bf16.msra.mxu0 %v10974_v56  ;;  %6952 = vmatpush1.bf16.msra.mxu1 %v10975_v28  ;;  %v10996_v56 = vld [vmem:[#allocation4 + $0x7c4] ss:$16 sps:$4 sm:$0xff]   ;;  %v10998_v28 = vld [vmem:[#allocation4 + $0x5c0] ss:$16 sps:$4 sm:$0xff]  }
 0x740   :  { %6912 = vmatprep.subr.bf16.mxu0 %v10976_v40  ;;  %6953 = vmatprep.subr.bf16.mxu1 %v10978_v22  ;;  %v10999_v40 = vld [vmem:[#allocation4 + $0x7c0] ss:$16 sps:$4 sm:$0xff]   ;;  %v11000_v22 = vld [vmem:[#allocation4 + $0x5a4] ss:$16 sps:$4 sm:$0xff]  }
 0x743   :  { %6913 = vmatpush1.bf16.msra.mxu0 %v10980_v1  ;;  %6954 = vmatpush1.bf16.msra.mxu1 %v10981_v54  ;;  %v11002_v1 = vld [vmem:[#allocation4 + $0x7a4] ss:$16 sps:$4 sm:$0xff]   ;;  %v11004_v54 = vld [vmem:[#allocation4 + $0x5a0] ss:$16 sps:$4 sm:$0xff]  }
 0x744   :  { %6914 = vmatprep.subr.bf16.mxu0 %v10982_v27  ;;  %6955 = vmatprep.subr.bf16.mxu1 %v10984_v10  ;;  %v11005_v27 = vld [vmem:[#allocation4 + $0x7a0] ss:$16 sps:$4 sm:$0xff]   ;;  %v11006_v10 = vld [vmem:[#allocation4 + $0x584] ss:$16 sps:$4 sm:$0xff]  }
 0x747   :  { %6915 = vmatpush1.bf16.msra.mxu0 %v10986_v25  ;;  %6956 = vmatpush1.bf16.msra.mxu1 %v10987_v18  ;;  %v11008_v25 = vld [vmem:[#allocation4 + $0x784] ss:$16 sps:$4 sm:$0xff]   ;;  %v11010_v18 = vld [vmem:[#allocation4 + $0x580] ss:$16 sps:$4 sm:$0xff]  }
 0x748   :  { %6916 = vmatprep.subr.bf16.mxu0 %v10988_v24  ;;  %6957 = vmatprep.subr.bf16.mxu1 %v10990_v45  ;;  %v11011_v24 = vld [vmem:[#allocation4 + $0x780] ss:$16 sps:$4 sm:$0xff]   ;;  %v11012_v45 = vld [vmem:[#allocation4 + $0x564] ss:$16 sps:$4 sm:$0xff]  }
 0x74b   :  { %6917 = vmatpush2.bf16.msra.mxu0 %v10992_v15  ;;  %6958 = vmatpush2.bf16.msra.mxu1 %v10993_v0  ;;  %v11014_v15 = vld [vmem:[#allocation4 + $0x764] ss:$16 sps:$4 sm:$0xff]   ;;  %v11016_v0 = vld [vmem:[#allocation4 + $0x560] ss:$16 sps:$4 sm:$0xff]  }
 0x74c   :  { %6918 = vmatprep.subr.bf16.mxu0 %v10994_v26  ;;  %6959 = vmatprep.subr.bf16.mxu1 %v10996_v56  ;;  %v11017_v26 = vld [vmem:[#allocation4 + $0x760] ss:$16 sps:$4 sm:$0xff]   ;;  %v11018_v56 = vld [vmem:[#allocation4 + $0x544] ss:$16 sps:$4 sm:$0xff]  }
 0x74f   :  { %6919 = vmatpush2.bf16.msra.mxu0 %v10998_v28  ;;  %6960 = vmatpush2.bf16.msra.mxu1 %v10999_v40  ;;  %v11020_v28 = vld [vmem:[#allocation4 + $0x744] ss:$16 sps:$4 sm:$0xff]   ;;  %v11022_v40 = vld [vmem:[#allocation4 + $0x540] ss:$16 sps:$4 sm:$0xff]  }
 0x750   :  { %6920 = vmatprep.subr.bf16.mxu0 %v11000_v22  ;;  %6961 = vmatprep.subr.bf16.mxu1 %v11002_v1  ;;  %v11023_v22 = vld [vmem:[#allocation4 + $0x740] ss:$16 sps:$4 sm:$0xff]   ;;  %v11024_v1 = vld [vmem:[#allocation4 + $0x524] ss:$16 sps:$4 sm:$0xff]  }
 0x753   :  { %6921 = vmatpush2.bf16.msra.mxu0 %v11004_v54  ;;  %6962 = vmatpush2.bf16.msra.mxu1 %v11005_v27  ;;  %v11026_v54 = vld [vmem:[#allocation4 + $0x724] ss:$16 sps:$4 sm:$0xff]   ;;  %v11028_v27 = vld [vmem:[#allocation4 + $0x520] ss:$16 sps:$4 sm:$0xff]  }
 0x754   :  { %6922 = vmatprep.subr.bf16.mxu0 %v11006_v10  ;;  %6963 = vmatprep.subr.bf16.mxu1 %v11008_v25  ;;  %v11029_v10 = vld [vmem:[#allocation4 + $0x720] ss:$16 sps:$4 sm:$0xff]   ;;  %v11030_v25 = vld [vmem:[#allocation4 + $0x504] ss:$16 sps:$4 sm:$0xff]  }
 0x757   :  { %6923 = vmatpush2.bf16.msra.mxu0 %v11010_v18  ;;  %6964 = vmatpush2.bf16.msra.mxu1 %v11011_v24  ;;  %v11032_v18 = vld [vmem:[#allocation4 + $0x704] ss:$16 sps:$4 sm:$0xff]   ;;  %v11034_v24 = vld [vmem:[#allocation4 + $0x500] ss:$16 sps:$4 sm:$0xff]  }
 0x758   :  { %6924 = vmatprep.subr.bf16.mxu0 %v11012_v45  ;;  %6965 = vmatprep.subr.bf16.mxu1 %v11014_v15  ;;  %v11035_v45 = vld [vmem:[#allocation4 + $0x700] ss:$16 sps:$4 sm:$0xff]   ;;  %v11038_v15 = vld [vmem:[#allocation4 + $0x4ec] ss:$16 sps:$4 sm:$0xff]  }
 0x75b   :  { %6925 = vmatpush2.bf16.msra.mxu0 %v11016_v0  ;;  %6966 = vmatpush2.bf16.msra.mxu1 %v11017_v26  ;;  %v11041_v0 = vld [vmem:[#allocation4 + $0x6ec] ss:$16 sps:$4 sm:$0xff]   ;;  %v13228_v26 = vpack.c.bf16 %v12923_v29, %v12923_v29 }
 0x75c   :  { %6926 = vmatprep.subr.bf16.mxu0 %v11018_v56  ;;  %6967 = vmatprep.subr.bf16.mxu1 %v11020_v28  ;;  %v13232_v56 = vpack.c.bf16 %v12930_v20, %v12930_v20  ;;  %v11036_v28 = vld [vmem:[#allocation4 + $0x4e8] ss:$16 sps:$4 sm:$0xff]   ;;  %v11050_v29 = vld [vmem:[#allocation4 + $0x4ac] ss:$16 sps:$4 sm:$0xff]  }
 0x75d   :  { %v11053_v20 = vld [vmem:[#allocation4 + $0x6ac] ss:$16 sps:$4 sm:$0xff]  }
 0x75f   :  { %6927 = vmatpush2.bf16.msra.mxu0 %v11022_v40  ;;  %6968 = vmatpush2.bf16.msra.mxu1 %v11023_v22  ;;  %v11039_v40 = vld [vmem:[#allocation4 + $0x6e8] ss:$16 sps:$4 sm:$0xff]   ;;  %v11044_v22 = vld [vmem:[#allocation4 + $0x4cc] ss:$16 sps:$4 sm:$0xff]  }
 0x760   :  { %6928 = vmatprep.subr.bf16.mxu0 %v11024_v1  ;;  %6969 = vmatprep.subr.bf16.mxu1 %v11026_v54  ;;  %v11047_v1 = vld [vmem:[#allocation4 + $0x6cc] ss:$16 sps:$4 sm:$0xff]   ;;  %v11042_v54 = vld [vmem:[#allocation4 + $0x4c8] ss:$16 sps:$4 sm:$0xff]  }
 0x763   :  { %6929 = vmatpush2.bf16.msra.mxu0 %v11028_v27  ;;  %6970 = vmatpush2.bf16.msra.mxu1 %v11029_v10  ;;  %v11045_v27 = vld [vmem:[#allocation4 + $0x6c8] ss:$16 sps:$4 sm:$0xff]  }
 0x764   :  { %6930 = vmatprep.subr.bf16.mxu0 %v11030_v25  ;;  %6971 = vmatprep.subr.bf16.mxu1 %v11032_v18  ;;  %v11048_v10 = vld [vmem:[#allocation4 + $0x4a8] ss:$16 sps:$4 sm:$0xff]   ;;  %v11056_v18 = vld [vmem:[#allocation4 + $0x48c] ss:$16 sps:$4 sm:$0xff]  }
 0x765   :  { %v11051_v25 = vld [vmem:[#allocation4 + $0x6a8] ss:$16 sps:$4 sm:$0xff]  }
 0x767   :  { %6931 = vmatpush2.bf16.msra.mxu0 %v11034_v24  ;;  %6972 = vmatpush2.bf16.msra.mxu1 %v11035_v45  ;;  %v11059_v24 = vld [vmem:[#allocation4 + $0x68c] ss:$16 sps:$4 sm:$0xff]   ;;  %v11054_v45 = vld [vmem:[#allocation4 + $0x488] ss:$16 sps:$4 sm:$0xff]  }
 0x768   :  { %6982 = vmatprep.subr.bf16.mxu0 %v11038_v15  ;;  %7023 = vmatprep.subr.bf16.mxu1 %v11041_v0  ;;  %v11057_v15 = vld [vmem:[#allocation4 + $0x688] ss:$16 sps:$4 sm:$0xff]   ;;  %v11062_v0 = vld [vmem:[#allocation4 + $0x46c] ss:$16 sps:$4 sm:$0xff]  }
 0x76a   :  { %6933 = vmatmul.mubr.bf16.vlgmr.msra.gmra.mxu0 %v13228_v26  ;;  %6974 = vmatmul.mubr.bf16.vlgmr.msra.gmra.mxu1 %v13232_v56 }
 0x76b   :  { %6983 = vmatpush1.bf16.msra.mxu0 %v11036_v28  ;;  %7024 = vmatpush1.bf16.msra.mxu1 %v11039_v40  ;;  %v11065_v28 = vld [vmem:[#allocation4 + $0x66c] ss:$16 sps:$4 sm:$0xff]   ;;  %v11060_v40 = vld [vmem:[#allocation4 + $0x468] ss:$16 sps:$4 sm:$0xff]  }
 0x76c   :  { %6984 = vmatprep.subr.bf16.mxu0 %v11044_v22  ;;  %7025 = vmatprep.subr.bf16.mxu1 %v11047_v1  ;;  %v11071_v22 = vld [vmem:[#allocation4 + $0x64c] ss:$16 sps:$4 sm:$0xff]   ;;  %v11066_v1 = vld [vmem:[#allocation4 + $0x448] ss:$16 sps:$4 sm:$0xff]  }
 0x76d   :  { %7014 = vmatprep.mubr.bf16.mxu0 %v13220_v5  ;;  %7055 = vmatprep.mubr.bf16.mxu1 %v13222_v58  ;;  %v11063_v5 = vld [vmem:[#allocation4 + $0x668] ss:$16 sps:$4 sm:$0xff]   ;;  %v11068_v58 = vld [vmem:[#allocation4 + $0x44c] ss:$16 sps:$4 sm:$0xff]  }
 0x76f   :  { %6985 = vmatpush1.bf16.msra.mxu0 %v11042_v54  ;;  %7026 = vmatpush1.bf16.msra.mxu1 %v11045_v27  ;;  %v11069_v54 = vld [vmem:[#allocation4 + $0x648] ss:$16 sps:$4 sm:$0xff]   ;;  %v11074_v27 = vld [vmem:[#allocation4 + $0x42c] ss:$16 sps:$4 sm:$0xff]  }
 0x770   :  { %6986 = vmatprep.subr.bf16.mxu0 %v11050_v29  ;;  %7027 = vmatprep.subr.bf16.mxu1 %v11053_v20  ;;  %v11077_v29 = vld [vmem:[#allocation4 + $0x62c] ss:$16 sps:$4 sm:$0xff]   ;;  %v11072_v20 = vld [vmem:[#allocation4 + $0x428] ss:$16 sps:$4 sm:$0xff]  }
 0x773   :  { %6987 = vmatpush1.bf16.msra.mxu0 %v11048_v10  ;;  %7028 = vmatpush1.bf16.msra.mxu1 %v11051_v25  ;;  %v11075_v10 = vld [vmem:[#allocation4 + $0x628] ss:$16 sps:$4 sm:$0xff]   ;;  %v11080_v25 = vld [vmem:[#allocation4 + $0x40c] ss:$16 sps:$4 sm:$0xff]  }
 0x774   :  { %6988 = vmatprep.subr.bf16.mxu0 %v11056_v18  ;;  %7029 = vmatprep.subr.bf16.mxu1 %v11059_v24  ;;  %v11083_v18 = vld [vmem:[#allocation4 + $0x60c] ss:$16 sps:$4 sm:$0xff]   ;;  %v11078_v24 = vld [vmem:[#allocation4 + $0x408] ss:$16 sps:$4 sm:$0xff]  }
 0x777   :  { %6989 = vmatpush1.bf16.msra.mxu0 %v11054_v45  ;;  %7030 = vmatpush1.bf16.msra.mxu1 %v11057_v15  ;;  %v11081_v45 = vld [vmem:[#allocation4 + $0x608] ss:$16 sps:$4 sm:$0xff]   ;;  %v11086_v15 = vld [vmem:[#allocation4 + $0x5ec] ss:$16 sps:$4 sm:$0xff]  }
 0x778   :  { %6990 = vmatprep.subr.bf16.mxu0 %v11062_v0  ;;  %7031 = vmatprep.subr.bf16.mxu1 %v11065_v28  ;;  %v11089_v0 = vld [vmem:[#allocation4 + $0x7ec] ss:$16 sps:$4 sm:$0xff]   ;;  %v11084_v28 = vld [vmem:[#allocation4 + $0x5e8] ss:$16 sps:$4 sm:$0xff]  }
 0x77b   :  { %6991 = vmatpush1.bf16.msra.mxu0 %v11060_v40  ;;  %7032 = vmatpush1.bf16.msra.mxu1 %v11063_v5  ;;  %v11087_v40 = vld [vmem:[#allocation4 + $0x7e8] ss:$16 sps:$4 sm:$0xff]   ;;  %v11092_v5 = vld [vmem:[#allocation4 + $0x5cc] ss:$16 sps:$4 sm:$0xff]  }
 0x77c   :  { %6992 = vmatprep.subr.bf16.mxu0 %v11068_v58  ;;  %7033 = vmatprep.subr.bf16.mxu1 %v11071_v22  ;;  %v11095_v58 = vld [vmem:[#allocation4 + $0x7cc] ss:$16 sps:$4 sm:$0xff]   ;;  %v11090_v22 = vld [vmem:[#allocation4 + $0x5c8] ss:$16 sps:$4 sm:$0xff]  }
 0x77f   :  { %6993 = vmatpush1.bf16.msra.mxu0 %v11066_v1  ;;  %7034 = vmatpush1.bf16.msra.mxu1 %v11069_v54  ;;  %v11093_v1 = vld [vmem:[#allocation4 + $0x7c8] ss:$16 sps:$4 sm:$0xff]   ;;  %v11098_v54 = vld [vmem:[#allocation4 + $0x5ac] ss:$16 sps:$4 sm:$0xff]  }
 0x780   :  { %6994 = vmatprep.subr.bf16.mxu0 %v11074_v27  ;;  %7035 = vmatprep.subr.bf16.mxu1 %v11077_v29  ;;  %v11101_v27 = vld [vmem:[#allocation4 + $0x7ac] ss:$16 sps:$4 sm:$0xff]   ;;  %v11096_v29 = vld [vmem:[#allocation4 + $0x5a8] ss:$16 sps:$4 sm:$0xff]  }
 0x783   :  { %6995 = vmatpush1.bf16.msra.mxu0 %v11072_v20  ;;  %7036 = vmatpush1.bf16.msra.mxu1 %v11075_v10  ;;  %v11099_v20 = vld [vmem:[#allocation4 + $0x7a8] ss:$16 sps:$4 sm:$0xff]   ;;  %v11104_v10 = vld [vmem:[#allocation4 + $0x58c] ss:$16 sps:$4 sm:$0xff]  }
 0x784   :  { %6996 = vmatprep.subr.bf16.mxu0 %v11080_v25  ;;  %7037 = vmatprep.subr.bf16.mxu1 %v11083_v18  ;;  %v11107_v25 = vld [vmem:[#allocation4 + $0x78c] ss:$16 sps:$4 sm:$0xff]   ;;  %v11102_v18 = vld [vmem:[#allocation4 + $0x588] ss:$16 sps:$4 sm:$0xff]  }
 0x787   :  { %6997 = vmatpush1.bf16.msra.mxu0 %v11078_v24  ;;  %7038 = vmatpush1.bf16.msra.mxu1 %v11081_v45  ;;  %v11105_v24 = vld [vmem:[#allocation4 + $0x788] ss:$16 sps:$4 sm:$0xff]   ;;  %v11110_v45 = vld [vmem:[#allocation4 + $0x56c] ss:$16 sps:$4 sm:$0xff]  }
 0x788   :  { %6998 = vmatprep.subr.bf16.mxu0 %v11086_v15  ;;  %7039 = vmatprep.subr.bf16.mxu1 %v11089_v0  ;;  %v11113_v15 = vld [vmem:[#allocation4 + $0x76c] ss:$16 sps:$4 sm:$0xff]   ;;  %v11108_v0 = vld [vmem:[#allocation4 + $0x568] ss:$16 sps:$4 sm:$0xff]  }
 0x78b   :  { %6999 = vmatpush2.bf16.msra.mxu0 %v11084_v28  ;;  %7040 = vmatpush2.bf16.msra.mxu1 %v11087_v40  ;;  %v11111_v28 = vld [vmem:[#allocation4 + $0x768] ss:$16 sps:$4 sm:$0xff]   ;;  %v11116_v40 = vld [vmem:[#allocation4 + $0x54c] ss:$16 sps:$4 sm:$0xff]  }
 0x78c   :  { %7000 = vmatprep.subr.bf16.mxu0 %v11092_v5  ;;  %7041 = vmatprep.subr.bf16.mxu1 %v11095_v58  ;;  %v11119_v5 = vld [vmem:[#allocation4 + $0x74c] ss:$16 sps:$4 sm:$0xff]   ;;  %v11114_v58 = vld [vmem:[#allocation4 + $0x548] ss:$16 sps:$4 sm:$0xff]  }
 0x78f   :  { %7001 = vmatpush2.bf16.msra.mxu0 %v11090_v22  ;;  %7042 = vmatpush2.bf16.msra.mxu1 %v11093_v1  ;;  %v11117_v22 = vld [vmem:[#allocation4 + $0x748] ss:$16 sps:$4 sm:$0xff]   ;;  %v11122_v1 = vld [vmem:[#allocation4 + $0x52c] ss:$16 sps:$4 sm:$0xff]  }
 0x790   :  { %7002 = vmatprep.subr.bf16.mxu0 %v11098_v54  ;;  %7043 = vmatprep.subr.bf16.mxu1 %v11101_v27  ;;  %v11125_v54 = vld [vmem:[#allocation4 + $0x72c] ss:$16 sps:$4 sm:$0xff]   ;;  %v11120_v27 = vld [vmem:[#allocation4 + $0x528] ss:$16 sps:$4 sm:$0xff]  }
 0x793   :  { %7003 = vmatpush2.bf16.msra.mxu0 %v11096_v29  ;;  %7044 = vmatpush2.bf16.msra.mxu1 %v11099_v20  ;;  %v11123_v29 = vld [vmem:[#allocation4 + $0x728] ss:$16 sps:$4 sm:$0xff]   ;;  %v11128_v20 = vld [vmem:[#allocation4 + $0x50c] ss:$16 sps:$4 sm:$0xff]  }
 0x794   :  { %7004 = vmatprep.subr.bf16.mxu0 %v11104_v10  ;;  %7045 = vmatprep.subr.bf16.mxu1 %v11107_v25  ;;  %v11131_v10 = vld [vmem:[#allocation4 + $0x70c] ss:$16 sps:$4 sm:$0xff]   ;;  %v11126_v25 = vld [vmem:[#allocation4 + $0x508] ss:$16 sps:$4 sm:$0xff]  }
 0x797   :  { %7005 = vmatpush2.bf16.msra.mxu0 %v11102_v18  ;;  %7046 = vmatpush2.bf16.msra.mxu1 %v11105_v24  ;;  %v11129_v18 = vld [vmem:[#allocation4 + $0x708] ss:$16 sps:$4 sm:$0xff]   ;;  %v9923_v24 = vcombine.high %v13010_v44, %v13014_v14 }
 0x798   :  { %7006 = vmatprep.subr.bf16.mxu0 %v11110_v45  ;;  %7047 = vmatprep.subr.bf16.mxu1 %v11113_v15  ;;  %v9987_v45 = vcombine.high %v13138_v61, %v13142_v16  ;;  %v9922_v15 = vcombine.low %v13010_v44, %v13014_v14  ;;  %v9918_v44 = vcombine.low %v13002_v43, %v13006_v6 }
 0x799   :  { %v9979_v14 = vcombine.high %v13122_v36, %v13126_v53 }
 0x79b   :  { %7007 = vmatpush2.bf16.msra.mxu0 %v11108_v0  ;;  %7048 = vmatpush2.bf16.msra.mxu1 %v11111_v28  ;;  %v9986_v0 = vcombine.low %v13138_v61, %v13142_v16  ;;  %v9919_v28 = vcombine.high %v13002_v43, %v13006_v6  ;;  %v9982_v61 = vcombine.low %v13130_v7, %v13134_v30 }
 0x79c   :  { %7008 = vmatprep.subr.bf16.mxu0 %v11116_v40  ;;  %7049 = vmatprep.subr.bf16.mxu1 %v11119_v5  ;;  %v9983_v40 = vcombine.high %v13130_v7, %v13134_v30  ;;  %v9915_v16 = vcombine.high %v12994_v17, %v12998_v41  ;;  %v9914_v43 = vcombine.low %v12994_v17, %v12998_v41 }
 0x79d   :  { %v9978_v7 = vcombine.low %v13122_v36, %v13126_v53  ;;  %v9911_v30 = vcombine.high %v12986_v8, %v12990_v63  ;;  %v9975_v6 = vcombine.high %v13114_v31, %v13118_v13  ;;  %v9907_v36 = vcombine.high %v12978_v34, %v12982_v23 }
 0x79e   :  { %v9971_v53 = vcombine.high %v13106_v52, %v13110_v39  ;;  %v9906_v17 = vcombine.low %v12978_v34, %v12982_v23  ;;  %v9970_v41 = vcombine.low %v13106_v52, %v13110_v39  ;;  %v9899_v39 = vcombine.high %v12962_v51, %v12966_v62 }
 0x79f   :  { %7009 = vmatpush2.bf16.msra.mxu0 %v11114_v58  ;;  %7050 = vmatpush2.bf16.msra.mxu1 %v11117_v22  ;;  %v9963_v34 = vcombine.high %v13090_v42, %v13094_v33  ;;  %v9898_v23 = vcombine.low %v12962_v51, %v12966_v62  ;;  %v9962_v52 = vcombine.low %v13090_v42, %v13094_v33  ;;  %v14304_v58 = vld [vmem:[#allocation61_spill] sm:$0xff] }
 0x7a0   :  { %7010 = vmatprep.subr.bf16.mxu0 %v11122_v1  ;;  %7051 = vmatprep.subr.bf16.mxu1 %v11125_v54  ;;  %v9955_v51 = vcombine.high %v13074_v12, %v13078_v57  ;;  %v10019_v62 = vcombine.high %v13202_v55, %v13206_v35  ;;  %v9954_v42 = vcombine.low %v13074_v12, %v13078_v57 }
 0x7a1   :  { %v10018_v33 = vcombine.low %v13202_v55, %v13206_v35  ;;  %v9947_v55 = vcombine.high %v13058_v3, %v13062_v19  ;;  %v14300_v35 = vld [vmem:[#allocation63_spill] sm:$0xff]  ;;  %v9946_v57 = vcombine.low %v13058_v3, %v13062_v19  ;;  %v14305_v19 = vld [vmem:[#allocation70_spill] sm:$0xff]  ;;  %v14306_v3 = vld [vmem:[#allocation49_spill] sm:$0xff] }
 0x7a2   :  { %v10011_v12 = vcombine.high %v14300_v35, %v13190_v47  ;;  %v10010_v5 = vcombine.low %v14300_v35, %v13190_v47  ;;  %v9939_v47 = vcombine.high %v14306_v3, %v14305_v19  ;;  %v14331_v35 = vld [vmem:[#allocation62_spill] sm:$0xff] }
 0x7a3   :  { %7011 = vmatpush2.bf16.msra.mxu0 %v11120_v27  ;;  %7052 = vmatpush2.bf16.msra.mxu1 %v11123_v29  ;;  %v14307_v27 = vld [vmem:[#allocation119_spill] sm:$0xff] }
 0x7a4   :  { %7012 = vmatprep.subr.bf16.mxu0 %v11128_v20  ;;  %7053 = vmatprep.subr.bf16.mxu1 %v11131_v10  ;;  %v14308_v29 = vld [vmem:[#allocation59_spill] sm:$0xff]  ;;  %v9938_v10 = vcombine.low %v14306_v3, %v14305_v19  ;;  %v14338_v19 = vld [vmem:[#allocation124_spill] sm:$0xff] }
 0x7a5   :  { %v10003_v20 = vcombine.high %v14308_v29, %v14307_v27 }
 0x7a7   :  { %7013 = vmatpush2.bf16.msra.mxu0 %v11126_v25  ;;  %7054 = vmatpush2.bf16.msra.mxu1 %v11129_v18  ;;  %v10002_v25 = vcombine.low %v14308_v29, %v14307_v27  ;;  %v14309_v18 = vld [vmem:[#allocation88_spill] sm:$0xff]  ;;  %v14340_v27 = vld [vmem:[#allocation75_spill] sm:$0xff] }
 0x7a8   :  { %7704 = vmatprep.subr.bf16.mxu0 %v9923_v24  ;;  %7745 = vmatprep.subr.bf16.mxu1 %v9987_v45  ;;  %v14310_v24 = vld [vmem:[#allocation112_spill] sm:$0xff] }
 0x7a9   :  { %v9935_v45 = vcombine.high %v14310_v24, %v14309_v18 }
 0x7aa   :  { %7015 = vmatmul.mubr.bf16.vlgmr.msra.gmra.mxu0 %v13228_v26  ;;  %7056 = vmatmul.mubr.bf16.vlgmr.msra.gmra.mxu1 %v13232_v56  ;;  %v9910_v26 = vcombine.low %v12986_v8, %v12990_v63  ;;  %v9974_v56 = vcombine.low %v13114_v31, %v13118_v13  ;;  %v9903_v31 = vcombine.high %v12970_v60, %v12974_v4 }
 0x7ab   :  { %7705 = vmatpush1.bf16.msra.mxu0 %v9922_v15  ;;  %7746 = vmatpush1.bf16.msra.mxu1 %v9986_v0  ;;  %v9967_v13 = vcombine.high %v13098_v21, %v13102_v49  ;;  %v9902_v8 = vcombine.low %v12970_v60, %v12974_v4  ;;  %v9966_v63 = vcombine.low %v13098_v21, %v13102_v49  ;;  %v14311_v15 = vld [vmem:[#allocation115_spill] sm:$0xff]  ;;  %v14312_v0 = vld [vmem:[#allocation57_spill] sm:$0xff] }
 0x7ac   :  { %7706 = vmatprep.subr.bf16.mxu0 %v9919_v28  ;;  %7747 = vmatprep.subr.bf16.mxu1 %v9983_v40  ;;  %v9895_v60 = vcombine.high %v12954_v9, %v12958_v48  ;;  %v9959_v4 = vcombine.high %v13082_v11, %v13086_v32  ;;  %v9894_v21 = vcombine.low %v12954_v9, %v12958_v48 }
 0x7ad   :  { %7736 = vmatprep.mubr.bf16.mxu0 %v12950_v37  ;;  %7777 = vmatprep.mubr.bf16.mxu1 %v12952_v59  ;;  %v9958_v49 = vcombine.low %v13082_v11, %v13086_v32  ;;  %v9951_v32 = vcombine.high %v13066_v46, %v13070_v50  ;;  %v10015_v9 = vcombine.high %v13194_v2, %v13198_v38 }
 0x7ae   :  { %v9950_v48 = vcombine.low %v13066_v46, %v13070_v50  ;;  %v10014_v11 = vcombine.low %v13194_v2, %v13198_v38  ;;  %v14301_v46 = vld [vmem:[#allocation116_spill] sm:$0xff]  ;;  %v14302_v2 = vld [vmem:[#allocation133_spill] sm:$0xff]  ;;  %v14303_v50 = vld [vmem:[#allocation123_spill] sm:$0xff]  ;;  %v9999_v28 = vcombine.high %v14312_v0, %v14311_v15  ;;  %v9934_v40 = vcombine.low %v14310_v24, %v14309_v18 }
 0x7af   :  { %7707 = vmatpush1.bf16.msra.mxu0 %v9918_v44  ;;  %7748 = vmatpush1.bf16.msra.mxu1 %v9982_v61  ;;  %v9943_v38 = vcombine.high %v14302_v2, %v14301_v46  ;;  %v10007_v22 = vcombine.high %v14304_v58, %v14303_v50  ;;  %v9942_v1 = vcombine.low %v14302_v2, %v14301_v46  ;;  %v14313_v61 = vld [vmem:[#allocation131_spill] sm:$0xff]  ;;  %v14334_v46 = vld [vmem:[#allocation52_spill] sm:$0xff] }
 0x7b0   :  { %7708 = vmatprep.subr.bf16.mxu0 %v9915_v16  ;;  %7749 = vmatprep.subr.bf16.mxu1 %v9979_v14  ;;  %v10006_v54 = vcombine.low %v14304_v58, %v14303_v50  ;;  %v9998_v44 = vcombine.low %v14312_v0, %v14311_v15  ;;  %v14314_v16 = vld [vmem:[#allocation66_spill] sm:$0xff]  ;;  %v14335_v58 = vld [vmem:[#allocation121_spill] sm:$0xff] }
 0x7b1   :  { %v9931_v14 = vcombine.high %v14314_v16, %v14313_v61  ;;  %v14344_v15 = vld [vmem:[#allocation102_spill] sm:$0xff] }
 0x7b3   :  { %7709 = vmatpush1.bf16.msra.mxu0 %v9914_v43  ;;  %7750 = vmatpush1.bf16.msra.mxu1 %v9978_v7  ;;  %v14315_v43 = vld [vmem:[#allocation111_spill] sm:$0xff]  ;;  %v14316_v7 = vld [vmem:[#allocation98_spill] sm:$0xff] }
 0x7b4   :  { %7710 = vmatprep.subr.bf16.mxu0 %v9911_v30  ;;  %7751 = vmatprep.subr.bf16.mxu1 %v9975_v6  ;;  %v9995_v30 = vcombine.high %v14316_v7, %v14315_v43  ;;  %v9930_v6 = vcombine.low %v14314_v16, %v14313_v61 }
 0x7b7   :  { %7711 = vmatpush1.bf16.msra.mxu0 %v9910_v26  ;;  %7752 = vmatpush1.bf16.msra.mxu1 %v9974_v56  ;;  %v9994_v26 = vcombine.low %v14316_v7, %v14315_v43  ;;  %v14317_v56 = vld [vmem:[#allocation86_spill] sm:$0xff]  ;;  %v14348_v43 = vld [vmem:[#allocation71_spill] sm:$0xff] }
 0x7b8   :  { %7712 = vmatprep.subr.bf16.mxu0 %v9907_v36  ;;  %7753 = vmatprep.subr.bf16.mxu1 %v9971_v53  ;;  %v14318_v36 = vld [vmem:[#allocation108_spill] sm:$0xff] }
 0x7b9   :  { %v9927_v53 = vcombine.high %v14318_v36, %v14317_v56 }
 0x7bb   :  { %7713 = vmatpush1.bf16.msra.mxu0 %v9906_v17  ;;  %7754 = vmatpush1.bf16.msra.mxu1 %v9970_v41  ;;  %v14319_v17 = vld [vmem:[#allocation135_spill] sm:$0xff]  ;;  %v14320_v41 = vld [vmem:[#allocation54_spill] sm:$0xff] }
 0x7bc   :  { %7714 = vmatprep.subr.bf16.mxu0 %v9903_v31  ;;  %7755 = vmatprep.subr.bf16.mxu1 %v9967_v13  ;;  %v9991_v31 = vcombine.high %v14320_v41, %v14319_v17  ;;  %v9926_v13 = vcombine.low %v14318_v36, %v14317_v56 }
 0x7bf   :  { %7715 = vmatpush1.bf16.msra.mxu0 %v9902_v8  ;;  %7756 = vmatpush1.bf16.msra.mxu1 %v9966_v63  ;;  %v9990_v8 = vcombine.low %v14320_v41, %v14319_v17  ;;  %v14321_v63 = vld [vmem:[#allocation64_spill] sm:$0xff] }
 0x7c0   :  { %7716 = vmatprep.subr.bf16.mxu0 %v9899_v39  ;;  %7757 = vmatprep.subr.bf16.mxu1 %v9963_v34  ;;  %v14322_v39 = vld [vmem:[#allocation83_spill] sm:$0xff]  ;;  %v14352_v17 = vld [vmem:[#allocation100_spill] sm:$0xff] }
 0x7c1   :  { %v9925_v34 = vcombine.high %v14322_v39, %v14321_v63 }
 0x7c3   :  { %7717 = vmatpush1.bf16.msra.mxu0 %v9898_v23  ;;  %7758 = vmatpush1.bf16.msra.mxu1 %v9962_v52  ;;  %v14323_v23 = vld [vmem:[#allocation97_spill] sm:$0xff] }
 0x7c4   :  { %7718 = vmatprep.subr.bf16.mxu0 %v9895_v60  ;;  %7759 = vmatprep.subr.bf16.mxu1 %v9959_v4  ;;  %v14324_v52 = vld [vmem:[#allocation137_spill] sm:$0xff]  ;;  %v9924_v4 = vcombine.low %v14322_v39, %v14321_v63 }
 0x7c5   :  { %v9989_v60 = vcombine.high %v14324_v52, %v14323_v23 }
 0x7c7   :  { %7719 = vmatpush1.bf16.msra.mxu0 %v9894_v21  ;;  %7760 = vmatpush1.bf16.msra.mxu1 %v9958_v49  ;;  %v9988_v21 = vcombine.low %v14324_v52, %v14323_v23  ;;  %v14325_v49 = vld [vmem:[#allocation125_spill] sm:$0xff]  ;;  %v14356_v23 = vld [vmem:[#allocation92_spill] sm:$0xff] }
 0x7c8   :  { %7720 = vmatprep.subr.bf16.mxu0 %v9955_v51  ;;  %7761 = vmatprep.subr.bf16.mxu1 %v10019_v62  ;;  %v14326_v51 = vld [vmem:[#allocation106_spill] sm:$0xff] }
 0x7c9   :  { %v9921_v62 = vcombine.high %v14326_v51, %v14325_v49 }
 0x7cb   :  { %7721 = vmatpush2.bf16.msra.mxu0 %v9954_v42  ;;  %7762 = vmatpush2.bf16.msra.mxu1 %v10018_v33  ;;  %v14327_v42 = vld [vmem:[#allocation138_spill] sm:$0xff]  ;;  %v14328_v33 = vld [vmem:[#allocation96_spill] sm:$0xff] }
 0x7cc   :  { %7722 = vmatprep.subr.bf16.mxu0 %v9951_v32  ;;  %7763 = vmatprep.subr.bf16.mxu1 %v10015_v9  ;;  %v9985_v32 = vcombine.high %v14328_v33, %v14327_v42  ;;  %v14329_v9 = vld [vmem:[#allocation67_spill] sm:$0xff] }
 0x7cf   :  { %7723 = vmatpush2.bf16.msra.mxu0 %v9950_v48  ;;  %7764 = vmatpush2.bf16.msra.mxu1 %v10014_v11  ;;  %v14330_v48 = vld [vmem:[#allocation56_spill] sm:$0xff]  ;;  %v9920_v11 = vcombine.low %v14326_v51, %v14325_v49 }
 0x7d0   :  { %7724 = vmatprep.subr.bf16.mxu0 %v9947_v55  ;;  %7765 = vmatprep.subr.bf16.mxu1 %v10011_v12  ;;  %v9984_v55 = vcombine.low %v14328_v33, %v14327_v42  ;;  %v14332_v12 = vld [vmem:[#allocation79_spill] sm:$0xff]  ;;  %v14360_v42 = vld [vmem:[#allocation74_spill] sm:$0xff] }
 0x7d3   :  { %7725 = vmatpush2.bf16.msra.mxu0 %v9946_v57  ;;  %7766 = vmatpush2.bf16.msra.mxu1 %v10010_v5  ;;  %v9917_v57 = vcombine.high %v14332_v12, %v14331_v35  ;;  %v14333_v5 = vld [vmem:[#allocation53_spill] sm:$0xff] }
 0x7d4   :  { %7726 = vmatprep.subr.bf16.mxu0 %v9943_v38  ;;  %7767 = vmatprep.subr.bf16.mxu1 %v10007_v22  ;;  %v9981_v2 = vcombine.high %v14334_v46, %v14333_v5  ;;  %v9916_v38 = vcombine.low %v14332_v12, %v14331_v35  ;;  %v9980_v50 = vcombine.low %v14334_v46, %v14333_v5  ;;  %v14336_v22 = vld [vmem:[#allocation104_spill] sm:$0xff]  ;;  %v14364_v5 = vld [vmem:[#allocation90_spill] sm:$0xff] }
 0x7d7   :  { %7727 = vmatpush2.bf16.msra.mxu0 %v9942_v1  ;;  %7768 = vmatpush2.bf16.msra.mxu1 %v10006_v54  ;;  %v9913_v1 = vcombine.high %v14336_v22, %v14335_v58  ;;  %v14337_v54 = vld [vmem:[#allocation95_spill] sm:$0xff] }
 0x7d8   :  { %7728 = vmatprep.subr.bf16.mxu0 %v9939_v47  ;;  %7769 = vmatprep.subr.bf16.mxu1 %v10003_v20  ;;  %v9977_v3 = vcombine.high %v14338_v19, %v14337_v54  ;;  %v14339_v47 = vld [vmem:[#allocation60_spill] sm:$0xff] }
 0x7d9   :  { %v9909_v29 = vcombine.high %v14340_v27, %v14339_v47  ;;  %v14341_v20 = vld [vmem:[#allocation80_spill] sm:$0xff]  ;;  %v9908_v18 = vcombine.low %v14340_v27, %v14339_v47 }
 0x7db   :  { %7729 = vmatpush2.bf16.msra.mxu0 %v9938_v10  ;;  %7770 = vmatpush2.bf16.msra.mxu1 %v10002_v25  ;;  %v14342_v10 = vld [vmem:[#allocation94_spill] sm:$0xff] }
 0x7dc   :  { %7730 = vmatprep.subr.bf16.mxu0 %v9935_v45  ;;  %7771 = vmatprep.subr.bf16.mxu1 %v9999_v28  ;;  %v9973_v25 = vcombine.high %v14342_v10, %v14341_v20  ;;  %v9972_v24 = vcombine.low %v14342_v10, %v14341_v20  ;;  %v14343_v45 = vld [vmem:[#allocation117_spill] sm:$0xff]  ;;  %v14345_v28 = vld [vmem:[#allocation51_spill] sm:$0xff]  ;;  %v14372_v20 = vld [vmem:[#allocation114_spill] sm:$0xff] }
 0x7dd   :  { %v9905_v0 = vcombine.high %v14344_v15, %v14343_v45  ;;  %v9904_v61 = vcombine.low %v14344_v15, %v14343_v45 }
 0x7df   :  { %7731 = vmatpush2.bf16.msra.mxu0 %v9934_v40  ;;  %7772 = vmatpush2.bf16.msra.mxu1 %v9998_v44  ;;  %v14346_v40 = vld [vmem:[#allocation78_spill] sm:$0xff] }
 0x7e0   :  { %7732 = vmatprep.subr.bf16.mxu0 %v9931_v14  ;;  %7773 = vmatprep.subr.bf16.mxu1 %v9995_v30  ;;  %v9969_v44 = vcombine.high %v14346_v40, %v14345_v28  ;;  %v9968_v16 = vcombine.low %v14346_v40, %v14345_v28  ;;  %v14347_v14 = vld [vmem:[#allocation58_spill] sm:$0xff]  ;;  %v14376_v28 = vld [vmem:[#allocation132_spill] sm:$0xff] }
 0x7e1   :  { %v9901_v7 = vcombine.high %v14348_v43, %v14347_v14  ;;  %v14349_v30 = vld [vmem:[#allocation122_spill] sm:$0xff]  ;;  %v9900_v56 = vcombine.low %v14348_v43, %v14347_v14 }
 0x7e3   :  { %7733 = vmatpush2.bf16.msra.mxu0 %v9930_v6  ;;  %7774 = vmatpush2.bf16.msra.mxu1 %v9994_v26  ;;  %v14350_v6 = vld [vmem:[#allocation50_spill] sm:$0xff] }
 0x7e4   :  { %7734 = vmatprep.subr.bf16.mxu0 %v9927_v53  ;;  %7775 = vmatprep.subr.bf16.mxu1 %v9991_v31  ;;  %v9965_v26 = vcombine.high %v14350_v6, %v14349_v30  ;;  %v9964_v36 = vcombine.low %v14350_v6, %v14349_v30  ;;  %v14351_v53 = vld [vmem:[#allocation113_spill] sm:$0xff]  ;;  %v14380_v30 = vld [vmem:[#allocation87_spill] sm:$0xff] }
 0x7e5   :  { %v9897_v41 = vcombine.high %v14352_v17, %v14351_v53  ;;  %v14353_v31 = vld [vmem:[#allocation93_spill] sm:$0xff]  ;;  %v9896_v63 = vcombine.low %v14352_v17, %v14351_v53 }
 0x7e7   :  { %7735 = vmatpush2.bf16.msra.mxu0 %v9926_v13  ;;  %7776 = vmatpush2.bf16.msra.mxu1 %v9990_v8  ;;  %v14354_v13 = vld [vmem:[#allocation120_spill] sm:$0xff] }
 0x7e8   :  { %7786 = vmatprep.subr.bf16.mxu0 %v9925_v34  ;;  %7827 = vmatprep.subr.bf16.mxu1 %v9989_v60  ;;  %v9961_v8 = vcombine.high %v14354_v13, %v14353_v31  ;;  %v9960_v39 = vcombine.low %v14354_v13, %v14353_v31  ;;  %v14355_v34 = vld [vmem:[#allocation76_spill] sm:$0xff]  ;;  %v14357_v60 = vld [vmem:[#allocation130_spill] sm:$0xff]  ;;  %v14384_v31 = vld [vmem:[#allocation129_spill] sm:$0xff] }
 0x7e9   :  { %v9957_v52 = vcombine.high %v14356_v23, %v14355_v34  ;;  %v9956_v49 = vcombine.low %v14356_v23, %v14355_v34 }
 0x7ea   :  { %7737 = vmatmul.mubr.bf16.vlgmr.msra.gmra.mxu0 %v14329_v9  ;;  %7778 = vmatmul.mubr.bf16.vlgmr.msra.gmra.mxu1 %v14330_v48 }
 0x7eb   :  { %7787 = vmatpush1.bf16.msra.mxu0 %v9924_v4  ;;  %7828 = vmatpush1.bf16.msra.mxu1 %v9988_v21  ;;  %v14358_v4 = vld [vmem:[#allocation85_spill] sm:$0xff] }
 0x7ec   :  { %7788 = vmatprep.subr.bf16.mxu0 %v9921_v62  ;;  %7829 = vmatprep.subr.bf16.mxu1 %v9985_v32  ;;  %v10021_v21 = vcombine.high %v14358_v4, %v14357_v60  ;;  %v10020_v51 = vcombine.low %v14358_v4, %v14357_v60  ;;  %v14359_v62 = vld [vmem:[#allocation91_spill] sm:$0xff]  ;;  %v14361_v32 = vld [vmem:[#allocation65_spill] sm:$0xff] }
 0x7ed   :  { %7818 = vmatprep.mubr.bf16.mxu0 %v12950_v37  ;;  %7859 = vmatprep.mubr.bf16.mxu1 %v12952_v59  ;;  %v9912_v37 = vcombine.low %v14336_v22, %v14335_v58  ;;  %v9976_v59 = vcombine.low %v14338_v19, %v14337_v54  ;;  %v9953_v33 = vcombine.high %v14360_v42, %v14359_v62  ;;  %v14368_v54 = vld [vmem:[#allocation72_spill] sm:$0xff] }
 0x7ee   :  { %v9952_v35 = vcombine.low %v14360_v42, %v14359_v62 }
 0x7ef   :  { %7789 = vmatpush1.bf16.msra.mxu0 %v9920_v11  ;;  %7830 = vmatpush1.bf16.msra.mxu1 %v9984_v55  ;;  %v14362_v11 = vld [vmem:[#allocation107_spill] sm:$0xff] }
 0x7f0   :  { %7790 = vmatprep.subr.bf16.mxu0 %v9917_v57  ;;  %7831 = vmatprep.subr.bf16.mxu1 %v9981_v2  ;;  %v10017_v55 = vcombine.high %v14362_v11, %v14361_v32  ;;  %v10016_v12 = vcombine.low %v14362_v11, %v14361_v32  ;;  %v14363_v57 = vld [vmem:[#allocation118_spill] sm:$0xff]  ;;  %v14365_v2 = vld [vmem:[#allocation127_spill] sm:$0xff] }
 0x7f1   :  { %v9949_v46 = vcombine.high %v14364_v5, %v14363_v57  ;;  %v9948_v58 = vcombine.low %v14364_v5, %v14363_v57 }
 0x7f3   :  { %7791 = vmatpush1.bf16.msra.mxu0 %v9916_v38  ;;  %7832 = vmatpush1.bf16.msra.mxu1 %v9980_v50  ;;  %v14366_v38 = vld [vmem:[#allocation81_spill] sm:$0xff] }
 0x7f4   :  { %7792 = vmatprep.subr.bf16.mxu0 %v9913_v1  ;;  %7833 = vmatprep.subr.bf16.mxu1 %v9977_v3  ;;  %v10013_v50 = vcombine.high %v14366_v38, %v14365_v2  ;;  %v10012_v22 = vcombine.low %v14366_v38, %v14365_v2  ;;  %v14367_v1 = vld [vmem:[#allocation134_spill] sm:$0xff]  ;;  %v14369_v3 = vld [vmem:[#allocation105_spill] sm:$0xff] }
 0x7f5   :  { %v9945_v19 = vcombine.high %v14368_v54, %v14367_v1  ;;  %v9944_v47 = vcombine.low %v14368_v54, %v14367_v1  ;;  %v14387_v1 = vld [vmem:[#allocation44_spill] sm:$0xff] }
 0x7f7   :  { %7793 = vmatpush1.bf16.msra.mxu0 %v9912_v37  ;;  %7834 = vmatpush1.bf16.msra.mxu1 %v9976_v59  ;;  %v14370_v37 = vld [vmem:[#allocation77_spill] sm:$0xff] }
 0x7f8   :  { %7794 = vmatprep.subr.bf16.mxu0 %v9909_v29  ;;  %7835 = vmatprep.subr.bf16.mxu1 %v9973_v25  ;;  %v10009_v59 = vcombine.high %v14370_v37, %v14369_v3  ;;  %v10008_v27 = vcombine.low %v14370_v37, %v14369_v3  ;;  %v14371_v29 = vld [vmem:[#allocation89_spill] sm:$0xff]  ;;  %v14373_v25 = vld [vmem:[#allocation103_spill] sm:$0xff] }
 0x7f9   :  { %v9941_v10 = vcombine.high %v14372_v20, %v14371_v29  ;;  %v9940_v45 = vcombine.low %v14372_v20, %v14371_v29 }
 0x7fb   :  { %7795 = vmatpush1.bf16.msra.mxu0 %v9908_v18  ;;  %7836 = vmatpush1.bf16.msra.mxu1 %v9972_v24  ;;  %v14374_v18 = vld [vmem:[#allocation73_spill] sm:$0xff] }
 0x7fc   :  { %7796 = vmatprep.subr.bf16.mxu0 %v9905_v0  ;;  %7837 = vmatprep.subr.bf16.mxu1 %v9969_v44  ;;  %v10005_v24 = vcombine.high %v14374_v18, %v14373_v25  ;;  %v10004_v15 = vcombine.low %v14374_v18, %v14373_v25  ;;  %v14375_v0 = vld [vmem:[#allocation48_spill] sm:$0xff]  ;;  %v14377_v44 = vld [vmem:[#allocation101_spill] sm:$0xff] }
 0x7fd   :  { %v9937_v40 = vcombine.high %v14376_v28, %v14375_v0  ;;  %v9936_v14 = vcombine.low %v14376_v28, %v14375_v0 }
 0x7ff   :  { %7797 = vmatpush1.bf16.msra.mxu0 %v9904_v61  ;;  %7838 = vmatpush1.bf16.msra.mxu1 %v9968_v16  ;;  %v14378_v61 = vld [vmem:[#allocation69_spill] sm:$0xff] }
 0x800   :  { %7798 = vmatprep.subr.bf16.mxu0 %v9901_v7  ;;  %7839 = vmatprep.subr.bf16.mxu1 %v9965_v26  ;;  %v10001_v16 = vcombine.high %v14378_v61, %v14377_v44  ;;  %v10000_v43 = vcombine.low %v14378_v61, %v14377_v44  ;;  %v14379_v7 = vld [vmem:[#allocation68_spill] sm:$0xff]  ;;  %v14381_v26 = vld [vmem:[#allocation99_spill] sm:$0xff] }
 0x801   :  { %v9933_v6 = vcombine.high %v14380_v30, %v14379_v7  ;;  %v9932_v53 = vcombine.low %v14380_v30, %v14379_v7 }
 0x803   :  { %7799 = vmatpush1.bf16.msra.mxu0 %v9900_v56  ;;  %7840 = vmatpush1.bf16.msra.mxu1 %v9964_v36  ;;  %v14382_v56 = vld [vmem:[#allocation109_spill] sm:$0xff] }
 0x804   :  { %7800 = vmatprep.subr.bf16.mxu0 %v9897_v41  ;;  %7841 = vmatprep.subr.bf16.mxu1 %v9961_v8  ;;  %v9997_v36 = vcombine.high %v14382_v56, %v14381_v26  ;;  %v9996_v17 = vcombine.low %v14382_v56, %v14381_v26  ;;  %v14383_v41 = vld [vmem:[#allocation110_spill] sm:$0xff]  ;;  %v14385_v8 = vld [vmem:[#allocation55_spill] sm:$0xff] }
 0x805   :  { %v9929_v13 = vcombine.high %v14384_v31, %v14383_v41  ;;  %v9928_v34 = vcombine.low %v14384_v31, %v14383_v41  ;;  %v14390_v26 = vld [vmem:[#allocation47_spill] sm:$0xff] }
 0x807   :  { %7801 = vmatpush1.bf16.msra.mxu0 %v9896_v63  ;;  %7842 = vmatpush1.bf16.msra.mxu1 %v9960_v39  ;;  %v14386_v63 = vld [vmem:[#allocation136_spill] sm:$0xff] }
 0x808   :  { %7802 = vmatprep.subr.bf16.mxu0 %v9957_v52  ;;  %7843 = vmatprep.subr.bf16.mxu1 %v10021_v21  ;;  %v9993_v39 = vcombine.high %v14386_v63, %v14385_v8  ;;  %v9992_v23 = vcombine.low %v14386_v63, %v14385_v8 }
 0x80b   :  { %7803 = vmatpush2.bf16.msra.mxu0 %v9956_v49  ;;  %7844 = vmatpush2.bf16.msra.mxu1 %v10020_v51 }
 0x80c   :  { %7804 = vmatprep.subr.bf16.mxu0 %v9953_v33  ;;  %7845 = vmatprep.subr.bf16.mxu1 %v10017_v55 }
 0x80f   :  { %7805 = vmatpush2.bf16.msra.mxu0 %v9952_v35  ;;  %7846 = vmatpush2.bf16.msra.mxu1 %v10016_v12 }
 0x810   :  { %7806 = vmatprep.subr.bf16.mxu0 %v9949_v46  ;;  %7847 = vmatprep.subr.bf16.mxu1 %v10013_v50  ;;  %v7868_v50 = vld [vmem:[#allocation9 + $0x10] sm:$0xf] }
 0x811   :  { %v7873_v54 = vrot.slane %v7868_v50, %v14387_v1  ;;  %v7885_v56 = vrot.slane %v7868_v50, %v14390_v26 }
 0x813   :  { %7807 = vmatpush2.bf16.msra.mxu0 %v9948_v58  ;;  %7848 = vmatpush2.bf16.msra.mxu1 %v10012_v22 }
 0x814   :  { %7808 = vmatprep.subr.bf16.mxu0 %v9945_v19  ;;  %7849 = vmatprep.subr.bf16.mxu1 %v10009_v59 }
 0x817   :  { %7809 = vmatpush2.bf16.msra.mxu0 %v9944_v47  ;;  %7850 = vmatpush2.bf16.msra.mxu1 %v10008_v27  ;;  %v14388_v47 = vld [vmem:[#allocation45_spill] sm:$0xff] }
 0x818   :  { %7810 = vmatprep.subr.bf16.mxu0 %v9941_v10  ;;  %7851 = vmatprep.subr.bf16.mxu1 %v10005_v24  ;;  %v7877_v27 = vrot.slane %v7868_v50, %v14388_v47 }
 0x81b   :  { %7811 = vmatpush2.bf16.msra.mxu0 %v9940_v45  ;;  %7852 = vmatpush2.bf16.msra.mxu1 %v10004_v15 }
 0x81c   :  { %7812 = vmatprep.subr.bf16.mxu0 %v9937_v40  ;;  %7853 = vmatprep.subr.bf16.mxu1 %v10001_v16  ;;  %v14389_v16 = vld [vmem:[#allocation46_spill] sm:$0xff] }
 0x81f   :  { %7813 = vmatpush2.bf16.msra.mxu0 %v9936_v14  ;;  %7854 = vmatpush2.bf16.msra.mxu1 %v10000_v43  ;;  %v7881_v14 = vrot.slane %v7868_v50, %v14389_v16 }
 0x820   :  { %7814 = vmatprep.subr.bf16.mxu0 %v9933_v6  ;;  %7855 = vmatprep.subr.bf16.mxu1 %v9997_v36 }
 0x823   :  { %7815 = vmatpush2.bf16.msra.mxu0 %v9932_v53  ;;  %7856 = vmatpush2.bf16.msra.mxu1 %v9996_v17 }
 0x824   :  { %7816 = vmatprep.subr.bf16.mxu0 %v9929_v13  ;;  %7857 = vmatprep.subr.bf16.mxu1 %v9993_v39 }
 0x827   :  { %7817 = vmatpush2.bf16.msra.mxu0 %v9928_v34  ;;  %7858 = vmatpush2.bf16.msra.mxu1 %v9992_v23 }
 0x82a   :  { %v6934_v52 = vpop.f32.mrf.mxu0  ;;  %v6975_v60 = vpop.f32.mrf.mxu1  ;;  %7819 = vmatmul.mubr.bf16.vlgmr.msra.gmra.mxu0 %v14329_v9  ;;  %7860 = vmatmul.mubr.bf16.vlgmr.msra.gmra.mxu1 %v14330_v48 }
 0x82b   :  { %v6976_v4 = vadd.f32 %v6975_v60, %v6934_v52 }
 0x82c   :  { %v6936_v21 = vpop.f32.mrf.mxu0  ;;  %v6977_v49 = vpop.f32.mrf.mxu1 }
 0x82d   :  { %v6978_v51 = vadd.f32 %v6977_v49, %v6936_v21 }
 0x82e   :  { %v6938_v62 = vpop.f32.mrf.mxu0  ;;  %v6979_v42 = vpop.f32.mrf.mxu1 }
 0x830   :  { %v6939_v33 = vpop.f32.mrf.mxu0  ;;  %v6980_v32 = vpop.f32.mrf.mxu1 }
 0x86a   :  { %v7016_v11 = vpop.f32.mrf.mxu0  ;;  %v7057_v55 = vpop.f32.mrf.mxu1 }
 0x86b   :  { %v7058_v35 = vadd.f32 %v7057_v55, %v7016_v11 }
 0x86c   :  { %v7018_v12 = vpop.f32.mrf.mxu0  ;;  %v7059_v57 = vpop.f32.mrf.mxu1 }
 0x86d   :  { %v7060_v5 = vadd.f32 %v7059_v57, %v7018_v12 }
 0x86e   :  { %v7020_v46 = vpop.f32.mrf.mxu0  ;;  %v7061_v2 = vpop.f32.mrf.mxu1 }
 0x870   :  { %v7021_v38 = vpop.f32.mrf.mxu0  ;;  %v7062_v9 = vpop.f32.mrf.mxu1 }
 0x8aa   :  { %v7738_v48 = vpop.f32.mrf.mxu0  ;;  %v7779_v58 = vpop.f32.mrf.mxu1 }
 0x8ab   :  { %v7739_v22 = vadd.f32 %v7738_v48, %v6976_v4 }
 0x8ac   :  { %v7740_v19 = vpop.f32.mrf.mxu0  ;;  %v7781_v3 = vpop.f32.mrf.mxu1 }
 0x8ad   :  { %v7780_v37 = vadd.f32 %v7779_v58, %v7739_v22  ;;  %v7741_v59 = vadd.f32 %v7740_v19, %v6978_v51 }
 0x8ae   :  { %v7742_v29 = vpop.f32.mrf.mxu0  ;;  %v7783_v20 = vpop.f32.mrf.mxu1 }
 0x8af   :  { %v7890_v10 = vadd.f32 %v7873_v54, %v7780_v37  ;;  %v7782_v25 = vadd.f32 %v7781_v3, %v7741_v59 }
 0x8b0   :  { %v7743_v18 = vpop.f32.mrf.mxu0  ;;  %v7784_v24 = vpop.f32.mrf.mxu1 }
 0x8b1   :  { %v7891_v45 = vadd.f32 %v7877_v27, %v7782_v25  ;;  %v7894_v15 = vmax.f32 %v7890_v10, 0.0 }
 0x8b3   :  { %v7895_v0 = vmax.f32 %v7891_v45, 0.0 }
 0x8b5   :  { %v13506_v28 = vcombine.low %v7894_v15, %v7895_v0 }
 0x8ea   :  { %v7820_v40 = vpop.f32.mrf.mxu0  ;;  %v7861_v44 = vpop.f32.mrf.mxu1 }
 0x8eb   :  { %v7821_v61 = vadd.f32 %v7820_v40, %v7058_v35 }
 0x8ec   :  { %v7822_v43 = vpop.f32.mrf.mxu0  ;;  %v7863_v7 = vpop.f32.mrf.mxu1 }
 0x8ed   :  { %v7862_v30 = vadd.f32 %v7861_v44, %v7821_v61  ;;  %v7823_v6 = vadd.f32 %v7822_v43, %v7060_v5 }
 0x8ee   :  { %v7824_v36 = vpop.f32.mrf.mxu0  ;;  %v7865_v53 = vpop.f32.mrf.mxu1 }
 0x8ef   :  { %v7892_v17 = vadd.f32 %v7881_v14, %v7862_v30  ;;  %v7864_v41 = vadd.f32 %v7863_v7, %v7823_v6 }
 0x8f0   :  { %v7825_v31 = vpop.f32.mrf.mxu0  ;;  %v7866_v13 = vpop.f32.mrf.mxu1 }
 0x8f1   :  { %v7893_v8 = vadd.f32 %v7885_v56, %v7864_v41  ;;  %v7896_v63 = vmax.f32 %v7892_v17, 0.0 }
 0x8f3   :  { %v7897_v39 = vmax.f32 %v7893_v8, 0.0 }
 0x8f5   :  { %v13510_v34 = vcombine.low %v7896_v63, %v7897_v39 }
 0x8f6   :  { %11624 = dma.done.wait [#allocation5], 16384 }
 0x8f7   :  { %11625 = vsyncadd [#allocation5], 4294950912  ;;  %v10160_v23 = vcombine.low %v7895_v0, %v7895_v0  ;;  %v10161_v52 = vcombine.low %v7897_v39, %v7897_v39  ;;  %v11132_v21 = vld [vmem:[#allocation4 + $0xe4] ss:$16 sps:$4 sm:$0xff]   ;;  %v11136_v51 = vld [vmem:[#allocation4 + $0xe0] ss:$16 sps:$4 sm:$0xff]  }
 0x8f8   :  { %v11134_v49 = vld [vmem:[#allocation4 + $0x2e4] ss:$16 sps:$4 sm:$0xff]   ;;  %8712 = vmatprep.subr.bf16.mxu0 %v11132_v21  ;;  %v11137_v62 = vld [vmem:[#allocation4 + $0x2e0] ss:$16 sps:$4 sm:$0xff]   ;;  %vm8889_vm1 = vcmask 1043456   ;;  %vm8966_vm2 = vcmask 834564  }
 0x8f9   :  { %v13512_v60 = vpack.c.bf16 %v10160_v23, %v10160_v23  ;;  %v13514_v4 = vpack.c.bf16 %v10161_v52, %v10161_v52  ;;  %8753 = vmatprep.subr.bf16.mxu1 %v11134_v49  ;;  %v11138_v42 = vld [vmem:[#allocation4 + $0xc4] ss:$16 sps:$4 sm:$0xff]   ;;  %8713 = vmatpush1.bf16.msra.mxu0 %v11136_v51  ;;  %v11142_v32 = vld [vmem:[#allocation4 + $0xc0] ss:$16 sps:$4 sm:$0xff]   ;;  %s11633_s1 = smov [#allocation11]   ;;  %vm8967_vm3 = vmor %vm8966_vm2, %vm8889_vm1 }
 0x8fa   :  { %8754 = vmatpush1.bf16.msra.mxu1 %v11137_v62  ;;  %v11140_v33 = vld [vmem:[#allocation4 + $0x2c4] ss:$16 sps:$4 sm:$0xff]   ;;  %8714 = vmatprep.subr.bf16.mxu0 %v11138_v42  ;;  %v11143_v11 = vld [vmem:[#allocation4 + $0x2c0] ss:$16 sps:$4 sm:$0xff]   ;;  %s8975_s23 = sshll.u32 %s11633_s1, 4  ;;  %s8976_s23 = int_to_ptr.vmem [resolvable:$true] %s8975_s23 }
 0x8fb   :  { %8744 = vmatprep.mubr.bf16.mxu0 %v13512_v60  ;;  %8785 = vmatprep.mubr.bf16.mxu1 %v13514_v4  ;;  %v11144_v55 = vld [vmem:[#allocation4 + $0xa4] ss:$16 sps:$4 sm:$0xff]   ;;  %v11148_v12 = vld [vmem:[#allocation4 + $0xa0] ss:$16 sps:$4 sm:$0xff]   ;;  %s11584_s2 = scalar_lea.vmem %s8976_s23, 128  ;;  %p11589_p7 = scmp.lt.s32.totalorder %s8976_s23, %s8976_s23 }
 0x8fc   :  { %8755 = vmatprep.subr.bf16.mxu1 %v11140_v33  ;;  %v11146_v35 = vld [vmem:[#allocation4 + $0x2a4] ss:$16 sps:$4 sm:$0xff]   ;;  %v11149_v57 = vld [vmem:[#allocation4 + $0x2a0] ss:$16 sps:$4 sm:$0xff]   ;;  %p11585_p6 = scmp.ne.s32.totalorder %s8976_s23, %s11584_s2  ;;  %p11590_p8 = scmp.lt.s32.totalorder %s11584_s2, %s11584_s2 }
 0x8fd   :  { %8715 = vmatpush1.bf16.msra.mxu0 %v11142_v32  ;;  %v11150_v5 = vld [vmem:[#allocation4 + $0x84] ss:$16 sps:$4 sm:$0xff]   ;;  %v11154_v2 = vld [vmem:[#allocation4 + $0x80] ss:$16 sps:$4 sm:$0xff]   ;;  %v13520_v32 = vpack.c.bf16 %v13506_v28, %v13506_v28 }
 0x8fe   :  { %8756 = vmatpush1.bf16.msra.mxu1 %v11143_v11  ;;  %8716 = vmatprep.subr.bf16.mxu0 %v11144_v55  ;;  %v11152_v46 = vld [vmem:[#allocation4 + $0x284] ss:$16 sps:$4 sm:$0xff]   ;;  %v11155_v38 = vld [vmem:[#allocation4 + $0x280] ss:$16 sps:$4 sm:$0xff]   ;;  %v13524_v11 = vpack.c.bf16 %v13510_v34, %v13510_v34  ;;  %p11591_p9 = por %p11590_p8, %p11589_p7 }
 0x8ff   :  { %8757 = vmatprep.subr.bf16.mxu1 %v11146_v35  ;;  %v11156_v9 = vld [vmem:[#allocation4 + $0x64] ss:$16 sps:$4 sm:$0xff]   ;;  %v11160_v48 = vld [vmem:[#allocation4 + $0x60] ss:$16 sps:$4 sm:$0xff]   ;;  %v14391_v35 = vlaneseq }
 0x900   :  { %v11158_v50 = vld [vmem:[#allocation4 + $0x264] ss:$16 sps:$4 sm:$0xff]   ;;  %v11161_v58 = vld [vmem:[#allocation4 + $0x260] ss:$16 sps:$4 sm:$0xff]   ;;  %p11592_p10 = pnand %p11591_p9, %p11585_p6 }
 0x901   :  { %8717 = vmatpush1.bf16.msra.mxu0 %v11148_v12  ;;  %v11162_v22 = vld [vmem:[#allocation4 + $0x44] ss:$16 sps:$4 sm:$0xff]   ;;  %v11166_v19 = vld [vmem:[#allocation4 + $0x40] ss:$16 sps:$4 sm:$0xff]   ;;  %v8877_v12 = vand.u32 127, %v14391_v35 }
 0x902   :  { %8758 = vmatpush1.bf16.msra.mxu1 %v11149_v57  ;;  %8718 = vmatprep.subr.bf16.mxu0 %v11150_v5  ;;  %v11164_v54 = vld [vmem:[#allocation4 + $0x244] ss:$16 sps:$4 sm:$0xff]   ;;  %v11167_v3 = vld [vmem:[#allocation4 + $0x240] ss:$16 sps:$4 sm:$0xff]   ;;  %v11258_v35 = vld [vmem:[#allocation4 + $0x48] ss:$16 sps:$4 sm:$0xff]  }
 0x903   :  { %8759 = vmatprep.subr.bf16.mxu1 %v11152_v46  ;;  %v11168_v37 = vld [vmem:[#allocation4 + $0x24] ss:$16 sps:$4 sm:$0xff]   ;;  %v11172_v27 = vld [vmem:[#allocation4 + $0x20] ss:$16 sps:$4 sm:$0xff]   ;;  %v13533_v46 = vadd.s32 128, %v8877_v12 }
 0x904   :  { %v11170_v59 = vld [vmem:[#allocation4 + $0x224] ss:$16 sps:$4 sm:$0xff]   ;;  %v11173_v29 = vld [vmem:[#allocation4 + $0x220] ss:$16 sps:$4 sm:$0xff]   ;;  %v11261_v12 = vld [vmem:[#allocation4 + $0x248] ss:$16 sps:$4 sm:$0xff]  }
 0x905   :  { %8719 = vmatpush1.bf16.msra.mxu0 %v11154_v2  ;;  %v11174_v20 = vld [vmem:[#allocation4 + $0x4] ss:$16 sps:$4 sm:$0xff]   ;;  %v11178_v25 = vld [vmem:[#allocation4] ss:$16 sps:$4 sm:$0xff]   ;;  %vm8882_vm0 = vcmp.ge.s32.totalorder %v13533_v46, 230 }
 0x906   :  { %8760 = vmatpush1.bf16.msra.mxu1 %v11155_v38  ;;  %8720 = vmatprep.subr.bf16.mxu0 %v11156_v9  ;;  %v11176_v10 = vld [vmem:[#allocation4 + $0x204] ss:$16 sps:$4 sm:$0xff]   ;;  %v11179_v18 = vld [vmem:[#allocation4 + $0x200] ss:$16 sps:$4 sm:$0xff]  }
 0x907   :  { %8761 = vmatprep.subr.bf16.mxu1 %v11158_v50  ;;  %v11180_v24 = vld [vmem:[#allocation4 + $0x1e4] ss:$16 sps:$4 sm:$0xff]   ;;  %v11184_v15 = vld [vmem:[#allocation4 + $0x1e0] ss:$16 sps:$4 sm:$0xff]  }
 0x908   :  { %v11182_v45 = vld [vmem:[#allocation4 + $0x3e4] ss:$16 sps:$4 sm:$0xff]   ;;  %v11185_v0 = vld [vmem:[#allocation4 + $0x3e0] ss:$16 sps:$4 sm:$0xff]  }
 0x909   :  { %8721 = vmatpush1.bf16.msra.mxu0 %v11160_v48  ;;  %v11186_v40 = vld [vmem:[#allocation4 + $0x1c4] ss:$16 sps:$4 sm:$0xff]   ;;  %v11190_v61 = vld [vmem:[#allocation4 + $0x1c0] ss:$16 sps:$4 sm:$0xff]  }
 0x90a   :  { %8762 = vmatpush1.bf16.msra.mxu1 %v11161_v58  ;;  %8722 = vmatprep.subr.bf16.mxu0 %v11162_v22  ;;  %v11188_v44 = vld [vmem:[#allocation4 + $0x3c4] ss:$16 sps:$4 sm:$0xff]   ;;  %v11191_v16 = vld [vmem:[#allocation4 + $0x3c0] ss:$16 sps:$4 sm:$0xff]  }
 0x90b   :  { %8763 = vmatprep.subr.bf16.mxu1 %v11164_v54  ;;  %v11192_v14 = vld [vmem:[#allocation4 + $0x1a4] ss:$16 sps:$4 sm:$0xff]   ;;  %v11196_v7 = vld [vmem:[#allocation4 + $0x1a0] ss:$16 sps:$4 sm:$0xff]  }
 0x90c   :  { %v11194_v43 = vld [vmem:[#allocation4 + $0x3a4] ss:$16 sps:$4 sm:$0xff]   ;;  %v11197_v30 = vld [vmem:[#allocation4 + $0x3a0] ss:$16 sps:$4 sm:$0xff]  }
 0x90d   :  { %8723 = vmatpush1.bf16.msra.mxu0 %v11166_v19  ;;  %v11198_v6 = vld [vmem:[#allocation4 + $0x184] ss:$16 sps:$4 sm:$0xff]   ;;  %v11202_v56 = vld [vmem:[#allocation4 + $0x180] ss:$16 sps:$4 sm:$0xff]  }
 0x90e   :  { %8764 = vmatpush1.bf16.msra.mxu1 %v11167_v3  ;;  %8724 = vmatprep.subr.bf16.mxu0 %v11168_v37  ;;  %v11200_v26 = vld [vmem:[#allocation4 + $0x384] ss:$16 sps:$4 sm:$0xff]   ;;  %v11203_v36 = vld [vmem:[#allocation4 + $0x380] ss:$16 sps:$4 sm:$0xff]   ;;  %v11632_v3 = vmov -inf  }
 0x90f   :  { %8765 = vmatprep.subr.bf16.mxu1 %v11170_v59  ;;  %v11204_v53 = vld [vmem:[#allocation4 + $0x164] ss:$16 sps:$4 sm:$0xff]   ;;  %v11208_v41 = vld [vmem:[#allocation4 + $0x160] ss:$16 sps:$4 sm:$0xff]   ;;  %v13541_v37 = vsel %vm8889_vm1, -1e+30, %v11632_v3 }
 0x910   :  { %v11206_v17 = vld [vmem:[#allocation4 + $0x364] ss:$16 sps:$4 sm:$0xff]   ;;  %v11209_v31 = vld [vmem:[#allocation4 + $0x360] ss:$16 sps:$4 sm:$0xff]   ;;  %v11293_v3 = vld [vmem:[#allocation4 + $0x3ac] ss:$16 sps:$4 sm:$0xff]  }
 0x911   :  { %8725 = vmatpush1.bf16.msra.mxu0 %v11172_v27  ;;  %v11210_v13 = vld [vmem:[#allocation4 + $0x144] ss:$16 sps:$4 sm:$0xff]   ;;  %v11214_v63 = vld [vmem:[#allocation4 + $0x140] ss:$16 sps:$4 sm:$0xff]  }
 0x912   :  { %8766 = vmatpush1.bf16.msra.mxu1 %v11173_v29  ;;  %8726 = vmatprep.subr.bf16.mxu0 %v11174_v20  ;;  %v11212_v8 = vld [vmem:[#allocation4 + $0x344] ss:$16 sps:$4 sm:$0xff]   ;;  %v11215_v39 = vld [vmem:[#allocation4 + $0x340] ss:$16 sps:$4 sm:$0xff]  }
 0x913   :  { %8767 = vmatprep.subr.bf16.mxu1 %v11176_v10  ;;  %v11216_v23 = vld [vmem:[#allocation4 + $0x124] ss:$16 sps:$4 sm:$0xff]   ;;  %v11220_v21 = vld [vmem:[#allocation4 + $0x120] ss:$16 sps:$4 sm:$0xff]  }
 0x914   :  { %v11218_v52 = vld [vmem:[#allocation4 + $0x324] ss:$16 sps:$4 sm:$0xff]   ;;  %v11221_v49 = vld [vmem:[#allocation4 + $0x320] ss:$16 sps:$4 sm:$0xff]  }
 0x915   :  { %8727 = vmatpush1.bf16.msra.mxu0 %v11178_v25  ;;  %v11222_v51 = vld [vmem:[#allocation4 + $0x104] ss:$16 sps:$4 sm:$0xff]   ;;  %v11226_v42 = vld [vmem:[#allocation4 + $0x100] ss:$16 sps:$4 sm:$0xff]  }
 0x916   :  { %8768 = vmatpush1.bf16.msra.mxu1 %v11179_v18  ;;  %8728 = vmatprep.subr.bf16.mxu0 %v11180_v24  ;;  %v11224_v62 = vld [vmem:[#allocation4 + $0x304] ss:$16 sps:$4 sm:$0xff]   ;;  %v11227_v33 = vld [vmem:[#allocation4 + $0x300] ss:$16 sps:$4 sm:$0xff]  }
 0x917   :  { %8769 = vmatprep.subr.bf16.mxu1 %v11182_v45  ;;  %v8050_v55 = vld [vmem:[#allocation9 + $0x14] sm:$0xf] }
 0x918   :  { %v8055_v28 = vrot.slane %v8050_v55, %v14387_v1  ;;  %v8059_v57 = vrot.slane %v8050_v55, %v14388_v47  ;;  %v11263_v55 = vld [vmem:[#allocation4 + $0x24c] ss:$16 sps:$4 sm:$0xff]  }
 0x919   :  { %8729 = vmatpush2.bf16.msra.mxu0 %v11184_v15 }
 0x91a   :  { %8770 = vmatpush2.bf16.msra.mxu1 %v11185_v0  ;;  %8730 = vmatprep.subr.bf16.mxu0 %v11186_v40 }
 0x91b   :  { %8771 = vmatprep.subr.bf16.mxu1 %v11188_v44 }
 0x91d   :  { %8731 = vmatpush2.bf16.msra.mxu0 %v11190_v61 }
 0x91e   :  { %8772 = vmatpush2.bf16.msra.mxu1 %v11191_v16  ;;  %8732 = vmatprep.subr.bf16.mxu0 %v11192_v14 }
 0x91f   :  { %8773 = vmatprep.subr.bf16.mxu1 %v11194_v43 }
 0x921   :  { %8733 = vmatpush2.bf16.msra.mxu0 %v11196_v7 }
 0x922   :  { %8774 = vmatpush2.bf16.msra.mxu1 %v11197_v30  ;;  %8734 = vmatprep.subr.bf16.mxu0 %v11198_v6  ;;  %v11228_v30 = vld [vmem:[#allocation4 + $0xe8] ss:$16 sps:$4 sm:$0xff]   ;;  %v11230_v6 = vld [vmem:[#allocation4 + $0xec] ss:$16 sps:$4 sm:$0xff]  }
 0x923   :  { %8775 = vmatprep.subr.bf16.mxu1 %v11200_v26  ;;  %v11231_v26 = vld [vmem:[#allocation4 + $0x2e8] ss:$16 sps:$4 sm:$0xff]  }
 0x925   :  { %8735 = vmatpush2.bf16.msra.mxu0 %v11202_v56  ;;  %v11233_v56 = vld [vmem:[#allocation4 + $0x2ec] ss:$16 sps:$4 sm:$0xff]  }
 0x926   :  { %8776 = vmatpush2.bf16.msra.mxu1 %v11203_v36  ;;  %8736 = vmatprep.subr.bf16.mxu0 %v11204_v53  ;;  %v11236_v36 = vld [vmem:[#allocation4 + $0xcc] ss:$16 sps:$4 sm:$0xff]  }
 0x927   :  { %8777 = vmatprep.subr.bf16.mxu1 %v11206_v17  ;;  %v11239_v53 = vld [vmem:[#allocation4 + $0x2cc] ss:$16 sps:$4 sm:$0xff]   ;;  %v11234_v17 = vld [vmem:[#allocation4 + $0xc8] ss:$16 sps:$4 sm:$0xff]  }
 0x929   :  { %8737 = vmatpush2.bf16.msra.mxu0 %v11208_v41  ;;  %v11237_v41 = vld [vmem:[#allocation4 + $0x2c8] ss:$16 sps:$4 sm:$0xff]  }
 0x92a   :  { %8778 = vmatpush2.bf16.msra.mxu1 %v11209_v31  ;;  %8738 = vmatprep.subr.bf16.mxu0 %v11210_v13  ;;  %v11242_v31 = vld [vmem:[#allocation4 + $0xac] ss:$16 sps:$4 sm:$0xff]  }
 0x92b   :  { %8779 = vmatprep.subr.bf16.mxu1 %v11212_v8  ;;  %v11245_v13 = vld [vmem:[#allocation4 + $0x2ac] ss:$16 sps:$4 sm:$0xff]   ;;  %v11240_v8 = vld [vmem:[#allocation4 + $0xa8] ss:$16 sps:$4 sm:$0xff]  }
 0x92d   :  { %8739 = vmatpush2.bf16.msra.mxu0 %v11214_v63  ;;  %v11243_v63 = vld [vmem:[#allocation4 + $0x2a8] ss:$16 sps:$4 sm:$0xff]  }
 0x92e   :  { %8780 = vmatpush2.bf16.msra.mxu1 %v11215_v39  ;;  %8740 = vmatprep.subr.bf16.mxu0 %v11216_v23  ;;  %v11248_v39 = vld [vmem:[#allocation4 + $0x8c] ss:$16 sps:$4 sm:$0xff]  }
 0x92f   :  { %8781 = vmatprep.subr.bf16.mxu1 %v11218_v52  ;;  %v11251_v23 = vld [vmem:[#allocation4 + $0x28c] ss:$16 sps:$4 sm:$0xff]   ;;  %v11246_v52 = vld [vmem:[#allocation4 + $0x88] ss:$16 sps:$4 sm:$0xff]  }
 0x931   :  { %8741 = vmatpush2.bf16.msra.mxu0 %v11220_v21  ;;  %v11249_v21 = vld [vmem:[#allocation4 + $0x288] ss:$16 sps:$4 sm:$0xff]  }
 0x932   :  { %8782 = vmatpush2.bf16.msra.mxu1 %v11221_v49  ;;  %8742 = vmatprep.subr.bf16.mxu0 %v11222_v51  ;;  %v11254_v49 = vld [vmem:[#allocation4 + $0x6c] ss:$16 sps:$4 sm:$0xff]  }
 0x933   :  { %8783 = vmatprep.subr.bf16.mxu1 %v11224_v62  ;;  %v11257_v51 = vld [vmem:[#allocation4 + $0x26c] ss:$16 sps:$4 sm:$0xff]   ;;  %v11252_v62 = vld [vmem:[#allocation4 + $0x68] ss:$16 sps:$4 sm:$0xff]  }
 0x935   :  { %8743 = vmatpush2.bf16.msra.mxu0 %v11226_v42  ;;  %v11255_v42 = vld [vmem:[#allocation4 + $0x268] ss:$16 sps:$4 sm:$0xff]  }
 0x936   :  { %8784 = vmatpush2.bf16.msra.mxu1 %v11227_v33  ;;  %8794 = vmatprep.subr.bf16.mxu0 %v11230_v6  ;;  %v11260_v33 = vld [vmem:[#allocation4 + $0x4c] ss:$16 sps:$4 sm:$0xff]   ;;  %v11315_v6 = vld [vmem:[#allocation4 + $0x328] ss:$16 sps:$4 sm:$0xff]  }
 0x937   :  { %8835 = vmatprep.subr.bf16.mxu1 %v11233_v56  ;;  %v11323_v56 = vld [vmem:[#allocation4 + $0x30c] ss:$16 sps:$4 sm:$0xff]  }
 0x938   :  { %8745 = vmatmul.mubr.bf16.vlgmr.msra.gmra.mxu0 %v13520_v32 }
 0x939   :  { %8786 = vmatmul.mubr.bf16.vlgmr.msra.gmra.mxu1 %v13524_v11  ;;  %8826 = vmatprep.mubr.bf16.mxu0 %v13512_v60 }
 0x93a   :  { %8867 = vmatprep.mubr.bf16.mxu1 %v13514_v4  ;;  %8795 = vmatpush1.bf16.msra.mxu0 %v11228_v30  ;;  %v11312_v30 = vld [vmem:[#allocation4 + $0x128] ss:$16 sps:$4 sm:$0xff]  }
 0x93b   :  { %8836 = vmatpush1.bf16.msra.mxu1 %v11231_v26  ;;  %8796 = vmatprep.subr.bf16.mxu0 %v11236_v36  ;;  %v11320_v26 = vld [vmem:[#allocation4 + $0x10c] ss:$16 sps:$4 sm:$0xff]   ;;  %v11318_v36 = vld [vmem:[#allocation4 + $0x108] ss:$16 sps:$4 sm:$0xff]  }
 0x93c   :  { %8837 = vmatprep.subr.bf16.mxu1 %v11239_v53  ;;  %v11321_v53 = vld [vmem:[#allocation4 + $0x308] ss:$16 sps:$4 sm:$0xff]  }
 0x93e   :  { %8797 = vmatpush1.bf16.msra.mxu0 %v11234_v17 }
 0x93f   :  { %8838 = vmatpush1.bf16.msra.mxu1 %v11237_v41  ;;  %8798 = vmatprep.subr.bf16.mxu0 %v11242_v31 }
 0x940   :  { %8839 = vmatprep.subr.bf16.mxu1 %v11245_v13 }
 0x942   :  { %8799 = vmatpush1.bf16.msra.mxu0 %v11240_v8 }
 0x943   :  { %8840 = vmatpush1.bf16.msra.mxu1 %v11243_v63  ;;  %8800 = vmatprep.subr.bf16.mxu0 %v11248_v39 }
 0x944   :  { %8841 = vmatprep.subr.bf16.mxu1 %v11251_v23 }
 0x946   :  { %8801 = vmatpush1.bf16.msra.mxu0 %v11246_v52 }
 0x947   :  { %8842 = vmatpush1.bf16.msra.mxu1 %v11249_v21  ;;  %8802 = vmatprep.subr.bf16.mxu0 %v11254_v49 }
 0x948   :  { %8843 = vmatprep.subr.bf16.mxu1 %v11257_v51 }
 0x94a   :  { %8803 = vmatpush1.bf16.msra.mxu0 %v11252_v62 }
 0x94b   :  { %8844 = vmatpush1.bf16.msra.mxu1 %v11255_v42  ;;  %8804 = vmatprep.subr.bf16.mxu0 %v11260_v33 }
 0x94c   :  { %8845 = vmatprep.subr.bf16.mxu1 %v11263_v55 }
 0x94e   :  { %8805 = vmatpush1.bf16.msra.mxu0 %v11258_v35 }
 0x94f   :  { %8846 = vmatpush1.bf16.msra.mxu1 %v11261_v12 }
 0x9f8   :  { %v8746_v5 = vpop.f32.mrf.mxu0 }
 0x9f9   :  { %v8787_v34 = vpop.f32.mrf.mxu1  ;;  %v8747_v2 = vadd.f32 %v8746_v5, %v8055_v28  ;;  %v11266_v28 = vld [vmem:[#allocation4 + $0x2c] ss:$16 sps:$4 sm:$0xff]   ;;  %v11264_v5 = vld [vmem:[#allocation4 + $0x28] ss:$16 sps:$4 sm:$0xff]  }
 0x9fa   :  { %v8748_v38 = vpop.f32.mrf.mxu0  ;;  %8806 = vmatprep.subr.bf16.mxu0 %v11266_v28 }
 0x9fb   :  { %v8789_v9 = vpop.f32.mrf.mxu1  ;;  %v8749_v50 = vadd.f32 %v8748_v38, %v8059_v57  ;;  %v8788_v48 = vadd.f32 %v8787_v34, %v8747_v2  ;;  %v11269_v57 = vld [vmem:[#allocation4 + $0x22c] ss:$16 sps:$4 sm:$0xff]   ;;  %v11267_v34 = vld [vmem:[#allocation4 + $0x228] ss:$16 sps:$4 sm:$0xff]   ;;  %8807 = vmatpush1.bf16.msra.mxu0 %v11264_v5 }
 0x9fc   :  { %v8750_v60 = vpop.f32.mrf.mxu0  ;;  %v11272_v2 = vld [vmem:[#allocation4 + $0xc] ss:$16 sps:$4 sm:$0xff]   ;;  %8847 = vmatprep.subr.bf16.mxu1 %v11269_v57 }
 0x9fd   :  { %v8791_v4 = vpop.f32.mrf.mxu1  ;;  %v8790_v58 = vadd.f32 %v8789_v9, %v8749_v50  ;;  %v8890_v47 = vsel %vm8889_vm1, %v8788_v48, -inf  ;;  %v11275_v38 = vld [vmem:[#allocation4 + $0x20c] ss:$16 sps:$4 sm:$0xff]   ;;  %v11270_v9 = vld [vmem:[#allocation4 + $0x8] ss:$16 sps:$4 sm:$0xff]   ;;  %8848 = vmatpush1.bf16.msra.mxu1 %v11267_v34  ;;  %8808 = vmatprep.subr.bf16.mxu0 %v11272_v2 }
 0x9fe   :  { %v8751_v22 = vpop.f32.mrf.mxu0  ;;  %v11273_v50 = vld [vmem:[#allocation4 + $0x208] ss:$16 sps:$4 sm:$0xff]   ;;  %8849 = vmatprep.subr.bf16.mxu1 %v11275_v38  ;;  %v11281_v60 = vld [vmem:[#allocation4 + $0x3ec] ss:$16 sps:$4 sm:$0xff]  }
 0x9ff   :  { %v8792_v54 = vpop.f32.mrf.mxu1  ;;  %v8886_v1 = vsel %vm8882_vm0, -1e+30, %v8790_v58  ;;  %8809 = vmatpush1.bf16.msra.mxu0 %v11270_v9  ;;  %v11276_v4 = vld [vmem:[#allocation4 + $0x1e8] ss:$16 sps:$4 sm:$0xff]   ;;  %v11284_v22 = vld [vmem:[#allocation4 + $0x1cc] ss:$16 sps:$4 sm:$0xff]  }
 0xa00   :  { %v8891_v19 = vsel %vm8889_vm1, %v8886_v1, -inf  ;;  %v11279_v58 = vld [vmem:[#allocation4 + $0x3e8] ss:$16 sps:$4 sm:$0xff]   ;;  %v11287_v54 = vld [vmem:[#allocation4 + $0x3cc] ss:$16 sps:$4 sm:$0xff]  }
 0xa01   :  { %v8894_v59 = vmax.f32 %v8890_v47, %v8891_v19  ;;  %8850 = vmatpush1.bf16.msra.mxu1 %v11273_v50  ;;  %v11285_v47 = vld [vmem:[#allocation4 + $0x3c8] ss:$16 sps:$4 sm:$0xff]   ;;  %v11290_v19 = vld [vmem:[#allocation4 + $0x1ac] ss:$16 sps:$4 sm:$0xff]  }
 0xa02   :  { %8851 = vmatprep.subr.bf16.mxu1 %v11281_v60 }
 0xa03   :  { %v8896_v27 = vmax.f32 %v8894_v59, %v13541_v37  ;;  %v11288_v59 = vld [vmem:[#allocation4 + $0x1a8] ss:$16 sps:$4 sm:$0xff]  }
 0xa05   :  { %8897 = vmax.xlane.f32.xlu0 %v8896_v27  ;;  %8852 = vmatpush2.bf16.msra.mxu1 %v11279_v58  ;;  %v11291_v27 = vld [vmem:[#allocation4 + $0x3a8] ss:$16 sps:$4 sm:$0xff]  }
 0xa06   :  { %8853 = vmatprep.subr.bf16.mxu1 %v11287_v54 }
 0xa09   :  { %8854 = vmatpush2.bf16.msra.mxu1 %v11285_v47 }
 0xa0a   :  { %8855 = vmatprep.subr.bf16.mxu1 %v11293_v3 }
 0xa0d   :  { %8856 = vmatpush2.bf16.msra.mxu1 %v11291_v27 }
 0xa8e   :  { %v8898_v29 = vpop.xlane.xlu0 %8897 }
 0xa8f   :  { %v8899_v20 = vsub.f32 %v8788_v48, %v8898_v29  ;;  %v8900_v10 = vsub.f32 %v8886_v1, %v8898_v29  ;;  %v8901_v25 = vsub.f32 -1e+30, %v8898_v29  ;;  %v11278_v48 = vld [vmem:[#allocation4 + $0x1ec] ss:$16 sps:$4 sm:$0xff]   ;;  %v11282_v1 = vld [vmem:[#allocation4 + $0x1c8] ss:$16 sps:$4 sm:$0xff]  }
 0xa90   :  { %8810 = vmatprep.subr.bf16.mxu0 %v11278_v48  ;;  %v11296_v29 = vld [vmem:[#allocation4 + $0x18c] ss:$16 sps:$4 sm:$0xff]  }
 0xa91   :  { %v8903_v18 = vmul.f32 1.442695, %v8899_v20  ;;  %v8905_v24 = vmul.f32 1.442695, %v8900_v10  ;;  %v8907_v45 = vmul.f32 1.442695, %v8901_v25  ;;  %8811 = vmatpush2.bf16.msra.mxu0 %v11276_v4 }
 0xa92   :  { %8812 = vmatprep.subr.bf16.mxu0 %v11284_v22  ;;  %v11299_v20 = vld [vmem:[#allocation4 + $0x38c] ss:$16 sps:$4 sm:$0xff]   ;;  %v11294_v10 = vld [vmem:[#allocation4 + $0x188] ss:$16 sps:$4 sm:$0xff]  }
 0xa93   :  { %11324 = vpow2.f32 %v8903_v18  ;;  %v11297_v25 = vld [vmem:[#allocation4 + $0x388] ss:$16 sps:$4 sm:$0xff]   ;;  %v11302_v18 = vld [vmem:[#allocation4 + $0x16c] ss:$16 sps:$4 sm:$0xff]   ;;  %8857 = vmatprep.subr.bf16.mxu1 %v11299_v20 }
 0xa94   :  { %11326 = vpow2.f32 %v8905_v24  ;;  %v11305_v24 = vld [vmem:[#allocation4 + $0x36c] ss:$16 sps:$4 sm:$0xff]   ;;  %8858 = vmatpush2.bf16.msra.mxu1 %v11297_v25 }
 0xa95   :  { %11328 = vpow2.f32 %v8907_v45  ;;  %8813 = vmatpush2.bf16.msra.mxu0 %v11282_v1  ;;  %v11300_v45 = vld [vmem:[#allocation4 + $0x168] ss:$16 sps:$4 sm:$0xff]   ;;  %8859 = vmatprep.subr.bf16.mxu1 %v11305_v24 }
 0xa96   :  { %8814 = vmatprep.subr.bf16.mxu0 %v11290_v19 }
 0xa99   :  { %8815 = vmatpush2.bf16.msra.mxu0 %v11288_v59 }
 0xa9a   :  { %8816 = vmatprep.subr.bf16.mxu0 %v11296_v29 }
 0xa9d   :  { %8817 = vmatpush2.bf16.msra.mxu0 %v11294_v10 }
 0xa9e   :  { %8818 = vmatprep.subr.bf16.mxu0 %v11302_v18 }
 0xaa0   :  { %v13544_v15 = vpop.eup %11324 }
 0xaa1   :  { %v13546_v0 = vpop.eup %11326  ;;  %v8911_v40 = vsel %vm8889_vm1, %v13544_v15, 0.0  ;;  %8819 = vmatpush2.bf16.msra.mxu0 %v11300_v45 }
 0xaa2   :  { %v11329_v44 = vpop.eup %11328  ;;  %v8912_v61 = vsel %vm8889_vm1, %v13546_v0, 0.0 }
 0xaa3   :  { %v8913_v16 = vadd.f32 %v8912_v61, %v8911_v40  ;;  %v8914_v14 = vsel %vm8889_vm1, %v11329_v44, 0.0  ;;  %v11303_v40 = vld [vmem:[#allocation4 + $0x368] ss:$16 sps:$4 sm:$0xff]   ;;  %v11308_v44 = vld [vmem:[#allocation4 + $0x14c] ss:$16 sps:$4 sm:$0xff]  }
 0xaa4   :  { %v11311_v61 = vld [vmem:[#allocation4 + $0x34c] ss:$16 sps:$4 sm:$0xff]   ;;  %8860 = vmatpush2.bf16.msra.mxu1 %v11303_v40  ;;  %8820 = vmatprep.subr.bf16.mxu0 %v11308_v44 }
 0xaa5   :  { %v8915_v43 = vadd.f32 %v8914_v14, %v8913_v16  ;;  %v11306_v16 = vld [vmem:[#allocation4 + $0x148] ss:$16 sps:$4 sm:$0xff]   ;;  %8861 = vmatprep.subr.bf16.mxu1 %v11311_v61 }
 0xaa6   :  { %8821 = vmatpush2.bf16.msra.mxu0 %v11306_v16 }
 0xaa7   :  { %v8917_v7 = vadd.f32 %v8915_v43, %v8914_v14  ;;  %v11309_v14 = vld [vmem:[#allocation4 + $0x348] ss:$16 sps:$4 sm:$0xff]   ;;  %v11314_v43 = vld [vmem:[#allocation4 + $0x12c] ss:$16 sps:$4 sm:$0xff]  }
 0xaa8   :  { %8862 = vmatpush2.bf16.msra.mxu1 %v11309_v14  ;;  %8822 = vmatprep.subr.bf16.mxu0 %v11314_v43 }
 0xaa9   :  { %8918 = vadd.xlane.f32.xlu0 %v8917_v7  ;;  %v11317_v7 = vld [vmem:[#allocation4 + $0x32c] ss:$16 sps:$4 sm:$0xff]  }
 0xaaa   :  { %8863 = vmatprep.subr.bf16.mxu1 %v11317_v7  ;;  %8823 = vmatpush2.bf16.msra.mxu0 %v11312_v30 }
 0xaab   :  { %8824 = vmatprep.subr.bf16.mxu0 %v11320_v26 }
 0xaac   :  { %8864 = vmatpush2.bf16.msra.mxu1 %v11315_v6 }
 0xaad   :  { %8865 = vmatprep.subr.bf16.mxu1 %v11323_v56 }
 0xaae   :  { %8825 = vmatpush2.bf16.msra.mxu0 %v11318_v36 }
 0xab0   :  { %8866 = vmatpush2.bf16.msra.mxu1 %v11321_v53 }
 0xab1   :  { %8827 = vmatmul.mubr.bf16.vlgmr.msra.gmra.mxu0 %v13520_v32 }
 0xab3   :  { %8868 = vmatmul.mubr.bf16.vlgmr.msra.gmra.mxu1 %v13524_v11 }
 0xb32   :  { %v8919_v17 = vpop.xlane.xlu0 %8918 }
 0xb33   :  { %11330 = vrcp.f32 %v8919_v17 }
 0xb40   :  { %v11331_v41 = vpop.eup %11330 }
 0xb41   :  { %v8921_v31 = vmul.f32 %v11331_v41, %v13544_v15  ;;  %v8922_v13 = vmul.f32 %v11331_v41, %v13546_v0 }
 0xb43   :  { %v8926_v8 = vsel %vm8882_vm0, -1e+30, %v8922_v13  ;;  %v8929_v63 = vsel %vm8889_vm1, %v8921_v31, -inf }
 0xb44   :  { %v8930_v39 = vsel %vm8889_vm1, %v8926_v8, -inf }
 0xb45   :  { %v8933_v23 = vmax.f32 %v8929_v63, %v8930_v39 }
 0xb47   :  { %v8935_v52 = vmax.f32 %v8933_v23, %v13541_v37 }
 0xb49   :  { %8936 = vmax.xlane.f32.xlu1 %v8935_v52 }
 0xb71   :  { %v8828_v32 = vpop.f32.mrf.mxu0 }
 0xb73   :  { %v8869_v11 = vpop.f32.mrf.mxu1  ;;  %v8830_v21 = vpop.f32.mrf.mxu0 }
 0xb75   :  { %v8871_v49 = vpop.f32.mrf.mxu1  ;;  %v8832_v51 = vpop.f32.mrf.mxu0 }
 0xb77   :  { %v8873_v62 = vpop.f32.mrf.mxu1  ;;  %v8833_v15 = vpop.f32.mrf.mxu0 }
 0xb79   :  { %v8874_v0 = vpop.f32.mrf.mxu1 }
 0xbd2   :  { %v8937_v42 = vpop.xlane.xlu1 %8936 }
 0xbd3   :  { %v8938_v33 = vsub.f32 %v8921_v31, %v8937_v42  ;;  %v8939_v46 = vsub.f32 %v8926_v8, %v8937_v42  ;;  %v8940_v55 = vsub.f32 -1e+30, %v8937_v42 }
 0xbd5   :  { %v8942_v35 = vmul.f32 1.442695, %v8938_v33  ;;  %v8944_v12 = vmul.f32 1.442695, %v8939_v46  ;;  %v8946_v28 = vmul.f32 1.442695, %v8940_v55 }
 0xbd7   :  { %11332 = vpow2.f32 %v8942_v35 }
 0xbd8   :  { %11334 = vpow2.f32 %v8944_v12 }
 0xbd9   :  { %11336 = vpow2.f32 %v8946_v28 }
 0xbe4   :  { %v11333_v37 = vpop.eup %11332 }
 0xbe5   :  { %v11335_v57 = vpop.eup %11334  ;;  %v8950_v5 = vsel %vm8889_vm1, %v11333_v37, 0.0 }
 0xbe6   :  { %v11337_v34 = vpop.eup %11336  ;;  %v8951_v2 = vsel %vm8889_vm1, %v11335_v57, 0.0 }
 0xbe7   :  { %v8952_v38 = vadd.f32 %v8951_v2, %v8950_v5  ;;  %v8953_v9 = vsel %vm8889_vm1, %v11337_v34, 0.0 }
 0xbe9   :  { %v8954_v50 = vadd.f32 %v8953_v9, %v8952_v38 }
 0xbeb   :  { %v8956_v48 = vadd.f32 %v8954_v50, %v8953_v9 }
 0xbed   :  { %8957 = vadd.xlane.f32.xlu1 %v8956_v48 }
 0xc76   :  { %v8958_v60 = vpop.xlane.xlu1 %8957 }
 0xc77   :  { %11338 = vrcp.f32 %v8958_v60 }
 0xc84   :  { %v11339_v4 = vpop.eup %11338 }
 0xc85   :  { %v8960_v58 = vmul.f32 %v11339_v4, %v11333_v37  ;;  %v8961_v22 = vmul.f32 %v11339_v4, %v11335_v57 }
 0xc87   :  { %v8964_v54 = vcombine.low %v8960_v58, %v8961_v22 }
 0xc89   :  { %8968 = vst.msk [vmem:[#allocation11] sm:$0xff] %vm8967_vm3, %v8964_v54 }
 0xc8a   :  { %11595 = shalt.err (!%p11592_p10)
}
 0xc8b   :  { %8978 = dma.vmem_to_hbm [thread:$0]  %s8976_s23, 128, %s13572_s3, [#allocation8]  }
 0xc8c   :  { %11626 = dma.done.wait [#allocation8], 128  }
 0xc8d   :  { %11627 = vsyncadd [#allocation8], 4294967168 }
 0xc8e   :  { %8982 = vsyncpa [#allocation7], 1 }
 0xc8f   :  { %8983 = vsyncpa [#allocation10], 1 }
 0xc90   :  { %8984 = vsyncpa [#allocation8], 1 }
 0xc91   :  { %8985 = vsyncmov [#allocation5] }
 0xc94   :  { %s8986_s30 = vpop.sfrf %8985 }
 0xc95   :  { %p10150_p11 = scmp.ne.s32.totalorder %s8986_s30, 0 }
 0xc97   :  { %8990 = shalt.err (%p10150_p11)  }
 0xc98   :  { %8992 = vsyncmov [#allocation5 + $0x1] }
 0xc9b   :  { %s8993_s4 = vpop.sfrf %8992 }
 0xc9c   :  { %p10151_p12 = scmp.ne.s32.totalorder %s8993_s4, 0 }
 0xc9e   :  { %8997 = shalt.err (%p10151_p12)  }

</bundles_post_ra>
